<compile_context>
chip_gen: v7x
topology: tpu7x:2x2x1
jax: 0.10.0
libtpu: 0.0.40
codegen_flags: <defaults>
</compile_context>

<pallas_src>
import numpy as np
import jax
import jax.numpy as jnp
from jax import lax
from jax.experimental import pallas as pl
from jax.experimental.pallas import tpu as pltpu

# ----------------------------- static config --------------------------------
D_MODEL = 32
D_FFN = 64
N_HEADS = 4
N_LEVELS = 2
N_POINTS = 2
HEAD_DIM = D_MODEL // N_HEADS
SPATIAL_SHAPES = ((8, 8), (4, 4))          # (H_l, W_l) per level
LEVEL_START = (0, 64)                      # cumulative starts of each level in src
LEN_IN = sum(h * w for h, w in SPATIAL_SHAPES)
N_QUERIES = 16
BATCH = 2
EPS = 1e-5

_NP = N_HEADS * N_LEVELS * N_POINTS        # total sampling points per query (16)
_F_OFF = 2 * _NP                           # sampling-offset output features
_F_AW = _NP                                # attention-weight output features
_REF_COLS = max(8, 2 * N_LEVELS)           # padded ref-point width (aligned matmul)


def _build_offsets(entries):
    offs, c = {}, 0
    for name, size in entries:
        offs[name] = (c, c + size)
        c += size
    return offs, c


# packed weight-slab column layout (input dim = d_model for all of these)
W_OFFS, W_COLS = _build_offsets([
    ('wq', D_MODEL), ('wk', D_MODEL), ('wv', D_MODEL), ('wo', D_MODEL),
    ('wvp', D_MODEL), ('wso', _F_OFF), ('waw', _F_AW), ('wop', D_MODEL),
    ('w1', D_FFN)])
# packed bias / norm-param slab layout
B_OFFS, B_COLS = _build_offsets([
    ('bq', D_MODEL), ('bk', D_MODEL), ('bv', D_MODEL), ('bo', D_MODEL),
    ('bvp', D_MODEL), ('bso', _F_OFF), ('baw', _F_AW), ('bop', D_MODEL),
    ('g1', D_MODEL), ('be1', D_MODEL), ('b1', D_FFN), ('b2', D_MODEL),
    ('g3', D_MODEL), ('be3', D_MODEL)])

# per-sampling-point (column) level; column order is (head, level, point)
_COL_LVL = [(j // N_POINTS) % N_LEVELS for j in range(_NP)]


def _layer_norm(x, g, b):
    mu = jnp.mean(x, axis=-1, keepdims=True)
    xc = x - mu
    var = jnp.mean(xc * xc, axis=-1, keepdims=True)
    return xc * lax.rsqrt(var + EPS) * g + b


# ------------------------------- the kernel ---------------------------------
def decoder_layer_kernel(tgt_ref, pos_ref, refp_ref, src_ref,
                         w_ref, w2_ref, sel_ref, b_ref, c_ref, out_ref):
    f32 = jnp.float32
    M, L, P, Dh = N_HEADS, N_LEVELS, N_POINTS, HEAD_DIM
    LP = L * P
    D = D_MODEL
    NQ = tgt_ref.shape[0]          # BATCH * N_QUERIES

    def w(name):
        a, b = W_OFFS[name]
        return w_ref[:, a:b]

    def bvec(name):
        a, b = B_OFFS[name]
        return b_ref[:, a:b]

    tgt = tgt_ref[...]
    pos = pos_ref[...]

    # row/batch indices (built from int iota; avoid vector integer division)
    row_i = lax.broadcasted_iota(jnp.int32, (NQ, 1), 0)
    col_i = lax.broadcasted_iota(jnp.int32, (1, NQ), 1)
    row_b = jnp.floor(row_i.astype(f32) * (1.0 / N_QUERIES))       # batch id per row
    col_b = jnp.floor(col_i.astype(f32) * (1.0 / N_QUERIES))

    # ----------------- self attention (block-diagonal over batch) -----------
    qk = tgt + pos
    # fused q/k projection: adjacent columns [wq | wk] and [bq | bk]
    qkp = (jnp.dot(qk, w_ref[:, W_OFFS['wq'][0]:W_OFFS['wk'][1]],
                   preferred_element_type=f32)
           + b_ref[:, B_OFFS['bq'][0]:B_OFFS['bk'][1]])
    scale = 1.0 / float(np.sqrt(Dh))
    q = qkp[:, :D] * scale
    k = qkp[:, D:]
    v = jnp.dot(tgt, w('wv'), preferred_element_type=f32) + bvec('bv')

    neg_mask = jnp.where(row_b != col_b, -1e9, 0.0).astype(f32)    # (NQ, NQ)
    wo = w('wo')
    sa = None
    for m in range(M):
        sl = slice(m * Dh, (m + 1) * Dh)
        s = lax.dot_general(q[:, sl], k[:, sl],
                            (((1,), (1,)), ((), ())),
                            preferred_element_type=f32) + neg_mask
        s = s - jnp.max(s, axis=-1, keepdims=True)
        e = jnp.exp(s)
        attn = e * pl.reciprocal(jnp.sum(e, axis=-1, keepdims=True), approx=True)
        ho = jnp.dot(attn, v[:, sl], preferred_element_type=f32)
        t = jnp.dot(ho, wo[sl, :], preferred_element_type=f32)
        sa = t if sa is None else sa + t
    tgt = tgt + sa + bvec('bo')    # dropout2 = identity; forward() applies NO norm2

    # ------------------ deformable cross attention (MSDeformAttn) -----------
    query = tgt + pos
    value = jnp.dot(src_ref[...], w('wvp'), preferred_element_type=f32) + bvec('bvp')  # (NV, d)

    # fused sampling-offset + attention-weight projection (adjacent columns)
    oa = (jnp.dot(query, w_ref[:, W_OFFS['wso'][0]:W_OFFS['waw'][1]],
                  preferred_element_type=f32)
          + b_ref[:, B_OFFS['bso'][0]:B_OFFS['baw'][1]])
    offs = oa[:, :2 * _NP]                    # raw offsets (-0.5 folded into bias)
    awl = oa[:, 2 * _NP:]                     # attention-weight logits (NQ, NP)

    # pixel-space sampling coords for ALL (head, level, point) at once:
    #   pix = ref * {W,H} + raw_offset - 0.5  ({W,H} scaling folded into `sel`)
    pix = offs + jnp.dot(refp_ref[...], sel_ref[...], preferred_element_type=f32)

    WLf = c_ref[0:1, :]                       # (1, NP) per-column W_l
    HLf = c_ref[1:2, :]                       # (1, NP) per-column H_l
    HWf = c_ref[2:3, :]                       # (1, NP) per-column H_l*W_l

    # clamp so the float->int cast below is always safe; only affects columns
    # whose corner weights are all zero anyway
    ix = jnp.minimum(jnp.maximum(pix[:, :_NP], -8.0), WLf + 8.0)
    iy = jnp.minimum(jnp.maximum(pix[:, _NP:], -8.0), HLf + 8.0)

    # wide bilinear corner weights (zero-padding validity folded in) + base index
    x0 = jnp.floor(ix)
    y0 = jnp.floor(iy)
    wx1 = ix - x0
    wx0 = 1.0 - wx1
    wy1 = iy - y0
    wy0 = 1.0 - wy1
    vx0 = (x0 >= 0.0) & (x0 <= WLf - 1.0)
    vx1 = (x0 >= -1.0) & (x0 <= WLf - 2.0)
    vy0 = (y0 >= 0.0) & (y0 <= HLf - 1.0)
    vy1 = (y0 >= -1.0) & (y0 <= HLf - 2.0)
    cw00 = jnp.where(vx0 & vy0, wx0 * wy0, 0.0)
    cw01 = jnp.where(vx1 & vy0, wx1 * wy0, 0.0)
    cw10 = jnp.where(vx0 & vy1, wx0 * wy1, 0.0)
    cw11 = jnp.where(vx1 & vy1, wx1 * wy1, 0.0)
    # flat index of the (x0, y0) corner inside the column's own level block of
    # `value` (levels are batch-stacked: row = b*H*W + y*W + x)
    idx_i = (y0 * WLf + x0 + row_b * HWf).astype(jnp.int32)        # (NQ, NP)

    # level row starts inside the per-level batch-stacked `value`
    lvl_row_start, rs = [], 0
    for (Hl, Wl) in SPATIAL_SHAPES:
        lvl_row_start.append(rs)
        rs += BATCH * Hl * Wl

    wop = w('wop')
    cross = None
    for m in range(M):
        # per-head softmax over (level, point)
        a = awl[:, m * LP:(m + 1) * LP]
        a = a - jnp.max(a, axis=-1, keepdims=True)
        e = jnp.exp(a)
        a_h = e * pl.reciprocal(jnp.sum(e, axis=-1, keepdims=True), approx=True)

        hv = None
        for l, (Hl, Wl) in enumerate(SPATIAL_SHAPES):
            NVl = BATCH * Hl * Wl
            liota = lax.broadcasted_iota(jnp.int32, (NQ, NVl), 1)
            bm = None
            for p in range(P):
                j = m * LP + l * P + p
                d = liota - idx_i[:, j:j + 1]
                # diff trick: 4 corners from one base index.  NOTE: a corner
                # index that wraps past a spatial-row / batch / level boundary
                # can spuriously match, but its bilinear weight is already 0
                # (validity masks above), so it contributes nothing.
                c = (jnp.where(d == 0, cw00[:, j:j + 1], 0.0)
                     + jnp.where(d == 1, cw01[:, j:j + 1], 0.0)
                     + jnp.where(d == Wl, cw10[:, j:j + 1], 0.0)
                     + jnp.where(d == Wl + 1, cw11[:, j:j + 1], 0.0))
                c = c * a_h[:, l * P + p:l * P + p + 1]
                bm = c if bm is None else bm + c
            rs = lvl_row_start[l]
            t = jnp.dot(bm, value[rs:rs + NVl, m * Dh:(m + 1) * Dh],
                        preferred_element_type=f32)
            hv = t if hv is None else hv + t
        t = jnp.dot(hv, wop[m * Dh:(m + 1) * Dh, :], preferred_element_type=f32)
        cross = t if cross is None else cross + t
    cross = cross + bvec('bop')
    tgt = _layer_norm(tgt + cross, bvec('g1'), bvec('be1'))

    # --------------------------------- FFN -----------------------------------
    h = jnp.dot(tgt, w('w1'), preferred_element_type=f32) + bvec('b1')
    h = jnp.maximum(h, 0.0)                                        # relu
    h = jnp.dot(h, w2_ref[...], preferred_element_type=f32) + bvec('b2')
    tgt = _layer_norm(tgt + h, bvec('g3'), bvec('be3'))

    out_ref[...] = tgt.astype(out_ref.dtype)


# ------------------------------ JAX wrapper ----------------------------------
@jax.jit
def deformable_decoder_layer(tgt, query_pos, reference_points, src,
                             w_slab, w2, sel, b_slab, cconst):
    N, Lq, d = tgt.shape
    NQ = N * Lq
    tgt2 = tgt.reshape(NQ, d)
    pos2 = query_pos.reshape(NQ, d)
    refp2 = reference_points.reshape(NQ, N_LEVELS * 2)
    refp2 = jnp.pad(refp2, ((0, 0), (0, _REF_COLS - N_LEVELS * 2)))

    # permute src rows to per-level, batch-stacked order:
    #   [b0_l0, b1_l0, b0_l1, b1_l1, ...]  (layout plumbing only)
    # TODO(synk): could be folded into per-level BlockSpecs / precomputed once.
    parts = []
    for l, (H, Wl) in enumerate(SPATIAL_SHAPES):
        s0 = LEVEL_START[l]
        for n in range(N):
            parts.append(src[n, s0:s0 + H * Wl])
    srcp = jnp.concatenate(parts, axis=0)                          # (N*LEN_IN, d)

    args = (tgt2, pos2, refp2, srcp, w_slab, w2, sel, b_slab, cconst)
    out2 = pl.pallas_call(
        decoder_layer_kernel,
        out_shape=jax.ShapeDtypeStruct((NQ, d), tgt.dtype),
        grid_spec=pltpu.PrefetchScalarGridSpec(
            num_scalar_prefetch=0,
            grid=(1,),
            in_specs=[pl.BlockSpec(a.shape, lambda i: (0, 0)) for a in args],
            out_specs=pl.BlockSpec((NQ, d), lambda i: (0, 0)),
        ),
        compiler_params=pltpu.CompilerParams(
            dimension_semantics=("arbitrary",)),
    )(*args)
    return out2.reshape(N, Lq, d)


# --------------------- deterministic parameter init --------------------------
def make_params(key):
    ks = iter(jax.random.split(key, 32))

    def rnd(shape, scale):
        return jax.random.normal(next(ks), shape, jnp.float32) * scale

    d, dffn = D_MODEL, D_FFN
    return {
        'in_proj_w': rnd((3 * d, d), 0.08), 'in_proj_b': rnd((3 * d,), 0.02),
        'out_proj_w': rnd((d, d), 0.08), 'out_proj_b': rnd((d,), 0.02),
        'value_proj_w': rnd((d, d), 0.08), 'value_proj_b': rnd((d,), 0.02),
        'samp_off_w': rnd((_F_OFF, d), 0.05), 'samp_off_b': rnd((_F_OFF,), 0.05),
        'attn_w_w': rnd((_F_AW, d), 0.08), 'attn_w_b': rnd((_F_AW,), 0.02),
        'out_proj2_w': rnd((d, d), 0.08), 'out_proj2_b': rnd((d,), 0.02),
        'norm1_g': jnp.ones((d,), jnp.float32), 'norm1_b': jnp.zeros((d,), jnp.float32),
        'lin1_w': rnd((dffn, d), 0.08), 'lin1_b': rnd((dffn,), 0.02),
        'lin2_w': rnd((d, dffn), 0.08), 'lin2_b': rnd((d,), 0.02),
        'norm3_g': jnp.ones((d,), jnp.float32), 'norm3_b': jnp.zeros((d,), jnp.float32),
    }


def make_selection_matrix():
    """(ref_cols, 2*NP) constant: pix = refp @ sel + raw_offsets - 0.5."""
    S = np.zeros((_REF_COLS, 2 * _NP), np.float32)
    for j in range(_NP):
        l = _COL_LVL[j]
        H, Wl = SPATIAL_SHAPES[l]
        S[2 * l, j] = float(Wl)                # x column of level l, scaled by W
        S[2 * l + 1, _NP + j] = float(H)       # y column of level l, scaled by H
    return jnp.asarray(S)


def make_column_consts():
    """(8, NP) per-sampling-column constants: rows = [W_l, H_l, H_l*W_l, 0...]."""
    c = np.zeros((8, _NP), np.float32)
    for j in range(_NP):
        l = _COL_LVL[j]
        H, Wl = SPATIAL_SHAPES[l]
        c[0, j] = float(Wl)
        c[1, j] = float(H)
        c[2, j] = float(H * Wl)
    return jnp.asarray(c)


def kernel_weights(p):
    """Pack PyTorch-layout params into the kernel's slabs (plain-JAX glue)."""
    d, M, L, P = D_MODEL, N_HEADS, N_LEVELS, N_POINTS
    wq, wk, wv = p['in_proj_w'][:d], p['in_proj_w'][d:2 * d], p['in_proj_w'][2 * d:]
    bq, bk, bv = p['in_proj_b'][:d], p['in_proj_b'][d:2 * d], p['in_proj_b'][2 * d:]
    # sampling offsets: output features (m, l, p, xy) -> (xy, m, l, p); fold the
    # grid_sample "-0.5" pixel shift into the bias.
    wso = p['samp_off_w'].reshape(M, L, P, 2, d).transpose(3, 0, 1, 2, 4).reshape(2 * M * L * P, d)
    bso = p['samp_off_b'].reshape(M, L, P, 2).transpose(3, 0, 1, 2).reshape(-1) - 0.5

    t = lambda x: jnp.asarray(x).T               # (out, in) -> (in, out); kernel does x @ W
    b2 = lambda x: jnp.asarray(x).reshape(1, -1)

    w_slab = jnp.concatenate(
        [t(wq), t(wk), t(wv), t(p['out_proj_w']), t(p['value_proj_w']),
         t(wso), t(p['attn_w_w']), t(p['out_proj2_w']), t(p['lin1_w'])],
        axis=1).astype(jnp.float32)              # (d, W_COLS)
    assert w_slab.shape == (d, W_COLS)

    w2 = t(p['lin2_w']).astype(jnp.float32)      # (d_ffn, d)

    b_slab = jnp.concatenate(
        [b2(bq), b2(bk), b2(bv), b2(p['out_proj_b']), b2(p['value_proj_b']),
         b2(bso), b2(p['attn_w_b']), b2(p['out_proj2_b']),
         b2(p['norm1_g']), b2(p['norm1_b']),
         b2(p['lin1_b']), b2(p['lin2_b']),
         b2(p['norm3_g']), b2(p['norm3_b'])],
        axis=1).astype(jnp.float32)              # (1, B_COLS)
    assert b_slab.shape == (1, B_COLS)

    sel = make_selection_matrix()
    return w_slab, w2, sel, b_slab


# --------------------------- pure-JAX reference ------------------------------
def reference_forward(tgt, pos, ref_pts, src, p):
    N, Lq, d = tgt.shape
    M, L, P, Dh = N_HEADS, N_LEVELS, N_POINTS, HEAD_DIM
    lin = lambda x, w, b: jnp.einsum('...i,oi->...o', x, w) + b

    def ln(x, g, b):
        mu = x.mean(-1, keepdims=True)
        var = ((x - mu) ** 2).mean(-1, keepdims=True)
        return (x - mu) / jnp.sqrt(var + EPS) * g + b

    # self attention
    qk = tgt + pos
    wq, wk, wv = jnp.split(p['in_proj_w'], 3, axis=0)
    bq, bk, bv = jnp.split(p['in_proj_b'], 3, axis=0)
    q = lin(qk, wq, bq).reshape(N, Lq, M, Dh)
    k = lin(qk, wk, bk).reshape(N, Lq, M, Dh)
    v = lin(tgt, wv, bv).reshape(N, Lq, M, Dh)
    s = jnp.einsum('nqmd,nkmd->nmqk', q, k) / np.sqrt(Dh)
    a = jax.nn.softmax(s, axis=-1)
    o = jnp.einsum('nmqk,nkmd->nqmd', a, v).reshape(N, Lq, d)
    t = tgt + lin(o, p['out_proj_w'], p['out_proj_b'])

    # MSDeformAttn
    query = t + pos
    value = lin(src, p['value_proj_w'], p['value_proj_b']).reshape(N, LEN_IN, M, Dh)
    offs = lin(query, p['samp_off_w'], p['samp_off_b']).reshape(N, Lq, M, L, P, 2)
    aw = lin(query, p['attn_w_w'], p['attn_w_b']).reshape(N, Lq, M, L * P)
    aw = jax.nn.softmax(aw, axis=-1).reshape(N, Lq, M, L, P)
    normalizer = jnp.array([[w_, h_] for (h_, w_) in SPATIAL_SHAPES], jnp.float32)
    loc = ref_pts[:, :, None, :, None, :] + offs / normalizer[None, None, None, :, None, :]
    out_acc = jnp.zeros((N, Lq, M, Dh), jnp.float32)
    for l, (Hl, Wl) in enumerate(SPATIAL_SHAPES):
        start = LEVEL_START[l]
        vl = value[:, start:start + Hl * Wl].reshape(N, Hl, Wl, M, Dh)
        loc_l = loc[:, :, :, l]
        ix = loc_l[..., 0] * Wl - 0.5
        iy = loc_l[..., 1] * Hl - 0.5
        x0 = jnp.floor(ix); y0 = jnp.floor(iy)
        wx1 = ix - x0; wx0 = 1 - wx1
        wy1 = iy - y0; wy0 = 1 - wy1
        n_idx = jnp.arange(N)[:, None, None, None]
        m_idx = jnp.arange(M)[None, None, :, None]

        def corner(xc, yc, w):
            valid = (xc >= 0) & (xc <= Wl - 1) & (yc >= 0) & (yc <= Hl - 1)
            xi = jnp.clip(xc, 0, Wl - 1).astype(jnp.int32)
            yi = jnp.clip(yc, 0, Hl - 1).astype(jnp.int32)
            g = vl[n_idx, yi, xi, m_idx]          # (N, Lq, M, P, Dh)
            return g * (w * valid)[..., None]

        sampled = (corner(x0, y0, wx0 * wy0) + corner(x0 + 1, y0, wx1 * wy0)
                   + corner(x0, y0 + 1, wx0 * wy1) + corner(x0 + 1, y0 + 1, wx1 * wy1))
        out_acc = out_acc + (sampled * aw[:, :, :, l, :, None]).sum(axis=3)
    cross = lin(out_acc.reshape(N, Lq, d), p['out_proj2_w'], p['out_proj2_b'])
    t = ln(t + cross, p['norm1_g'], p['norm1_b'])

    h = jnp.maximum(lin(t, p['lin1_w'], p['lin1_b']), 0.0)
    h = lin(h, p['lin2_w'], p['lin2_b'])
    return ln(t + h, p['norm3_g'], p['norm3_b'])


if __name__ == "__main__":
    key = jax.random.PRNGKey(0)
    k1, k2, k3, k4, kp = jax.random.split(key, 5)
    tgt = jax.random.normal(k1, (BATCH, N_QUERIES, D_MODEL), jnp.float32)
    query_pos = jax.random.normal(k2, (BATCH, N_QUERIES, D_MODEL), jnp.float32)
    reference_points = jax.random.uniform(k3, (BATCH, N_QUERIES, N_LEVELS, 2), jnp.float32)
    src = jax.random.normal(k4, (BATCH, LEN_IN, D_MODEL), jnp.float32)

    params = make_params(kp)
    w_slab, w2, sel, b_slab = kernel_weights(params)
    cconst = make_column_consts()

    out = deformable_decoder_layer(tgt, query_pos, reference_points, src,
                                   w_slab, w2, sel, b_slab, cconst)
    out = jax.block_until_ready(out)

    ref = reference_forward(tgt, query_pos, reference_points, src, params)
    err = float(jnp.max(jnp.abs(out - ref)))
    assert np.isfinite(err) and err < 5e-2, f"max |kernel - reference| = {err}"
    print("KERNEL_OK")
</pallas_src>

<mosaic_0001>
module attributes {stable_mosaic.version = 11 : i64} {
  func.func @decoder_layer_kernel(%arg0: i32, %arg1: memref<32x32xf32, #tpu.memory_space<vmem>>, %arg2: memref<32x32xf32, #tpu.memory_space<vmem>>, %arg3: memref<32x8xf32, #tpu.memory_space<vmem>>, %arg4: memref<160x32xf32, #tpu.memory_space<vmem>>, %arg5: memref<32x304xf32, #tpu.memory_space<vmem>>, %arg6: memref<64x32xf32, #tpu.memory_space<vmem>>, %arg7: memref<8x32xf32, #tpu.memory_space<vmem>>, %arg8: memref<1x464xf32, #tpu.memory_space<vmem>>, %arg9: memref<8x16xf32, #tpu.memory_space<vmem>>, %arg10: memref<32x32xf32, #tpu.memory_space<vmem>>) attributes {dimension_semantics = [#tpu.dimension_semantics<arbitrary>], iteration_bounds = array<i64: 1>, scalar_prefetch = 0 : i64, scratch_operands = 0 : i64, tpu.core_type = #tpu.core_type<tc>, window_params = [{pipeline_mode = #tpu.pipeline_mode<synchronous>, transform_indices = @transform_0, window_bounds = array<i64: 32, 32>}, {pipeline_mode = #tpu.pipeline_mode<synchronous>, transform_indices = @transform_1, window_bounds = array<i64: 32, 32>}, {pipeline_mode = #tpu.pipeline_mode<synchronous>, transform_indices = @transform_2, window_bounds = array<i64: 32, 8>}, {pipeline_mode = #tpu.pipeline_mode<synchronous>, transform_indices = @transform_3, window_bounds = array<i64: 160, 32>}, {pipeline_mode = #tpu.pipeline_mode<synchronous>, transform_indices = @transform_4, window_bounds = array<i64: 32, 304>}, {pipeline_mode = #tpu.pipeline_mode<synchronous>, transform_indices = @transform_5, window_bounds = array<i64: 64, 32>}, {pipeline_mode = #tpu.pipeline_mode<synchronous>, transform_indices = @transform_6, window_bounds = array<i64: 8, 32>}, {pipeline_mode = #tpu.pipeline_mode<synchronous>, transform_indices = @transform_7, window_bounds = array<i64: 1, 464>}, {pipeline_mode = #tpu.pipeline_mode<synchronous>, transform_indices = @transform_8, window_bounds = array<i64: 8, 16>}, {pipeline_mode = #tpu.pipeline_mode<synchronous>, transform_indices = @transform_9, window_bounds = array<i64: 32, 32>}]} {
    %c0 = arith.constant 0 : index
    %c0_0 = arith.constant 0 : index
    %0 = vector.load %arg1[%c0, %c0_0] : memref<32x32xf32, #tpu.memory_space<vmem>>, vector<32x32xf32>
    %c0_1 = arith.constant 0 : index
    %c0_2 = arith.constant 0 : index
    %1 = vector.load %arg2[%c0_1, %c0_2] : memref<32x32xf32, #tpu.memory_space<vmem>>, vector<32x32xf32>
    %2 = tpu.iota {dimensions = array<i32: 0>} : vector<32x1xi32>
    %3 = tpu.iota {dimensions = array<i32: 1>} : vector<1x32xi32>
    %4 = arith.sitofp %2 : vector<32x1xi32> to vector<32x1xf32>
    %cst = arith.constant 6.250000e-02 : f32
    %5 = vector.broadcast %cst : f32 to vector<32x1xf32>
    %6 = arith.mulf %4, %5 : vector<32x1xf32>
    %7 = math.floor %6 : vector<32x1xf32>
    %8 = arith.sitofp %3 : vector<1x32xi32> to vector<1x32xf32>
    %cst_3 = arith.constant 6.250000e-02 : f32
    %9 = vector.broadcast %cst_3 : f32 to vector<1x32xf32>
    %10 = arith.mulf %8, %9 : vector<1x32xf32>
    %11 = math.floor %10 : vector<1x32xf32>
    %12 = arith.addf %0, %1 : vector<32x32xf32>
    %c0_4 = arith.constant 0 : index
    %c0_5 = arith.constant 0 : index
    %13 = vector.load %arg5[%c0_4, %c0_5] : memref<32x304xf32, #tpu.memory_space<vmem>>, vector<32x64xf32>
    %cst_6 = arith.constant dense<0.000000e+00> : vector<32x64xf32>
    %14 = tpu.matmul %12, %13, %cst_6 {dimension_numbers = #tpu.dot_dimension_numbers<[1], [0], [0], [1], [0, 0, 1, 1], [], []>} : vector<32x32xf32>, vector<32x64xf32>, vector<32x64xf32> -> vector<32x64xf32>
    %c0_7 = arith.constant 0 : index
    %c0_8 = arith.constant 0 : index
    %15 = vector.load %arg8[%c0_7, %c0_8] : memref<1x464xf32, #tpu.memory_space<vmem>>, vector<1x64xf32>
    %16 = vector.broadcast %15 : vector<1x64xf32> to vector<32x64xf32>
    %17 = arith.addf %14, %16 : vector<32x64xf32>
    %18 = vector.extract_strided_slice %17 {offsets = [0, 0], sizes = [32, 32], strides = [1, 1]} : vector<32x64xf32> to vector<32x32xf32>
    %cst_9 = arith.constant 0.353553385 : f32
    %19 = vector.broadcast %cst_9 : f32 to vector<32x32xf32>
    %20 = arith.mulf %18, %19 : vector<32x32xf32>
    %21 = vector.extract_strided_slice %17 {offsets = [0, 32], sizes = [32, 32], strides = [1, 1]} : vector<32x64xf32> to vector<32x32xf32>
    %c0_10 = arith.constant 0 : index
    %c64 = arith.constant 64 : index
    %22 = vector.load %arg5[%c0_10, %c64] : memref<32x304xf32, #tpu.memory_space<vmem>>, vector<32x32xf32>
    %cst_11 = arith.constant dense<0.000000e+00> : vector<32x32xf32>
    %23 = tpu.matmul %0, %22, %cst_11 {dimension_numbers = #tpu.dot_dimension_numbers<[1], [0], [0], [1], [0, 0, 1, 1], [], []>} : vector<32x32xf32>, vector<32x32xf32>, vector<32x32xf32> -> vector<32x32xf32>
    %c0_12 = arith.constant 0 : index
    %c64_13 = arith.constant 64 : index
    %24 = vector.load %arg8[%c0_12, %c64_13] : memref<1x464xf32, #tpu.memory_space<vmem>>, vector<1x32xf32>
    %25 = vector.broadcast %24 : vector<1x32xf32> to vector<32x32xf32>
    %26 = arith.addf %23, %25 : vector<32x32xf32>
    %27 = vector.broadcast %7 : vector<32x1xf32> to vector<32x32xf32>
    %28 = vector.broadcast %11 : vector<1x32xf32> to vector<32x32xf32>
    %29 = arith.cmpf one, %27, %28 : vector<32x32xf32>
    %cst_14 = arith.constant -1.000000e+09 : f32
    %cst_15 = arith.constant 0.000000e+00 : f32
    %30 = vector.broadcast %cst_14 : f32 to vector<32x32xf32>
    %31 = vector.broadcast %cst_15 : f32 to vector<32x32xf32>
    %32 = arith.select %29, %30, %31 : vector<32x32xi1>, vector<32x32xf32>
    %c0_16 = arith.constant 0 : index
    %c96 = arith.constant 96 : index
    %33 = vector.load %arg5[%c0_16, %c96] : memref<32x304xf32, #tpu.memory_space<vmem>>, vector<32x32xf32>
    %34 = vector.extract_strided_slice %20 {offsets = [0, 0], sizes = [32, 8], strides = [1, 1]} : vector<32x32xf32> to vector<32x8xf32>
    %35 = vector.extract_strided_slice %21 {offsets = [0, 0], sizes = [32, 8], strides = [1, 1]} : vector<32x32xf32> to vector<32x8xf32>
    %cst_17 = arith.constant dense<0.000000e+00> : vector<32x32xf32>
    %36 = tpu.matmul %34, %35, %cst_17 {dimension_numbers = #tpu.dot_dimension_numbers<[1], [1], [0], [0], [0, 0, 1, 0], [], []>} : vector<32x8xf32>, vector<32x8xf32>, vector<32x32xf32> -> vector<32x32xf32>
    %37 = arith.addf %36, %32 : vector<32x32xf32>
    %cst_18 = arith.constant dense<0xFF800000> : vector<32xf32>
    %38 = vector.multi_reduction <maximumf>, %37, %cst_18 [1] : vector<32x32xf32> to vector<32xf32>
    %39 = vector.shape_cast %38 : vector<32xf32> to vector<32x1xf32>
    %40 = vector.broadcast %39 : vector<32x1xf32> to vector<32x32xf32>
    %41 = arith.subf %37, %40 : vector<32x32xf32>
    %42 = math.exp %41 : vector<32x32xf32>
    %cst_19 = arith.constant dense<0.000000e+00> : vector<32xf32>
    %43 = vector.multi_reduction <add>, %42, %cst_19 [1] : vector<32x32xf32> to vector<32xf32>
    %44 = vector.shape_cast %43 : vector<32xf32> to vector<32x1xf32>
    %45 = tpu.reciprocal %44 {approx = true} : vector<32x1xf32> -> vector<32x1xf32>
    %46 = vector.broadcast %45 : vector<32x1xf32> to vector<32x32xf32>
    %47 = arith.mulf %42, %46 : vector<32x32xf32>
    %48 = vector.extract_strided_slice %26 {offsets = [0, 0], sizes = [32, 8], strides = [1, 1]} : vector<32x32xf32> to vector<32x8xf32>
    %cst_20 = arith.constant dense<0.000000e+00> : vector<32x8xf32>
    %49 = tpu.matmul %47, %48, %cst_20 {dimension_numbers = #tpu.dot_dimension_numbers<[1], [0], [0], [1], [0, 0, 1, 1], [], []>} : vector<32x32xf32>, vector<32x8xf32>, vector<32x8xf32> -> vector<32x8xf32>
    %50 = vector.extract_strided_slice %33 {offsets = [0, 0], sizes = [8, 32], strides = [1, 1]} : vector<32x32xf32> to vector<8x32xf32>
    %cst_21 = arith.constant dense<0.000000e+00> : vector<32x32xf32>
    %51 = tpu.matmul %49, %50, %cst_21 {dimension_numbers = #tpu.dot_dimension_numbers<[1], [0], [0], [1], [0, 0, 1, 1], [], []>} : vector<32x8xf32>, vector<8x32xf32>, vector<32x32xf32> -> vector<32x32xf32>
    %52 = vector.extract_strided_slice %20 {offsets = [0, 8], sizes = [32, 8], strides = [1, 1]} : vector<32x32xf32> to vector<32x8xf32>
    %53 = vector.extract_strided_slice %21 {offsets = [0, 8], sizes = [32, 8], strides = [1, 1]} : vector<32x32xf32> to vector<32x8xf32>
    %cst_22 = arith.constant dense<0.000000e+00> : vector<32x32xf32>
    %54 = tpu.matmul %52, %53, %cst_22 {dimension_numbers = #tpu.dot_dimension_numbers<[1], [1], [0], [0], [0, 0, 1, 0], [], []>} : vector<32x8xf32>, vector<32x8xf32>, vector<32x32xf32> -> vector<32x32xf32>
    %55 = arith.addf %54, %32 : vector<32x32xf32>
    %cst_23 = arith.constant dense<0xFF800000> : vector<32xf32>
    %56 = vector.multi_reduction <maximumf>, %55, %cst_23 [1] : vector<32x32xf32> to vector<32xf32>
    %57 = vector.shape_cast %56 : vector<32xf32> to vector<32x1xf32>
    %58 = vector.broadcast %57 : vector<32x1xf32> to vector<32x32xf32>
    %59 = arith.subf %55, %58 : vector<32x32xf32>
    %60 = math.exp %59 : vector<32x32xf32>
    %cst_24 = arith.constant dense<0.000000e+00> : vector<32xf32>
    %61 = vector.multi_reduction <add>, %60, %cst_24 [1] : vector<32x32xf32> to vector<32xf32>
    %62 = vector.shape_cast %61 : vector<32xf32> to vector<32x1xf32>
    %63 = tpu.reciprocal %62 {approx = true} : vector<32x1xf32> -> vector<32x1xf32>
    %64 = vector.broadcast %63 : vector<32x1xf32> to vector<32x32xf32>
    %65 = arith.mulf %60, %64 : vector<32x32xf32>
    %66 = vector.extract_strided_slice %26 {offsets = [0, 8], sizes = [32, 8], strides = [1, 1]} : vector<32x32xf32> to vector<32x8xf32>
    %cst_25 = arith.constant dense<0.000000e+00> : vector<32x8xf32>
    %67 = tpu.matmul %65, %66, %cst_25 {dimension_numbers = #tpu.dot_dimension_numbers<[1], [0], [0], [1], [0, 0, 1, 1], [], []>} : vector<32x32xf32>, vector<32x8xf32>, vector<32x8xf32> -> vector<32x8xf32>
    %68 = vector.extract_strided_slice %33 {offsets = [8, 0], sizes = [8, 32], strides = [1, 1]} : vector<32x32xf32> to vector<8x32xf32>
    %cst_26 = arith.constant dense<0.000000e+00> : vector<32x32xf32>
    %69 = tpu.matmul %67, %68, %cst_26 {dimension_numbers = #tpu.dot_dimension_numbers<[1], [0], [0], [1], [0, 0, 1, 1], [], []>} : vector<32x8xf32>, vector<8x32xf32>, vector<32x32xf32> -> vector<32x32xf32>
    %70 = arith.addf %51, %69 : vector<32x32xf32>
    %71 = vector.extract_strided_slice %20 {offsets = [0, 16], sizes = [32, 8], strides = [1, 1]} : vector<32x32xf32> to vector<32x8xf32>
    %72 = vector.extract_strided_slice %21 {offsets = [0, 16], sizes = [32, 8], strides = [1, 1]} : vector<32x32xf32> to vector<32x8xf32>
    %cst_27 = arith.constant dense<0.000000e+00> : vector<32x32xf32>
    %73 = tpu.matmul %71, %72, %cst_27 {dimension_numbers = #tpu.dot_dimension_numbers<[1], [1], [0], [0], [0, 0, 1, 0], [], []>} : vector<32x8xf32>, vector<32x8xf32>, vector<32x32xf32> -> vector<32x32xf32>
    %74 = arith.addf %73, %32 : vector<32x32xf32>
    %cst_28 = arith.constant dense<0xFF800000> : vector<32xf32>
    %75 = vector.multi_reduction <maximumf>, %74, %cst_28 [1] : vector<32x32xf32> to vector<32xf32>
    %76 = vector.shape_cast %75 : vector<32xf32> to vector<32x1xf32>
    %77 = vector.broadcast %76 : vector<32x1xf32> to vector<32x32xf32>
    %78 = arith.subf %74, %77 : vector<32x32xf32>
    %79 = math.exp %78 : vector<32x32xf32>
    %cst_29 = arith.constant dense<0.000000e+00> : vector<32xf32>
    %80 = vector.multi_reduction <add>, %79, %cst_29 [1] : vector<32x32xf32> to vector<32xf32>
    %81 = vector.shape_cast %80 : vector<32xf32> to vector<32x1xf32>
    %82 = tpu.reciprocal %81 {approx = true} : vector<32x1xf32> -> vector<32x1xf32>
    %83 = vector.broadcast %82 : vector<32x1xf32> to vector<32x32xf32>
    %84 = arith.mulf %79, %83 : vector<32x32xf32>
    %85 = vector.extract_strided_slice %26 {offsets = [0, 16], sizes = [32, 8], strides = [1, 1]} : vector<32x32xf32> to vector<32x8xf32>
    %cst_30 = arith.constant dense<0.000000e+00> : vector<32x8xf32>
    %86 = tpu.matmul %84, %85, %cst_30 {dimension_numbers = #tpu.dot_dimension_numbers<[1], [0], [0], [1], [0, 0, 1, 1], [], []>} : vector<32x32xf32>, vector<32x8xf32>, vector<32x8xf32> -> vector<32x8xf32>
    %87 = vector.extract_strided_slice %33 {offsets = [16, 0], sizes = [8, 32], strides = [1, 1]} : vector<32x32xf32> to vector<8x32xf32>
    %cst_31 = arith.constant dense<0.000000e+00> : vector<32x32xf32>
    %88 = tpu.matmul %86, %87, %cst_31 {dimension_numbers = #tpu.dot_dimension_numbers<[1], [0], [0], [1], [0, 0, 1, 1], [], []>} : vector<32x8xf32>, vector<8x32xf32>, vector<32x32xf32> -> vector<32x32xf32>
    %89 = arith.addf %70, %88 : vector<32x32xf32>
    %90 = vector.extract_strided_slice %20 {offsets = [0, 24], sizes = [32, 8], strides = [1, 1]} : vector<32x32xf32> to vector<32x8xf32>
    %91 = vector.extract_strided_slice %21 {offsets = [0, 24], sizes = [32, 8], strides = [1, 1]} : vector<32x32xf32> to vector<32x8xf32>
    %cst_32 = arith.constant dense<0.000000e+00> : vector<32x32xf32>
    %92 = tpu.matmul %90, %91, %cst_32 {dimension_numbers = #tpu.dot_dimension_numbers<[1], [1], [0], [0], [0, 0, 1, 0], [], []>} : vector<32x8xf32>, vector<32x8xf32>, vector<32x32xf32> -> vector<32x32xf32>
    %93 = arith.addf %92, %32 : vector<32x32xf32>
    %cst_33 = arith.constant dense<0xFF800000> : vector<32xf32>
    %94 = vector.multi_reduction <maximumf>, %93, %cst_33 [1] : vector<32x32xf32> to vector<32xf32>
    %95 = vector.shape_cast %94 : vector<32xf32> to vector<32x1xf32>
    %96 = vector.broadcast %95 : vector<32x1xf32> to vector<32x32xf32>
    %97 = arith.subf %93, %96 : vector<32x32xf32>
    %98 = math.exp %97 : vector<32x32xf32>
    %cst_34 = arith.constant dense<0.000000e+00> : vector<32xf32>
    %99 = vector.multi_reduction <add>, %98, %cst_34 [1] : vector<32x32xf32> to vector<32xf32>
    %100 = vector.shape_cast %99 : vector<32xf32> to vector<32x1xf32>
    %101 = tpu.reciprocal %100 {approx = true} : vector<32x1xf32> -> vector<32x1xf32>
    %102 = vector.broadcast %101 : vector<32x1xf32> to vector<32x32xf32>
    %103 = arith.mulf %98, %102 : vector<32x32xf32>
    %104 = vector.extract_strided_slice %26 {offsets = [0, 24], sizes = [32, 8], strides = [1, 1]} : vector<32x32xf32> to vector<32x8xf32>
    %cst_35 = arith.constant dense<0.000000e+00> : vector<32x8xf32>
    %105 = tpu.matmul %103, %104, %cst_35 {dimension_numbers = #tpu.dot_dimension_numbers<[1], [0], [0], [1], [0, 0, 1, 1], [], []>} : vector<32x32xf32>, vector<32x8xf32>, vector<32x8xf32> -> vector<32x8xf32>
    %106 = vector.extract_strided_slice %33 {offsets = [24, 0], sizes = [8, 32], strides = [1, 1]} : vector<32x32xf32> to vector<8x32xf32>
    %cst_36 = arith.constant dense<0.000000e+00> : vector<32x32xf32>
    %107 = tpu.matmul %105, %106, %cst_36 {dimension_numbers = #tpu.dot_dimension_numbers<[1], [0], [0], [1], [0, 0, 1, 1], [], []>} : vector<32x8xf32>, vector<8x32xf32>, vector<32x32xf32> -> vector<32x32xf32>
    %108 = arith.addf %89, %107 : vector<32x32xf32>
    %109 = arith.addf %0, %108 : vector<32x32xf32>
    %c0_37 = arith.constant 0 : index
    %c96_38 = arith.constant 96 : index
    %110 = vector.load %arg8[%c0_37, %c96_38] : memref<1x464xf32, #tpu.memory_space<vmem>>, vector<1x32xf32>
    %111 = vector.broadcast %110 : vector<1x32xf32> to vector<32x32xf32>
    %112 = arith.addf %109, %111 : vector<32x32xf32>
    %113 = arith.addf %112, %1 : vector<32x32xf32>
    %c0_39 = arith.constant 0 : index
    %c0_40 = arith.constant 0 : index
    %114 = vector.load %arg4[%c0_39, %c0_40] : memref<160x32xf32, #tpu.memory_space<vmem>>, vector<160x32xf32>
    %c0_41 = arith.constant 0 : index
    %c128 = arith.constant 128 : index
    %115 = vector.load %arg5[%c0_41, %c128] : memref<32x304xf32, #tpu.memory_space<vmem>>, vector<32x32xf32>
    %cst_42 = arith.constant dense<0.000000e+00> : vector<160x32xf32>
    %116 = tpu.matmul %114, %115, %cst_42 {dimension_numbers = #tpu.dot_dimension_numbers<[1], [0], [0], [1], [0, 0, 1, 1], [], []>} : vector<160x32xf32>, vector<32x32xf32>, vector<160x32xf32> -> vector<160x32xf32>
    %c0_43 = arith.constant 0 : index
    %c128_44 = arith.constant 128 : index
    %117 = vector.load %arg8[%c0_43, %c128_44] : memref<1x464xf32, #tpu.memory_space<vmem>>, vector<1x32xf32>
    %118 = vector.broadcast %117 : vector<1x32xf32> to vector<160x32xf32>
    %119 = arith.addf %116, %118 : vector<160x32xf32>
    %c0_45 = arith.constant 0 : index
    %c160 = arith.constant 160 : index
    %120 = vector.load %arg5[%c0_45, %c160] : memref<32x304xf32, #tpu.memory_space<vmem>>, vector<32x48xf32>
    %cst_46 = arith.constant dense<0.000000e+00> : vector<32x48xf32>
    %121 = tpu.matmul %113, %120, %cst_46 {dimension_numbers = #tpu.dot_dimension_numbers<[1], [0], [0], [1], [0, 0, 1, 1], [], []>} : vector<32x32xf32>, vector<32x48xf32>, vector<32x48xf32> -> vector<32x48xf32>
    %c0_47 = arith.constant 0 : index
    %c160_48 = arith.constant 160 : index
    %122 = vector.load %arg8[%c0_47, %c160_48] : memref<1x464xf32, #tpu.memory_space<vmem>>, vector<1x48xf32>
    %123 = vector.broadcast %122 : vector<1x48xf32> to vector<32x48xf32>
    %124 = arith.addf %121, %123 : vector<32x48xf32>
    %125 = vector.extract_strided_slice %124 {offsets = [0, 0], sizes = [32, 32], strides = [1, 1]} : vector<32x48xf32> to vector<32x32xf32>
    %126 = vector.extract_strided_slice %124 {offsets = [0, 32], sizes = [32, 16], strides = [1, 1]} : vector<32x48xf32> to vector<32x16xf32>
    %c0_49 = arith.constant 0 : index
    %c0_50 = arith.constant 0 : index
    %127 = vector.load %arg3[%c0_49, %c0_50] : memref<32x8xf32, #tpu.memory_space<vmem>>, vector<32x8xf32>
    %c0_51 = arith.constant 0 : index
    %c0_52 = arith.constant 0 : index
    %128 = vector.load %arg7[%c0_51, %c0_52] : memref<8x32xf32, #tpu.memory_space<vmem>>, vector<8x32xf32>
    %cst_53 = arith.constant dense<0.000000e+00> : vector<32x32xf32>
    %129 = tpu.matmul %127, %128, %cst_53 {dimension_numbers = #tpu.dot_dimension_numbers<[1], [0], [0], [1], [0, 0, 1, 1], [], []>} : vector<32x8xf32>, vector<8x32xf32>, vector<32x32xf32> -> vector<32x32xf32>
    %130 = arith.addf %125, %129 : vector<32x32xf32>
    %c0_54 = arith.constant 0 : index
    %c0_55 = arith.constant 0 : index
    %131 = vector.load %arg9[%c0_54, %c0_55] : memref<8x16xf32, #tpu.memory_space<vmem>>, vector<1x16xf32>
    %c1 = arith.constant 1 : index
    %c0_56 = arith.constant 0 : index
    %132 = vector.load %arg9[%c1, %c0_56] : memref<8x16xf32, #tpu.memory_space<vmem>>, vector<1x16xf32>
    %c2 = arith.constant 2 : index
    %c0_57 = arith.constant 0 : index
    %133 = vector.load %arg9[%c2, %c0_57] : memref<8x16xf32, #tpu.memory_space<vmem>>, vector<1x16xf32>
    %134 = vector.extract_strided_slice %130 {offsets = [0, 0], sizes = [32, 16], strides = [1, 1]} : vector<32x32xf32> to vector<32x16xf32>
    %cst_58 = arith.constant -8.000000e+00 : f32
    %135 = vector.broadcast %cst_58 : f32 to vector<32x16xf32>
    %136 = arith.maximumf %134, %135 : vector<32x16xf32>
    %cst_59 = arith.constant 8.000000e+00 : f32
    %137 = vector.broadcast %cst_59 : f32 to vector<1x16xf32>
    %138 = arith.addf %131, %137 : vector<1x16xf32>
    %139 = vector.broadcast %138 : vector<1x16xf32> to vector<32x16xf32>
    %140 = arith.minimumf %136, %139 : vector<32x16xf32>
    %141 = vector.extract_strided_slice %130 {offsets = [0, 16], sizes = [32, 16], strides = [1, 1]} : vector<32x32xf32> to vector<32x16xf32>
    %cst_60 = arith.constant -8.000000e+00 : f32
    %142 = vector.broadcast %cst_60 : f32 to vector<32x16xf32>
    %143 = arith.maximumf %141, %142 : vector<32x16xf32>
    %cst_61 = arith.constant 8.000000e+00 : f32
    %144 = vector.broadcast %cst_61 : f32 to vector<1x16xf32>
    %145 = arith.addf %132, %144 : vector<1x16xf32>
    %146 = vector.broadcast %145 : vector<1x16xf32> to vector<32x16xf32>
    %147 = arith.minimumf %143, %146 : vector<32x16xf32>
    %148 = math.floor %140 : vector<32x16xf32>
    %149 = math.floor %147 : vector<32x16xf32>
    %150 = arith.subf %140, %148 : vector<32x16xf32>
    %cst_62 = arith.constant 1.000000e+00 : f32
    %151 = vector.broadcast %cst_62 : f32 to vector<32x16xf32>
    %152 = arith.subf %151, %150 : vector<32x16xf32>
    %153 = arith.subf %147, %149 : vector<32x16xf32>
    %cst_63 = arith.constant 1.000000e+00 : f32
    %154 = vector.broadcast %cst_63 : f32 to vector<32x16xf32>
    %155 = arith.subf %154, %153 : vector<32x16xf32>
    %cst_64 = arith.constant 0.000000e+00 : f32
    %156 = vector.broadcast %cst_64 : f32 to vector<32x16xf32>
    %157 = arith.cmpf oge, %148, %156 : vector<32x16xf32>
    %cst_65 = arith.constant 1.000000e+00 : f32
    %158 = vector.broadcast %cst_65 : f32 to vector<1x16xf32>
    %159 = arith.subf %131, %158 : vector<1x16xf32>
    %160 = vector.broadcast %159 : vector<1x16xf32> to vector<32x16xf32>
    %161 = arith.cmpf ole, %148, %160 : vector<32x16xf32>
    %162 = arith.andi %157, %161 : vector<32x16xi1>
    %cst_66 = arith.constant -1.000000e+00 : f32
    %163 = vector.broadcast %cst_66 : f32 to vector<32x16xf32>
    %164 = arith.cmpf oge, %148, %163 : vector<32x16xf32>
    %cst_67 = arith.constant 2.000000e+00 : f32
    %165 = vector.broadcast %cst_67 : f32 to vector<1x16xf32>
    %166 = arith.subf %131, %165 : vector<1x16xf32>
    %167 = vector.broadcast %166 : vector<1x16xf32> to vector<32x16xf32>
    %168 = arith.cmpf ole, %148, %167 : vector<32x16xf32>
    %169 = arith.andi %164, %168 : vector<32x16xi1>
    %cst_68 = arith.constant 0.000000e+00 : f32
    %170 = vector.broadcast %cst_68 : f32 to vector<32x16xf32>
    %171 = arith.cmpf oge, %149, %170 : vector<32x16xf32>
    %cst_69 = arith.constant 1.000000e+00 : f32
    %172 = vector.broadcast %cst_69 : f32 to vector<1x16xf32>
    %173 = arith.subf %132, %172 : vector<1x16xf32>
    %174 = vector.broadcast %173 : vector<1x16xf32> to vector<32x16xf32>
    %175 = arith.cmpf ole, %149, %174 : vector<32x16xf32>
    %176 = arith.andi %171, %175 : vector<32x16xi1>
    %cst_70 = arith.constant -1.000000e+00 : f32
    %177 = vector.broadcast %cst_70 : f32 to vector<32x16xf32>
    %178 = arith.cmpf oge, %149, %177 : vector<32x16xf32>
    %cst_71 = arith.constant 2.000000e+00 : f32
    %179 = vector.broadcast %cst_71 : f32 to vector<1x16xf32>
    %180 = arith.subf %132, %179 : vector<1x16xf32>
    %181 = vector.broadcast %180 : vector<1x16xf32> to vector<32x16xf32>
    %182 = arith.cmpf ole, %149, %181 : vector<32x16xf32>
    %183 = arith.andi %178, %182 : vector<32x16xi1>
    %184 = arith.andi %162, %176 : vector<32x16xi1>
    %185 = arith.mulf %152, %155 : vector<32x16xf32>
    %cst_72 = arith.constant 0.000000e+00 : f32
    %186 = vector.broadcast %cst_72 : f32 to vector<32x16xf32>
    %187 = arith.select %184, %185, %186 : vector<32x16xi1>, vector<32x16xf32>
    %188 = arith.andi %169, %176 : vector<32x16xi1>
    %189 = arith.mulf %150, %155 : vector<32x16xf32>
    %cst_73 = arith.constant 0.000000e+00 : f32
    %190 = vector.broadcast %cst_73 : f32 to vector<32x16xf32>
    %191 = arith.select %188, %189, %190 : vector<32x16xi1>, vector<32x16xf32>
    %192 = arith.andi %162, %183 : vector<32x16xi1>
    %193 = arith.mulf %152, %153 : vector<32x16xf32>
    %cst_74 = arith.constant 0.000000e+00 : f32
    %194 = vector.broadcast %cst_74 : f32 to vector<32x16xf32>
    %195 = arith.select %192, %193, %194 : vector<32x16xi1>, vector<32x16xf32>
    %196 = arith.andi %169, %183 : vector<32x16xi1>
    %197 = arith.mulf %150, %153 : vector<32x16xf32>
    %cst_75 = arith.constant 0.000000e+00 : f32
    %198 = vector.broadcast %cst_75 : f32 to vector<32x16xf32>
    %199 = arith.select %196, %197, %198 : vector<32x16xi1>, vector<32x16xf32>
    %200 = vector.broadcast %131 : vector<1x16xf32> to vector<32x16xf32>
    %201 = arith.mulf %149, %200 : vector<32x16xf32>
    %202 = arith.addf %201, %148 : vector<32x16xf32>
    %203 = vector.broadcast %7 : vector<32x1xf32> to vector<32x16xf32>
    %204 = vector.broadcast %133 : vector<1x16xf32> to vector<32x16xf32>
    %205 = arith.mulf %203, %204 : vector<32x16xf32>
    %206 = arith.addf %202, %205 : vector<32x16xf32>
    %207 = arith.fptosi %206 : vector<32x16xf32> to vector<32x16xi32>
    %c0_76 = arith.constant 0 : index
    %c208 = arith.constant 208 : index
    %208 = vector.load %arg5[%c0_76, %c208] : memref<32x304xf32, #tpu.memory_space<vmem>>, vector<32x32xf32>
    %209 = vector.extract_strided_slice %126 {offsets = [0, 0], sizes = [32, 4], strides = [1, 1]} : vector<32x16xf32> to vector<32x4xf32>
    %cst_77 = arith.constant dense<0xFF800000> : vector<32xf32>
    %210 = vector.multi_reduction <maximumf>, %209, %cst_77 [1] : vector<32x4xf32> to vector<32xf32>
    %211 = vector.shape_cast %210 : vector<32xf32> to vector<32x1xf32>
    %212 = vector.broadcast %211 : vector<32x1xf32> to vector<32x4xf32>
    %213 = arith.subf %209, %212 : vector<32x4xf32>
    %214 = math.exp %213 : vector<32x4xf32>
    %cst_78 = arith.constant dense<0.000000e+00> : vector<32xf32>
    %215 = vector.multi_reduction <add>, %214, %cst_78 [1] : vector<32x4xf32> to vector<32xf32>
    %216 = vector.shape_cast %215 : vector<32xf32> to vector<32x1xf32>
    %217 = tpu.reciprocal %216 {approx = true} : vector<32x1xf32> -> vector<32x1xf32>
    %218 = vector.broadcast %217 : vector<32x1xf32> to vector<32x4xf32>
    %219 = arith.mulf %214, %218 : vector<32x4xf32>
    %220 = tpu.iota {dimensions = array<i32: 1>} : vector<32x128xi32>
    %221 = vector.extract_strided_slice %207 {offsets = [0, 0], sizes = [32, 1], strides = [1, 1]} : vector<32x16xi32> to vector<32x1xi32>
    %222 = vector.broadcast %221 : vector<32x1xi32> to vector<32x128xi32>
    %223 = arith.subi %220, %222 : vector<32x128xi32>
    %c0_i32 = arith.constant 0 : i32
    %224 = vector.broadcast %c0_i32 : i32 to vector<32x128xi32>
    %225 = arith.cmpi eq, %223, %224 : vector<32x128xi32>
    %226 = vector.extract_strided_slice %187 {offsets = [0, 0], sizes = [32, 1], strides = [1, 1]} : vector<32x16xf32> to vector<32x1xf32>
    %cst_79 = arith.constant 0.000000e+00 : f32
    %227 = vector.shape_cast %226 : vector<32x1xf32> to vector<32x1xf32>
    %228 = vector.broadcast %227 : vector<32x1xf32> to vector<32x128xf32>
    %229 = vector.broadcast %cst_79 : f32 to vector<32x128xf32>
    %230 = arith.select %225, %228, %229 : vector<32x128xi1>, vector<32x128xf32>
    %c1_i32 = arith.constant 1 : i32
    %231 = vector.broadcast %c1_i32 : i32 to vector<32x128xi32>
    %232 = arith.cmpi eq, %223, %231 : vector<32x128xi32>
    %233 = vector.extract_strided_slice %191 {offsets = [0, 0], sizes = [32, 1], strides = [1, 1]} : vector<32x16xf32> to vector<32x1xf32>
    %cst_80 = arith.constant 0.000000e+00 : f32
    %234 = vector.shape_cast %233 : vector<32x1xf32> to vector<32x1xf32>
    %235 = vector.broadcast %234 : vector<32x1xf32> to vector<32x128xf32>
    %236 = vector.broadcast %cst_80 : f32 to vector<32x128xf32>
    %237 = arith.select %232, %235, %236 : vector<32x128xi1>, vector<32x128xf32>
    %238 = arith.addf %230, %237 : vector<32x128xf32>
    %c8_i32 = arith.constant 8 : i32
    %239 = vector.broadcast %c8_i32 : i32 to vector<32x128xi32>
    %240 = arith.cmpi eq, %223, %239 : vector<32x128xi32>
    %241 = vector.extract_strided_slice %195 {offsets = [0, 0], sizes = [32, 1], strides = [1, 1]} : vector<32x16xf32> to vector<32x1xf32>
    %cst_81 = arith.constant 0.000000e+00 : f32
    %242 = vector.shape_cast %241 : vector<32x1xf32> to vector<32x1xf32>
    %243 = vector.broadcast %242 : vector<32x1xf32> to vector<32x128xf32>
    %244 = vector.broadcast %cst_81 : f32 to vector<32x128xf32>
    %245 = arith.select %240, %243, %244 : vector<32x128xi1>, vector<32x128xf32>
    %246 = arith.addf %238, %245 : vector<32x128xf32>
    %c9_i32 = arith.constant 9 : i32
    %247 = vector.broadcast %c9_i32 : i32 to vector<32x128xi32>
    %248 = arith.cmpi eq, %223, %247 : vector<32x128xi32>
    %249 = vector.extract_strided_slice %199 {offsets = [0, 0], sizes = [32, 1], strides = [1, 1]} : vector<32x16xf32> to vector<32x1xf32>
    %cst_82 = arith.constant 0.000000e+00 : f32
    %250 = vector.shape_cast %249 : vector<32x1xf32> to vector<32x1xf32>
    %251 = vector.broadcast %250 : vector<32x1xf32> to vector<32x128xf32>
    %252 = vector.broadcast %cst_82 : f32 to vector<32x128xf32>
    %253 = arith.select %248, %251, %252 : vector<32x128xi1>, vector<32x128xf32>
    %254 = arith.addf %246, %253 : vector<32x128xf32>
    %255 = vector.extract_strided_slice %219 {offsets = [0, 0], sizes = [32, 1], strides = [1, 1]} : vector<32x4xf32> to vector<32x1xf32>
    %256 = vector.broadcast %255 : vector<32x1xf32> to vector<32x128xf32>
    %257 = arith.mulf %254, %256 : vector<32x128xf32>
    %258 = vector.extract_strided_slice %207 {offsets = [0, 1], sizes = [32, 1], strides = [1, 1]} : vector<32x16xi32> to vector<32x1xi32>
    %259 = vector.broadcast %258 : vector<32x1xi32> to vector<32x128xi32>
    %260 = arith.subi %220, %259 : vector<32x128xi32>
    %c0_i32_83 = arith.constant 0 : i32
    %261 = vector.broadcast %c0_i32_83 : i32 to vector<32x128xi32>
    %262 = arith.cmpi eq, %260, %261 : vector<32x128xi32>
    %263 = vector.extract_strided_slice %187 {offsets = [0, 1], sizes = [32, 1], strides = [1, 1]} : vector<32x16xf32> to vector<32x1xf32>
    %cst_84 = arith.constant 0.000000e+00 : f32
    %264 = vector.shape_cast %263 : vector<32x1xf32> to vector<32x1xf32>
    %265 = vector.broadcast %264 : vector<32x1xf32> to vector<32x128xf32>
    %266 = vector.broadcast %cst_84 : f32 to vector<32x128xf32>
    %267 = arith.select %262, %265, %266 : vector<32x128xi1>, vector<32x128xf32>
    %c1_i32_85 = arith.constant 1 : i32
    %268 = vector.broadcast %c1_i32_85 : i32 to vector<32x128xi32>
    %269 = arith.cmpi eq, %260, %268 : vector<32x128xi32>
    %270 = vector.extract_strided_slice %191 {offsets = [0, 1], sizes = [32, 1], strides = [1, 1]} : vector<32x16xf32> to vector<32x1xf32>
    %cst_86 = arith.constant 0.000000e+00 : f32
    %271 = vector.shape_cast %270 : vector<32x1xf32> to vector<32x1xf32>
    %272 = vector.broadcast %271 : vector<32x1xf32> to vector<32x128xf32>
    %273 = vector.broadcast %cst_86 : f32 to vector<32x128xf32>
    %274 = arith.select %269, %272, %273 : vector<32x128xi1>, vector<32x128xf32>
    %275 = arith.addf %267, %274 : vector<32x128xf32>
    %c8_i32_87 = arith.constant 8 : i32
    %276 = vector.broadcast %c8_i32_87 : i32 to vector<32x128xi32>
    %277 = arith.cmpi eq, %260, %276 : vector<32x128xi32>
    %278 = vector.extract_strided_slice %195 {offsets = [0, 1], sizes = [32, 1], strides = [1, 1]} : vector<32x16xf32> to vector<32x1xf32>
    %cst_88 = arith.constant 0.000000e+00 : f32
    %279 = vector.shape_cast %278 : vector<32x1xf32> to vector<32x1xf32>
    %280 = vector.broadcast %279 : vector<32x1xf32> to vector<32x128xf32>
    %281 = vector.broadcast %cst_88 : f32 to vector<32x128xf32>
    %282 = arith.select %277, %280, %281 : vector<32x128xi1>, vector<32x128xf32>
    %283 = arith.addf %275, %282 : vector<32x128xf32>
    %c9_i32_89 = arith.constant 9 : i32
    %284 = vector.broadcast %c9_i32_89 : i32 to vector<32x128xi32>
    %285 = arith.cmpi eq, %260, %284 : vector<32x128xi32>
    %286 = vector.extract_strided_slice %199 {offsets = [0, 1], sizes = [32, 1], strides = [1, 1]} : vector<32x16xf32> to vector<32x1xf32>
    %cst_90 = arith.constant 0.000000e+00 : f32
    %287 = vector.shape_cast %286 : vector<32x1xf32> to vector<32x1xf32>
    %288 = vector.broadcast %287 : vector<32x1xf32> to vector<32x128xf32>
    %289 = vector.broadcast %cst_90 : f32 to vector<32x128xf32>
    %290 = arith.select %285, %288, %289 : vector<32x128xi1>, vector<32x128xf32>
    %291 = arith.addf %283, %290 : vector<32x128xf32>
    %292 = vector.extract_strided_slice %219 {offsets = [0, 1], sizes = [32, 1], strides = [1, 1]} : vector<32x4xf32> to vector<32x1xf32>
    %293 = vector.broadcast %292 : vector<32x1xf32> to vector<32x128xf32>
    %294 = arith.mulf %291, %293 : vector<32x128xf32>
    %295 = arith.addf %257, %294 : vector<32x128xf32>
    %296 = vector.extract_strided_slice %119 {offsets = [0, 0], sizes = [128, 8], strides = [1, 1]} : vector<160x32xf32> to vector<128x8xf32>
    %cst_91 = arith.constant dense<0.000000e+00> : vector<32x8xf32>
    %297 = tpu.matmul %295, %296, %cst_91 {dimension_numbers = #tpu.dot_dimension_numbers<[1], [0], [0], [1], [0, 0, 1, 1], [], []>} : vector<32x128xf32>, vector<128x8xf32>, vector<32x8xf32> -> vector<32x8xf32>
    %298 = tpu.iota {dimensions = array<i32: 1>} : vector<32x32xi32>
    %299 = vector.extract_strided_slice %207 {offsets = [0, 2], sizes = [32, 1], strides = [1, 1]} : vector<32x16xi32> to vector<32x1xi32>
    %300 = vector.broadcast %299 : vector<32x1xi32> to vector<32x32xi32>
    %301 = arith.subi %298, %300 : vector<32x32xi32>
    %c0_i32_92 = arith.constant 0 : i32
    %302 = vector.broadcast %c0_i32_92 : i32 to vector<32x32xi32>
    %303 = arith.cmpi eq, %301, %302 : vector<32x32xi32>
    %304 = vector.extract_strided_slice %187 {offsets = [0, 2], sizes = [32, 1], strides = [1, 1]} : vector<32x16xf32> to vector<32x1xf32>
    %cst_93 = arith.constant 0.000000e+00 : f32
    %305 = vector.shape_cast %304 : vector<32x1xf32> to vector<32x1xf32>
    %306 = vector.broadcast %305 : vector<32x1xf32> to vector<32x32xf32>
    %307 = vector.broadcast %cst_93 : f32 to vector<32x32xf32>
    %308 = arith.select %303, %306, %307 : vector<32x32xi1>, vector<32x32xf32>
    %c1_i32_94 = arith.constant 1 : i32
    %309 = vector.broadcast %c1_i32_94 : i32 to vector<32x32xi32>
    %310 = arith.cmpi eq, %301, %309 : vector<32x32xi32>
    %311 = vector.extract_strided_slice %191 {offsets = [0, 2], sizes = [32, 1], strides = [1, 1]} : vector<32x16xf32> to vector<32x1xf32>
    %cst_95 = arith.constant 0.000000e+00 : f32
    %312 = vector.shape_cast %311 : vector<32x1xf32> to vector<32x1xf32>
    %313 = vector.broadcast %312 : vector<32x1xf32> to vector<32x32xf32>
    %314 = vector.broadcast %cst_95 : f32 to vector<32x32xf32>
    %315 = arith.select %310, %313, %314 : vector<32x32xi1>, vector<32x32xf32>
    %316 = arith.addf %308, %315 : vector<32x32xf32>
    %c4_i32 = arith.constant 4 : i32
    %317 = vector.broadcast %c4_i32 : i32 to vector<32x32xi32>
    %318 = arith.cmpi eq, %301, %317 : vector<32x32xi32>
    %319 = vector.extract_strided_slice %195 {offsets = [0, 2], sizes = [32, 1], strides = [1, 1]} : vector<32x16xf32> to vector<32x1xf32>
    %cst_96 = arith.constant 0.000000e+00 : f32
    %320 = vector.shape_cast %319 : vector<32x1xf32> to vector<32x1xf32>
    %321 = vector.broadcast %320 : vector<32x1xf32> to vector<32x32xf32>
    %322 = vector.broadcast %cst_96 : f32 to vector<32x32xf32>
    %323 = arith.select %318, %321, %322 : vector<32x32xi1>, vector<32x32xf32>
    %324 = arith.addf %316, %323 : vector<32x32xf32>
    %c5_i32 = arith.constant 5 : i32
    %325 = vector.broadcast %c5_i32 : i32 to vector<32x32xi32>
    %326 = arith.cmpi eq, %301, %325 : vector<32x32xi32>
    %327 = vector.extract_strided_slice %199 {offsets = [0, 2], sizes = [32, 1], strides = [1, 1]} : vector<32x16xf32> to vector<32x1xf32>
    %cst_97 = arith.constant 0.000000e+00 : f32
    %328 = vector.shape_cast %327 : vector<32x1xf32> to vector<32x1xf32>
    %329 = vector.broadcast %328 : vector<32x1xf32> to vector<32x32xf32>
    %330 = vector.broadcast %cst_97 : f32 to vector<32x32xf32>
    %331 = arith.select %326, %329, %330 : vector<32x32xi1>, vector<32x32xf32>
    %332 = arith.addf %324, %331 : vector<32x32xf32>
    %333 = vector.extract_strided_slice %219 {offsets = [0, 2], sizes = [32, 1], strides = [1, 1]} : vector<32x4xf32> to vector<32x1xf32>
    %334 = vector.broadcast %333 : vector<32x1xf32> to vector<32x32xf32>
    %335 = arith.mulf %332, %334 : vector<32x32xf32>
    %336 = vector.extract_strided_slice %207 {offsets = [0, 3], sizes = [32, 1], strides = [1, 1]} : vector<32x16xi32> to vector<32x1xi32>
    %337 = vector.broadcast %336 : vector<32x1xi32> to vector<32x32xi32>
    %338 = arith.subi %298, %337 : vector<32x32xi32>
    %c0_i32_98 = arith.constant 0 : i32
    %339 = vector.broadcast %c0_i32_98 : i32 to vector<32x32xi32>
    %340 = arith.cmpi eq, %338, %339 : vector<32x32xi32>
    %341 = vector.extract_strided_slice %187 {offsets = [0, 3], sizes = [32, 1], strides = [1, 1]} : vector<32x16xf32> to vector<32x1xf32>
    %cst_99 = arith.constant 0.000000e+00 : f32
    %342 = vector.shape_cast %341 : vector<32x1xf32> to vector<32x1xf32>
    %343 = vector.broadcast %342 : vector<32x1xf32> to vector<32x32xf32>
    %344 = vector.broadcast %cst_99 : f32 to vector<32x32xf32>
    %345 = arith.select %340, %343, %344 : vector<32x32xi1>, vector<32x32xf32>
    %c1_i32_100 = arith.constant 1 : i32
    %346 = vector.broadcast %c1_i32_100 : i32 to vector<32x32xi32>
    %347 = arith.cmpi eq, %338, %346 : vector<32x32xi32>
    %348 = vector.extract_strided_slice %191 {offsets = [0, 3], sizes = [32, 1], strides = [1, 1]} : vector<32x16xf32> to vector<32x1xf32>
    %cst_101 = arith.constant 0.000000e+00 : f32
    %349 = vector.shape_cast %348 : vector<32x1xf32> to vector<32x1xf32>
    %350 = vector.broadcast %349 : vector<32x1xf32> to vector<32x32xf32>
    %351 = vector.broadcast %cst_101 : f32 to vector<32x32xf32>
    %352 = arith.select %347, %350, %351 : vector<32x32xi1>, vector<32x32xf32>
    %353 = arith.addf %345, %352 : vector<32x32xf32>
    %c4_i32_102 = arith.constant 4 : i32
    %354 = vector.broadcast %c4_i32_102 : i32 to vector<32x32xi32>
    %355 = arith.cmpi eq, %338, %354 : vector<32x32xi32>
    %356 = vector.extract_strided_slice %195 {offsets = [0, 3], sizes = [32, 1], strides = [1, 1]} : vector<32x16xf32> to vector<32x1xf32>
    %cst_103 = arith.constant 0.000000e+00 : f32
    %357 = vector.shape_cast %356 : vector<32x1xf32> to vector<32x1xf32>
    %358 = vector.broadcast %357 : vector<32x1xf32> to vector<32x32xf32>
    %359 = vector.broadcast %cst_103 : f32 to vector<32x32xf32>
    %360 = arith.select %355, %358, %359 : vector<32x32xi1>, vector<32x32xf32>
    %361 = arith.addf %353, %360 : vector<32x32xf32>
    %c5_i32_104 = arith.constant 5 : i32
    %362 = vector.broadcast %c5_i32_104 : i32 to vector<32x32xi32>
    %363 = arith.cmpi eq, %338, %362 : vector<32x32xi32>
    %364 = vector.extract_strided_slice %199 {offsets = [0, 3], sizes = [32, 1], strides = [1, 1]} : vector<32x16xf32> to vector<32x1xf32>
    %cst_105 = arith.constant 0.000000e+00 : f32
    %365 = vector.shape_cast %364 : vector<32x1xf32> to vector<32x1xf32>
    %366 = vector.broadcast %365 : vector<32x1xf32> to vector<32x32xf32>
    %367 = vector.broadcast %cst_105 : f32 to vector<32x32xf32>
    %368 = arith.select %363, %366, %367 : vector<32x32xi1>, vector<32x32xf32>
    %369 = arith.addf %361, %368 : vector<32x32xf32>
    %370 = vector.extract_strided_slice %219 {offsets = [0, 3], sizes = [32, 1], strides = [1, 1]} : vector<32x4xf32> to vector<32x1xf32>
    %371 = vector.broadcast %370 : vector<32x1xf32> to vector<32x32xf32>
    %372 = arith.mulf %369, %371 : vector<32x32xf32>
    %373 = arith.addf %335, %372 : vector<32x32xf32>
    %374 = vector.extract_strided_slice %119 {offsets = [128, 0], sizes = [32, 8], strides = [1, 1]} : vector<160x32xf32> to vector<32x8xf32>
    %cst_106 = arith.constant dense<0.000000e+00> : vector<32x8xf32>
    %375 = tpu.matmul %373, %374, %cst_106 {dimension_numbers = #tpu.dot_dimension_numbers<[1], [0], [0], [1], [0, 0, 1, 1], [], []>} : vector<32x32xf32>, vector<32x8xf32>, vector<32x8xf32> -> vector<32x8xf32>
    %376 = arith.addf %297, %375 : vector<32x8xf32>
    %377 = vector.extract_strided_slice %208 {offsets = [0, 0], sizes = [8, 32], strides = [1, 1]} : vector<32x32xf32> to vector<8x32xf32>
    %cst_107 = arith.constant dense<0.000000e+00> : vector<32x32xf32>
    %378 = tpu.matmul %376, %377, %cst_107 {dimension_numbers = #tpu.dot_dimension_numbers<[1], [0], [0], [1], [0, 0, 1, 1], [], []>} : vector<32x8xf32>, vector<8x32xf32>, vector<32x32xf32> -> vector<32x32xf32>
    %379 = vector.extract_strided_slice %126 {offsets = [0, 4], sizes = [32, 4], strides = [1, 1]} : vector<32x16xf32> to vector<32x4xf32>
    %cst_108 = arith.constant dense<0xFF800000> : vector<32xf32>
    %380 = vector.multi_reduction <maximumf>, %379, %cst_108 [1] : vector<32x4xf32> to vector<32xf32>
    %381 = vector.shape_cast %380 : vector<32xf32> to vector<32x1xf32>
    %382 = vector.broadcast %381 : vector<32x1xf32> to vector<32x4xf32>
    %383 = arith.subf %379, %382 : vector<32x4xf32>
    %384 = math.exp %383 : vector<32x4xf32>
    %cst_109 = arith.constant dense<0.000000e+00> : vector<32xf32>
    %385 = vector.multi_reduction <add>, %384, %cst_109 [1] : vector<32x4xf32> to vector<32xf32>
    %386 = vector.shape_cast %385 : vector<32xf32> to vector<32x1xf32>
    %387 = tpu.reciprocal %386 {approx = true} : vector<32x1xf32> -> vector<32x1xf32>
    %388 = vector.broadcast %387 : vector<32x1xf32> to vector<32x4xf32>
    %389 = arith.mulf %384, %388 : vector<32x4xf32>
    %390 = tpu.iota {dimensions = array<i32: 1>} : vector<32x128xi32>
    %391 = vector.extract_strided_slice %207 {offsets = [0, 4], sizes = [32, 1], strides = [1, 1]} : vector<32x16xi32> to vector<32x1xi32>
    %392 = vector.broadcast %391 : vector<32x1xi32> to vector<32x128xi32>
    %393 = arith.subi %390, %392 : vector<32x128xi32>
    %c0_i32_110 = arith.constant 0 : i32
    %394 = vector.broadcast %c0_i32_110 : i32 to vector<32x128xi32>
    %395 = arith.cmpi eq, %393, %394 : vector<32x128xi32>
    %396 = vector.extract_strided_slice %187 {offsets = [0, 4], sizes = [32, 1], strides = [1, 1]} : vector<32x16xf32> to vector<32x1xf32>
    %cst_111 = arith.constant 0.000000e+00 : f32
    %397 = vector.shape_cast %396 : vector<32x1xf32> to vector<32x1xf32>
    %398 = vector.broadcast %397 : vector<32x1xf32> to vector<32x128xf32>
    %399 = vector.broadcast %cst_111 : f32 to vector<32x128xf32>
    %400 = arith.select %395, %398, %399 : vector<32x128xi1>, vector<32x128xf32>
    %c1_i32_112 = arith.constant 1 : i32
    %401 = vector.broadcast %c1_i32_112 : i32 to vector<32x128xi32>
    %402 = arith.cmpi eq, %393, %401 : vector<32x128xi32>
    %403 = vector.extract_strided_slice %191 {offsets = [0, 4], sizes = [32, 1], strides = [1, 1]} : vector<32x16xf32> to vector<32x1xf32>
    %cst_113 = arith.constant 0.000000e+00 : f32
    %404 = vector.shape_cast %403 : vector<32x1xf32> to vector<32x1xf32>
    %405 = vector.broadcast %404 : vector<32x1xf32> to vector<32x128xf32>
    %406 = vector.broadcast %cst_113 : f32 to vector<32x128xf32>
    %407 = arith.select %402, %405, %406 : vector<32x128xi1>, vector<32x128xf32>
    %408 = arith.addf %400, %407 : vector<32x128xf32>
    %c8_i32_114 = arith.constant 8 : i32
    %409 = vector.broadcast %c8_i32_114 : i32 to vector<32x128xi32>
    %410 = arith.cmpi eq, %393, %409 : vector<32x128xi32>
    %411 = vector.extract_strided_slice %195 {offsets = [0, 4], sizes = [32, 1], strides = [1, 1]} : vector<32x16xf32> to vector<32x1xf32>
    %cst_115 = arith.constant 0.000000e+00 : f32
    %412 = vector.shape_cast %411 : vector<32x1xf32> to vector<32x1xf32>
    %413 = vector.broadcast %412 : vector<32x1xf32> to vector<32x128xf32>
    %414 = vector.broadcast %cst_115 : f32 to vector<32x128xf32>
    %415 = arith.select %410, %413, %414 : vector<32x128xi1>, vector<32x128xf32>
    %416 = arith.addf %408, %415 : vector<32x128xf32>
    %c9_i32_116 = arith.constant 9 : i32
    %417 = vector.broadcast %c9_i32_116 : i32 to vector<32x128xi32>
    %418 = arith.cmpi eq, %393, %417 : vector<32x128xi32>
    %419 = vector.extract_strided_slice %199 {offsets = [0, 4], sizes = [32, 1], strides = [1, 1]} : vector<32x16xf32> to vector<32x1xf32>
    %cst_117 = arith.constant 0.000000e+00 : f32
    %420 = vector.shape_cast %419 : vector<32x1xf32> to vector<32x1xf32>
    %421 = vector.broadcast %420 : vector<32x1xf32> to vector<32x128xf32>
    %422 = vector.broadcast %cst_117 : f32 to vector<32x128xf32>
    %423 = arith.select %418, %421, %422 : vector<32x128xi1>, vector<32x128xf32>
    %424 = arith.addf %416, %423 : vector<32x128xf32>
    %425 = vector.extract_strided_slice %389 {offsets = [0, 0], sizes = [32, 1], strides = [1, 1]} : vector<32x4xf32> to vector<32x1xf32>
    %426 = vector.broadcast %425 : vector<32x1xf32> to vector<32x128xf32>
    %427 = arith.mulf %424, %426 : vector<32x128xf32>
    %428 = vector.extract_strided_slice %207 {offsets = [0, 5], sizes = [32, 1], strides = [1, 1]} : vector<32x16xi32> to vector<32x1xi32>
    %429 = vector.broadcast %428 : vector<32x1xi32> to vector<32x128xi32>
    %430 = arith.subi %390, %429 : vector<32x128xi32>
    %c0_i32_118 = arith.constant 0 : i32
    %431 = vector.broadcast %c0_i32_118 : i32 to vector<32x128xi32>
    %432 = arith.cmpi eq, %430, %431 : vector<32x128xi32>
    %433 = vector.extract_strided_slice %187 {offsets = [0, 5], sizes = [32, 1], strides = [1, 1]} : vector<32x16xf32> to vector<32x1xf32>
    %cst_119 = arith.constant 0.000000e+00 : f32
    %434 = vector.shape_cast %433 : vector<32x1xf32> to vector<32x1xf32>
    %435 = vector.broadcast %434 : vector<32x1xf32> to vector<32x128xf32>
    %436 = vector.broadcast %cst_119 : f32 to vector<32x128xf32>
    %437 = arith.select %432, %435, %436 : vector<32x128xi1>, vector<32x128xf32>
    %c1_i32_120 = arith.constant 1 : i32
    %438 = vector.broadcast %c1_i32_120 : i32 to vector<32x128xi32>
    %439 = arith.cmpi eq, %430, %438 : vector<32x128xi32>
    %440 = vector.extract_strided_slice %191 {offsets = [0, 5], sizes = [32, 1], strides = [1, 1]} : vector<32x16xf32> to vector<32x1xf32>
    %cst_121 = arith.constant 0.000000e+00 : f32
    %441 = vector.shape_cast %440 : vector<32x1xf32> to vector<32x1xf32>
    %442 = vector.broadcast %441 : vector<32x1xf32> to vector<32x128xf32>
    %443 = vector.broadcast %cst_121 : f32 to vector<32x128xf32>
    %444 = arith.select %439, %442, %443 : vector<32x128xi1>, vector<32x128xf32>
    %445 = arith.addf %437, %444 : vector<32x128xf32>
    %c8_i32_122 = arith.constant 8 : i32
    %446 = vector.broadcast %c8_i32_122 : i32 to vector<32x128xi32>
    %447 = arith.cmpi eq, %430, %446 : vector<32x128xi32>
    %448 = vector.extract_strided_slice %195 {offsets = [0, 5], sizes = [32, 1], strides = [1, 1]} : vector<32x16xf32> to vector<32x1xf32>
    %cst_123 = arith.constant 0.000000e+00 : f32
    %449 = vector.shape_cast %448 : vector<32x1xf32> to vector<32x1xf32>
    %450 = vector.broadcast %449 : vector<32x1xf32> to vector<32x128xf32>
    %451 = vector.broadcast %cst_123 : f32 to vector<32x128xf32>
    %452 = arith.select %447, %450, %451 : vector<32x128xi1>, vector<32x128xf32>
    %453 = arith.addf %445, %452 : vector<32x128xf32>
    %c9_i32_124 = arith.constant 9 : i32
    %454 = vector.broadcast %c9_i32_124 : i32 to vector<32x128xi32>
    %455 = arith.cmpi eq, %430, %454 : vector<32x128xi32>
    %456 = vector.extract_strided_slice %199 {offsets = [0, 5], sizes = [32, 1], strides = [1, 1]} : vector<32x16xf32> to vector<32x1xf32>
    %cst_125 = arith.constant 0.000000e+00 : f32
    %457 = vector.shape_cast %456 : vector<32x1xf32> to vector<32x1xf32>
    %458 = vector.broadcast %457 : vector<32x1xf32> to vector<32x128xf32>
    %459 = vector.broadcast %cst_125 : f32 to vector<32x128xf32>
    %460 = arith.select %455, %458, %459 : vector<32x128xi1>, vector<32x128xf32>
    %461 = arith.addf %453, %460 : vector<32x128xf32>
    %462 = vector.extract_strided_slice %389 {offsets = [0, 1], sizes = [32, 1], strides = [1, 1]} : vector<32x4xf32> to vector<32x1xf32>
    %463 = vector.broadcast %462 : vector<32x1xf32> to vector<32x128xf32>
    %464 = arith.mulf %461, %463 : vector<32x128xf32>
    %465 = arith.addf %427, %464 : vector<32x128xf32>
    %466 = vector.extract_strided_slice %119 {offsets = [0, 8], sizes = [128, 8], strides = [1, 1]} : vector<160x32xf32> to vector<128x8xf32>
    %cst_126 = arith.constant dense<0.000000e+00> : vector<32x8xf32>
    %467 = tpu.matmul %465, %466, %cst_126 {dimension_numbers = #tpu.dot_dimension_numbers<[1], [0], [0], [1], [0, 0, 1, 1], [], []>} : vector<32x128xf32>, vector<128x8xf32>, vector<32x8xf32> -> vector<32x8xf32>
    %468 = tpu.iota {dimensions = array<i32: 1>} : vector<32x32xi32>
    %469 = vector.extract_strided_slice %207 {offsets = [0, 6], sizes = [32, 1], strides = [1, 1]} : vector<32x16xi32> to vector<32x1xi32>
    %470 = vector.broadcast %469 : vector<32x1xi32> to vector<32x32xi32>
    %471 = arith.subi %468, %470 : vector<32x32xi32>
    %c0_i32_127 = arith.constant 0 : i32
    %472 = vector.broadcast %c0_i32_127 : i32 to vector<32x32xi32>
    %473 = arith.cmpi eq, %471, %472 : vector<32x32xi32>
    %474 = vector.extract_strided_slice %187 {offsets = [0, 6], sizes = [32, 1], strides = [1, 1]} : vector<32x16xf32> to vector<32x1xf32>
    %cst_128 = arith.constant 0.000000e+00 : f32
    %475 = vector.shape_cast %474 : vector<32x1xf32> to vector<32x1xf32>
    %476 = vector.broadcast %475 : vector<32x1xf32> to vector<32x32xf32>
    %477 = vector.broadcast %cst_128 : f32 to vector<32x32xf32>
    %478 = arith.select %473, %476, %477 : vector<32x32xi1>, vector<32x32xf32>
    %c1_i32_129 = arith.constant 1 : i32
    %479 = vector.broadcast %c1_i32_129 : i32 to vector<32x32xi32>
    %480 = arith.cmpi eq, %471, %479 : vector<32x32xi32>
    %481 = vector.extract_strided_slice %191 {offsets = [0, 6], sizes = [32, 1], strides = [1, 1]} : vector<32x16xf32> to vector<32x1xf32>
    %cst_130 = arith.constant 0.000000e+00 : f32
    %482 = vector.shape_cast %481 : vector<32x1xf32> to vector<32x1xf32>
    %483 = vector.broadcast %482 : vector<32x1xf32> to vector<32x32xf32>
    %484 = vector.broadcast %cst_130 : f32 to vector<32x32xf32>
    %485 = arith.select %480, %483, %484 : vector<32x32xi1>, vector<32x32xf32>
    %486 = arith.addf %478, %485 : vector<32x32xf32>
    %c4_i32_131 = arith.constant 4 : i32
    %487 = vector.broadcast %c4_i32_131 : i32 to vector<32x32xi32>
    %488 = arith.cmpi eq, %471, %487 : vector<32x32xi32>
    %489 = vector.extract_strided_slice %195 {offsets = [0, 6], sizes = [32, 1], strides = [1, 1]} : vector<32x16xf32> to vector<32x1xf32>
    %cst_132 = arith.constant 0.000000e+00 : f32
    %490 = vector.shape_cast %489 : vector<32x1xf32> to vector<32x1xf32>
    %491 = vector.broadcast %490 : vector<32x1xf32> to vector<32x32xf32>
    %492 = vector.broadcast %cst_132 : f32 to vector<32x32xf32>
    %493 = arith.select %488, %491, %492 : vector<32x32xi1>, vector<32x32xf32>
    %494 = arith.addf %486, %493 : vector<32x32xf32>
    %c5_i32_133 = arith.constant 5 : i32
    %495 = vector.broadcast %c5_i32_133 : i32 to vector<32x32xi32>
    %496 = arith.cmpi eq, %471, %495 : vector<32x32xi32>
    %497 = vector.extract_strided_slice %199 {offsets = [0, 6], sizes = [32, 1], strides = [1, 1]} : vector<32x16xf32> to vector<32x1xf32>
    %cst_134 = arith.constant 0.000000e+00 : f32
    %498 = vector.shape_cast %497 : vector<32x1xf32> to vector<32x1xf32>
    %499 = vector.broadcast %498 : vector<32x1xf32> to vector<32x32xf32>
    %500 = vector.broadcast %cst_134 : f32 to vector<32x32xf32>
    %501 = arith.select %496, %499, %500 : vector<32x32xi1>, vector<32x32xf32>
    %502 = arith.addf %494, %501 : vector<32x32xf32>
    %503 = vector.extract_strided_slice %389 {offsets = [0, 2], sizes = [32, 1], strides = [1, 1]} : vector<32x4xf32> to vector<32x1xf32>
    %504 = vector.broadcast %503 : vector<32x1xf32> to vector<32x32xf32>
    %505 = arith.mulf %502, %504 : vector<32x32xf32>
    %506 = vector.extract_strided_slice %207 {offsets = [0, 7], sizes = [32, 1], strides = [1, 1]} : vector<32x16xi32> to vector<32x1xi32>
    %507 = vector.broadcast %506 : vector<32x1xi32> to vector<32x32xi32>
    %508 = arith.subi %468, %507 : vector<32x32xi32>
    %c0_i32_135 = arith.constant 0 : i32
    %509 = vector.broadcast %c0_i32_135 : i32 to vector<32x32xi32>
    %510 = arith.cmpi eq, %508, %509 : vector<32x32xi32>
    %511 = vector.extract_strided_slice %187 {offsets = [0, 7], sizes = [32, 1], strides = [1, 1]} : vector<32x16xf32> to vector<32x1xf32>
    %cst_136 = arith.constant 0.000000e+00 : f32
    %512 = vector.shape_cast %511 : vector<32x1xf32> to vector<32x1xf32>
    %513 = vector.broadcast %512 : vector<32x1xf32> to vector<32x32xf32>
    %514 = vector.broadcast %cst_136 : f32 to vector<32x32xf32>
    %515 = arith.select %510, %513, %514 : vector<32x32xi1>, vector<32x32xf32>
    %c1_i32_137 = arith.constant 1 : i32
    %516 = vector.broadcast %c1_i32_137 : i32 to vector<32x32xi32>
    %517 = arith.cmpi eq, %508, %516 : vector<32x32xi32>
    %518 = vector.extract_strided_slice %191 {offsets = [0, 7], sizes = [32, 1], strides = [1, 1]} : vector<32x16xf32> to vector<32x1xf32>
    %cst_138 = arith.constant 0.000000e+00 : f32
    %519 = vector.shape_cast %518 : vector<32x1xf32> to vector<32x1xf32>
    %520 = vector.broadcast %519 : vector<32x1xf32> to vector<32x32xf32>
    %521 = vector.broadcast %cst_138 : f32 to vector<32x32xf32>
    %522 = arith.select %517, %520, %521 : vector<32x32xi1>, vector<32x32xf32>
    %523 = arith.addf %515, %522 : vector<32x32xf32>
    %c4_i32_139 = arith.constant 4 : i32
    %524 = vector.broadcast %c4_i32_139 : i32 to vector<32x32xi32>
    %525 = arith.cmpi eq, %508, %524 : vector<32x32xi32>
    %526 = vector.extract_strided_slice %195 {offsets = [0, 7], sizes = [32, 1], strides = [1, 1]} : vector<32x16xf32> to vector<32x1xf32>
    %cst_140 = arith.constant 0.000000e+00 : f32
    %527 = vector.shape_cast %526 : vector<32x1xf32> to vector<32x1xf32>
    %528 = vector.broadcast %527 : vector<32x1xf32> to vector<32x32xf32>
    %529 = vector.broadcast %cst_140 : f32 to vector<32x32xf32>
    %530 = arith.select %525, %528, %529 : vector<32x32xi1>, vector<32x32xf32>
    %531 = arith.addf %523, %530 : vector<32x32xf32>
    %c5_i32_141 = arith.constant 5 : i32
    %532 = vector.broadcast %c5_i32_141 : i32 to vector<32x32xi32>
    %533 = arith.cmpi eq, %508, %532 : vector<32x32xi32>
    %534 = vector.extract_strided_slice %199 {offsets = [0, 7], sizes = [32, 1], strides = [1, 1]} : vector<32x16xf32> to vector<32x1xf32>
    %cst_142 = arith.constant 0.000000e+00 : f32
    %535 = vector.shape_cast %534 : vector<32x1xf32> to vector<32x1xf32>
    %536 = vector.broadcast %535 : vector<32x1xf32> to vector<32x32xf32>
    %537 = vector.broadcast %cst_142 : f32 to vector<32x32xf32>
    %538 = arith.select %533, %536, %537 : vector<32x32xi1>, vector<32x32xf32>
    %539 = arith.addf %531, %538 : vector<32x32xf32>
    %540 = vector.extract_strided_slice %389 {offsets = [0, 3], sizes = [32, 1], strides = [1, 1]} : vector<32x4xf32> to vector<32x1xf32>
    %541 = vector.broadcast %540 : vector<32x1xf32> to vector<32x32xf32>
    %542 = arith.mulf %539, %541 : vector<32x32xf32>
    %543 = arith.addf %505, %542 : vector<32x32xf32>
    %544 = vector.extract_strided_slice %119 {offsets = [128, 8], sizes = [32, 8], strides = [1, 1]} : vector<160x32xf32> to vector<32x8xf32>
    %cst_143 = arith.constant dense<0.000000e+00> : vector<32x8xf32>
    %545 = tpu.matmul %543, %544, %cst_143 {dimension_numbers = #tpu.dot_dimension_numbers<[1], [0], [0], [1], [0, 0, 1, 1], [], []>} : vector<32x32xf32>, vector<32x8xf32>, vector<32x8xf32> -> vector<32x8xf32>
    %546 = arith.addf %467, %545 : vector<32x8xf32>
    %547 = vector.extract_strided_slice %208 {offsets = [8, 0], sizes = [8, 32], strides = [1, 1]} : vector<32x32xf32> to vector<8x32xf32>
    %cst_144 = arith.constant dense<0.000000e+00> : vector<32x32xf32>
    %548 = tpu.matmul %546, %547, %cst_144 {dimension_numbers = #tpu.dot_dimension_numbers<[1], [0], [0], [1], [0, 0, 1, 1], [], []>} : vector<32x8xf32>, vector<8x32xf32>, vector<32x32xf32> -> vector<32x32xf32>
    %549 = arith.addf %378, %548 : vector<32x32xf32>
    %550 = vector.extract_strided_slice %126 {offsets = [0, 8], sizes = [32, 4], strides = [1, 1]} : vector<32x16xf32> to vector<32x4xf32>
    %cst_145 = arith.constant dense<0xFF800000> : vector<32xf32>
    %551 = vector.multi_reduction <maximumf>, %550, %cst_145 [1] : vector<32x4xf32> to vector<32xf32>
    %552 = vector.shape_cast %551 : vector<32xf32> to vector<32x1xf32>
    %553 = vector.broadcast %552 : vector<32x1xf32> to vector<32x4xf32>
    %554 = arith.subf %550, %553 : vector<32x4xf32>
    %555 = math.exp %554 : vector<32x4xf32>
    %cst_146 = arith.constant dense<0.000000e+00> : vector<32xf32>
    %556 = vector.multi_reduction <add>, %555, %cst_146 [1] : vector<32x4xf32> to vector<32xf32>
    %557 = vector.shape_cast %556 : vector<32xf32> to vector<32x1xf32>
    %558 = tpu.reciprocal %557 {approx = true} : vector<32x1xf32> -> vector<32x1xf32>
    %559 = vector.broadcast %558 : vector<32x1xf32> to vector<32x4xf32>
    %560 = arith.mulf %555, %559 : vector<32x4xf32>
    %561 = tpu.iota {dimensions = array<i32: 1>} : vector<32x128xi32>
    %562 = vector.extract_strided_slice %207 {offsets = [0, 8], sizes = [32, 1], strides = [1, 1]} : vector<32x16xi32> to vector<32x1xi32>
    %563 = vector.broadcast %562 : vector<32x1xi32> to vector<32x128xi32>
    %564 = arith.subi %561, %563 : vector<32x128xi32>
    %c0_i32_147 = arith.constant 0 : i32
    %565 = vector.broadcast %c0_i32_147 : i32 to vector<32x128xi32>
    %566 = arith.cmpi eq, %564, %565 : vector<32x128xi32>
    %567 = vector.extract_strided_slice %187 {offsets = [0, 8], sizes = [32, 1], strides = [1, 1]} : vector<32x16xf32> to vector<32x1xf32>
    %cst_148 = arith.constant 0.000000e+00 : f32
    %568 = vector.shape_cast %567 : vector<32x1xf32> to vector<32x1xf32>
    %569 = vector.broadcast %568 : vector<32x1xf32> to vector<32x128xf32>
    %570 = vector.broadcast %cst_148 : f32 to vector<32x128xf32>
    %571 = arith.select %566, %569, %570 : vector<32x128xi1>, vector<32x128xf32>
    %c1_i32_149 = arith.constant 1 : i32
    %572 = vector.broadcast %c1_i32_149 : i32 to vector<32x128xi32>
    %573 = arith.cmpi eq, %564, %572 : vector<32x128xi32>
    %574 = vector.extract_strided_slice %191 {offsets = [0, 8], sizes = [32, 1], strides = [1, 1]} : vector<32x16xf32> to vector<32x1xf32>
    %cst_150 = arith.constant 0.000000e+00 : f32
    %575 = vector.shape_cast %574 : vector<32x1xf32> to vector<32x1xf32>
    %576 = vector.broadcast %575 : vector<32x1xf32> to vector<32x128xf32>
    %577 = vector.broadcast %cst_150 : f32 to vector<32x128xf32>
    %578 = arith.select %573, %576, %577 : vector<32x128xi1>, vector<32x128xf32>
    %579 = arith.addf %571, %578 : vector<32x128xf32>
    %c8_i32_151 = arith.constant 8 : i32
    %580 = vector.broadcast %c8_i32_151 : i32 to vector<32x128xi32>
    %581 = arith.cmpi eq, %564, %580 : vector<32x128xi32>
    %582 = vector.extract_strided_slice %195 {offsets = [0, 8], sizes = [32, 1], strides = [1, 1]} : vector<32x16xf32> to vector<32x1xf32>
    %cst_152 = arith.constant 0.000000e+00 : f32
    %583 = vector.shape_cast %582 : vector<32x1xf32> to vector<32x1xf32>
    %584 = vector.broadcast %583 : vector<32x1xf32> to vector<32x128xf32>
    %585 = vector.broadcast %cst_152 : f32 to vector<32x128xf32>
    %586 = arith.select %581, %584, %585 : vector<32x128xi1>, vector<32x128xf32>
    %587 = arith.addf %579, %586 : vector<32x128xf32>
    %c9_i32_153 = arith.constant 9 : i32
    %588 = vector.broadcast %c9_i32_153 : i32 to vector<32x128xi32>
    %589 = arith.cmpi eq, %564, %588 : vector<32x128xi32>
    %590 = vector.extract_strided_slice %199 {offsets = [0, 8], sizes = [32, 1], strides = [1, 1]} : vector<32x16xf32> to vector<32x1xf32>
    %cst_154 = arith.constant 0.000000e+00 : f32
    %591 = vector.shape_cast %590 : vector<32x1xf32> to vector<32x1xf32>
    %592 = vector.broadcast %591 : vector<32x1xf32> to vector<32x128xf32>
    %593 = vector.broadcast %cst_154 : f32 to vector<32x128xf32>
    %594 = arith.select %589, %592, %593 : vector<32x128xi1>, vector<32x128xf32>
    %595 = arith.addf %587, %594 : vector<32x128xf32>
    %596 = vector.extract_strided_slice %560 {offsets = [0, 0], sizes = [32, 1], strides = [1, 1]} : vector<32x4xf32> to vector<32x1xf32>
    %597 = vector.broadcast %596 : vector<32x1xf32> to vector<32x128xf32>
    %598 = arith.mulf %595, %597 : vector<32x128xf32>
    %599 = vector.extract_strided_slice %207 {offsets = [0, 9], sizes = [32, 1], strides = [1, 1]} : vector<32x16xi32> to vector<32x1xi32>
    %600 = vector.broadcast %599 : vector<32x1xi32> to vector<32x128xi32>
    %601 = arith.subi %561, %600 : vector<32x128xi32>
    %c0_i32_155 = arith.constant 0 : i32
    %602 = vector.broadcast %c0_i32_155 : i32 to vector<32x128xi32>
    %603 = arith.cmpi eq, %601, %602 : vector<32x128xi32>
    %604 = vector.extract_strided_slice %187 {offsets = [0, 9], sizes = [32, 1], strides = [1, 1]} : vector<32x16xf32> to vector<32x1xf32>
    %cst_156 = arith.constant 0.000000e+00 : f32
    %605 = vector.shape_cast %604 : vector<32x1xf32> to vector<32x1xf32>
    %606 = vector.broadcast %605 : vector<32x1xf32> to vector<32x128xf32>
    %607 = vector.broadcast %cst_156 : f32 to vector<32x128xf32>
    %608 = arith.select %603, %606, %607 : vector<32x128xi1>, vector<32x128xf32>
    %c1_i32_157 = arith.constant 1 : i32
    %609 = vector.broadcast %c1_i32_157 : i32 to vector<32x128xi32>
    %610 = arith.cmpi eq, %601, %609 : vector<32x128xi32>
    %611 = vector.extract_strided_slice %191 {offsets = [0, 9], sizes = [32, 1], strides = [1, 1]} : vector<32x16xf32> to vector<32x1xf32>
    %cst_158 = arith.constant 0.000000e+00 : f32
    %612 = vector.shape_cast %611 : vector<32x1xf32> to vector<32x1xf32>
    %613 = vector.broadcast %612 : vector<32x1xf32> to vector<32x128xf32>
    %614 = vector.broadcast %cst_158 : f32 to vector<32x128xf32>
    %615 = arith.select %610, %613, %614 : vector<32x128xi1>, vector<32x128xf32>
    %616 = arith.addf %608, %615 : vector<32x128xf32>
    %c8_i32_159 = arith.constant 8 : i32
    %617 = vector.broadcast %c8_i32_159 : i32 to vector<32x128xi32>
    %618 = arith.cmpi eq, %601, %617 : vector<32x128xi32>
    %619 = vector.extract_strided_slice %195 {offsets = [0, 9], sizes = [32, 1], strides = [1, 1]} : vector<32x16xf32> to vector<32x1xf32>
    %cst_160 = arith.constant 0.000000e+00 : f32
    %620 = vector.shape_cast %619 : vector<32x1xf32> to vector<32x1xf32>
    %621 = vector.broadcast %620 : vector<32x1xf32> to vector<32x128xf32>
    %622 = vector.broadcast %cst_160 : f32 to vector<32x128xf32>
    %623 = arith.select %618, %621, %622 : vector<32x128xi1>, vector<32x128xf32>
    %624 = arith.addf %616, %623 : vector<32x128xf32>
    %c9_i32_161 = arith.constant 9 : i32
    %625 = vector.broadcast %c9_i32_161 : i32 to vector<32x128xi32>
    %626 = arith.cmpi eq, %601, %625 : vector<32x128xi32>
    %627 = vector.extract_strided_slice %199 {offsets = [0, 9], sizes = [32, 1], strides = [1, 1]} : vector<32x16xf32> to vector<32x1xf32>
    %cst_162 = arith.constant 0.000000e+00 : f32
    %628 = vector.shape_cast %627 : vector<32x1xf32> to vector<32x1xf32>
    %629 = vector.broadcast %628 : vector<32x1xf32> to vector<32x128xf32>
    %630 = vector.broadcast %cst_162 : f32 to vector<32x128xf32>
    %631 = arith.select %626, %629, %630 : vector<32x128xi1>, vector<32x128xf32>
    %632 = arith.addf %624, %631 : vector<32x128xf32>
    %633 = vector.extract_strided_slice %560 {offsets = [0, 1], sizes = [32, 1], strides = [1, 1]} : vector<32x4xf32> to vector<32x1xf32>
    %634 = vector.broadcast %633 : vector<32x1xf32> to vector<32x128xf32>
    %635 = arith.mulf %632, %634 : vector<32x128xf32>
    %636 = arith.addf %598, %635 : vector<32x128xf32>
    %637 = vector.extract_strided_slice %119 {offsets = [0, 16], sizes = [128, 8], strides = [1, 1]} : vector<160x32xf32> to vector<128x8xf32>
    %cst_163 = arith.constant dense<0.000000e+00> : vector<32x8xf32>
    %638 = tpu.matmul %636, %637, %cst_163 {dimension_numbers = #tpu.dot_dimension_numbers<[1], [0], [0], [1], [0, 0, 1, 1], [], []>} : vector<32x128xf32>, vector<128x8xf32>, vector<32x8xf32> -> vector<32x8xf32>
    %639 = tpu.iota {dimensions = array<i32: 1>} : vector<32x32xi32>
    %640 = vector.extract_strided_slice %207 {offsets = [0, 10], sizes = [32, 1], strides = [1, 1]} : vector<32x16xi32> to vector<32x1xi32>
    %641 = vector.broadcast %640 : vector<32x1xi32> to vector<32x32xi32>
    %642 = arith.subi %639, %641 : vector<32x32xi32>
    %c0_i32_164 = arith.constant 0 : i32
    %643 = vector.broadcast %c0_i32_164 : i32 to vector<32x32xi32>
    %644 = arith.cmpi eq, %642, %643 : vector<32x32xi32>
    %645 = vector.extract_strided_slice %187 {offsets = [0, 10], sizes = [32, 1], strides = [1, 1]} : vector<32x16xf32> to vector<32x1xf32>
    %cst_165 = arith.constant 0.000000e+00 : f32
    %646 = vector.shape_cast %645 : vector<32x1xf32> to vector<32x1xf32>
    %647 = vector.broadcast %646 : vector<32x1xf32> to vector<32x32xf32>
    %648 = vector.broadcast %cst_165 : f32 to vector<32x32xf32>
    %649 = arith.select %644, %647, %648 : vector<32x32xi1>, vector<32x32xf32>
    %c1_i32_166 = arith.constant 1 : i32
    %650 = vector.broadcast %c1_i32_166 : i32 to vector<32x32xi32>
    %651 = arith.cmpi eq, %642, %650 : vector<32x32xi32>
    %652 = vector.extract_strided_slice %191 {offsets = [0, 10], sizes = [32, 1], strides = [1, 1]} : vector<32x16xf32> to vector<32x1xf32>
    %cst_167 = arith.constant 0.000000e+00 : f32
    %653 = vector.shape_cast %652 : vector<32x1xf32> to vector<32x1xf32>
    %654 = vector.broadcast %653 : vector<32x1xf32> to vector<32x32xf32>
    %655 = vector.broadcast %cst_167 : f32 to vector<32x32xf32>
    %656 = arith.select %651, %654, %655 : vector<32x32xi1>, vector<32x32xf32>
    %657 = arith.addf %649, %656 : vector<32x32xf32>
    %c4_i32_168 = arith.constant 4 : i32
    %658 = vector.broadcast %c4_i32_168 : i32 to vector<32x32xi32>
    %659 = arith.cmpi eq, %642, %658 : vector<32x32xi32>
    %660 = vector.extract_strided_slice %195 {offsets = [0, 10], sizes = [32, 1], strides = [1, 1]} : vector<32x16xf32> to vector<32x1xf32>
    %cst_169 = arith.constant 0.000000e+00 : f32
    %661 = vector.shape_cast %660 : vector<32x1xf32> to vector<32x1xf32>
    %662 = vector.broadcast %661 : vector<32x1xf32> to vector<32x32xf32>
    %663 = vector.broadcast %cst_169 : f32 to vector<32x32xf32>
    %664 = arith.select %659, %662, %663 : vector<32x32xi1>, vector<32x32xf32>
    %665 = arith.addf %657, %664 : vector<32x32xf32>
    %c5_i32_170 = arith.constant 5 : i32
    %666 = vector.broadcast %c5_i32_170 : i32 to vector<32x32xi32>
    %667 = arith.cmpi eq, %642, %666 : vector<32x32xi32>
    %668 = vector.extract_strided_slice %199 {offsets = [0, 10], sizes = [32, 1], strides = [1, 1]} : vector<32x16xf32> to vector<32x1xf32>
    %cst_171 = arith.constant 0.000000e+00 : f32
    %669 = vector.shape_cast %668 : vector<32x1xf32> to vector<32x1xf32>
    %670 = vector.broadcast %669 : vector<32x1xf32> to vector<32x32xf32>
    %671 = vector.broadcast %cst_171 : f32 to vector<32x32xf32>
    %672 = arith.select %667, %670, %671 : vector<32x32xi1>, vector<32x32xf32>
    %673 = arith.addf %665, %672 : vector<32x32xf32>
    %674 = vector.extract_strided_slice %560 {offsets = [0, 2], sizes = [32, 1], strides = [1, 1]} : vector<32x4xf32> to vector<32x1xf32>
    %675 = vector.broadcast %674 : vector<32x1xf32> to vector<32x32xf32>
    %676 = arith.mulf %673, %675 : vector<32x32xf32>
    %677 = vector.extract_strided_slice %207 {offsets = [0, 11], sizes = [32, 1], strides = [1, 1]} : vector<32x16xi32> to vector<32x1xi32>
    %678 = vector.broadcast %677 : vector<32x1xi32> to vector<32x32xi32>
    %679 = arith.subi %639, %678 : vector<32x32xi32>
    %c0_i32_172 = arith.constant 0 : i32
    %680 = vector.broadcast %c0_i32_172 : i32 to vector<32x32xi32>
    %681 = arith.cmpi eq, %679, %680 : vector<32x32xi32>
    %682 = vector.extract_strided_slice %187 {offsets = [0, 11], sizes = [32, 1], strides = [1, 1]} : vector<32x16xf32> to vector<32x1xf32>
    %cst_173 = arith.constant 0.000000e+00 : f32
    %683 = vector.shape_cast %682 : vector<32x1xf32> to vector<32x1xf32>
    %684 = vector.broadcast %683 : vector<32x1xf32> to vector<32x32xf32>
    %685 = vector.broadcast %cst_173 : f32 to vector<32x32xf32>
    %686 = arith.select %681, %684, %685 : vector<32x32xi1>, vector<32x32xf32>
    %c1_i32_174 = arith.constant 1 : i32
    %687 = vector.broadcast %c1_i32_174 : i32 to vector<32x32xi32>
    %688 = arith.cmpi eq, %679, %687 : vector<32x32xi32>
    %689 = vector.extract_strided_slice %191 {offsets = [0, 11], sizes = [32, 1], strides = [1, 1]} : vector<32x16xf32> to vector<32x1xf32>
    %cst_175 = arith.constant 0.000000e+00 : f32
    %690 = vector.shape_cast %689 : vector<32x1xf32> to vector<32x1xf32>
    %691 = vector.broadcast %690 : vector<32x1xf32> to vector<32x32xf32>
    %692 = vector.broadcast %cst_175 : f32 to vector<32x32xf32>
    %693 = arith.select %688, %691, %692 : vector<32x32xi1>, vector<32x32xf32>
    %694 = arith.addf %686, %693 : vector<32x32xf32>
    %c4_i32_176 = arith.constant 4 : i32
    %695 = vector.broadcast %c4_i32_176 : i32 to vector<32x32xi32>
    %696 = arith.cmpi eq, %679, %695 : vector<32x32xi32>
    %697 = vector.extract_strided_slice %195 {offsets = [0, 11], sizes = [32, 1], strides = [1, 1]} : vector<32x16xf32> to vector<32x1xf32>
    %cst_177 = arith.constant 0.000000e+00 : f32
    %698 = vector.shape_cast %697 : vector<32x1xf32> to vector<32x1xf32>
    %699 = vector.broadcast %698 : vector<32x1xf32> to vector<32x32xf32>
    %700 = vector.broadcast %cst_177 : f32 to vector<32x32xf32>
    %701 = arith.select %696, %699, %700 : vector<32x32xi1>, vector<32x32xf32>
    %702 = arith.addf %694, %701 : vector<32x32xf32>
    %c5_i32_178 = arith.constant 5 : i32
    %703 = vector.broadcast %c5_i32_178 : i32 to vector<32x32xi32>
    %704 = arith.cmpi eq, %679, %703 : vector<32x32xi32>
    %705 = vector.extract_strided_slice %199 {offsets = [0, 11], sizes = [32, 1], strides = [1, 1]} : vector<32x16xf32> to vector<32x1xf32>
    %cst_179 = arith.constant 0.000000e+00 : f32
    %706 = vector.shape_cast %705 : vector<32x1xf32> to vector<32x1xf32>
    %707 = vector.broadcast %706 : vector<32x1xf32> to vector<32x32xf32>
    %708 = vector.broadcast %cst_179 : f32 to vector<32x32xf32>
    %709 = arith.select %704, %707, %708 : vector<32x32xi1>, vector<32x32xf32>
    %710 = arith.addf %702, %709 : vector<32x32xf32>
    %711 = vector.extract_strided_slice %560 {offsets = [0, 3], sizes = [32, 1], strides = [1, 1]} : vector<32x4xf32> to vector<32x1xf32>
    %712 = vector.broadcast %711 : vector<32x1xf32> to vector<32x32xf32>
    %713 = arith.mulf %710, %712 : vector<32x32xf32>
    %714 = arith.addf %676, %713 : vector<32x32xf32>
    %715 = vector.extract_strided_slice %119 {offsets = [128, 16], sizes = [32, 8], strides = [1, 1]} : vector<160x32xf32> to vector<32x8xf32>
    %cst_180 = arith.constant dense<0.000000e+00> : vector<32x8xf32>
    %716 = tpu.matmul %714, %715, %cst_180 {dimension_numbers = #tpu.dot_dimension_numbers<[1], [0], [0], [1], [0, 0, 1, 1], [], []>} : vector<32x32xf32>, vector<32x8xf32>, vector<32x8xf32> -> vector<32x8xf32>
    %717 = arith.addf %638, %716 : vector<32x8xf32>
    %718 = vector.extract_strided_slice %208 {offsets = [16, 0], sizes = [8, 32], strides = [1, 1]} : vector<32x32xf32> to vector<8x32xf32>
    %cst_181 = arith.constant dense<0.000000e+00> : vector<32x32xf32>
    %719 = tpu.matmul %717, %718, %cst_181 {dimension_numbers = #tpu.dot_dimension_numbers<[1], [0], [0], [1], [0, 0, 1, 1], [], []>} : vector<32x8xf32>, vector<8x32xf32>, vector<32x32xf32> -> vector<32x32xf32>
    %720 = arith.addf %549, %719 : vector<32x32xf32>
    %721 = vector.extract_strided_slice %126 {offsets = [0, 12], sizes = [32, 4], strides = [1, 1]} : vector<32x16xf32> to vector<32x4xf32>
    %cst_182 = arith.constant dense<0xFF800000> : vector<32xf32>
    %722 = vector.multi_reduction <maximumf>, %721, %cst_182 [1] : vector<32x4xf32> to vector<32xf32>
    %723 = vector.shape_cast %722 : vector<32xf32> to vector<32x1xf32>
    %724 = vector.broadcast %723 : vector<32x1xf32> to vector<32x4xf32>
    %725 = arith.subf %721, %724 : vector<32x4xf32>
    %726 = math.exp %725 : vector<32x4xf32>
    %cst_183 = arith.constant dense<0.000000e+00> : vector<32xf32>
    %727 = vector.multi_reduction <add>, %726, %cst_183 [1] : vector<32x4xf32> to vector<32xf32>
    %728 = vector.shape_cast %727 : vector<32xf32> to vector<32x1xf32>
    %729 = tpu.reciprocal %728 {approx = true} : vector<32x1xf32> -> vector<32x1xf32>
    %730 = vector.broadcast %729 : vector<32x1xf32> to vector<32x4xf32>
    %731 = arith.mulf %726, %730 : vector<32x4xf32>
    %732 = tpu.iota {dimensions = array<i32: 1>} : vector<32x128xi32>
    %733 = vector.extract_strided_slice %207 {offsets = [0, 12], sizes = [32, 1], strides = [1, 1]} : vector<32x16xi32> to vector<32x1xi32>
    %734 = vector.broadcast %733 : vector<32x1xi32> to vector<32x128xi32>
    %735 = arith.subi %732, %734 : vector<32x128xi32>
    %c0_i32_184 = arith.constant 0 : i32
    %736 = vector.broadcast %c0_i32_184 : i32 to vector<32x128xi32>
    %737 = arith.cmpi eq, %735, %736 : vector<32x128xi32>
    %738 = vector.extract_strided_slice %187 {offsets = [0, 12], sizes = [32, 1], strides = [1, 1]} : vector<32x16xf32> to vector<32x1xf32>
    %cst_185 = arith.constant 0.000000e+00 : f32
    %739 = vector.shape_cast %738 : vector<32x1xf32> to vector<32x1xf32>
    %740 = vector.broadcast %739 : vector<32x1xf32> to vector<32x128xf32>
    %741 = vector.broadcast %cst_185 : f32 to vector<32x128xf32>
    %742 = arith.select %737, %740, %741 : vector<32x128xi1>, vector<32x128xf32>
    %c1_i32_186 = arith.constant 1 : i32
    %743 = vector.broadcast %c1_i32_186 : i32 to vector<32x128xi32>
    %744 = arith.cmpi eq, %735, %743 : vector<32x128xi32>
    %745 = vector.extract_strided_slice %191 {offsets = [0, 12], sizes = [32, 1], strides = [1, 1]} : vector<32x16xf32> to vector<32x1xf32>
    %cst_187 = arith.constant 0.000000e+00 : f32
    %746 = vector.shape_cast %745 : vector<32x1xf32> to vector<32x1xf32>
    %747 = vector.broadcast %746 : vector<32x1xf32> to vector<32x128xf32>
    %748 = vector.broadcast %cst_187 : f32 to vector<32x128xf32>
    %749 = arith.select %744, %747, %748 : vector<32x128xi1>, vector<32x128xf32>
    %750 = arith.addf %742, %749 : vector<32x128xf32>
    %c8_i32_188 = arith.constant 8 : i32
    %751 = vector.broadcast %c8_i32_188 : i32 to vector<32x128xi32>
    %752 = arith.cmpi eq, %735, %751 : vector<32x128xi32>
    %753 = vector.extract_strided_slice %195 {offsets = [0, 12], sizes = [32, 1], strides = [1, 1]} : vector<32x16xf32> to vector<32x1xf32>
    %cst_189 = arith.constant 0.000000e+00 : f32
    %754 = vector.shape_cast %753 : vector<32x1xf32> to vector<32x1xf32>
    %755 = vector.broadcast %754 : vector<32x1xf32> to vector<32x128xf32>
    %756 = vector.broadcast %cst_189 : f32 to vector<32x128xf32>
    %757 = arith.select %752, %755, %756 : vector<32x128xi1>, vector<32x128xf32>
    %758 = arith.addf %750, %757 : vector<32x128xf32>
    %c9_i32_190 = arith.constant 9 : i32
    %759 = vector.broadcast %c9_i32_190 : i32 to vector<32x128xi32>
    %760 = arith.cmpi eq, %735, %759 : vector<32x128xi32>
    %761 = vector.extract_strided_slice %199 {offsets = [0, 12], sizes = [32, 1], strides = [1, 1]} : vector<32x16xf32> to vector<32x1xf32>
    %cst_191 = arith.constant 0.000000e+00 : f32
    %762 = vector.shape_cast %761 : vector<32x1xf32> to vector<32x1xf32>
    %763 = vector.broadcast %762 : vector<32x1xf32> to vector<32x128xf32>
    %764 = vector.broadcast %cst_191 : f32 to vector<32x128xf32>
    %765 = arith.select %760, %763, %764 : vector<32x128xi1>, vector<32x128xf32>
    %766 = arith.addf %758, %765 : vector<32x128xf32>
    %767 = vector.extract_strided_slice %731 {offsets = [0, 0], sizes = [32, 1], strides = [1, 1]} : vector<32x4xf32> to vector<32x1xf32>
    %768 = vector.broadcast %767 : vector<32x1xf32> to vector<32x128xf32>
    %769 = arith.mulf %766, %768 : vector<32x128xf32>
    %770 = vector.extract_strided_slice %207 {offsets = [0, 13], sizes = [32, 1], strides = [1, 1]} : vector<32x16xi32> to vector<32x1xi32>
    %771 = vector.broadcast %770 : vector<32x1xi32> to vector<32x128xi32>
    %772 = arith.subi %732, %771 : vector<32x128xi32>
    %c0_i32_192 = arith.constant 0 : i32
    %773 = vector.broadcast %c0_i32_192 : i32 to vector<32x128xi32>
    %774 = arith.cmpi eq, %772, %773 : vector<32x128xi32>
    %775 = vector.extract_strided_slice %187 {offsets = [0, 13], sizes = [32, 1], strides = [1, 1]} : vector<32x16xf32> to vector<32x1xf32>
    %cst_193 = arith.constant 0.000000e+00 : f32
    %776 = vector.shape_cast %775 : vector<32x1xf32> to vector<32x1xf32>
    %777 = vector.broadcast %776 : vector<32x1xf32> to vector<32x128xf32>
    %778 = vector.broadcast %cst_193 : f32 to vector<32x128xf32>
    %779 = arith.select %774, %777, %778 : vector<32x128xi1>, vector<32x128xf32>
    %c1_i32_194 = arith.constant 1 : i32
    %780 = vector.broadcast %c1_i32_194 : i32 to vector<32x128xi32>
    %781 = arith.cmpi eq, %772, %780 : vector<32x128xi32>
    %782 = vector.extract_strided_slice %191 {offsets = [0, 13], sizes = [32, 1], strides = [1, 1]} : vector<32x16xf32> to vector<32x1xf32>
    %cst_195 = arith.constant 0.000000e+00 : f32
    %783 = vector.shape_cast %782 : vector<32x1xf32> to vector<32x1xf32>
    %784 = vector.broadcast %783 : vector<32x1xf32> to vector<32x128xf32>
    %785 = vector.broadcast %cst_195 : f32 to vector<32x128xf32>
    %786 = arith.select %781, %784, %785 : vector<32x128xi1>, vector<32x128xf32>
    %787 = arith.addf %779, %786 : vector<32x128xf32>
    %c8_i32_196 = arith.constant 8 : i32
    %788 = vector.broadcast %c8_i32_196 : i32 to vector<32x128xi32>
    %789 = arith.cmpi eq, %772, %788 : vector<32x128xi32>
    %790 = vector.extract_strided_slice %195 {offsets = [0, 13], sizes = [32, 1], strides = [1, 1]} : vector<32x16xf32> to vector<32x1xf32>
    %cst_197 = arith.constant 0.000000e+00 : f32
    %791 = vector.shape_cast %790 : vector<32x1xf32> to vector<32x1xf32>
    %792 = vector.broadcast %791 : vector<32x1xf32> to vector<32x128xf32>
    %793 = vector.broadcast %cst_197 : f32 to vector<32x128xf32>
    %794 = arith.select %789, %792, %793 : vector<32x128xi1>, vector<32x128xf32>
    %795 = arith.addf %787, %794 : vector<32x128xf32>
    %c9_i32_198 = arith.constant 9 : i32
    %796 = vector.broadcast %c9_i32_198 : i32 to vector<32x128xi32>
    %797 = arith.cmpi eq, %772, %796 : vector<32x128xi32>
    %798 = vector.extract_strided_slice %199 {offsets = [0, 13], sizes = [32, 1], strides = [1, 1]} : vector<32x16xf32> to vector<32x1xf32>
    %cst_199 = arith.constant 0.000000e+00 : f32
    %799 = vector.shape_cast %798 : vector<32x1xf32> to vector<32x1xf32>
    %800 = vector.broadcast %799 : vector<32x1xf32> to vector<32x128xf32>
    %801 = vector.broadcast %cst_199 : f32 to vector<32x128xf32>
    %802 = arith.select %797, %800, %801 : vector<32x128xi1>, vector<32x128xf32>
    %803 = arith.addf %795, %802 : vector<32x128xf32>
    %804 = vector.extract_strided_slice %731 {offsets = [0, 1], sizes = [32, 1], strides = [1, 1]} : vector<32x4xf32> to vector<32x1xf32>
    %805 = vector.broadcast %804 : vector<32x1xf32> to vector<32x128xf32>
    %806 = arith.mulf %803, %805 : vector<32x128xf32>
    %807 = arith.addf %769, %806 : vector<32x128xf32>
    %808 = vector.extract_strided_slice %119 {offsets = [0, 24], sizes = [128, 8], strides = [1, 1]} : vector<160x32xf32> to vector<128x8xf32>
    %cst_200 = arith.constant dense<0.000000e+00> : vector<32x8xf32>
    %809 = tpu.matmul %807, %808, %cst_200 {dimension_numbers = #tpu.dot_dimension_numbers<[1], [0], [0], [1], [0, 0, 1, 1], [], []>} : vector<32x128xf32>, vector<128x8xf32>, vector<32x8xf32> -> vector<32x8xf32>
    %810 = tpu.iota {dimensions = array<i32: 1>} : vector<32x32xi32>
    %811 = vector.extract_strided_slice %207 {offsets = [0, 14], sizes = [32, 1], strides = [1, 1]} : vector<32x16xi32> to vector<32x1xi32>
    %812 = vector.broadcast %811 : vector<32x1xi32> to vector<32x32xi32>
    %813 = arith.subi %810, %812 : vector<32x32xi32>
    %c0_i32_201 = arith.constant 0 : i32
    %814 = vector.broadcast %c0_i32_201 : i32 to vector<32x32xi32>
    %815 = arith.cmpi eq, %813, %814 : vector<32x32xi32>
    %816 = vector.extract_strided_slice %187 {offsets = [0, 14], sizes = [32, 1], strides = [1, 1]} : vector<32x16xf32> to vector<32x1xf32>
    %cst_202 = arith.constant 0.000000e+00 : f32
    %817 = vector.shape_cast %816 : vector<32x1xf32> to vector<32x1xf32>
    %818 = vector.broadcast %817 : vector<32x1xf32> to vector<32x32xf32>
    %819 = vector.broadcast %cst_202 : f32 to vector<32x32xf32>
    %820 = arith.select %815, %818, %819 : vector<32x32xi1>, vector<32x32xf32>
    %c1_i32_203 = arith.constant 1 : i32
    %821 = vector.broadcast %c1_i32_203 : i32 to vector<32x32xi32>
    %822 = arith.cmpi eq, %813, %821 : vector<32x32xi32>
    %823 = vector.extract_strided_slice %191 {offsets = [0, 14], sizes = [32, 1], strides = [1, 1]} : vector<32x16xf32> to vector<32x1xf32>
    %cst_204 = arith.constant 0.000000e+00 : f32
    %824 = vector.shape_cast %823 : vector<32x1xf32> to vector<32x1xf32>
    %825 = vector.broadcast %824 : vector<32x1xf32> to vector<32x32xf32>
    %826 = vector.broadcast %cst_204 : f32 to vector<32x32xf32>
    %827 = arith.select %822, %825, %826 : vector<32x32xi1>, vector<32x32xf32>
    %828 = arith.addf %820, %827 : vector<32x32xf32>
    %c4_i32_205 = arith.constant 4 : i32
    %829 = vector.broadcast %c4_i32_205 : i32 to vector<32x32xi32>
    %830 = arith.cmpi eq, %813, %829 : vector<32x32xi32>
    %831 = vector.extract_strided_slice %195 {offsets = [0, 14], sizes = [32, 1], strides = [1, 1]} : vector<32x16xf32> to vector<32x1xf32>
    %cst_206 = arith.constant 0.000000e+00 : f32
    %832 = vector.shape_cast %831 : vector<32x1xf32> to vector<32x1xf32>
    %833 = vector.broadcast %832 : vector<32x1xf32> to vector<32x32xf32>
    %834 = vector.broadcast %cst_206 : f32 to vector<32x32xf32>
    %835 = arith.select %830, %833, %834 : vector<32x32xi1>, vector<32x32xf32>
    %836 = arith.addf %828, %835 : vector<32x32xf32>
    %c5_i32_207 = arith.constant 5 : i32
    %837 = vector.broadcast %c5_i32_207 : i32 to vector<32x32xi32>
    %838 = arith.cmpi eq, %813, %837 : vector<32x32xi32>
    %839 = vector.extract_strided_slice %199 {offsets = [0, 14], sizes = [32, 1], strides = [1, 1]} : vector<32x16xf32> to vector<32x1xf32>
    %cst_208 = arith.constant 0.000000e+00 : f32
    %840 = vector.shape_cast %839 : vector<32x1xf32> to vector<32x1xf32>
    %841 = vector.broadcast %840 : vector<32x1xf32> to vector<32x32xf32>
    %842 = vector.broadcast %cst_208 : f32 to vector<32x32xf32>
    %843 = arith.select %838, %841, %842 : vector<32x32xi1>, vector<32x32xf32>
    %844 = arith.addf %836, %843 : vector<32x32xf32>
    %845 = vector.extract_strided_slice %731 {offsets = [0, 2], sizes = [32, 1], strides = [1, 1]} : vector<32x4xf32> to vector<32x1xf32>
    %846 = vector.broadcast %845 : vector<32x1xf32> to vector<32x32xf32>
    %847 = arith.mulf %844, %846 : vector<32x32xf32>
    %848 = vector.extract_strided_slice %207 {offsets = [0, 15], sizes = [32, 1], strides = [1, 1]} : vector<32x16xi32> to vector<32x1xi32>
    %849 = vector.broadcast %848 : vector<32x1xi32> to vector<32x32xi32>
    %850 = arith.subi %810, %849 : vector<32x32xi32>
    %c0_i32_209 = arith.constant 0 : i32
    %851 = vector.broadcast %c0_i32_209 : i32 to vector<32x32xi32>
    %852 = arith.cmpi eq, %850, %851 : vector<32x32xi32>
    %853 = vector.extract_strided_slice %187 {offsets = [0, 15], sizes = [32, 1], strides = [1, 1]} : vector<32x16xf32> to vector<32x1xf32>
    %cst_210 = arith.constant 0.000000e+00 : f32
    %854 = vector.shape_cast %853 : vector<32x1xf32> to vector<32x1xf32>
    %855 = vector.broadcast %854 : vector<32x1xf32> to vector<32x32xf32>
    %856 = vector.broadcast %cst_210 : f32 to vector<32x32xf32>
    %857 = arith.select %852, %855, %856 : vector<32x32xi1>, vector<32x32xf32>
    %c1_i32_211 = arith.constant 1 : i32
    %858 = vector.broadcast %c1_i32_211 : i32 to vector<32x32xi32>
    %859 = arith.cmpi eq, %850, %858 : vector<32x32xi32>
    %860 = vector.extract_strided_slice %191 {offsets = [0, 15], sizes = [32, 1], strides = [1, 1]} : vector<32x16xf32> to vector<32x1xf32>
    %cst_212 = arith.constant 0.000000e+00 : f32
    %861 = vector.shape_cast %860 : vector<32x1xf32> to vector<32x1xf32>
    %862 = vector.broadcast %861 : vector<32x1xf32> to vector<32x32xf32>
    %863 = vector.broadcast %cst_212 : f32 to vector<32x32xf32>
    %864 = arith.select %859, %862, %863 : vector<32x32xi1>, vector<32x32xf32>
    %865 = arith.addf %857, %864 : vector<32x32xf32>
    %c4_i32_213 = arith.constant 4 : i32
    %866 = vector.broadcast %c4_i32_213 : i32 to vector<32x32xi32>
    %867 = arith.cmpi eq, %850, %866 : vector<32x32xi32>
    %868 = vector.extract_strided_slice %195 {offsets = [0, 15], sizes = [32, 1], strides = [1, 1]} : vector<32x16xf32> to vector<32x1xf32>
    %cst_214 = arith.constant 0.000000e+00 : f32
    %869 = vector.shape_cast %868 : vector<32x1xf32> to vector<32x1xf32>
    %870 = vector.broadcast %869 : vector<32x1xf32> to vector<32x32xf32>
    %871 = vector.broadcast %cst_214 : f32 to vector<32x32xf32>
    %872 = arith.select %867, %870, %871 : vector<32x32xi1>, vector<32x32xf32>
    %873 = arith.addf %865, %872 : vector<32x32xf32>
    %c5_i32_215 = arith.constant 5 : i32
    %874 = vector.broadcast %c5_i32_215 : i32 to vector<32x32xi32>
    %875 = arith.cmpi eq, %850, %874 : vector<32x32xi32>
    %876 = vector.extract_strided_slice %199 {offsets = [0, 15], sizes = [32, 1], strides = [1, 1]} : vector<32x16xf32> to vector<32x1xf32>
    %cst_216 = arith.constant 0.000000e+00 : f32
    %877 = vector.shape_cast %876 : vector<32x1xf32> to vector<32x1xf32>
    %878 = vector.broadcast %877 : vector<32x1xf32> to vector<32x32xf32>
    %879 = vector.broadcast %cst_216 : f32 to vector<32x32xf32>
    %880 = arith.select %875, %878, %879 : vector<32x32xi1>, vector<32x32xf32>
    %881 = arith.addf %873, %880 : vector<32x32xf32>
    %882 = vector.extract_strided_slice %731 {offsets = [0, 3], sizes = [32, 1], strides = [1, 1]} : vector<32x4xf32> to vector<32x1xf32>
    %883 = vector.broadcast %882 : vector<32x1xf32> to vector<32x32xf32>
    %884 = arith.mulf %881, %883 : vector<32x32xf32>
    %885 = arith.addf %847, %884 : vector<32x32xf32>
    %886 = vector.extract_strided_slice %119 {offsets = [128, 24], sizes = [32, 8], strides = [1, 1]} : vector<160x32xf32> to vector<32x8xf32>
    %cst_217 = arith.constant dense<0.000000e+00> : vector<32x8xf32>
    %887 = tpu.matmul %885, %886, %cst_217 {dimension_numbers = #tpu.dot_dimension_numbers<[1], [0], [0], [1], [0, 0, 1, 1], [], []>} : vector<32x32xf32>, vector<32x8xf32>, vector<32x8xf32> -> vector<32x8xf32>
    %888 = arith.addf %809, %887 : vector<32x8xf32>
    %889 = vector.extract_strided_slice %208 {offsets = [24, 0], sizes = [8, 32], strides = [1, 1]} : vector<32x32xf32> to vector<8x32xf32>
    %cst_218 = arith.constant dense<0.000000e+00> : vector<32x32xf32>
    %890 = tpu.matmul %888, %889, %cst_218 {dimension_numbers = #tpu.dot_dimension_numbers<[1], [0], [0], [1], [0, 0, 1, 1], [], []>} : vector<32x8xf32>, vector<8x32xf32>, vector<32x32xf32> -> vector<32x32xf32>
    %891 = arith.addf %720, %890 : vector<32x32xf32>
    %c0_219 = arith.constant 0 : index
    %c208_220 = arith.constant 208 : index
    %892 = vector.load %arg8[%c0_219, %c208_220] : memref<1x464xf32, #tpu.memory_space<vmem>>, vector<1x32xf32>
    %893 = vector.broadcast %892 : vector<1x32xf32> to vector<32x32xf32>
    %894 = arith.addf %891, %893 : vector<32x32xf32>
    %895 = arith.addf %112, %894 : vector<32x32xf32>
    %c0_221 = arith.constant 0 : index
    %c240 = arith.constant 240 : index
    %896 = vector.load %arg8[%c0_221, %c240] : memref<1x464xf32, #tpu.memory_space<vmem>>, vector<1x32xf32>
    %c0_222 = arith.constant 0 : index
    %c272 = arith.constant 272 : index
    %897 = vector.load %arg8[%c0_222, %c272] : memref<1x464xf32, #tpu.memory_space<vmem>>, vector<1x32xf32>
    %cst_223 = arith.constant dense<0.000000e+00> : vector<32xf32>
    %898 = vector.multi_reduction <add>, %895, %cst_223 [1] : vector<32x32xf32> to vector<32xf32>
    %899 = vector.shape_cast %898 : vector<32xf32> to vector<32x1xf32>
    %cst_224 = arith.constant 3.200000e+01 : f32
    %900 = vector.broadcast %cst_224 : f32 to vector<32x1xf32>
    %901 = arith.divf %899, %900 : vector<32x1xf32>
    %902 = vector.broadcast %901 : vector<32x1xf32> to vector<32x32xf32>
    %903 = arith.subf %895, %902 : vector<32x32xf32>
    %904 = arith.mulf %903, %903 : vector<32x32xf32>
    %cst_225 = arith.constant dense<0.000000e+00> : vector<32xf32>
    %905 = vector.multi_reduction <add>, %904, %cst_225 [1] : vector<32x32xf32> to vector<32xf32>
    %906 = vector.shape_cast %905 : vector<32xf32> to vector<32x1xf32>
    %cst_226 = arith.constant 3.200000e+01 : f32
    %907 = vector.broadcast %cst_226 : f32 to vector<32x1xf32>
    %908 = arith.divf %906, %907 : vector<32x1xf32>
    %cst_227 = arith.constant 9.99999974E-6 : f32
    %909 = vector.broadcast %cst_227 : f32 to vector<32x1xf32>
    %910 = arith.addf %908, %909 : vector<32x1xf32>
    %911 = math.rsqrt %910 : vector<32x1xf32>
    %912 = vector.broadcast %911 : vector<32x1xf32> to vector<32x32xf32>
    %913 = arith.mulf %903, %912 : vector<32x32xf32>
    %914 = vector.broadcast %896 : vector<1x32xf32> to vector<32x32xf32>
    %915 = arith.mulf %913, %914 : vector<32x32xf32>
    %916 = vector.broadcast %897 : vector<1x32xf32> to vector<32x32xf32>
    %917 = arith.addf %915, %916 : vector<32x32xf32>
    %c0_228 = arith.constant 0 : index
    %c240_229 = arith.constant 240 : index
    %918 = vector.load %arg5[%c0_228, %c240_229] : memref<32x304xf32, #tpu.memory_space<vmem>>, vector<32x64xf32>
    %cst_230 = arith.constant dense<0.000000e+00> : vector<32x64xf32>
    %919 = tpu.matmul %917, %918, %cst_230 {dimension_numbers = #tpu.dot_dimension_numbers<[1], [0], [0], [1], [0, 0, 1, 1], [], []>} : vector<32x32xf32>, vector<32x64xf32>, vector<32x64xf32> -> vector<32x64xf32>
    %c0_231 = arith.constant 0 : index
    %c304 = arith.constant 304 : index
    %920 = vector.load %arg8[%c0_231, %c304] : memref<1x464xf32, #tpu.memory_space<vmem>>, vector<1x64xf32>
    %921 = vector.broadcast %920 : vector<1x64xf32> to vector<32x64xf32>
    %922 = arith.addf %919, %921 : vector<32x64xf32>
    %cst_232 = arith.constant 0.000000e+00 : f32
    %923 = vector.broadcast %cst_232 : f32 to vector<32x64xf32>
    %924 = arith.maximumf %922, %923 : vector<32x64xf32>
    %c0_233 = arith.constant 0 : index
    %c0_234 = arith.constant 0 : index
    %925 = vector.load %arg6[%c0_233, %c0_234] : memref<64x32xf32, #tpu.memory_space<vmem>>, vector<64x32xf32>
    %cst_235 = arith.constant dense<0.000000e+00> : vector<32x32xf32>
    %926 = tpu.matmul %924, %925, %cst_235 {dimension_numbers = #tpu.dot_dimension_numbers<[1], [0], [0], [1], [0, 0, 1, 1], [], []>} : vector<32x64xf32>, vector<64x32xf32>, vector<32x32xf32> -> vector<32x32xf32>
    %c0_236 = arith.constant 0 : index
    %c368 = arith.constant 368 : index
    %927 = vector.load %arg8[%c0_236, %c368] : memref<1x464xf32, #tpu.memory_space<vmem>>, vector<1x32xf32>
    %928 = vector.broadcast %927 : vector<1x32xf32> to vector<32x32xf32>
    %929 = arith.addf %926, %928 : vector<32x32xf32>
    %930 = arith.addf %917, %929 : vector<32x32xf32>
    %c0_237 = arith.constant 0 : index
    %c400 = arith.constant 400 : index
    %931 = vector.load %arg8[%c0_237, %c400] : memref<1x464xf32, #tpu.memory_space<vmem>>, vector<1x32xf32>
    %c0_238 = arith.constant 0 : index
    %c432 = arith.constant 432 : index
    %932 = vector.load %arg8[%c0_238, %c432] : memref<1x464xf32, #tpu.memory_space<vmem>>, vector<1x32xf32>
    %cst_239 = arith.constant dense<0.000000e+00> : vector<32xf32>
    %933 = vector.multi_reduction <add>, %930, %cst_239 [1] : vector<32x32xf32> to vector<32xf32>
    %934 = vector.shape_cast %933 : vector<32xf32> to vector<32x1xf32>
    %cst_240 = arith.constant 3.200000e+01 : f32
    %935 = vector.broadcast %cst_240 : f32 to vector<32x1xf32>
    %936 = arith.divf %934, %935 : vector<32x1xf32>
    %937 = vector.broadcast %936 : vector<32x1xf32> to vector<32x32xf32>
    %938 = arith.subf %930, %937 : vector<32x32xf32>
    %939 = arith.mulf %938, %938 : vector<32x32xf32>
    %cst_241 = arith.constant dense<0.000000e+00> : vector<32xf32>
    %940 = vector.multi_reduction <add>, %939, %cst_241 [1] : vector<32x32xf32> to vector<32xf32>
    %941 = vector.shape_cast %940 : vector<32xf32> to vector<32x1xf32>
    %cst_242 = arith.constant 3.200000e+01 : f32
    %942 = vector.broadcast %cst_242 : f32 to vector<32x1xf32>
    %943 = arith.divf %941, %942 : vector<32x1xf32>
    %cst_243 = arith.constant 9.99999974E-6 : f32
    %944 = vector.broadcast %cst_243 : f32 to vector<32x1xf32>
    %945 = arith.addf %943, %944 : vector<32x1xf32>
    %946 = math.rsqrt %945 : vector<32x1xf32>
    %947 = vector.broadcast %946 : vector<32x1xf32> to vector<32x32xf32>
    %948 = arith.mulf %938, %947 : vector<32x32xf32>
    %949 = vector.broadcast %931 : vector<1x32xf32> to vector<32x32xf32>
    %950 = arith.mulf %948, %949 : vector<32x32xf32>
    %951 = vector.broadcast %932 : vector<1x32xf32> to vector<32x32xf32>
    %952 = arith.addf %950, %951 : vector<32x32xf32>
    %c0_244 = arith.constant 0 : index
    %c0_245 = arith.constant 0 : index
    %953 = vector.load %arg10[%c0_244, %c0_245] : memref<32x32xf32, #tpu.memory_space<vmem>>, vector<32x32xf32>
    tpu.vector_store %arg10[%c0_244, %c0_245], %952 {strides = array<i32>} : memref<32x32xf32, #tpu.memory_space<vmem>>, vector<32x32xf32>,
    return
  }
  func.func @transform_0(%arg0: i32) -> (i32, i32) {
    %c0_i32 = arith.constant 0 : i32
    %c0_i32_0 = arith.constant 0 : i32
    %c0_i32_1 = arith.constant 0 : i32
    return %c0_i32, %c0_i32_0 : i32, i32
  }
  func.func @transform_1(%arg0: i32) -> (i32, i32) {
    %c0_i32 = arith.constant 0 : i32
    %c0_i32_0 = arith.constant 0 : i32
    %c0_i32_1 = arith.constant 0 : i32
    return %c0_i32, %c0_i32_0 : i32, i32
  }
  func.func @transform_2(%arg0: i32) -> (i32, i32) {
    %c0_i32 = arith.constant 0 : i32
    %c0_i32_0 = arith.constant 0 : i32
    %c0_i32_1 = arith.constant 0 : i32
    return %c0_i32, %c0_i32_0 : i32, i32
  }
  func.func @transform_3(%arg0: i32) -> (i32, i32) {
    %c0_i32 = arith.constant 0 : i32
    %c0_i32_0 = arith.constant 0 : i32
    %c0_i32_1 = arith.constant 0 : i32
    return %c0_i32, %c0_i32_0 : i32, i32
  }
  func.func @transform_4(%arg0: i32) -> (i32, i32) {
    %c0_i32 = arith.constant 0 : i32
    %c0_i32_0 = arith.constant 0 : i32
    %c0_i32_1 = arith.constant 0 : i32
    return %c0_i32, %c0_i32_0 : i32, i32
  }
  func.func @transform_5(%arg0: i32) -> (i32, i32) {
    %c0_i32 = arith.constant 0 : i32
    %c0_i32_0 = arith.constant 0 : i32
    %c0_i32_1 = arith.constant 0 : i32
    return %c0_i32, %c0_i32_0 : i32, i32
  }
  func.func @transform_6(%arg0: i32) -> (i32, i32) {
    %c0_i32 = arith.constant 0 : i32
    %c0_i32_0 = arith.constant 0 : i32
    %c0_i32_1 = arith.constant 0 : i32
    return %c0_i32, %c0_i32_0 : i32, i32
  }
  func.func @transform_7(%arg0: i32) -> (i32, i32) {
    %c0_i32 = arith.constant 0 : i32
    %c0_i32_0 = arith.constant 0 : i32
    %c0_i32_1 = arith.constant 0 : i32
    return %c0_i32, %c0_i32_0 : i32, i32
  }
  func.func @transform_8(%arg0: i32) -> (i32, i32) {
    %c0_i32 = arith.constant 0 : i32
    %c0_i32_0 = arith.constant 0 : i32
    %c0_i32_1 = arith.constant 0 : i32
    return %c0_i32, %c0_i32_0 : i32, i32
  }
  func.func @transform_9(%arg0: i32) -> (i32, i32) {
    %c0_i32 = arith.constant 0 : i32
    %c0_i32_0 = arith.constant 0 : i32
    %c0_i32_1 = arith.constant 0 : i32
    return %c0_i32, %c0_i32_0 : i32, i32
  }
}

</mosaic_0001>

<bundles_post_ra>
// kernel: deformable_decoder_layer.1
= control target key start
LH: loop header
LB: loop body
LE: loop exit
PB: predicated region body
PF: predicated region fallthrough
CT: control target
= control target key end

     0   :  { %vm13355_vm0 = vcmask 261120   ;;  %s13326_s0 = inlined_call_operand.vmem [shape: f32[32,32], index: 0, kind: input, shape index: {}]   ;;  %s13327_s1 = inlined_call_operand.vmem [shape: f32[32,32], index: 1, kind: input, shape index: {}]   ;;  %s13328_s2 = inlined_call_operand.vmem [shape: f32[32,8], index: 2, kind: input, shape index: {}]   ;;  %s13329_s3 = inlined_call_operand.vmem [shape: f32[160,32], index: 3, kind: input, shape index: {}]   ;;  %s13330_s4 = inlined_call_operand.vmem [shape: f32[32,304], index: 4, kind: input, shape index: {}]   ;;  %s13331_s5 = inlined_call_operand.vmem [shape: f32[64,32], index: 5, kind: input, shape index: {}]   ;;  %s13332_s6 = inlined_call_operand.vmem [shape: f32[8,32], index: 6, kind: input, shape index: {}]   ;;  %s13333_s7 = inlined_call_operand.vmem [shape: f32[1,464], index: 7, kind: input, shape index: {}]   ;;  %s13334_s8 = inlined_call_operand.vmem [shape: f32[8,16], index: 8, kind: input, shape index: {}]   ;;  %s13335_s9 = inlined_call_operand.hbm [shape: f32[32,32], index: 9, kind: output, shape index: {}]  }
   0x1   :  { %v9200_v0 = vld [vmem:[%s13330_s4] sm:$0xff]  ;;  %v9205_v1 = vld [vmem:[%s13330_s4 + $0x18] sm:$0xff]  ;;  %v69_v2 = vld [vmem:[%s13330_s4 + $0x30] sm:$0xff] }
   0x2   :  { %v7938_v3 = vpack.c.bf16 %v9205_v1, %v9200_v0  ;;  %v70_v4 = vld [vmem:[%s13330_s4 + $0x48] sm:$0xff]  ;;  %v33_v5 = vld [vmem:[%s13326_s0] sm:$0xff] }
   0x3   :  { %v37_v6 = vld [vmem:[%s13327_s1] sm:$0xff]  ;;  %v7942_v7 = vpack.c.bf16 %v70_v4, %v69_v2  ;;  %7452 = vmatprep.mubr.msk.f32.mxu1 %vm13355_vm0, %v33_v5  ;;  %v9226_v9 = vld [vmem:[%s13326_s0 + $0x8] sm:$0xff] }
   0x4   :  { %v63_v8 = vadd.f32 %v37_v6, %v33_v5  ;;  %7939 = vmatprep.subr.bf16.mxu0 %v7938_v3  ;;  %v38_v10 = vld [vmem:[%s13327_s1 + $0x8] sm:$0xff] }
   0x5   :  { %7941 = vmatpush3.bf16.msra.mxu0 %v7938_v3 }
   0x6   :  { %7438 = vmatprep.mubr.msk.f32.mxu0 %vm13355_vm0, %v63_v8 }
   0x7   :  { %14 = vsyncpa [#allocation3], 0  ;;  %7943 = vmatprep.subr.bf16.mxu0 %v7942_v7  ;;  %v9234_v11 = vld [vmem:[%s13326_s0 + $0x10] sm:$0xff]  ;;  %v64_v13 = vadd.f32 %v38_v10, %v9226_v9  ;;  %v36_v15 = vld [vmem:[%s13326_s0 + $0x18] sm:$0xff]  ;;  %vm13354_vm1 = vcmask 64512   ;;  %s9082_s14 = smov 96   ;;  %v8357_v30 = vpack.i.bf16 %v9205_v1, %v9200_v0  ;;  %v8362_v31 = vpack.i.bf16 %v70_v4, %v69_v2 }
   0x8   :  { %v39_v12 = vld [vmem:[%s13327_s1 + $0x10] sm:$0xff]  ;;  %v40_v16 = vld [vmem:[%s13327_s1 + $0x18] sm:$0xff]  ;;  %v9253_v18 = vld [vmem:[%s13333_s7] ss:$0 sm:$0xff]  ;;  %s9083_s15 = smov 64   ;;  %v41_v52 = vlaneseq  ;;  %v9084_v10 = vmov 0.0  }
   0x9   :  { %7945 = vmatpush3.bf16.msra.mxu0 %v7942_v7  ;;  %v65_v14 = vadd.f32 %v39_v12, %v9234_v11  ;;  %v66_v17 = vadd.f32 %v40_v16, %v36_v15  ;;  %8358 = vrot.lane.b32.xlu1 %v8357_v30, %s9083_s15  ;;  %vm9277_vm2 = vmpackc.low %vm13354_vm1, %vm13354_vm1  ;;  %s9085_s16 = smov 88   ;;  %s9086_s17 = smov 120   ;;  %v1800_v35 = vld [vmem:[%s13329_s3] sm:$0xff]  ;;  %vm13357_vm7 = vcmask 326944   ;;  %vm2583_vm8 = vcmask 294144  }
   0xa   :  { %v9306_v53 = vshrl.u32 %v41_v52, 7  ;;  %v9309_v55 = vand.u32 127, %v41_v52  ;;  %s9087_s18 = smov 80   ;;  %s9088_s19 = smov 112   ;;  %vm13356_vm9 = vcmask 359744   ;;  %vm5537_vm10 = vcmask 392544  }
   0xb   :  { %s9089_s20 = smov 72   ;;  %s9090_s21 = smov 104  }
   0xc   :  { %7439 = vmatmul.mubr.msk.f32.vlgmr.msra.gmra.mrb[0].mxu0 %vm13355_vm0, %v64_v13  ;;  %13544 = vst [vmem:[#allocation5_spill] sm:$0xff] %v9306_v53  ;;  %v43_v54 = vadd.s32 8, %v9306_v53  ;;  %13545 = vst [vmem:[#allocation6_spill] sm:$0xff] %v9309_v55  ;;  %v60_v57 = vcvt.s32.f32 %v9309_v55  ;;  %v48_v58 = vcvt.s32.f32 %v9306_v53  ;;  %v44_v59 = vadd.s32 16, %v9306_v53  ;;  %s9091_s22 = smov 32   ;;  %s9092_s24 = smov 16  }
   0xd   :  { %7441 = vmatprep.mubr.msk.f32.mxu0 %vm13355_vm0, %v65_v14  ;;  %8363 = vrot.lane.b32.xlu1 %v8362_v31, %s9083_s15  ;;  %v45_v60 = vadd.s32 24, %v9306_v53  ;;  %s9135_s10 = smov 48  }
   0xe   :  { %v49_v56 = vcvt.s32.f32 %v43_v54  ;;  %v61_v62 = vmul.f32 0.0625, %v60_v57  ;;  %v9317_v63 = vmul.f32 0.0625, %v48_v58  ;;  %v50_v2 = vcvt.s32.f32 %v44_v59 }
   0xf   :  { %v51_v3 = vcvt.s32.f32 %v45_v60 }
  0x10   :  { %7442 = vmatmul.mubr.msk.f32.gmra.mrb[2].mxu0 %vm13355_vm0, %v66_v17  ;;  %v9315_v61 = vmul.f32 0.0625, %v49_v56  ;;  %v62_v5 = vfloor.f32 %v61_v62  ;;  %v56_v6 = vfloor.f32 %v9317_v63  ;;  %v9321_v7 = vmul.f32 0.0625, %v50_v2 }
  0x11   :  { %v9323_v8 = vmul.f32 0.0625, %v51_v3 }
  0x12   :  { %v57_v4 = vfloor.f32 %v9315_v61  ;;  %vm296_vm4 = vcmp.ne.f32.partialorder %v56_v6, %v62_v5 }
  0x13   :  { %v59_v12 = vfloor.f32 %v9323_v8  ;;  %v9333_v13 = vsel %vm296_vm4, -1e+09, %v9084_v10 }
  0x14   :  { %vm297_vm3 = vcmp.ne.f32.partialorder %v57_v4, %v62_v5 }
  0x15   :  { %vm299_vm6 = vcmp.ne.f32.partialorder %v59_v12, %v62_v5 }
  0x7b   :  { %v8359_v44 = vpop.permute.xlu1 %8358 }
  0x7c   :  { %v8361_v45 = vunpack.i.h.bf16 %v8359_v44  ;;  %v8360_v46 = vunpack.i.l.bf16 %v8359_v44 }
  0x7e   :  { %v7946_v47 = vpack.c.bf16 %v8361_v45, %v8360_v46 }
  0x7f   :  { %v8364_v48 = vpop.permute.xlu1 %8363 }
  0x80   :  { %v8366_v49 = vunpack.i.h.bf16 %v8364_v48  ;;  %v8365_v50 = vunpack.i.l.bf16 %v8364_v48  ;;  %7947 = vmatprep.subr.bf16.mxu1 %v7946_v47 }
  0x81   :  { %7949 = vmatpush3.bf16.msra.mxu1 %v7946_v47 }
  0x82   :  { %v7950_v51 = vpack.c.bf16 %v8366_v49, %v8365_v50 }
  0x84   :  { %7951 = vmatprep.subr.bf16.mxu1 %v7950_v51 }
  0x85   :  { %7953 = vmatpush3.bf16.msra.mxu1 %v7950_v51 }
  0x88   :  { %7453 = vmatmul.mubr.msk.f32.vlgmr.msra.gmra.mrb[0].mxu1 %vm13355_vm0, %v9226_v9  ;;  %v58_v9 = vfloor.f32 %v9321_v7 }
  0x89   :  { %7455 = vmatprep.mubr.msk.f32.mxu1 %vm13355_vm0, %v9234_v11  ;;  %v9330_v11 = vsel %vm297_vm3, -1e+09, %v9084_v10 }
  0x8a   :  { %vm298_vm5 = vcmp.ne.f32.partialorder %v58_v9, %v62_v5 }
  0x8c   :  { %7456 = vmatmul.mubr.msk.f32.gmra.mrb[2].mxu1 %vm13355_vm0, %v36_v15 }
  0xdf   :  { %v7440_v19 = vpop.f32.mrb[0].mxu0 }
  0xe0   :  { %v163_v20 = vadd.f32 %v7440_v19, %v9253_v18  ;;  %v157_v21 = vpop.f32.mrb[1].mxu0 }
  0xe1   :  { %v158_v22 = vadd.f32 %v9253_v18, %v157_v21 }
  0xe2   :  { %v9289_v41 = vmul.f32 0.35355338, %v163_v20 }
  0xe3   :  { %v9257_v23 = vpack.i.bf16 %v163_v20, %v158_v22  ;;  %v9259_v24 = vmul.f32 0.35355338, %v158_v22  ;;  %v7443_v25 = vpop.f32.mrb[2].mxu0  ;;  %v9342_v20 = vsel %vm298_vm5, -1e+09, %v9084_v10 }
  0xe4   :  { %v173_v26 = vadd.f32 %v7443_v25, %v9253_v18  ;;  %v167_v27 = vpop.f32.mrb[3].mxu0  ;;  %v9345_v25 = vsel %vm299_vm6, -1e+09, %v9084_v10 }
  0xe5   :  { %8348 = vrot.lane.b32.xlu0 %v9257_v23, %s9082_s14  ;;  %7466 = vmatprep.mubr.msk.f32.mxu0 %vm13354_vm1, %v9259_v24  ;;  %v168_v28 = vadd.f32 %v9253_v18, %v167_v27 }
  0xe6   :  { %v9297_v43 = vmul.f32 0.35355338, %v173_v26 }
  0xe7   :  { %v9267_v29 = vpack.i.bf16 %v173_v26, %v168_v28  ;;  %v9291_v42 = vmul.f32 0.35355338, %v168_v28 }
  0xe9   :  { %8353 = vrot.lane.b32.xlu0 %v9267_v29, %s9082_s14 }
 0x157   :  { %v8349_v32 = vpop.permute.xlu0 %8348 }
 0x158   :  { %v8351_v33 = vunpack.i.h.bf16 %v8349_v32  ;;  %v8350_v34 = vunpack.i.l.bf16 %v8349_v32 }
 0x15a   :  { %v7954_v36 = vpack.c.bf16 %v8351_v33, %v8350_v34 }
 0x15b   :  { %v8354_v37 = vpop.permute.xlu0 %8353  ;;  %v7454_v32 = vpop.f32.mrb[0].mxu1 }
 0x15c   :  { %7956 = vmatprep.subr.msk.bf16.mxu0 %vm9277_vm2, %v7954_v36  ;;  %v8356_v38 = vunpack.i.h.bf16 %v8354_v37  ;;  %v8355_v39 = vunpack.i.l.bf16 %v8354_v37  ;;  %v277_v33 = vpop.f32.mrb[1].mxu1 }
 0x15d   :  { %7959 = vmatpush3.bf16.xpose.msk.msra.mxu0 %vm9277_vm2, %v7954_v36 }
 0x15e   :  { %v7960_v40 = vpack.c.bf16 %v8356_v38, %v8355_v39 }
 0x15f   :  { %v7457_v34 = vpop.f32.mrb[2].mxu1 }
 0x160   :  { %7962 = vmatprep.subr.msk.bf16.mxu0 %vm9277_vm2, %v7960_v40  ;;  %v287_v36 = vpop.f32.mrb[3].mxu1 }
 0x165   :  { %7965 = vmatpush3.bf16.xpose.msk.msra.mxu0 %vm9277_vm2, %v7960_v40 }
 0x16c   :  { %7467 = vmatmul.mubr.msk.f32.vlgmr.msra.gmra.mrb[4].mxu0 %vm13354_vm1, %v9289_v41 }
 0x16d   :  { %7469 = vmatprep.mubr.msk.f32.mxu0 %vm13354_vm1, %v9291_v42 }
 0x170   :  { %7470 = vmatmul.mubr.msk.f32.gmra.mrb[6].mxu0 %vm13354_vm1, %v9297_v43 }
 0x23f   :  { %v7468_v14 = vpop.f32.mrb[4].mxu0 }
 0x240   :  { %v409_v15 = vadd.f32 %v7468_v14, %v9330_v11  ;;  %v403_v16 = vpop.f32.mrb[5].mxu0 }
 0x241   :  { %v404_v17 = vadd.f32 %v403_v16, %v9333_v13 }
 0x242   :  { %v425_v19 = vsel %vm13355_vm0, %v409_v15, -inf }
 0x243   :  { %426 = vmax.xlane.f32.xlu1 %v425_v19  ;;  %v7471_v21 = vpop.f32.mrb[6].mxu0  ;;  %v422_v22 = vsel %vm13355_vm0, %v404_v17, -inf }
 0x244   :  { %v413_v26 = vpop.f32.mrb[7].mxu0  ;;  %423 = vmax.xlane.f32.xlu0 %v422_v22  ;;  %v419_v28 = vadd.f32 %v7471_v21, %v9345_v25 }
 0x245   :  { %v414_v27 = vadd.f32 %v413_v26, %v9342_v20 }
 0x246   :  { %v431_v31 = vsel %vm13355_vm0, %v419_v28, -inf }
 0x247   :  { %v428_v30 = vsel %vm13355_vm0, %v414_v27, -inf }
 0x248   :  { %429 = vmax.xlane.f32.xlu0 %v428_v30 }
 0x24c   :  { %432 = vmax.xlane.f32.xlu0 %v431_v31 }
 0x254   :  { %196 = vrot.lane.b32.xlu1 %v9253_v18, %s9083_s15 }
 0x2d0   :  { %v427_v37 = vpop.xlane.xlu1 %426 }
 0x2d1   :  { %v435_v38 = vsub.f32 %v409_v15, %v427_v37  ;;  %v424_v39 = vpop.xlane.xlu0 %423 }
 0x2d2   :  { %v434_v40 = vsub.f32 %v404_v17, %v424_v39 }
 0x2d3   :  { %v440_v44 = vmul.f32 1.442695, %v435_v38 }
 0x2d4   :  { %v438_v45 = vmul.f32 1.442695, %v434_v40  ;;  %v197_v46 = vpop.permute.xlu1 %196 }
 0x2d5   :  { %8898 = vpow2.f32 %v440_v44  ;;  %v430_v47 = vpop.xlane.xlu0 %429  ;;  %v278_v48 = vadd.f32 %v277_v33, %v197_v46  ;;  %v283_v49 = vadd.f32 %v7454_v32, %v197_v46  ;;  %v293_v50 = vadd.f32 %v7457_v34, %v197_v46 }
 0x2d6   :  { %8900 = vpow2.f32 %v438_v45  ;;  %v288_v51 = vadd.f32 %v287_v36, %v197_v46  ;;  %v436_v54 = vsub.f32 %v414_v27, %v430_v47 }
 0x2d7   :  { %v7966_v52 = vpack.c.bf16 %v283_v49, %v278_v48  ;;  %v9353_v18 = vpack.i.bf16 %v283_v49, %v278_v48 }
 0x2d8   :  { %v7970_v56 = vpack.c.bf16 %v293_v50, %v288_v51  ;;  %v9355_v57 = vpack.i.bf16 %v293_v50, %v288_v51  ;;  %v442_v60 = vmul.f32 1.442695, %v436_v54 }
 0x2d9   :  { %v433_v58 = vpop.xlane.xlu0 %432  ;;  %7967 = vmatprep.subr.bf16.mxu1 %v7966_v52 }
 0x2da   :  { %v437_v59 = vsub.f32 %v419_v28, %v433_v58  ;;  %7969 = vmatpush3.bf16.msra.mxu1 %v7966_v52 }
 0x2db   :  { %7971 = vmatprep.subr.bf16.mxu1 %v7970_v56 }
 0x2dc   :  { %v444_v62 = vmul.f32 1.442695, %v437_v59 }
 0x2de   :  { %8902 = vpow2.f32 %v444_v62  ;;  %7973 = vmatpush3.bf16.msra.mxu1 %v7970_v56 }
 0x2df   :  { %v8899_v2 = vpop.eup %8898  ;;  %8904 = vpow2.f32 %v442_v60 }
 0x2e0   :  { %v8901_v3 = vpop.eup %8900  ;;  %v449_v5 = vsel %vm13355_vm0, %v8899_v2, 0.0 }
 0x2e1   :  { %450 = vadd.xlane.f32.xlu0 %v449_v5  ;;  %v446_v10 = vsel %vm13355_vm0, %v8901_v3, 0.0 }
 0x2e2   :  { %447 = vadd.xlane.f32.xlu1 %v446_v10 }
 0x2e8   :  { %v8903_v14 = vpop.eup %8902 }
 0x2e9   :  { %v455_v15 = vsel %vm13355_vm0, %v8903_v14, 0.0  ;;  %v8905_v16 = vpop.eup %8904 }
 0x2ea   :  { %456 = vadd.xlane.f32.xlu0 %v455_v15  ;;  %v452_v17 = vsel %vm13355_vm0, %v8905_v16, 0.0 }
 0x2ee   :  { %453 = vadd.xlane.f32.xlu0 %v452_v17 }
 0x2f3   :  { %8373 = vrot.lane.b32.xlu1 %v9267_v29, %s9085_s16 }
 0x2f7   :  { %563 = vrot.lane.b32.xlu1 %v9259_v24, %s9086_s17 }
 0x2fb   :  { %565 = vrot.lane.b32.xlu1 %v9289_v41, %s9086_s17 }
 0x2ff   :  { %567 = vrot.lane.b32.xlu1 %v9291_v42, %s9086_s17 }
 0x303   :  { %8378 = vrot.lane.b32.xlu1 %v9257_v23, %s9087_s18 }
 0x304   :  { %8368 = vrot.lane.b32.xlu0 %v9257_v23, %s9085_s16 }
 0x307   :  { %1037 = vrot.lane.b32.xlu1 %v9259_v24, %s9088_s19 }
 0x308   :  { %569 = vrot.lane.b32.xlu0 %v9297_v43, %s9086_s17 }
 0x30b   :  { %1041 = vrot.lane.b32.xlu1 %v9291_v42, %s9088_s19 }
 0x30c   :  { %8383 = vrot.lane.b32.xlu0 %v9267_v29, %s9087_s18 }
 0x310   :  { %1039 = vrot.lane.b32.xlu0 %v9289_v41, %s9088_s19 }
 0x314   :  { %1043 = vrot.lane.b32.xlu0 %v9297_v43, %s9088_s19 }
 0x36e   :  { %v451_v19 = vpop.xlane.xlu0 %450 }
 0x36f   :  { %8906 = vrcp.f32 %v451_v19  ;;  %v448_v21 = vpop.xlane.xlu1 %447 }
 0x370   :  { %8908 = vrcp.f32 %v448_v21 }
 0x373   :  { %v8374_v22 = vpop.permute.xlu1 %8373 }
 0x374   :  { %v8376_v38 = vunpack.i.h.bf16 %v8374_v22  ;;  %v8375_v39 = vunpack.i.l.bf16 %v8374_v22 }
 0x376   :  { %v7980_v46 = vpack.c.bf16 %v8376_v38, %v8375_v39 }
 0x377   :  { %v564_v26 = vpop.permute.xlu1 %563  ;;  %v457_v27 = vpop.xlane.xlu0 %456 }
 0x378   :  { %8910 = vrcp.f32 %v457_v27 }
 0x379   :  { %v8907_v28 = vpop.eup %8906 }
 0x37a   :  { %v8909_v30 = vpop.eup %8908  ;;  %v463_v34 = vmul.f32 %v8907_v28, %v8899_v2 }
 0x37b   :  { %v566_v31 = vpop.permute.xlu1 %565  ;;  %v454_v32 = vpop.xlane.xlu0 %453  ;;  %v462_v33 = vmul.f32 %v8909_v30, %v8901_v3 }
 0x37c   :  { %8912 = vrcp.f32 %v454_v32 }
 0x37d   :  { %7480 = vmatprep.mubr.msk.f32.mxu1 %vm13355_vm0, %v462_v33 }
 0x37e   :  { %7481 = vmatmul.mubr.msk.f32.vlgmr.msra.gmra.mrb[4].mxu1 %vm13355_vm0, %v463_v34 }
 0x37f   :  { %v568_v36 = vpop.permute.xlu1 %567  ;;  %v8369_v37 = vpop.permute.xlu0 %8368 }
 0x380   :  { %v8371_v40 = vunpack.i.h.bf16 %v8369_v37  ;;  %v8370_v44 = vunpack.i.l.bf16 %v8369_v37 }
 0x382   :  { %v7974_v45 = vpack.c.bf16 %v8371_v40, %v8370_v44  ;;  %v8911_v47 = vpop.eup %8910 }
 0x383   :  { %v8379_v48 = vpop.permute.xlu1 %8378  ;;  %v570_v50 = vpop.permute.xlu0 %569  ;;  %v465_v56 = vmul.f32 %v8911_v47, %v8903_v14 }
 0x384   :  { %7976 = vmatprep.subr.msk.bf16.mxu1 %vm9277_vm2, %v7974_v45  ;;  %v8381_v52 = vunpack.i.h.bf16 %v8379_v48  ;;  %v8380_v54 = vunpack.i.l.bf16 %v8379_v48 }
 0x385   :  { %7979 = vmatpush3.bf16.xpose.msk.msra.mxu1 %vm9277_vm2, %v7974_v45 }
 0x386   :  { %v8913_v49 = vpop.eup %8912  ;;  %7982 = vmatprep.subr.msk.bf16.mxu1 %vm9277_vm2, %v7980_v46  ;;  %v7994_v58 = vpack.c.bf16 %v8381_v52, %v8380_v54 }
 0x387   :  { %v464_v51 = vmul.f32 %v8913_v49, %v8905_v16  ;;  %v8384_v59 = vpop.permute.xlu0 %8383  ;;  %v1038_v3 = vpop.permute.xlu1 %1037 }
 0x388   :  { %v8386_v60 = vunpack.i.h.bf16 %v8384_v59  ;;  %v8385_v62 = vunpack.i.l.bf16 %v8384_v59 }
 0x389   :  { %7483 = vmatprep.mubr.msk.f32.mxu1 %vm13355_vm0, %v464_v51 }
 0x38a   :  { %7484 = vmatmul.mubr.msk.f32.gmra.mrb[6].mxu1 %vm13355_vm0, %v465_v56  ;;  %v8000_v2 = vpack.c.bf16 %v8386_v60, %v8385_v62 }
 0x38b   :  { %7494 = vmatprep.mubr.msk.f32.mxu1 %vm13354_vm1, %v564_v26  ;;  %v1040_v5 = vpop.permute.xlu0 %1039  ;;  %v1042_v10 = vpop.permute.xlu1 %1041 }
 0x38d   :  { %7985 = vmatpush3.bf16.xpose.msk.msra.mxu1 %vm9277_vm2, %v7980_v46 }
 0x38e   :  { %7996 = vmatprep.subr.msk.bf16.mxu1 %vm9277_vm2, %v7994_v58 }
 0x38f   :  { %v1044_v14 = vpop.permute.xlu0 %1043 }
 0x394   :  { %7495 = vmatmul.mubr.msk.f32.vlgmr.msra.gmra.mrb[8].mxu1 %vm13354_vm1, %v566_v31 }
 0x395   :  { %7497 = vmatprep.mubr.msk.f32.mxu1 %vm13354_vm1, %v568_v36  ;;  %7999 = vmatpush3.bf16.xpose.msk.msra.mxu1 %vm9277_vm2, %v7994_v58 }
 0x396   :  { %8002 = vmatprep.subr.msk.bf16.mxu1 %vm9277_vm2, %v8000_v2 }
 0x398   :  { %7498 = vmatmul.mubr.msk.f32.gmra.mrb[10].mxu1 %vm13354_vm1, %v570_v50 }
 0x399   :  { %7538 = vmatprep.mubr.msk.f32.mxu1 %vm13354_vm1, %v1038_v3 }
 0x39d   :  { %8005 = vmatpush3.bf16.xpose.msk.msra.mxu1 %vm9277_vm2, %v8000_v2 }
 0x3a4   :  { %7539 = vmatmul.mubr.msk.f32.vlgmr.msra.gmra.mrb[12].mxu1 %vm13354_vm1, %v1040_v5 }
 0x3a5   :  { %7541 = vmatprep.mubr.msk.f32.mxu1 %vm13354_vm1, %v1042_v10 }
 0x3a8   :  { %7542 = vmatmul.mubr.msk.f32.gmra.mrb[14].mxu1 %vm13354_vm1, %v1044_v14 }
 0x451   :  { %v9413_v15 = vpop.f32.mrb[4].mxu1 }
 0x452   :  { %v9415_v16 = vpop.f32.mrb[5].mxu1 }
 0x45d   :  { %v9417_v17 = vpop.f32.mrb[6].mxu1 }
 0x45e   :  { %v9419_v19 = vpop.f32.mrb[7].mxu1 }
 0x467   :  { %v7496_v21 = vpop.f32.mrb[8].mxu1 }
 0x468   :  { %v667_v22 = vadd.f32 %v7496_v21, %v9330_v11  ;;  %v661_v26 = vpop.f32.mrb[9].mxu1 }
 0x469   :  { %v662_v27 = vadd.f32 %v661_v26, %v9333_v13 }
 0x46a   :  { %v683_v28 = vsel %vm13355_vm0, %v667_v22, -inf }
 0x46b   :  { %684 = vmax.xlane.f32.xlu0 %v683_v28  ;;  %v7499_v30 = vpop.f32.mrb[10].mxu1  ;;  %v680_v31 = vsel %vm13355_vm0, %v662_v27, -inf }
 0x46c   :  { %v677_v32 = vadd.f32 %v7499_v30, %v9345_v25  ;;  %v671_v33 = vpop.f32.mrb[11].mxu1  ;;  %681 = vmax.xlane.f32.xlu1 %v680_v31 }
 0x46d   :  { %v672_v34 = vadd.f32 %v671_v33, %v9342_v20 }
 0x46e   :  { %v689_v36 = vsel %vm13355_vm0, %v677_v32, -inf }
 0x46f   :  { %v686_v37 = vsel %vm13355_vm0, %v672_v34, -inf }
 0x470   :  { %687 = vmax.xlane.f32.xlu0 %v686_v37  ;;  %690 = vmax.xlane.f32.xlu1 %v689_v36 }
 0x477   :  { %v7540_v38 = vpop.f32.mrb[12].mxu1 }
 0x478   :  { %v1135_v39 = vpop.f32.mrb[13].mxu1 }
 0x47b   :  { %v7543_v40 = vpop.f32.mrb[14].mxu1 }
 0x47c   :  { %v1145_v44 = vpop.f32.mrb[15].mxu1 }
 0x47d   :  { %v9463_v26 = vadd.f32 %v1145_v44, %v9342_v20 }
 0x4f8   :  { %v685_v45 = vpop.xlane.xlu0 %684 }
 0x4f9   :  { %v693_v46 = vsub.f32 %v667_v22, %v685_v45  ;;  %v682_v47 = vpop.xlane.xlu1 %681  ;;  %v9460_v22 = vadd.f32 %v1135_v39, %v9333_v13 }
 0x4fa   :  { %v692_v48 = vsub.f32 %v662_v27, %v682_v47 }
 0x4fb   :  { %v698_v49 = vmul.f32 1.442695, %v693_v46 }
 0x4fc   :  { %v696_v50 = vmul.f32 1.442695, %v692_v48 }
 0x4fd   :  { %8914 = vpow2.f32 %v698_v49  ;;  %v688_v51 = vpop.xlane.xlu0 %687  ;;  %v691_v52 = vpop.xlane.xlu1 %690 }
 0x4fe   :  { %8916 = vpow2.f32 %v696_v50  ;;  %v694_v54 = vsub.f32 %v672_v34, %v688_v51  ;;  %v695_v56 = vsub.f32 %v677_v32, %v691_v52 }
 0x500   :  { %v700_v58 = vmul.f32 1.442695, %v694_v54  ;;  %v702_v59 = vmul.f32 1.442695, %v695_v56 }
 0x502   :  { %8918 = vpow2.f32 %v700_v58 }
 0x503   :  { %8920 = vpow2.f32 %v702_v59 }
 0x507   :  { %v9429_v60 = vpop.eup %8914 }
 0x508   :  { %v8917_v62 = vpop.eup %8916  ;;  %v707_v2 = vsel %vm13355_vm0, %v9429_v60, 0.0 }
 0x509   :  { %708 = vadd.xlane.f32.xlu1 %v707_v2  ;;  %v704_v3 = vsel %vm13355_vm0, %v8917_v62, 0.0  ;;  %v9493_v2 = vld [vmem:[%s13330_s4 + $0x8] sm:$0xff] }
 0x50a   :  { %705 = vadd.xlane.f32.xlu0 %v704_v3  ;;  %v9498_v3 = vld [vmem:[%s13330_s4 + $0x20] sm:$0xff] }
 0x50c   :  { %v9434_v5 = vpop.eup %8918 }
 0x50d   :  { %v9436_v10 = vpop.eup %8920  ;;  %v710_v14 = vsel %vm13355_vm0, %v9434_v5, 0.0 }
 0x50e   :  { %711 = vadd.xlane.f32.xlu0 %v710_v14  ;;  %v713_v21 = vsel %vm13355_vm0, %v9436_v10, 0.0  ;;  %v8034_v14 = vpack.c.bf16 %v9498_v3, %v9493_v2 }
 0x50f   :  { %714 = vadd.xlane.f32.xlu1 %v713_v21  ;;  %v9516_v21 = vld [vmem:[%s13330_s4 + $0x50] sm:$0xff] }
 0x520   :  { %8393 = vrot.lane.b32.xlu1 %v9355_v57, %s9086_s17 }
 0x524   :  { %8398 = vrot.lane.b32.xlu1 %v9257_v23, %s9089_s20  ;;  %8388 = vrot.lane.b32.xlu0 %v9353_v18, %s9086_s17  ;;  %v9457_v23 = vadd.f32 %v7540_v38, %v9330_v11 }
 0x528   :  { %1411 = vrot.lane.b32.xlu1 %v9259_v24, %s9090_s21  ;;  %8403 = vrot.lane.b32.xlu0 %v9267_v29, %s9089_s20  ;;  %v1157_v24 = vsel %vm13355_vm0, %v9457_v23, -inf  ;;  %v9468_v29 = vadd.f32 %v7543_v40, %v9345_v25 }
 0x52c   :  { %1415 = vrot.lane.b32.xlu1 %v9291_v42, %s9090_s21  ;;  %1413 = vrot.lane.b32.xlu0 %v9289_v41, %s9090_s21  ;;  %v1154_v41 = vsel %vm13355_vm0, %v9460_v22, -inf  ;;  %v1160_v42 = vsel %vm13355_vm0, %v9463_v26, -inf }
 0x530   :  { %1417 = vrot.lane.b32.xlu0 %v9297_v43, %s9090_s21  ;;  %v1163_v43 = vsel %vm13355_vm0, %v9468_v29, -inf }
 0x54f   :  { %1158 = vmax.xlane.f32.xlu0 %v1157_v24 }
 0x550   :  { %1155 = vmax.xlane.f32.xlu1 %v1154_v41 }
 0x553   :  { %1161 = vmax.xlane.f32.xlu0 %v1160_v42 }
 0x554   :  { %1164 = vmax.xlane.f32.xlu1 %v1163_v43  ;;  %v1801_v43 = vld [vmem:[%s13329_s3 + $0x8] sm:$0xff] }
 0x565   :  { %937 = vrot.lane.b32.xlu1 %v9200_v0, %s9091_s22 }
 0x569   :  { %837 = vrot.lane.b32.xlu0 %v9205_v1, %s9091_s22 }
 0x596   :  { %v709_v27 = vpop.xlane.xlu1 %708 }
 0x597   :  { %v706_v28 = vpop.xlane.xlu0 %705 }
 0x598   :  { %8922 = vrcp.f32 %v706_v28  ;;  %v1803_v28 = vld [vmem:[%s13329_s3 + $0x18] sm:$0xff] }
 0x599   :  { %8924 = vrcp.f32 %v709_v27  ;;  %v1802_v27 = vld [vmem:[%s13329_s3 + $0x10] sm:$0xff] }
 0x59b   :  { %v712_v30 = vpop.xlane.xlu0 %711 }
 0x59c   :  { %v715_v31 = vpop.xlane.xlu1 %714  ;;  %8926 = vrcp.f32 %v712_v30  ;;  %v1804_v30 = vld [vmem:[%s13329_s3 + $0x20] sm:$0xff] }
 0x59d   :  { %8928 = vrcp.f32 %v715_v31  ;;  %v1805_v31 = vld [vmem:[%s13329_s3 + $0x28] sm:$0xff] }
 0x59f   :  { %v8389_v32 = vpop.permute.xlu0 %8388 }
 0x5a0   :  { %v8391_v33 = vunpack.i.h.bf16 %v8389_v32  ;;  %v8390_v34 = vunpack.i.l.bf16 %v8389_v32  ;;  %v8394_v36 = vpop.permute.xlu1 %8393  ;;  %v1806_v32 = vld [vmem:[%s13329_s3 + $0x30] sm:$0xff] }
 0x5a1   :  { %v8396_v37 = vunpack.i.h.bf16 %v8394_v36  ;;  %v8395_v38 = vunpack.i.l.bf16 %v8394_v36  ;;  %v1809_v36 = vld [vmem:[%s13329_s3 + $0x48] sm:$0xff] }
 0x5a2   :  { %v8923_v39 = vpop.eup %8922  ;;  %v7986_v40 = vpack.c.bf16 %v8391_v33, %v8390_v34  ;;  %v1807_v33 = vld [vmem:[%s13329_s3 + $0x38] sm:$0xff]  ;;  %v1808_v34 = vld [vmem:[%s13329_s3 + $0x40] sm:$0xff] }
 0x5a3   :  { %v8404_v0 = vpop.permute.xlu0 %8403  ;;  %v720_v44 = vmul.f32 %v8923_v39, %v8917_v62  ;;  %v7990_v1 = vpack.c.bf16 %v8396_v37, %v8395_v38  ;;  %v8925_v51 = vpop.eup %8924  ;;  %v1810_v37 = vld [vmem:[%s13329_s3 + $0x50] sm:$0xff]  ;;  %v1811_v38 = vld [vmem:[%s13329_s3 + $0x58] sm:$0xff]  ;;  %v1812_v39 = vld [vmem:[%s13329_s3 + $0x60] sm:$0xff] }
 0x5a4   :  { %v8399_v45 = vpop.permute.xlu1 %8398  ;;  %7987 = vmatprep.subr.bf16.mxu0 %v7986_v40  ;;  %v8406_v46 = vunpack.i.h.bf16 %v8404_v0  ;;  %v8405_v47 = vunpack.i.l.bf16 %v8404_v0  ;;  %v721_v58 = vmul.f32 %v8925_v51, %v9429_v60  ;;  %v1814_v0 = vld [vmem:[%s13329_s3 + $0x70] sm:$0xff] }
 0x5a5   :  { %v8401_v48 = vunpack.i.h.bf16 %v8399_v45  ;;  %v8400_v49 = vunpack.i.l.bf16 %v8399_v45  ;;  %7989 = vmatpush3.bf16.msra.mxu0 %v7986_v40  ;;  %7508 = vmatprep.mubr.msk.f32.mxu0 %vm13355_vm0, %v720_v44  ;;  %v1813_v40 = vld [vmem:[%s13329_s3 + $0x68] sm:$0xff]  ;;  %v1815_v44 = vld [vmem:[%s13329_s3 + $0x78] sm:$0xff]  ;;  %v1816_v45 = vld [vmem:[%s13329_s3 + $0x80] sm:$0xff] }
 0x5a6   :  { %7991 = vmatprep.subr.bf16.mxu0 %v7990_v1  ;;  %v8927_v54 = vpop.eup %8926  ;;  %v8020_v56 = vpack.c.bf16 %v8406_v46, %v8405_v47  ;;  %v1818_v51 = vld [vmem:[%s13329_s3 + $0x90] sm:$0xff] }
 0x5a7   :  { %v8014_v50 = vpack.c.bf16 %v8401_v48, %v8400_v49  ;;  %v8929_v59 = vpop.eup %8928  ;;  %v722_v62 = vmul.f32 %v8927_v54, %v9434_v5  ;;  %v9511_v5 = vld [vmem:[%s13330_s4 + $0x38] sm:$0xff]  ;;  %v1817_v49 = vld [vmem:[%s13329_s3 + $0x88] sm:$0xff] }
 0x5a8   :  { %v1412_v52 = vpop.permute.xlu1 %1411  ;;  %v723_v60 = vmul.f32 %v8929_v59, %v9436_v10  ;;  %v1414_v10 = vpop.permute.xlu0 %1413  ;;  %v8038_v24 = vpack.c.bf16 %v9516_v21, %v9511_v5 }
 0x5a9   :  { %8016 = vmatprep.subr.msk.bf16.mxu1 %vm9277_vm2, %v8014_v50  ;;  %7574 = vmatprep.mubr.msk.f32.mxu1 %vm13354_vm1, %v1412_v52 }
 0x5aa   :  { %7993 = vmatpush3.bf16.msra.mxu0 %v7990_v1  ;;  %8019 = vmatpush3.bf16.xpose.msk.msra.mxu1 %vm9277_vm2, %v8014_v50 }
 0x5ab   :  { %8022 = vmatprep.subr.msk.bf16.mxu1 %vm9277_vm2, %v8020_v56 }
 0x5ac   :  { %v1416_v41 = vpop.permute.xlu1 %1415  ;;  %v1418_v42 = vpop.permute.xlu0 %1417 }
 0x5ad   :  { %7509 = vmatmul.mubr.msk.f32.vlgmr.msra.gmra.mrb[8].mxu0 %vm13355_vm0, %v721_v58  ;;  %v1819_v58 = vld [vmem:[%s13329_s3 + $0x98] sm:$0xff] }
 0x5ae   :  { %7511 = vmatprep.mubr.msk.f32.mxu0 %vm13355_vm0, %v722_v62 }
 0x5b1   :  { %7512 = vmatmul.mubr.msk.f32.gmra.mrb[10].mxu0 %vm13355_vm0, %v723_v60 }
 0x5b2   :  { %8025 = vmatpush3.bf16.xpose.msk.msra.mxu1 %vm9277_vm2, %v8020_v56 }
 0x5b3   :  { %8035 = vmatprep.subr.bf16.mxu1 %v8034_v14 }
 0x5b9   :  { %7575 = vmatmul.mubr.msk.f32.vlgmr.msra.gmra.mrb[16].mxu1 %vm13354_vm1, %v1414_v10 }
 0x5ba   :  { %7577 = vmatprep.mubr.msk.f32.mxu1 %vm13354_vm1, %v1416_v41  ;;  %8037 = vmatpush3.bf16.msra.mxu1 %v8034_v14 }
 0x5bb   :  { %8039 = vmatprep.subr.bf16.mxu1 %v8038_v24 }
 0x5bd   :  { %7578 = vmatmul.mubr.msk.f32.gmra.mrb[18].mxu1 %vm13354_vm1, %v1418_v42 }
 0x5be   :  { %8041 = vmatpush3.bf16.msra.mxu1 %v8038_v24  ;;  %7610 = vmatprep.mubr.msk.f32.mxu1 %vm13355_vm0, %v1800_v35 }
 0x5c1   :  { %7611 = vmatmul.mubr.msk.f32.vlgmr.msra.gmra.mrb[20].mxu1 %vm13355_vm0, %v1801_v43 }
 0x5c2   :  { %7613 = vmatprep.mubr.msk.f32.mxu1 %vm13355_vm0, %v1802_v27 }
 0x5c5   :  { %7614 = vmatmul.mubr.msk.f32.gmra.mrb[22].mxu1 %vm13355_vm0, %v1803_v28 }
 0x5c6   :  { %7616 = vmatprep.mubr.msk.f32.mxu1 %vm13355_vm0, %v1804_v30 }
 0x5c9   :  { %7617 = vmatmul.mubr.msk.f32.gmra.mrb[24].mxu1 %vm13355_vm0, %v1805_v31 }
 0x5ca   :  { %7619 = vmatprep.mubr.msk.f32.mxu1 %vm13355_vm0, %v1806_v32 }
 0x5cd   :  { %7620 = vmatmul.mubr.msk.f32.gmra.mrb[26].mxu1 %vm13355_vm0, %v1807_v33 }
 0x5ce   :  { %7622 = vmatprep.mubr.msk.f32.mxu1 %vm13355_vm0, %v1808_v34 }
 0x5d1   :  { %7623 = vmatmul.mubr.msk.f32.gmra.mrb[28].mxu1 %vm13355_vm0, %v1809_v36 }
 0x5d2   :  { %7625 = vmatprep.mubr.msk.f32.mxu1 %vm13355_vm0, %v1810_v37 }
 0x5d5   :  { %7626 = vmatmul.mubr.msk.f32.gmra.mrb[30].mxu1 %vm13355_vm0, %v1811_v38 }
 0x5d6   :  { %7628 = vmatprep.mubr.msk.f32.mxu1 %vm13355_vm0, %v1812_v39 }
 0x5d9   :  { %7629 = vmatmul.mubr.msk.f32.gmra.mrb[32].mxu1 %vm13355_vm0, %v1813_v40 }
 0x5da   :  { %7631 = vmatprep.mubr.msk.f32.mxu1 %vm13355_vm0, %v1814_v0 }
 0x5dc   :  { %v1159_v1 = vpop.xlane.xlu0 %1158 }
 0x5dd   :  { %v1167_v46 = vsub.f32 %v9457_v23, %v1159_v1  ;;  %v1156_v47 = vpop.xlane.xlu1 %1155  ;;  %7632 = vmatmul.mubr.msk.f32.gmra.mrb[34].mxu1 %vm13355_vm0, %v1815_v44 }
 0x5de   :  { %v1166_v48 = vsub.f32 %v9460_v22, %v1156_v47  ;;  %7634 = vmatprep.mubr.msk.f32.mxu1 %vm13355_vm0, %v1816_v45 }
 0x5df   :  { %v1172_v50 = vmul.f32 1.442695, %v1167_v46 }
 0x5e0   :  { %v1170_v52 = vmul.f32 1.442695, %v1166_v48  ;;  %v1162_v54 = vpop.xlane.xlu0 %1161 }
 0x5e1   :  { %8930 = vpow2.f32 %v1172_v50  ;;  %v1168_v23 = vsub.f32 %v9463_v26, %v1162_v54  ;;  %v1165_v56 = vpop.xlane.xlu1 %1164  ;;  %7635 = vmatmul.mubr.msk.f32.gmra.mrb[36].mxu1 %vm13355_vm0, %v1817_v49 }
 0x5e2   :  { %8932 = vpow2.f32 %v1170_v52  ;;  %v1169_v22 = vsub.f32 %v9468_v29, %v1165_v56  ;;  %7637 = vmatprep.mubr.msk.f32.mxu1 %vm13355_vm0, %v1818_v51 }
 0x5e3   :  { %v1174_v59 = vmul.f32 1.442695, %v1168_v23 }
 0x5e4   :  { %v1176_v62 = vmul.f32 1.442695, %v1169_v22  ;;  %v838_v60 = vpop.permute.xlu0 %837 }
 0x5e5   :  { %8934 = vpow2.f32 %v1174_v59  ;;  %7638 = vmatmul.mubr.msk.f32.gmra.mrb[38].mxu1 %vm13355_vm0, %v1819_v58  ;;  %7514 = vmatprep.subr.mxu0 %v838_v60  ;;  %v938_v26 = vpop.permute.xlu1 %937 }
 0x5e6   :  { %8936 = vpow2.f32 %v1176_v62  ;;  %7515 = vmatpush3.msra.mxu0 %v838_v60 }
 0x5e7   :  { %7522 = vmatprep.subr.mxu0 %v938_v26 }
 0x5eb   :  { %v8931_v14 = vpop.eup %8930 }
 0x5ec   :  { %v8933_v10 = vpop.eup %8932  ;;  %v1181_v29 = vsel %vm13355_vm0, %v8931_v14, 0.0 }
 0x5ed   :  { %1182 = vadd.xlane.f32.xlu1 %v1181_v29  ;;  %v1178_v24 = vsel %vm13355_vm0, %v8933_v10, 0.0 }
 0x5ee   :  { %1179 = vadd.xlane.f32.xlu0 %v1178_v24 }
 0x5ef   :  { %v8935_v41 = vpop.eup %8934 }
 0x5f0   :  { %v9609_v35 = vpop.eup %8936  ;;  %v1184_v42 = vsel %vm13355_vm0, %v8935_v41, 0.0 }
 0x5f1   :  { %v1187_v43 = vsel %vm13355_vm0, %v9609_v35, 0.0 }
 0x5f2   :  { %1185 = vadd.xlane.f32.xlu0 %v1184_v42  ;;  %1188 = vadd.xlane.f32.xlu1 %v1187_v43 }
 0x603   :  { %8408 = vrot.lane.b32.xlu1 %v9353_v18, %s9088_s19 }
 0x608   :  { %8413 = vrot.lane.b32.xlu0 %v9355_v57, %s9088_s19 }
 0x67a   :  { %v1183_v27 = vpop.xlane.xlu1 %1182 }
 0x67b   :  { %v1180_v28 = vpop.xlane.xlu0 %1179 }
 0x67c   :  { %8938 = vrcp.f32 %v1180_v28 }
 0x67d   :  { %8940 = vrcp.f32 %v1183_v27 }
 0x67f   :  { %v1186_v30 = vpop.xlane.xlu0 %1185  ;;  %v1189_v31 = vpop.xlane.xlu1 %1188 }
 0x680   :  { %v7510_v32 = vpop.f32.mrb[8].mxu0  ;;  %8942 = vrcp.f32 %v1186_v30 }
 0x681   :  { %v818_v33 = vpop.f32.mrb[9].mxu0  ;;  %8944 = vrcp.f32 %v1189_v31 }
 0x682   :  { %7516 = vmatprep.mubr.msk.f32.mxu0 %vm13354_vm1, %v818_v33 }
 0x683   :  { %v8409_v34 = vpop.permute.xlu1 %8408  ;;  %7517 = vmatmul.mubr.msk.f32.vlgmr.msra.gmra.mrb[12].mxu0 %vm13354_vm1, %v7510_v32  ;;  %v8414_v36 = vpop.permute.xlu0 %8413 }
 0x684   :  { %v8411_v37 = vunpack.i.h.bf16 %v8409_v34  ;;  %v8410_v38 = vunpack.i.l.bf16 %v8409_v34  ;;  %v7513_v39 = vpop.f32.mrb[10].mxu0  ;;  %7523 = vmatpush3.msra.mxu0 %v938_v26  ;;  %v8416_v44 = vunpack.i.h.bf16 %v8414_v36  ;;  %v8415_v45 = vunpack.i.l.bf16 %v8414_v36 }
 0x685   :  { %v828_v40 = vpop.f32.mrb[11].mxu0 }
 0x686   :  { %7519 = vmatprep.mubr.msk.f32.mxu0 %vm13354_vm1, %v828_v40  ;;  %v8006_v0 = vpack.c.bf16 %v8411_v37, %v8410_v38  ;;  %v8010_v1 = vpack.c.bf16 %v8416_v44, %v8415_v45  ;;  %v8939_v46 = vpop.eup %8938 }
 0x687   :  { %7520 = vmatmul.mubr.msk.f32.gmra.mrb[14].mxu0 %vm13354_vm1, %v7513_v39  ;;  %v8941_v50 = vpop.eup %8940  ;;  %v1194_v52 = vmul.f32 %v8939_v46, %v8933_v10 }
 0x688   :  { %7524 = vmatprep.mubr.msk.f32.mxu0 %vm13354_vm1, %v9415_v16  ;;  %8007 = vmatprep.subr.bf16.mxu0 %v8006_v0  ;;  %v1195_v54 = vmul.f32 %v8941_v50, %v8931_v14 }
 0x68a   :  { %v8943_v16 = vpop.eup %8942 }
 0x68b   :  { %7525 = vmatmul.mubr.msk.f32.vlgmr.msra.gmra.mrb[12].mxu0 %vm13354_vm1, %v9413_v15  ;;  %v8945_v56 = vpop.eup %8944  ;;  %v1196_v22 = vmul.f32 %v8943_v16, %v8935_v41 }
 0x68c   :  { %8009 = vmatpush3.bf16.msra.mxu0 %v8006_v0  ;;  %7527 = vmatprep.mubr.msk.f32.mxu0 %vm13354_vm1, %v9419_v19  ;;  %v7576_v47 = vpop.f32.mrb[16].mxu1 }
 0x68d   :  { %8011 = vmatprep.subr.bf16.mxu0 %v8010_v1  ;;  %v9629_v48 = vadd.f32 %v7576_v47, %v9330_v11  ;;  %v1509_v49 = vpop.f32.mrb[17].mxu1 }
 0x68e   :  { %v9632_v51 = vadd.f32 %v1509_v49, %v9333_v13 }
 0x68f   :  { %7528 = vmatmul.mubr.msk.f32.gmra.mrb[14].mxu0 %vm13354_vm1, %v9417_v17  ;;  %v1531_v15 = vsel %vm13355_vm0, %v9629_v48, -inf }
 0x690   :  { %8013 = vmatpush3.bf16.msra.mxu0 %v8010_v1  ;;  %1532 = vmax.xlane.f32.xlu0 %v1531_v15  ;;  %v7579_v19 = vpop.f32.mrb[18].mxu1  ;;  %v1528_v11 = vsel %vm13355_vm0, %v9632_v51, -inf }
 0x691   :  { %7552 = vmatprep.mubr.msk.f32.mxu0 %vm13355_vm0, %v1194_v52  ;;  %v9642_v13 = vadd.f32 %v7579_v19, %v9345_v25  ;;  %v1519_v23 = vpop.f32.mrb[19].mxu1  ;;  %1529 = vmax.xlane.f32.xlu1 %v1528_v11  ;;  %v9656_v25 = vld [vmem:[%s13333_s7 + $0x1] ss:$0 sm:$0xff]  ;;  %v8427_v52 = vpack.i.bf16 %v9498_v3, %v9493_v2  ;;  %v9712_v3 = vsub.s32 0, %v9306_v53 }
 0x692   :  { %v9645_v17 = vadd.f32 %v1519_v23, %v9342_v20  ;;  %v1197_v20 = vmul.f32 %v8945_v56, %v9609_v35  ;;  %v2279_v11 = vld [vmem:[%s13334_s8 + $0x1] sm:$0x1] }
 0x693   :  { %7553 = vmatmul.mubr.msk.f32.vlgmr.msra.gmra.mrb[16].mxu0 %vm13355_vm0, %v1195_v54  ;;  %v1537_v58 = vsel %vm13355_vm0, %v9642_v13, -inf  ;;  %13558 = vst [vmem:[#allocation19_spill] sm:$0xff] %v9712_v3 }
 0x694   :  { %7555 = vmatprep.mubr.msk.f32.mxu0 %vm13355_vm0, %v1196_v22  ;;  %v1534_v59 = vsel %vm13355_vm0, %v9645_v17, -inf  ;;  %v7612_v62 = vpop.f32.mrb[20].mxu1  ;;  %v2294_v22 = vadd.f32 8.0, %v2279_v11 }
 0x695   :  { %1535 = vmax.xlane.f32.xlu0 %v1534_v59  ;;  %1538 = vmax.xlane.f32.xlu1 %v1537_v58  ;;  %v1963_v60 = vadd.f32 %v7612_v62, %v9656_v25  ;;  %v1957_v26 = vpop.f32.mrb[21].mxu1  ;;  %v9043_v59 = vld [vmem:[%s13330_s4 + $0x48] sm:$0xff]  ;;  %v8432_v62 = vpack.i.bf16 %v9516_v21, %v9511_v5  ;;  %v7096_v5 = vadd.f32 -1.0, %v2279_v11 }
 0x696   :  { %v1958_v14 = vadd.f32 %v9656_v25, %v1957_v26 }
 0x697   :  { %7556 = vmatmul.mubr.msk.f32.gmra.mrb[18].mxu0 %vm13355_vm0, %v1197_v20 }
 0x698   :  { %v7615_v10 = vpop.f32.mrb[22].mxu1  ;;  %v9662_v29 = vpack.i.bf16 %v1963_v60, %v1958_v14  ;;  %v9664_v24 = vpack.c.bf16 %v1963_v60, %v1958_v14 }
 0x699   :  { %v1973_v41 = vadd.f32 %v7615_v10, %v9656_v25  ;;  %v1967_v42 = vpop.f32.mrb[23].mxu1 }
 0x69a   :  { %13546 = vst [vmem:[#allocation7_spill] sm:$0xff] %v9662_v29  ;;  %13547 = vst [vmem:[#allocation8_spill] sm:$0xff] %v9664_v24  ;;  %v1968_v43 = vadd.f32 %v9656_v25, %v1967_v42  ;;  %v2298_v42 = vrot.slane %v2294_v22, %v9712_v3 }
 0x69c   :  { %v7618_v27 = vpop.f32.mrb[24].mxu1  ;;  %v9668_v28 = vpack.i.bf16 %v1973_v41, %v1968_v43  ;;  %v9670_v35 = vpack.c.bf16 %v1973_v41, %v1968_v43  ;;  %v9044_v41 = vld [vmem:[%s13333_s7] ss:$0 sm:$0xff]  ;;  %v7097_v43 = vadd.f32 -2.0, %v2279_v11 }
 0x69d   :  { %v1983_v30 = vadd.f32 %v7618_v27, %v9656_v25  ;;  %v1977_v31 = vpop.f32.mrb[25].mxu1 }
 0x69e   :  { %13548 = vst [vmem:[#allocation9_spill] sm:$0xff] %v9668_v28  ;;  %13549 = vst [vmem:[#allocation10_spill] sm:$0xff] %v9670_v35  ;;  %v1978_v32 = vadd.f32 %v9656_v25, %v1977_v31 }
 0x6a0   :  { %v7621_v33 = vpop.f32.mrb[26].mxu1  ;;  %v9674_v34 = vpack.i.bf16 %v1983_v30, %v1978_v32  ;;  %v9676_v36 = vpack.c.bf16 %v1983_v30, %v1978_v32 }
 0x6a1   :  { %v1993_v37 = vadd.f32 %v7621_v33, %v9656_v25  ;;  %v1987_v38 = vpop.f32.mrb[27].mxu1 }
 0x6a2   :  { %13550 = vst [vmem:[#allocation11_spill] sm:$0xff] %v9674_v34  ;;  %13551 = vst [vmem:[#allocation12_spill] sm:$0xff] %v9676_v36  ;;  %v1988_v39 = vadd.f32 %v9656_v25, %v1987_v38 }
 0x6a4   :  { %v7624_v40 = vpop.f32.mrb[28].mxu1  ;;  %v9680_v0 = vpack.i.bf16 %v1993_v37, %v1988_v39  ;;  %v9682_v44 = vpack.c.bf16 %v1993_v37, %v1988_v39  ;;  %v2394_v37 = vrot.slane %v7097_v43, %v9712_v3  ;;  %v2373_v39 = vrot.slane %v7096_v5, %v9712_v3 }
 0x6a5   :  { %v2003_v45 = vadd.f32 %v7624_v40, %v9656_v25  ;;  %v1997_v1 = vpop.f32.mrb[29].mxu1  ;;  %v7098_v40 = vld [vmem:[%s13334_s8 + $0x2] ss:$0 sm:$0xff] }
 0x6a6   :  { %13552 = vst [vmem:[#allocation13_spill] sm:$0xff] %v9680_v0  ;;  %13553 = vst [vmem:[#allocation14_spill] sm:$0xff] %v9682_v44  ;;  %8418 = vrot.lane.b32.xlu1 %v9353_v18, %s9090_s21  ;;  %v1998_v46 = vadd.f32 %v9656_v25, %v1997_v1  ;;  %v9042_v18 = vld [vmem:[%s13330_s4 + $0x30] sm:$0xff]  ;;  %v2556_v63 = vmul.f32 %v7098_v40, %v57_v4 }
 0x6a8   :  { %v7627_v47 = vpop.f32.mrb[30].mxu1  ;;  %v9688_v49 = vpack.i.bf16 %v2003_v45, %v1998_v46  ;;  %v9690_v50 = vpack.c.bf16 %v2003_v45, %v1998_v46  ;;  %v9750_v45 = vld [vmem:[%s13334_s8] sm:$0x1] }
 0x6a9   :  { %v2013_v16 = vadd.f32 %v7627_v47, %v9656_v25  ;;  %v2007_v15 = vpop.f32.mrb[31].mxu1 }
 0x6aa   :  { %13554 = vst [vmem:[#allocation15_spill] sm:$0xff] %v9688_v49  ;;  %13555 = vst [vmem:[#allocation16_spill] sm:$0xff] %v9690_v50  ;;  %8423 = vrot.lane.b32.xlu1 %v9355_v57, %s9090_s21  ;;  %v2008_v19 = vadd.f32 %v9656_v25, %v2007_v15 }
 0x6ab   :  { %1307 = vrot.lane.b32.xlu0 %v9042_v18, %s9091_s22  ;;  %v2522_v18 = vrot.slane %v9750_v45, %v9712_v3 }
 0x6ac   :  { %v7630_v54 = vpop.f32.mrb[32].mxu1  ;;  %v9705_v23 = vpack.i.bf16 %v2013_v16, %v2008_v19  ;;  %v9707_v56 = vpack.c.bf16 %v2013_v16, %v2008_v19 }
 0x6ad   :  { %v2023_v57 = vadd.f32 %v7630_v54, %v9656_v25  ;;  %v2017_v2 = vpop.f32.mrb[33].mxu1 }
 0x6ae   :  { %13556 = vst [vmem:[#allocation17_spill] sm:$0xff] %v9705_v23  ;;  %13557 = vst [vmem:[#allocation18_spill] sm:$0xff] %v9707_v56  ;;  %8428 = vrot.lane.b32.xlu1 %v8427_v52, %s9082_s14  ;;  %v2018_v58 = vadd.f32 %v9656_v25, %v2017_v2  ;;  %v2555_v52 = vmul.f32 %v7098_v40, %v56_v6  ;;  %v2558_v6 = vmul.f32 %v7098_v40, %v59_v12 }
 0x6af   :  { %1681 = vrot.lane.b32.xlu0 %v9043_v59, %s9091_s22 }
 0x6b0   :  { %v7633_v20 = vpop.f32.mrb[34].mxu1  ;;  %v9721_v60 = vpack.i.bf16 %v2023_v57, %v2018_v58  ;;  %v9723_v26 = vpack.c.bf16 %v2023_v57, %v2018_v58  ;;  %v2557_v57 = vmul.f32 %v7098_v40, %v58_v9 }
 0x6b1   :  { %v2033_v14 = vadd.f32 %v7633_v20, %v9656_v25  ;;  %v2027_v10 = vpop.f32.mrb[35].mxu1 }
 0x6b2   :  { %13559 = vst [vmem:[#allocation20_spill] sm:$0xff] %v9721_v60  ;;  %13560 = vst [vmem:[#allocation21_spill] sm:$0xff] %v9723_v26  ;;  %1789 = vrot.lane.b32.xlu1 %v9044_v41, %s9091_s22  ;;  %v2028_v27 = vadd.f32 %v9656_v25, %v2027_v10 }
 0x6b3   :  { %8433 = vrot.lane.b32.xlu0 %v8432_v62, %s9082_s14 }
 0x6b4   :  { %v7636_v21 = vpop.f32.mrb[36].mxu1  ;;  %v9733_v30 = vpack.i.bf16 %v2033_v14, %v2028_v27  ;;  %v9735_v31 = vpack.c.bf16 %v2033_v14, %v2028_v27 }
 0x6b5   :  { %v2043_v32 = vadd.f32 %v7636_v21, %v9656_v25  ;;  %v2037_v33 = vpop.f32.mrb[37].mxu1 }
 0x6b6   :  { %13561 = vst [vmem:[#allocation22_spill] sm:$0xff] %v9733_v30  ;;  %13562 = vst [vmem:[#allocation23_spill] sm:$0xff] %v9735_v31  ;;  %2300 = vrot.lane.b32.xlu1 %v2298_v42, %s9092_s24  ;;  %v2038_v38 = vadd.f32 %v9656_v25, %v2037_v33 }
 0x6b7   :  { %2072 = vrot.lane.b32.xlu0 %v9656_v25, %s9082_s14 }
 0x6b8   :  { %v7639_v1 = vpop.f32.mrb[38].mxu1  ;;  %v9752_v46 = vpack.i.bf16 %v2043_v32, %v2038_v38  ;;  %v9754_v47 = vpack.c.bf16 %v2043_v32, %v2038_v38 }
 0x6b9   :  { %v2053_v16 = vadd.f32 %v7639_v1, %v9656_v25  ;;  %v2047_v15 = vpop.f32.mrb[39].mxu1 }
 0x6ba   :  { %13563 = vst [vmem:[#allocation24_spill] sm:$0xff] %v9752_v46  ;;  %2396 = vrot.lane.b32.xlu1 %v2394_v37, %s9092_s24  ;;  %v2048_v19 = vadd.f32 %v9656_v25, %v2047_v15 }
 0x6bb   :  { %2375 = vrot.lane.b32.xlu0 %v2373_v39, %s9092_s24 }
 0x6bc   :  { %v9764_v11 = vpack.i.bf16 %v2053_v16, %v2048_v19  ;;  %v9766_v54 = vpack.c.bf16 %v2053_v16, %v2048_v19 }
 0x6be   :  { %13564 = vst [vmem:[#allocation25_spill] sm:$0xff] %v9764_v11  ;;  %2563 = vrot.lane.b32.xlu1 %v2555_v52, %s9092_s24 }
 0x6bf   :  { %2524 = vrot.lane.b32.xlu0 %v2522_v18, %s9092_s24 }
 0x6c2   :  { %2567 = vrot.lane.b32.xlu1 %v2557_v57, %s9092_s24 }
 0x6c3   :  { %2565 = vrot.lane.b32.xlu0 %v2556_v63, %s9092_s24 }
 0x6c6   :  { %8443 = vrot.lane.b32.xlu1 %v9764_v11, %s9086_s17 }
 0x6c7   :  { %2569 = vrot.lane.b32.xlu0 %v2558_v6, %s9092_s24 }
 0x6ca   :  { %8453 = vrot.lane.b32.xlu1 %v9668_v28, %s9086_s17 }
 0x6cb   :  { %8438 = vrot.lane.b32.xlu0 %v9752_v46, %s9086_s17 }
 0x6ce   :  { %8463 = vrot.lane.b32.xlu1 %v9680_v0, %s9086_s17 }
 0x6cf   :  { %8448 = vrot.lane.b32.xlu0 %v9662_v29, %s9086_s17 }
 0x6d2   :  { %8468 = vrot.lane.b32.xlu1 %v9688_v49, %s9086_s17 }
 0x6d3   :  { %8458 = vrot.lane.b32.xlu0 %v9674_v34, %s9086_s17 }
 0x6d6   :  { %8478 = vrot.lane.b32.xlu1 %v9721_v60, %s9086_s17 }
 0x6d7   :  { %8473 = vrot.lane.b32.xlu0 %v9705_v23, %s9086_s17 }
 0x6da   :  { %8493 = vrot.lane.b32.xlu1 %v9764_v11, %s9088_s19 }
 0x6db   :  { %8483 = vrot.lane.b32.xlu0 %v9733_v30, %s9086_s17 }
 0x6de   :  { %8498 = vrot.lane.b32.xlu1 %v9662_v29, %s9088_s19 }
 0x6df   :  { %8488 = vrot.lane.b32.xlu0 %v9752_v46, %s9088_s19 }
 0x6e2   :  { %8508 = vrot.lane.b32.xlu1 %v9674_v34, %s9088_s19 }
 0x6e3   :  { %8503 = vrot.lane.b32.xlu0 %v9668_v28, %s9088_s19 }
 0x6e6   :  { %8513 = vrot.lane.b32.xlu1 %v9680_v0, %s9088_s19 }
 0x6e7   :  { %8518 = vrot.lane.b32.xlu0 %v9688_v49, %s9088_s19 }
 0x6ea   :  { %8523 = vrot.lane.b32.xlu1 %v9705_v23, %s9088_s19 }
 0x71d   :  { %v1533_v61 = vpop.xlane.xlu0 %1532 }
 0x71e   :  { %v1541_v4 = vsub.f32 %v9629_v48, %v1533_v61  ;;  %v1530_v7 = vpop.xlane.xlu1 %1529 }
 0x71f   :  { %v1540_v8 = vsub.f32 %v9632_v51, %v1530_v7 }
 0x720   :  { %v1546_v9 = vmul.f32 1.442695, %v1541_v4 }
 0x721   :  { %v1544_v12 = vmul.f32 1.442695, %v1540_v8 }
 0x722   :  { %8946 = vpow2.f32 %v1546_v9  ;;  %v1536_v25 = vpop.xlane.xlu0 %1535  ;;  %v1539_v2 = vpop.xlane.xlu1 %1538 }
 0x723   :  { %8948 = vpow2.f32 %v1544_v12  ;;  %v1542_v22 = vsub.f32 %v9645_v17, %v1536_v25  ;;  %v1543_v58 = vsub.f32 %v9642_v13, %v1539_v2 }
 0x725   :  { %v1548_v59 = vmul.f32 1.442695, %v1542_v22  ;;  %v1550_v62 = vmul.f32 1.442695, %v1543_v58 }
 0x726   :  { %v1308_v20 = vpop.permute.xlu0 %1307  ;;  %v8419_v14 = vpop.permute.xlu1 %8418 }
 0x727   :  { %8950 = vpow2.f32 %v1548_v59  ;;  %v8421_v10 = vunpack.i.h.bf16 %v8419_v14  ;;  %v8420_v48 = vunpack.i.l.bf16 %v8419_v14  ;;  %7558 = vmatprep.subr.mxu0 %v1308_v20 }
 0x728   :  { %8952 = vpow2.f32 %v1550_v62  ;;  %7559 = vmatpush3.msra.mxu0 %v1308_v20 }
 0x729   :  { %v8026_v51 = vpack.c.bf16 %v8421_v10, %v8420_v48 }
 0x72a   :  { %v9819_v41 = vpop.permute.xlu0 %1681  ;;  %v8424_v42 = vpop.permute.xlu1 %8423 }
 0x72b   :  { %8027 = vmatprep.subr.bf16.mxu0 %v8026_v51  ;;  %v8426_v62 = vunpack.i.h.bf16 %v8424_v42  ;;  %v8425_v20 = vunpack.i.l.bf16 %v8424_v42 }
 0x72c   :  { %v9821_v43 = vpop.eup %8946 }
 0x72d   :  { %v9823_v17 = vpop.eup %8948  ;;  %v1555_v13 = vsel %vm13355_vm0, %v9821_v43, 0.0  ;;  %v8030_v48 = vpack.c.bf16 %v8426_v62, %v8425_v20 }
 0x72e   :  { %v9827_v27 = vpop.permute.xlu0 %8433  ;;  %1556 = vadd.xlane.f32.xlu1 %v1555_v13  ;;  %v9829_v5 = vpop.permute.xlu1 %8428  ;;  %v1552_v21 = vsel %vm13355_vm0, %v9823_v17, 0.0 }
 0x72f   :  { %1553 = vadd.xlane.f32.xlu0 %v1552_v21  ;;  %v8430_v53 = vunpack.i.l.bf16 %v9829_v5 }
 0x731   :  { %v9833_v32 = vpop.eup %8950 }
 0x732   :  { %v9835_v33 = vpop.eup %8952  ;;  %v9837_v37 = vpop.permute.xlu0 %2072  ;;  %v1558_v39 = vsel %vm13355_vm0, %v9833_v32, 0.0 }
 0x733   :  { %v9839_v38 = vpop.permute.xlu1 %1789  ;;  %1559 = vadd.xlane.f32.xlu0 %v1558_v39  ;;  %v1561_v40 = vsel %vm13355_vm0, %v9835_v33, 0.0 }
 0x734   :  { %1562 = vadd.xlane.f32.xlu1 %v1561_v40 }
 0x736   :  { %v9845_v1 = vpop.permute.xlu0 %2375 }
 0x737   :  { %v9847_v16 = vpop.permute.xlu1 %2300 }
 0x73a   :  { %v9849_v15 = vpop.permute.xlu0 %2524 }
 0x73b   :  { %v9851_v52 = vpop.permute.xlu1 %2396 }
 0x73e   :  { %v9853_v19 = vpop.permute.xlu0 %2565 }
 0x73f   :  { %v9855_v18 = vpop.permute.xlu1 %2563 }
 0x742   :  { %v9857_v57 = vpop.permute.xlu0 %2569 }
 0x743   :  { %v9859_v63 = vpop.permute.xlu1 %2567 }
 0x745   :  { %8533 = vrot.lane.b32.xlu1 %v9733_v30, %s9088_s19 }
 0x746   :  { %v8439_v6 = vpop.permute.xlu0 %8438 }
 0x747   :  { %v8444_v61 = vpop.permute.xlu1 %8443  ;;  %v8441_v4 = vunpack.i.h.bf16 %v8439_v6  ;;  %v8440_v7 = vunpack.i.l.bf16 %v8439_v6 }
 0x748   :  { %v8446_v8 = vunpack.i.h.bf16 %v8444_v61  ;;  %v8445_v9 = vunpack.i.l.bf16 %v8444_v61 }
 0x749   :  { %8528 = vrot.lane.b32.xlu0 %v9721_v60, %s9088_s19  ;;  %v8090_v12 = vpack.c.bf16 %v8441_v4, %v8440_v7 }
 0x74a   :  { %v8094_v25 = vpack.c.bf16 %v8446_v8, %v8445_v9  ;;  %v8449_v2 = vpop.permute.xlu0 %8448 }
 0x74b   :  { %v8451_v22 = vunpack.i.h.bf16 %v8449_v2  ;;  %v8450_v58 = vunpack.i.l.bf16 %v8449_v2  ;;  %8091 = vmatprep.subr.bf16.mxu1 %v8090_v12  ;;  %v9873_v39 = vpop.permute.xlu1 %8453 }
 0x74c   :  { %8093 = vmatpush3.bf16.msra.mxu1 %v8090_v12  ;;  %13566 = vst [vmem:[#allocation27_spill] sm:$0xff] %v9873_v39 }
 0x74d   :  { %8095 = vmatprep.subr.bf16.mxu1 %v8094_v25  ;;  %v9865_v59 = vpack.c.bf16 %v8451_v22, %v8450_v58 }
 0x74e   :  { %v9881_v61 = vpop.permute.xlu0 %8458 }
 0x74f   :  { %13565 = vst [vmem:[#allocation26_spill] sm:$0xff] %v9865_v59  ;;  %v9875_v42 = vpop.permute.xlu1 %8463  ;;  %13570 = vst [vmem:[#allocation31_spill] sm:$0xff] %v9881_v61 }
 0x750   :  { %8097 = vmatpush3.bf16.msra.mxu1 %v8094_v25  ;;  %13567 = vst [vmem:[#allocation28_spill] sm:$0xff] %v9875_v42 }
 0x751   :  { %8099 = vmatprep.subr.bf16.mxu1 %v9865_v59 }
 0x752   :  { %v9885_v4 = vpop.permute.xlu0 %8473 }
 0x753   :  { %v9877_v40 = vpop.permute.xlu1 %8468  ;;  %13572 = vst [vmem:[#allocation33_spill] sm:$0xff] %v9885_v4 }
 0x754   :  { %13568 = vst [vmem:[#allocation29_spill] sm:$0xff] %v9877_v40 }
 0x756   :  { %v9889_v8 = vpop.permute.xlu0 %8483 }
 0x757   :  { %v9879_v6 = vpop.permute.xlu1 %8478  ;;  %13574 = vst [vmem:[#allocation35_spill] sm:$0xff] %v9889_v8 }
 0x758   :  { %13569 = vst [vmem:[#allocation30_spill] sm:$0xff] %v9879_v6 }
 0x75a   :  { %v9893_v12 = vpop.permute.xlu0 %8488 }
 0x75b   :  { %13576 = vst [vmem:[#allocation37_spill] sm:$0xff] %v9893_v12 }
 0x75e   :  { %v9897_v2 = vpop.permute.xlu0 %8503 }
 0x75f   :  { %13578 = vst [vmem:[#allocation39_spill] sm:$0xff] %v9897_v2 }
 0x762   :  { %v9901_v58 = vpop.permute.xlu0 %8518 }
 0x763   :  { %13580 = vst [vmem:[#allocation41_spill] sm:$0xff] %v9901_v58 }
 0x766   :  { %v7554_v14 = vpop.f32.mrb[16].mxu0 }
 0x767   :  { %v1288_v10 = vpop.f32.mrb[17].mxu0 }
 0x768   :  { %7560 = vmatprep.mubr.msk.f32.mxu0 %vm13354_vm1, %v1288_v10 }
 0x769   :  { %7561 = vmatmul.mubr.msk.f32.vlgmr.msra.gmra.mrb[12].mxu0 %vm13354_vm1, %v7554_v14 }
 0x76a   :  { %8029 = vmatpush3.bf16.msra.mxu0 %v8026_v51  ;;  %v7557_v13 = vpop.f32.mrb[18].mxu0  ;;  %v9883_v51 = vpop.permute.xlu1 %8493 }
 0x76b   :  { %8031 = vmatprep.subr.bf16.mxu0 %v8030_v48  ;;  %v1298_v21 = vpop.f32.mrb[19].mxu0  ;;  %13571 = vst [vmem:[#allocation32_spill] sm:$0xff] %v9883_v51 }
 0x76c   :  { %7563 = vmatprep.mubr.msk.f32.mxu0 %vm13354_vm1, %v1298_v21  ;;  %v8431_v21 = vunpack.i.h.bf16 %v9829_v5 }
 0x76d   :  { %7564 = vmatmul.mubr.msk.f32.gmra.mrb[14].mxu0 %vm13354_vm1, %v7557_v13 }
 0x76e   :  { %8033 = vmatpush3.bf16.msra.mxu0 %v8030_v48  ;;  %v9887_v7 = vpop.permute.xlu1 %8498 }
 0x76f   :  { %7594 = vmatprep.subr.mxu0 %v9819_v41  ;;  %13573 = vst [vmem:[#allocation34_spill] sm:$0xff] %v9887_v7 }
 0x772   :  { %v9891_v9 = vpop.permute.xlu1 %8508 }
 0x773   :  { %13575 = vst [vmem:[#allocation36_spill] sm:$0xff] %v9891_v9 }
 0x776   :  { %v9895_v25 = vpop.permute.xlu1 %8513 }
 0x777   :  { %13577 = vst [vmem:[#allocation38_spill] sm:$0xff] %v9895_v25 }
 0x77a   :  { %v9899_v22 = vpop.permute.xlu1 %8523 }
 0x77b   :  { %13579 = vst [vmem:[#allocation40_spill] sm:$0xff] %v9899_v22 }
 0x7bb   :  { %v1557_v62 = vpop.xlane.xlu1 %1556 }
 0x7bc   :  { %8954 = vrcp.f32 %v1557_v62  ;;  %v1554_v20 = vpop.xlane.xlu0 %1553  ;;  %v8042_v62 = vpack.c.bf16 %v8431_v21, %v8430_v53 }
 0x7bd   :  { %8956 = vrcp.f32 %v1554_v20 }
 0x7c0   :  { %v1560_v14 = vpop.xlane.xlu0 %1559 }
 0x7c1   :  { %8958 = vrcp.f32 %v1560_v14  ;;  %v1563_v10 = vpop.xlane.xlu1 %1562 }
 0x7c2   :  { %8960 = vrcp.f32 %v1563_v10 }
 0x7c6   :  { %v8955_v48 = vpop.eup %8954 }
 0x7c7   :  { %v8957_v13 = vpop.eup %8956  ;;  %v1569_v23 = vmul.f32 %v8955_v48, %v9821_v43  ;;  %v8436_v43 = vunpack.i.h.bf16 %v9827_v27 }
 0x7c8   :  { %v1568_v30 = vmul.f32 %v8957_v13, %v9823_v17  ;;  %v9046_v13 = vld [vmem:[%s13326_s0] sm:$0xff] }
 0x7ca   :  { %7588 = vmatprep.mubr.msk.f32.mxu0 %vm13355_vm0, %v1568_v30  ;;  %v8435_v30 = vunpack.i.l.bf16 %v9827_v27 }
 0x7cb   :  { %v8959_v60 = vpop.eup %8958  ;;  %7589 = vmatmul.mubr.msk.f32.vlgmr.msra.gmra.mrb[20].mxu0 %vm13355_vm0, %v1569_v23 }
 0x7cc   :  { %v8961_v20 = vpop.eup %8960  ;;  %7595 = vmatpush3.msra.mxu0 %v9819_v41  ;;  %v1570_v14 = vmul.f32 %v8959_v60, %v9833_v32  ;;  %v8046_v53 = vpack.c.bf16 %v8436_v43, %v8435_v30  ;;  %v2176_v41 = vld [vmem:[%s13332_s6] sm:$0xff]  ;;  %v9045_v32 = vld [vmem:[%s13326_s0 + $0x8] sm:$0xff]  ;;  %s9118_s6 = smov 92  }
 0x7cd   :  { %8043 = vmatprep.subr.bf16.mxu0 %v8042_v62  ;;  %v1571_v10 = vmul.f32 %v8961_v20, %v9835_v33 }
 0x7ce   :  { %7591 = vmatprep.mubr.msk.f32.mxu0 %vm13355_vm0, %v1570_v14 }
 0x7cf   :  { %7592 = vmatmul.mubr.msk.f32.gmra.mrb[22].mxu0 %vm13355_vm0, %v1571_v10  ;;  %v9047_v10 = vld [vmem:[%s13326_s0 + $0x18] sm:$0xff] }
 0x89e   :  { %v7590_v17 = vpop.f32.mrb[20].mxu0 }
 0x89f   :  { %v1662_v5 = vpop.f32.mrb[21].mxu0 }
 0x8a0   :  { %7596 = vmatprep.mubr.msk.f32.mxu0 %vm13354_vm1, %v1662_v5 }
 0x8a1   :  { %7597 = vmatmul.mubr.msk.f32.vlgmr.msra.gmra.mrb[12].mxu0 %vm13354_vm1, %v7590_v17  ;;  %v9048_v17 = vld [vmem:[%s13327_s1] sm:$0xff] }
 0x8a2   :  { %8045 = vmatpush3.bf16.msra.mxu0 %v8042_v62  ;;  %v7593_v23 = vpop.f32.mrb[22].mxu0 }
 0x8a3   :  { %8047 = vmatprep.subr.bf16.mxu0 %v8046_v53  ;;  %v1672_v60 = vpop.f32.mrb[23].mxu0 }
 0x8a4   :  { %7599 = vmatprep.mubr.msk.f32.mxu0 %vm13354_vm1, %v1672_v60  ;;  %v9050_v60 = vld [vmem:[%s13327_s1 + $0x8] sm:$0xff] }
 0x8a5   :  { %7600 = vmatmul.mubr.msk.f32.gmra.mrb[14].mxu0 %vm13354_vm1, %v7593_v23 }
 0x8a6   :  { %8049 = vmatpush3.bf16.msra.mxu0 %v8046_v53  ;;  %v9049_v53 = vld [vmem:[%s13326_s0 + $0x10] sm:$0xff] }
 0x8a7   :  { %7654 = vmatprep.subr.mxu0 %v2176_v41 }
 0x974   :  { %v7598_v27 = vpop.f32.mrb[12].mxu0 }
 0x975   :  { %v1786_v33 = vadd.f32 %v9045_v32, %v7598_v27  ;;  %v1762_v48 = vpop.f32.mrb[13].mxu0 }
 0x976   :  { %v1785_v21 = vadd.f32 %v9046_v13, %v1762_v48  ;;  %v9051_v48 = vld [vmem:[%s13327_s1 + $0x10] sm:$0xff] }
 0x977   :  { %v9930_v62 = vadd.f32 %v9839_v38, %v1786_v33 }
 0x978   :  { %v9933_v20 = vadd.f32 %v9839_v38, %v1785_v21  ;;  %v7601_v14 = vpop.f32.mrb[14].mxu0  ;;  %v9052_v21 = vld [vmem:[%s13327_s1 + $0x18] sm:$0xff] }
 0x979   :  { %13581 = vst [vmem:[#allocation42_spill] sm:$0xff] %v9930_v62  ;;  %v1788_v43 = vadd.f32 %v9047_v10, %v7601_v14  ;;  %v1772_v30 = vpop.f32.mrb[15].mxu0  ;;  %v1797_v27 = vadd.f32 %v9050_v60, %v9930_v62  ;;  %v2174_v10 = vld [vmem:[%s13328_s2 + $0x10] sm:$0xff] }
 0x97a   :  { %13582 = vst [vmem:[#allocation43_spill] sm:$0xff] %v9933_v20  ;;  %v1796_v5 = vadd.f32 %v9048_v17, %v9933_v20  ;;  %v1787_v23 = vadd.f32 %v9049_v53, %v1772_v30  ;;  %v13341_v30 = vmov 0  }
 0x97b   :  { %v9950_v32 = vadd.f32 %v9839_v38, %v1788_v43  ;;  %v2175_v43 = vld [vmem:[%s13328_s2 + $0x18] sm:$0xff]  ;;  %8537 = vset.pattern.permute.xlu1 %v13341_v30 }
 0x97c   :  { %v9953_v33 = vadd.f32 %v9839_v38, %v1787_v23  ;;  %7648 = vmatprep.mubr.msk.f32.mxu0 %vm13355_vm0, %v1796_v5  ;;  %v2172_v38 = vld [vmem:[%s13328_s2] sm:$0xff] }
 0x97d   :  { %13583 = vst [vmem:[#allocation44_spill] sm:$0xff] %v9950_v32  ;;  %7649 = vmatmul.mubr.msk.f32.vlgmr.msra.gmra.mrb[24].mxu0 %vm13355_vm0, %v1797_v27  ;;  %v1799_v14 = vadd.f32 %v9052_v21, %v9950_v32  ;;  %v2285_v27 = vadd.f32 8.0, %v9750_v45 }
 0x97e   :  { %13584 = vst [vmem:[#allocation45_spill] sm:$0xff] %v9953_v33  ;;  %v1798_v13 = vadd.f32 %v9051_v48, %v9953_v33  ;;  %7655 = vmatpush3.msra.mxu0 %v2176_v41  ;;  %v2173_v41 = vld [vmem:[%s13328_s2 + $0x8] sm:$0xff]  ;;  %s9117_s2 = smov 84  }
 0x97f   :  { %8051 = vmatprep.subr.bf16.mxu0 %v9754_v47 }
 0x980   :  { %7651 = vmatprep.mubr.msk.f32.mxu0 %vm13355_vm0, %v1798_v13 }
 0x981   :  { %7652 = vmatmul.mubr.msk.f32.gmra.mrb[26].mxu0 %vm13355_vm0, %v1799_v14 }
 0x982   :  { %7656 = vmatprep.mubr.msk.f32.mxu0 %vm13354_vm1, %v2172_v38 }
 0x985   :  { %7657 = vmatmul.mubr.msk.f32.vlgmr.msra.gmra.mrb[28].mxu0 %vm13354_vm1, %v2173_v41  ;;  %v2289_v41 = vrot.slane %v2285_v27, %v9712_v3 }
 0x986   :  { %8053 = vmatpush3.bf16.msra.mxu0 %v9754_v47  ;;  %7659 = vmatprep.mubr.msk.f32.mxu0 %vm13354_vm1, %v2174_v10 }
 0x987   :  { %8055 = vmatprep.subr.bf16.mxu0 %v9766_v54 }
 0x989   :  { %7660 = vmatmul.mubr.msk.f32.gmra.mrb[30].mxu0 %vm13354_vm1, %v2175_v43 }
 0x98a   :  { %8057 = vmatpush3.bf16.msra.mxu0 %v9766_v54 }
 0x98b   :  { %8059 = vmatprep.subr.bf16.mxu0 %v9664_v24 }
 0xa50   :  { %v7650_v17 = vpop.f32.mrb[24].mxu0 }
 0xa51   :  { %v9990_v47 = vadd.f32 %v7650_v17, %v9837_v37  ;;  %v2153_v5 = vpop.f32.mrb[25].mxu0 }
 0xa52   :  { %v9993_v53 = vadd.f32 %v2153_v5, %v9837_v37 }
 0xa53   :  { %v3435_v23 = vsel %vm13357_vm7, %v9990_v47, -inf  ;;  %v2587_v54 = vsel %vm2583_vm8, %v9990_v47, -inf  ;;  %v4546_v13 = vsel %vm13356_vm9, %v9990_v47, -inf }
 0xa54   :  { %3436 = vmax.xlane.f32.xlu1 %v3435_v23  ;;  %2588 = vmax.xlane.f32.xlu0 %v2587_v54  ;;  %v7653_v60 = vpop.f32.mrb[26].mxu0  ;;  %v3432_v21 = vsel %vm13357_vm7, %v9993_v53, -inf  ;;  %v5541_v23 = vsel %vm5537_vm10, %v9990_v47, -inf  ;;  %v5538_v54 = vsel %vm5537_vm10, %v9993_v53, -inf  ;;  %v4543_v49 = vsel %vm13356_vm9, %v9993_v53, -inf }
 0xa55   :  { %v2163_v48 = vpop.f32.mrb[27].mxu0  ;;  %v10012_v17 = vadd.f32 %v7653_v60, %v9837_v37 }
 0xa58   :  { %4547 = vmax.xlane.f32.xlu1 %v4546_v13  ;;  %3433 = vmax.xlane.f32.xlu0 %v3432_v21  ;;  %v7658_v14 = vpop.f32.mrb[28].mxu0  ;;  %v10020_v13 = vadd.f32 %v2163_v48, %v9837_v37 }
 0xa59   :  { %v10005_v38 = vadd.f32 %v7658_v14, %v9990_v47  ;;  %v2255_v10 = vpop.f32.mrb[29].mxu0 }
 0xa5a   :  { %v10009_v43 = vadd.f32 %v2255_v10, %v9993_v53 }
 0xa5b   :  { %v13344_v5 = vmax.f32 %v10005_v38, -8.0  ;;  %v13604_v31 = vmax.f32 %v10005_v38, -8.0 }
 0xa5c   :  { %v13346_v27 = vmax.f32 %v10009_v43, -8.0  ;;  %5542 = vmax.xlane.f32.xlu1 %v5541_v23  ;;  %5539 = vmax.xlane.f32.xlu0 %v5538_v54  ;;  %v7661_v21 = vpop.f32.mrb[30].mxu0  ;;  %v2584_v23 = vsel %vm2583_vm8, %v9993_v53, -inf  ;;  %v4552_v54 = vsel %vm13356_vm9, %v10012_v17, -inf }
 0xa5d   :  { %v2291_v60 = vmin.f32 %v13344_v5, %v2289_v41  ;;  %v10026_v14 = vadd.f32 %v7661_v21, %v10012_v17  ;;  %v2265_v10 = vpop.f32.mrb[31].mxu0 }
 0xa5e   :  { %v2290_v30 = vmin.f32 %v13346_v27, %v2289_v41  ;;  %v10031_v32 = vadd.f32 %v2265_v10, %v10020_v13 }
 0xa5f   :  { %v2308_v37 = vfloor.f32 %v2291_v60  ;;  %v13351_v48 = vmax.f32 %v10026_v14, -8.0 }
 0xa60   :  { %v10038_v5 = vfloor.f32 %v2290_v30  ;;  %v13352_v21 = vmax.f32 %v10031_v32, -8.0  ;;  %2585 = vmax.xlane.f32.xlu1 %v2584_v23  ;;  %4553 = vmax.xlane.f32.xlu0 %v4552_v54  ;;  %v2590_v23 = vsel %vm2583_vm8, %v10020_v13, -inf  ;;  %v7095_v54 = vadd.f32 -2.0, %v9750_v45 }
 0xa61   :  { %v10041_v33 = vsub.f32 %v2291_v60, %v2308_v37  ;;  %v2293_v10 = vmin.f32 %v13351_v48, %v2289_v41  ;;  %v7094_v60 = vadd.f32 -1.0, %v9750_v45  ;;  %v2593_v48 = vsel %vm2583_vm8, %v10012_v17, -inf }
 0xa62   :  { %v10046_v27 = vsub.f32 %v2290_v30, %v10038_v5  ;;  %v2292_v20 = vmin.f32 %v13352_v21, %v2289_v41  ;;  %v5544_v21 = vsel %vm5537_vm10, %v10020_v13, -inf  ;;  %v2356_v34 = vrot.slane %v7095_v54, %v9712_v3 }
 0xa63   :  { %v10050_v62 = vfloor.f32 %v2293_v10  ;;  %v2339_v45 = vrot.slane %v7094_v60, %v9712_v3  ;;  %vm2331_vm11 = vcmp.ge.f32.partialorder %v10038_v5, 0.0  ;;  %vm2348_vm13 = vcmp.ge.f32.partialorder %v10038_v5, -1.0 }
 0xa64   :  { %v10058_v0 = vfloor.f32 %v2292_v20  ;;  %4544 = vmax.xlane.f32.xlu1 %v4543_v49  ;;  %2591 = vmax.xlane.f32.xlu0 %v2590_v23  ;;  %v3441_v49 = vsel %vm13357_vm7, %v10012_v17, -inf  ;;  %vm2357_vm14 = vcmp.le.f32.partialorder %v10038_v5, %v2356_v34  ;;  %vm2332_vm2 = vcmp.ge.f32.partialorder %v2308_v37, 0.0 }
 0xa65   :  { %v10061_v30 = vsub.f32 %v2293_v10, %v10050_v62  ;;  %vm2340_vm12 = vcmp.le.f32.partialorder %v10038_v5, %v2339_v45  ;;  %vm2341_vm3 = vcmp.le.f32.partialorder %v2308_v37, %v2339_v45  ;;  %vm2349_vm4 = vcmp.ge.f32.partialorder %v2308_v37, -1.0  ;;  %vm10084_vm5 = vmand %vm2348_vm13, %vm2357_vm14 }
 0xa66   :  { %v10064_v41 = vsub.f32 %v2292_v20, %v10058_v0  ;;  %vm10078_vm15 = vmand %vm2331_vm11, %vm2340_vm12  ;;  %vm2358_vm6 = vcmp.le.f32.partialorder %v2308_v37, %v2356_v34  ;;  %vm2333_vm8 = vcmp.ge.f32.partialorder %v10058_v0, 0.0  ;;  %vm2342_vm1 = vcmp.le.f32.partialorder %v10058_v0, %v2339_v45 }
 0xa67   :  { %vm10090_vm11 = vmand %vm2332_vm2, %vm2341_vm3  ;;  %vm2350_vm12 = vcmp.ge.f32.partialorder %v10058_v0, -1.0  ;;  %vm2359_vm0 = vcmp.le.f32.partialorder %v10058_v0, %v2356_v34  ;;  %vm2343_vm13 = vcmp.le.f32.partialorder %v10050_v62, %v2339_v45  ;;  %vm2360_vm14 = vcmp.le.f32.partialorder %v10050_v62, %v2356_v34 }
 0xa68   :  { %2594 = vmax.xlane.f32.xlu1 %v2593_v48  ;;  %5545 = vmax.xlane.f32.xlu0 %v5544_v21  ;;  %v5547_v48 = vsel %vm5537_vm10, %v10012_v17, -inf  ;;  %v13587_v21 = vmov 0  ;;  %vm10096_vm9 = vmand %vm2349_vm4, %vm2358_vm6  ;;  %vm2334_vm10 = vcmp.ge.f32.partialorder %v10050_v62, 0.0  ;;  %vm2351_vm2 = vcmp.ge.f32.partialorder %v10050_v62, -1.0 }
 0xa69   :  { %v13588_v21 = vsel %vm10084_vm5, 4294967295, %v13587_v21  ;;  %vm10103_vm7 = vmand %vm2333_vm8, %vm2342_vm1  ;;  %vm13595_vm3 = vcmask 326944   ;;  %v13602_v45 = vmax.f32 %v10009_v43, -8.0  ;;  %vm13603_vm1 = vcmask 359744  }
 0xa6a   :  { %v3438_v54 = vsel %vm13595_vm3, %v10020_v13, -inf  ;;  %vm10110_vm5 = vmand %vm2350_vm12, %vm2359_vm0  ;;  %v4549_v28 = vsel %vm13603_vm1, %v10020_v13, -inf  ;;  %v2304_v43 = vmin.f32 %v13604_v31, %v9847_v16  ;;  %v13606_v38 = vmax.f32 %v10031_v32, -8.0 }
 0xa6b   :  { %vm10114_vm4 = vmand %vm2334_vm10, %vm2343_vm13  ;;  %v2303_v3 = vmin.f32 %v13602_v45, %v9847_v16  ;;  %v13391_v22 = vsub.f32 1.0, %v10046_v27  ;;  %v2320_v12 = vsub.f32 1.0, %v10041_v33  ;;  %v13397_v10 = vmov 3  }
 0xa6c   :  { %3442 = vmax.xlane.f32.xlu1 %v3441_v49  ;;  %vm10118_vm6 = vmand %vm2351_vm2, %vm2360_vm14  ;;  %v10142_v45 = vfloor.f32 %v2304_v43  ;;  %v2305_v26 = vmin.f32 %v13606_v38, %v9847_v16  ;;  %v13399_v23 = vmov 1   ;;  %v13624_v34 = vmov 1  }
 0xa6d   :  { %v10127_v11 = vfloor.f32 %v2303_v3 }
 0xa6e   :  { %vm2366_vm2 = vcmp.ge.f32.partialorder %v10142_v45, 0.0  ;;  %vm2379_vm3 = vcmp.le.f32.partialorder %v10142_v45, %v9845_v1  ;;  %v2324_v31 = vsub.f32 %v2304_v43, %v10142_v45 }
 0xa6f   :  { %vm2365_vm0 = vcmp.ge.f32.partialorder %v10127_v11, 0.0  ;;  %vm2378_vm8 = vcmp.le.f32.partialorder %v10127_v11, %v9845_v1  ;;  %vm2386_vm10 = vcmp.ge.f32.partialorder %v10127_v11, -1.0  ;;  %vm2399_vm13 = vcmp.le.f32.partialorder %v10127_v11, %v9851_v52  ;;  %vm2383_vm1 = vmand %vm2366_vm2, %vm2379_vm3 }
 0xa70   :  { %5548 = vmax.xlane.f32.xlu1 %v5547_v48  ;;  %vm2382_vm12 = vmand %vm2365_vm0, %vm2378_vm8  ;;  %vm2387_vm0 = vcmp.ge.f32.partialorder %v10142_v45, -1.0  ;;  %vm2400_vm8 = vcmp.le.f32.partialorder %v10142_v45, %v9851_v52  ;;  %v2328_v38 = vsub.f32 1.0, %v2324_v31  ;;  %v13405_v48 = vmov 11  }
 0xa71   :  { %vm2403_vm14 = vmand %vm2386_vm10, %vm2399_vm13 }
 0xa74   :  { %3439 = vmax.xlane.f32.xlu1 %v3438_v54  ;;  %v2323_v54 = vsub.f32 %v2303_v3, %v10127_v11 }
 0xa78   :  { %4550 = vmax.xlane.f32.xlu1 %v4549_v28  ;;  %v13605_v28 = vmov 0  }
 0xa79   :  { %v2463_v3 = vsel %vm2403_vm14, 1, %v13605_v28  ;;  %v2408_v43 = vsel %vm2383_vm1, 1, %v13605_v28 }
 0xa7e   :  { %2537 = vrot.lane.b32.xlu0 %v2308_v37, %s9092_s24  ;;  %v2407_v37 = vsel %vm2382_vm12, 1, %v13605_v28  ;;  %vm2404_vm12 = vmand %vm2387_vm0, %vm2400_vm8 }
 0xa7f   :  { %v2464_v32 = vsel %vm2404_vm12, 1, %v13605_v28 }
 0xa82   :  { %2487 = vrot.lane.b32.xlu0 %v2323_v54, %s9088_s19 }
 0xa86   :  { %2411 = vrot.lane.b32.xlu0 %v2407_v37, %s9088_s19  ;;  %v2327_v37 = vsub.f32 1.0, %v2323_v54  ;;  %v13607_v54 = vmax.f32 %v10026_v14, -8.0  ;;  %v13365_v14 = vmov 7  }
 0xa87   :  { %8540 = vset.pattern.permute.xlu0 %v13365_v14 }
 0xa89   :  { %2535 = vrot.lane.b32.xlu1 %v10038_v5, %s9092_s24  ;;  %v10162_v5 = vfloor.f32 %v2305_v26 }
 0xa8a   :  { %2467 = vrot.lane.b32.xlu0 %v2463_v3, %s9088_s19  ;;  %v2306_v3 = vmin.f32 %v13607_v54, %v9847_v16  ;;  %v10206_v54 = vpop.permute.xlu1 %8533 }
 0xa8b   :  { %vm2367_vm10 = vcmp.ge.f32.partialorder %v10162_v5, 0.0  ;;  %vm2380_vm13 = vcmp.le.f32.partialorder %v10162_v5, %v9845_v1  ;;  %vm2388_vm2 = vcmp.ge.f32.partialorder %v10162_v5, -1.0  ;;  %vm2401_vm3 = vcmp.le.f32.partialorder %v10162_v5, %v9851_v52  ;;  %13609 = vst [vmem:[#allocation47_spill] sm:$0xff] %v10206_v54 }
 0xa8c   :  { %vm2384_vm14 = vmand %vm2367_vm10, %vm2380_vm13 }
 0xa8d   :  { %2489 = vrot.lane.b32.xlu1 %v2324_v31, %s9088_s19  ;;  %vm2405_vm1 = vmand %vm2388_vm2, %vm2401_vm3 }
 0xa8e   :  { %2541 = vrot.lane.b32.xlu0 %v10050_v62, %s9092_s24  ;;  %v2325_v62 = vsub.f32 %v2305_v26, %v10162_v5  ;;  %v2409_v26 = vsel %vm2384_vm14, 1, %v13605_v28  ;;  %v2465_v16 = vsel %vm2405_vm1, 1, %v13605_v28 }
 0xa91   :  { %2413 = vrot.lane.b32.xlu1 %v2408_v43, %s9088_s19  ;;  %v2329_v43 = vsub.f32 1.0, %v2325_v62 }
 0xa92   :  { %2431 = vrot.lane.b32.xlu0 %v2327_v37, %s9088_s19  ;;  %v10182_v37 = vfloor.f32 %v2306_v3 }
 0xa94   :  { %vm2368_vm0 = vcmp.ge.f32.partialorder %v10182_v37, 0.0  ;;  %vm2381_vm8 = vcmp.le.f32.partialorder %v10182_v37, %v9845_v1  ;;  %v2326_v31 = vsub.f32 %v2306_v3, %v10182_v37  ;;  %vm2389_vm10 = vcmp.ge.f32.partialorder %v10182_v37, -1.0 }
 0xa95   :  { %2469 = vrot.lane.b32.xlu1 %v2464_v32, %s9088_s19  ;;  %vm2385_vm12 = vmand %vm2368_vm0, %vm2381_vm8  ;;  %vm2402_vm13 = vcmp.le.f32.partialorder %v10182_v37, %v9851_v52  ;;  %v10204_v32 = vpop.permute.xlu0 %8528 }
 0xa96   :  { %2491 = vrot.lane.b32.xlu0 %v2325_v62, %s9088_s19  ;;  %vm2406_vm14 = vmand %vm2389_vm10, %vm2402_vm13  ;;  %v2330_v62 = vsub.f32 1.0, %v2326_v31  ;;  %13608 = vst [vmem:[#allocation46_spill] sm:$0xff] %v10204_v32 }
 0xa97   :  { %v2466_v1 = vsel %vm2406_vm14, 1, %v13605_v28 }
 0xa99   :  { %2433 = vrot.lane.b32.xlu1 %v2328_v38, %s9088_s19 }
 0xa9a   :  { %2415 = vrot.lane.b32.xlu0 %v2409_v26, %s9088_s19 }
 0xa9d   :  { %2539 = vrot.lane.b32.xlu1 %v10058_v0, %s9092_s24  ;;  %v2410_v0 = vsel %vm2385_vm12, 1, %v13605_v28 }
 0xa9e   :  { %2471 = vrot.lane.b32.xlu0 %v2465_v16, %s9088_s19 }
 0xaa1   :  { %2493 = vrot.lane.b32.xlu1 %v2326_v31, %s9088_s19 }
 0xaa2   :  { %2435 = vrot.lane.b32.xlu0 %v2329_v43, %s9088_s19 }
 0xaa5   :  { %2417 = vrot.lane.b32.xlu1 %v2410_v0, %s9088_s19 }
 0xaa9   :  { %2473 = vrot.lane.b32.xlu1 %v2466_v1, %s9088_s19 }
 0xaad   :  { %2437 = vrot.lane.b32.xlu1 %v2330_v62, %s9088_s19 }
 0xae1   :  { %v10208_v3 = vpop.xlane.xlu1 %3436  ;;  %v10210_v38 = vpop.xlane.xlu0 %2588 }
 0xae5   :  { %v10212_v52 = vpop.xlane.xlu1 %4547  ;;  %v10214_v26 = vpop.xlane.xlu0 %3433 }
 0xae9   :  { %v10216_v16 = vpop.xlane.xlu1 %5542  ;;  %v10218_v43 = vpop.xlane.xlu0 %5539 }
 0xaed   :  { %v10220_v0 = vpop.xlane.xlu1 %2585  ;;  %v10222_v31 = vpop.xlane.xlu0 %4553 }
 0xaf1   :  { %v10224_v1 = vpop.xlane.xlu1 %4544  ;;  %v10226_v62 = vpop.xlane.xlu0 %2591 }
 0xaf2   :  { %13610 = vst [vmem:[#allocation48_spill] sm:$0xff] %v10226_v62 }
 0xaf5   :  { %v10228_v14 = vpop.xlane.xlu1 %2594  ;;  %v10230_v54 = vpop.xlane.xlu0 %5545 }
 0xaf9   :  { %v10232_v32 = vpop.xlane.xlu1 %3442  ;;  %v10234_v56 = vpop.permute.xlu0 %2537 }
 0xafd   :  { %v10236_v29 = vpop.xlane.xlu1 %5548  ;;  %v10238_v50 = vpop.permute.xlu0 %2487 }
 0xafe   :  { %13611 = vst [vmem:[#allocation49_spill] sm:$0xff] %v10236_v29 }
 0xb01   :  { %v10240_v46 = vpop.xlane.xlu1 %3439  ;;  %v10242_v44 = vpop.permute.xlu0 %2411 }
 0xb02   :  { %13612 = vst [vmem:[#allocation50_spill] sm:$0xff] %v10240_v46  ;;  %vm2419_vm2 = vcmp.ne.s32.totalorder %v10242_v44, 0  ;;  %v13403_v46 = vmov 4  }
 0xb03   :  { %vm2423_vm3 = vmand %vm10078_vm15, %vm2419_vm2 }
 0xb05   :  { %v10244_v36 = vpop.xlane.xlu1 %4550  ;;  %v10246_v35 = vpop.permute.xlu0 %2467 }
 0xb09   :  { %v10248_v24 = vpop.permute.xlu1 %2535  ;;  %v10250_v59 = vpop.permute.xlu0 %2541 }
 0xb0d   :  { %v2490_v25 = vpop.permute.xlu1 %2489  ;;  %v10254_v9 = vpop.permute.xlu0 %2431 }
 0xb0e   :  { %v2443_v58 = vmul.f32 %v10254_v9, %v13391_v22  ;;  %v2500_v8 = vmul.f32 %v2490_v25, %v2320_v12  ;;  %v2512_v40 = vmul.f32 %v2490_v25, %v10041_v33 }
 0xb10   :  { %v10263_v7 = vsel %vm2423_vm3, %v2443_v58, 0.0 }
 0xb11   :  { %13613 = vst [vmem:[#allocation51_spill] sm:$0xff] %v10263_v7  ;;  %v2414_v2 = vpop.permute.xlu1 %2413  ;;  %v10265_v51 = vpop.permute.xlu0 %2491 }
 0xb12   :  { %vm2420_vm0 = vcmp.ne.s32.totalorder %v2414_v2, 0  ;;  %v2513_v60 = vmul.f32 %v10265_v51, %v10064_v41 }
 0xb13   :  { %vm2424_vm10 = vmand %vm10090_vm11, %vm2420_vm0 }
 0xb14   :  { %vm2452_vm13 = vmand %vm10096_vm9, %vm2420_vm0 }
 0xb15   :  { %v2470_v55 = vpop.permute.xlu1 %2469  ;;  %v10268_v6 = vpop.permute.xlu0 %2415 }
 0xb16   :  { %vm2476_vm1 = vcmp.ne.s32.totalorder %v2470_v55, 0  ;;  %vm2421_vm14 = vcmp.ne.s32.totalorder %v10268_v6, 0 }
 0xb17   :  { %vm2480_vm8 = vmand %vm10090_vm11, %vm2476_vm1 }
 0xb18   :  { %v10273_v22 = vsel %vm2480_vm8, %v2500_v8, 0.0  ;;  %vm2508_vm12 = vmand %vm10096_vm9, %vm2476_vm1  ;;  %v13395_v8 = vsub.f32 1.0, %v10064_v41 }
 0xb19   :  { %13614 = vst [vmem:[#allocation52_spill] sm:$0xff] %v10273_v22  ;;  %v10277_v58 = vsel %vm2508_vm12, %v2512_v40, 0.0  ;;  %v2434_v4 = vpop.permute.xlu1 %2433  ;;  %v10279_v42 = vpop.permute.xlu0 %2471  ;;  %4009 = vperm.xlu0 %8540, %v10273_v22   ;;  %2732 = vperm.xlu1 %8537, %v10273_v22   ;;  %vm2425_vm9 = vmand %vm10103_vm7, %vm2421_vm14 }
 0xb1a   :  { %13615 = vst [vmem:[#allocation53_spill] sm:$0xff] %v10277_v58  ;;  %v2444_v55 = vmul.f32 %v2434_v4, %v2320_v12  ;;  %v2456_v25 = vmul.f32 %v2434_v4, %v10041_v33 }
 0xb1c   :  { %v10290_v40 = vsel %vm2424_vm10, %v2444_v55, 0.0  ;;  %v10292_v2 = vsel %vm2452_vm13, %v2456_v25, 0.0  ;;  %vm13627_vm10 = vnez %v13588_v21 }
 0xb1d   :  { %13616 = vst [vmem:[#allocation54_spill] sm:$0xff] %v10290_v40  ;;  %13617 = vst [vmem:[#allocation55_spill] sm:$0xff] %v10292_v2  ;;  %4037 = vperm.xlu0 %8540, %v10277_v58   ;;  %v10295_v61 = vpop.permute.xlu0 %2435  ;;  %2764 = vperm.xlu1 %8537, %v10277_v58   ;;  %v10298_v12 = vpop.permute.xlu1 %2539 }
 0xb1e   :  { %v2445_v4 = vmul.f32 %v10295_v61, %v13395_v8  ;;  %v13401_v8 = vmov 6  }
 0xb20   :  { %v10307_v33 = vsel %vm2425_vm9, %v2445_v4, 0.0  ;;  %v2322_v4 = vsub.f32 1.0, %v10061_v30 }
 0xb21   :  { %13618 = vst [vmem:[#allocation56_spill] sm:$0xff] %v10307_v33  ;;  %8542 = vset.pattern.permute.xlu0 %v13397_v10  ;;  %8538 = vset.pattern.permute.xlu1 %v13399_v23  ;;  %v2494_v55 = vpop.permute.xlu1 %2493 }
 0xb22   :  { %3178 = vperm.xlu0 %8542, %v10273_v22   ;;  %2886 = vperm.xlu1 %8538, %v10273_v22   ;;  %v2502_v10 = vmul.f32 %v2494_v55, %v2322_v4  ;;  %v2514_v23 = vmul.f32 %v2494_v55, %v10061_v30 }
 0xb25   :  { %v2418_v25 = vpop.permute.xlu1 %2417 }
 0xb26   :  { %3206 = vperm.xlu0 %8542, %v10277_v58   ;;  %8539 = vset.pattern.permute.xlu1 %v13401_v8  ;;  %vm2422_vm3 = vcmp.ne.s32.totalorder %v2418_v25, 0 }
 0xb27   :  { %3865 = vperm.xlu1 %8539, %v10273_v22   ;;  %vm2426_vm8 = vmand %vm10114_vm4, %vm2422_vm3 }
 0xb28   :  { %vm2454_vm12 = vmand %vm10118_vm6, %vm2422_vm3 }
 0xb29   :  { %v2474_v39 = vpop.permute.xlu1 %2473 }
 0xb2a   :  { %vm2478_vm11 = vcmp.ne.s32.totalorder %v2474_v39, 0  ;;  %8546 = vset.pattern.permute.xlu0 %v13403_v46  ;;  %v13411_v46 = vmov 5  }
 0xb2b   :  { %vm2482_vm1 = vmand %vm10114_vm4, %vm2478_vm11  ;;  %3597 = vperm.xlu0 %8546, %v10277_v58   ;;  %3893 = vperm.xlu1 %8539, %v10277_v58   ;;  %vm2475_vm4 = vcmp.ne.s32.totalorder %v10246_v35, 0  ;;  %v2511_v35 = vmul.f32 %v10238_v50, %v10046_v27 }
 0xb2c   :  { %v10323_v8 = vsel %vm2482_vm1, %v2502_v10, 0.0  ;;  %vm2510_vm0 = vmand %vm10118_vm6, %vm2478_vm11  ;;  %v13417_v10 = vmov 2  }
 0xb2d   :  { %13619 = vst [vmem:[#allocation57_spill] sm:$0xff] %v10323_v8  ;;  %v10327_v62 = vsel %vm2510_vm0, %v2514_v23, 0.0  ;;  %v2438_v39 = vpop.permute.xlu1 %2437  ;;  %vm2479_vm6 = vmand %vm10078_vm15, %vm2475_vm4 }
 0xb2e   :  { %13620 = vst [vmem:[#allocation58_spill] sm:$0xff] %v10327_v62  ;;  %v2446_v55 = vmul.f32 %v2438_v39, %v2322_v4  ;;  %v2458_v25 = vmul.f32 %v2438_v39, %v10061_v30  ;;  %v13623_v30 = vmov 4   ;;  %v13409_v4 = vmov 10   ;;  %vm2507_vm13 = vmand %vm13627_vm10, %vm2475_vm4 }
 0xb2f   :  { %8547 = vset.pattern.permute.xlu0 %v13411_v46  ;;  %8541 = vset.pattern.permute.xlu1 %v13417_v10  ;;  %v13625_v39 = vsub.f32 1.0, %v10046_v27  ;;  %v10371_v20 = vsel %vm2507_vm13, %v2511_v35, 0.0  ;;  %v13631_v35 = vmov 3   ;;  %vm2451_vm15 = vmand %vm13627_vm10, %vm2419_vm2  ;;  %vm2477_vm2 = vcmp.ne.s32.totalorder %v10279_v42, 0 }
 0xb30   :  { %v10336_v29 = vsel %vm2426_vm8, %v2446_v55, 0.0  ;;  %v10338_v23 = vsel %vm2454_vm12, %v2458_v25, 0.0  ;;  %3745 = vperm.xlu0 %8547, %v10277_v58   ;;  %3034 = vperm.xlu1 %8541, %v10273_v22   ;;  %13628 = vst [vmem:[#allocation62_spill] sm:$0xff] %v10371_v20  ;;  %vm2481_vm9 = vmand %vm10103_vm7, %vm2477_vm2 }
 0xb31   :  { %13621 = vst [vmem:[#allocation59_spill] sm:$0xff] %v10336_v29  ;;  %13622 = vst [vmem:[#allocation60_spill] sm:$0xff] %v10338_v23  ;;  %v2499_v55 = vmul.f32 %v10238_v50, %v13625_v39  ;;  %v13629_v39 = vmov 6   ;;  %v13630_v50 = vmov 7  }
 0xb32   :  { %vm2509_vm11 = vmand %vm10110_vm5, %vm2477_vm2 }
 0xb33   :  { %v10363_v25 = vsel %vm2479_vm6, %v2499_v55, 0.0  ;;  %v13407_v55 = vmov 9   ;;  %vm2453_vm7 = vmand %vm10110_vm5, %vm2421_vm14  ;;  %vm2624_vm5 = vcmask 31744  }
 0xb34   :  { %8549 = vset.pattern.permute.xlu0 %v13405_v48  ;;  %8543 = vset.pattern.permute.xlu1 %v13623_v30  ;;  %13626 = vst [vmem:[#allocation61_spill] sm:$0xff] %v10363_v25  ;;  %v13423_v48 = vmov 8  }
 0xb35   :  { %5120 = vperm.xlu0 %8549, %v10273_v22   ;;  %3569 = vperm.xlu1 %8543, %v10273_v22  }
 0xb39   :  { %5148 = vperm.xlu0 %8549, %v10277_v58   ;;  %8544 = vset.pattern.permute.xlu1 %v13411_v46 }
 0xb3a   :  { %3717 = vperm.xlu1 %8544, %v10273_v22  }
 0xb3d   :  { %8550 = vset.pattern.permute.xlu0 %v13624_v34 }
 0xb3e   :  { %2914 = vperm.xlu0 %8550, %v10277_v58   ;;  %8545 = vset.pattern.permute.xlu1 %v13417_v10 }
 0xb3f   :  { %3062 = vperm.xlu1 %8545, %v10277_v58  }
 0xb42   :  { %8556 = vset.pattern.permute.xlu0 %v13605_v28 }
 0xb43   :  { %2700 = vperm.xlu0 %8556, %v10292_v2   ;;  %8548 = vset.pattern.permute.xlu1 %v13409_v4 }
 0xb44   :  { %4976 = vperm.xlu1 %8548, %v10273_v22  }
 0xb47   :  { %2727 = vperm.xlu0 %8556, %v10363_v25  }
 0xb48   :  { %5004 = vperm.xlu1 %8548, %v10277_v58  }
 0xb4b   :  { %2759 = vperm.xlu0 %8556, %v10371_v20  }
 0xb4c   :  { %8551 = vset.pattern.permute.xlu1 %v13423_v48 }
 0xb4d   :  { %4680 = vperm.xlu1 %8551, %v10273_v22  }
 0xb4f   :  { %8558 = vset.pattern.permute.xlu0 %v13629_v39 }
 0xb50   :  { %3813 = vperm.xlu0 %8558, %v10290_v40  }
 0xb51   :  { %8552 = vset.pattern.permute.xlu1 %v13407_v55 }
 0xb52   :  { %4828 = vperm.xlu1 %8552, %v10273_v22  }
 0xb54   :  { %8560 = vset.pattern.permute.xlu0 %v13630_v50 }
 0xb55   :  { %3957 = vperm.xlu0 %8560, %v10290_v40  }
 0xb56   :  { %8553 = vset.pattern.permute.xlu1 %v13423_v48 }
 0xb57   :  { %4708 = vperm.xlu1 %8553, %v10277_v58  }
 0xb59   :  { %4005 = vperm.xlu0 %8560, %v10363_v25  }
 0xb5b   :  { %8554 = vset.pattern.permute.xlu1 %v13407_v55  ;;  %v13632_v55 = vmov 11  }
 0xb5c   :  { %4856 = vperm.xlu1 %8554, %v10277_v58   ;;  %v13633_v58 = vmov 9  }
 0xb5d   :  { %4033 = vperm.xlu0 %8560, %v10371_v20  }
 0xb60   :  { %8555 = vset.pattern.permute.xlu1 %v13605_v28 }
 0xb61   :  { %8564 = vset.pattern.permute.xlu0 %v13417_v10  ;;  %2672 = vperm.xlu1 %8555, %v10290_v40  }
 0xb62   :  { %3006 = vperm.xlu0 %8564, %v10292_v2  }
 0xb65   :  { %8557 = vset.pattern.permute.xlu1 %v13624_v34 }
 0xb66   :  { %8569 = vset.pattern.permute.xlu0 %v13631_v35  ;;  %2834 = vperm.xlu1 %8557, %v10290_v40  }
 0xb67   :  { %3174 = vperm.xlu0 %8569, %v10363_v25  }
 0xb6a   :  { %2858 = vperm.xlu1 %8557, %v10292_v2  }
 0xb6b   :  { %3202 = vperm.xlu0 %8569, %v10371_v20  }
 0xb6e   :  { %2882 = vperm.xlu1 %8557, %v10363_v25  }
 0xb6f   :  { %8573 = vset.pattern.permute.xlu0 %v13623_v30 }
 0xb70   :  { %3593 = vperm.xlu0 %8573, %v10371_v20  }
 0xb72   :  { %8559 = vset.pattern.permute.xlu1 %v13629_v39 }
 0xb73   :  { %3837 = vperm.xlu1 %8559, %v10292_v2  }
 0xb74   :  { %8574 = vset.pattern.permute.xlu0 %v13411_v46 }
 0xb75   :  { %3741 = vperm.xlu0 %8574, %v10371_v20  }
 0xb77   :  { %8561 = vset.pattern.permute.xlu1 %v13630_v50 }
 0xb78   :  { %3981 = vperm.xlu1 %8561, %v10292_v2  }
 0xb79   :  { %8576 = vset.pattern.permute.xlu0 %v13409_v4  ;;  %v2528_v4 = vmul.f32 %v9849_v15, %v10142_v45  ;;  %v13419_v45 = vmov 17  }
 0xb7a   :  { %4948 = vperm.xlu0 %8576, %v10292_v2  }
 0xb7b   :  { %v2548_v46 = vadd.f32 %v10234_v56, %v2528_v4 }
 0xb7c   :  { %8562 = vset.pattern.permute.xlu1 %v13629_v39 }
 0xb7d   :  { %3861 = vperm.xlu1 %8562, %v10363_v25   ;;  %v2576_v22 = vadd.f32 %v9853_v19, %v2548_v46  ;;  %v2455_v19 = vmul.f32 %v10254_v9, %v10046_v27  ;;  %v13421_v27 = vmov 23  }
 0xb7e   :  { %4972 = vperm.xlu0 %8576, %v10363_v25  }
 0xb7f   :  { %v10451_v4 = vsel %vm2451_vm15, %v2455_v19, 0.0  ;;  %v13425_v19 = vmov 20  }
 0xb80   :  { %13638 = vst [vmem:[#allocation66_spill] sm:$0xff] %v10451_v4 }
 0xb81   :  { %3889 = vperm.xlu1 %8562, %v10371_v20  }
 0xb82   :  { %8579 = vset.pattern.permute.xlu0 %v13632_v55 }
 0xb83   :  { %5144 = vperm.xlu0 %8579, %v10371_v20  }
 0xb85   :  { %8563 = vset.pattern.permute.xlu1 %v13417_v10  ;;  %v8276_v10 = vtrunc.f32 %v2576_v22  ;;  %v13636_v22 = vmov 5  }
 0xb86   :  { %2982 = vperm.xlu1 %8563, %v10290_v40  }
 0xb87   :  { %8582 = vset.pattern.permute.xlu0 %v13423_v48  ;;  %v10432_v56 = vcvt.f32.s32 %v8276_v10 }
 0xb88   :  { %4652 = vperm.xlu0 %8582, %v10292_v2  }
 0xb89   :  { %13634 = vst [vmem:[#allocation63_spill] sm:$0xff] %v10432_v56 }
 0xb8a   :  { %8565 = vset.pattern.permute.xlu1 %v13631_v35 }
 0xb8b   :  { %3126 = vperm.xlu1 %8565, %v10290_v40  }
 0xb8c   :  { %8584 = vset.pattern.permute.xlu0 %v13633_v58 }
 0xb8d   :  { %4800 = vperm.xlu0 %8584, %v10292_v2  }
 0xb8f   :  { %3150 = vperm.xlu1 %8565, %v10292_v2  }
 0xb91   :  { %8585 = vset.pattern.permute.xlu0 %v13423_v48 }
 0xb92   :  { %4676 = vperm.xlu0 %8585, %v10363_v25  }
 0xb93   :  { %8566 = vset.pattern.permute.xlu1 %v13623_v30 }
 0xb94   :  { %3517 = vperm.xlu1 %8566, %v10290_v40  }
 0xb96   :  { %8590 = vset.pattern.permute.xlu0 %v13419_v45  ;;  %v13640_v45 = vmov 2  }
 0xb97   :  { %2813 = vperm.xlu0 %8590, %v10432_v56  }
 0xb98   :  { %3541 = vperm.xlu1 %8566, %v10292_v2   ;;  %v10437_v46 = vpop.permute.xlu1 %2732 }
 0xb99   :  { %13635 = vst [vmem:[#allocation64_spill] sm:$0xff] %v10437_v46 }
 0xb9b   :  { %8591 = vset.pattern.permute.xlu0 %v13624_v34 }
 0xb9c   :  { %2830 = vperm.xlu0 %8591, %v10263_v7   ;;  %8567 = vset.pattern.permute.xlu1 %v13636_v22  ;;  %v10444_v10 = vpop.permute.xlu1 %2764 }
 0xb9d   :  { %13637 = vst [vmem:[#allocation65_spill] sm:$0xff] %v10444_v10  ;;  %3665 = vperm.xlu1 %8567, %v10290_v40   ;;  %v2527_v10 = vmul.f32 %v9849_v15, %v10127_v11 }
 0xba0   :  { %2854 = vperm.xlu0 %8591, %v10451_v4  }
 0xba1   :  { %3689 = vperm.xlu1 %8567, %v10292_v2   ;;  %v10455_v9 = vpop.permute.xlu1 %2886 }
 0xba2   :  { %13639 = vst [vmem:[#allocation67_spill] sm:$0xff] %v10455_v9 }
 0xba4   :  { %8593 = vset.pattern.permute.xlu0 %v13421_v27 }
 0xba5   :  { %3936 = vperm.xlu0 %8593, %v10432_v56   ;;  %8568 = vset.pattern.permute.xlu1 %v13640_v45 }
 0xba6   :  { %3030 = vperm.xlu1 %8568, %v10363_v25   ;;  %v10461_v44 = vpop.permute.xlu1 %3865 }
 0xba7   :  { %13641 = vst [vmem:[#allocation68_spill] sm:$0xff] %v10461_v44  ;;  %v13427_v44 = vmov 27  }
 0xba9   :  { %8595 = vset.pattern.permute.xlu0 %v13629_v39 }
 0xbaa   :  { %3833 = vperm.xlu0 %8595, %v10451_v4   ;;  %8570 = vset.pattern.permute.xlu1 %v13623_v30  ;;  %v10466_v21 = vpop.permute.xlu1 %3893 }
 0xbab   :  { %13642 = vst [vmem:[#allocation69_spill] sm:$0xff] %v10466_v21  ;;  %3565 = vperm.xlu1 %8570, %v10363_v25  }
 0xbae   :  { %8599 = vset.pattern.permute.xlu0 %v13425_v19  ;;  %v13645_v19 = vmov 10  }
 0xbaf   :  { %3496 = vperm.xlu0 %8599, %v10432_v56   ;;  %8571 = vset.pattern.permute.xlu1 %v13636_v22  ;;  %v10472_v27 = vpop.permute.xlu1 %3034 }
 0xbb0   :  { %13643 = vst [vmem:[#allocation70_spill] sm:$0xff] %v10472_v27  ;;  %3713 = vperm.xlu1 %8571, %v10363_v25  }
 0xbb3   :  { %8601 = vset.pattern.permute.xlu0 %v13640_v45 }
 0xbb4   :  { %2978 = vperm.xlu0 %8601, %v10263_v7   ;;  %8572 = vset.pattern.permute.xlu1 %v13640_v45  ;;  %v10478_v48 = vpop.permute.xlu1 %3569 }
 0xbb5   :  { %13644 = vst [vmem:[#allocation71_spill] sm:$0xff] %v10478_v48  ;;  %3058 = vperm.xlu1 %8572, %v10371_v20  }
 0xbb8   :  { %8604 = vset.pattern.permute.xlu0 %v13631_v35 }
 0xbb9   :  { %3146 = vperm.xlu0 %8604, %v10451_v4   ;;  %8575 = vset.pattern.permute.xlu1 %v13645_v19  ;;  %v10484_v21 = vpop.permute.xlu1 %3717 }
 0xbba   :  { %13646 = vst [vmem:[#allocation72_spill] sm:$0xff] %v10484_v21  ;;  %4924 = vperm.xlu1 %8575, %v10290_v40  }
 0xbbd   :  { %8606 = vset.pattern.permute.xlu0 %v13636_v22 }
 0xbbe   :  { %3661 = vperm.xlu0 %8606, %v10263_v7   ;;  %8577 = vset.pattern.permute.xlu1 %v13632_v55  ;;  %v10490_v27 = vpop.permute.xlu1 %3062 }
 0xbbf   :  { %13647 = vst [vmem:[#allocation73_spill] sm:$0xff] %v10490_v27  ;;  %5068 = vperm.xlu1 %8577, %v10290_v40   ;;  %v2547_v27 = vadd.f32 %v10248_v24, %v2527_v10 }
 0xbc2   :  { %8609 = vset.pattern.permute.xlu0 %v13427_v44  ;;  %v10507_v44 = vpop.permute.xlu0 %4009 }
 0xbc3   :  { %5047 = vperm.xlu0 %8609, %v10432_v56   ;;  %5092 = vperm.xlu1 %8577, %v10292_v2   ;;  %v10496_v21 = vpop.permute.xlu1 %4976  ;;  %13650 = vst [vmem:[#allocation76_spill] sm:$0xff] %v10507_v44  ;;  %v13431_v2 = vmov 25  }
 0xbc4   :  { %13648 = vst [vmem:[#allocation74_spill] sm:$0xff] %v10496_v21  ;;  %v2575_v21 = vadd.f32 %v9855_v18, %v2547_v27  ;;  %v13433_v18 = vmov 16  }
 0xbc6   :  { %v10520_v10 = vpop.permute.xlu0 %4037 }
 0xbc7   :  { %8611 = vset.pattern.permute.xlu0 %v13645_v19  ;;  %5116 = vperm.xlu1 %8577, %v10363_v25   ;;  %v10502_v46 = vpop.permute.xlu1 %5004  ;;  %13653 = vst [vmem:[#allocation79_spill] sm:$0xff] %v10520_v10 }
 0xbc8   :  { %13649 = vst [vmem:[#allocation75_spill] sm:$0xff] %v10502_v46  ;;  %4944 = vperm.xlu0 %8611, %v10451_v4   ;;  %v8274_v46 = vtrunc.f32 %v2575_v21 }
 0xbca   :  { %v10531_v21 = vpop.permute.xlu0 %3178 }
 0xbcb   :  { %8578 = vset.pattern.permute.xlu1 %v13645_v19  ;;  %13657 = vst [vmem:[#allocation82_spill] sm:$0xff] %v10531_v21 }
 0xbcc   :  { %8614 = vset.pattern.permute.xlu0 %v13431_v2  ;;  %5000 = vperm.xlu1 %8578, %v10371_v20   ;;  %v10511_v11 = vpop.permute.xlu1 %4680  ;;  %v10523_v2 = vcvt.f32.s32 %v8274_v46 }
 0xbcd   :  { %13651 = vst [vmem:[#allocation77_spill] sm:$0xff] %v10511_v11  ;;  %4755 = vperm.xlu0 %8614, %v10432_v56   ;;  %v13655_v11 = vmov 8  }
 0xbce   :  { %13654 = vst [vmem:[#allocation80_spill] sm:$0xff] %v10523_v2  ;;  %v10539_v10 = vpop.permute.xlu0 %3206 }
 0xbcf   :  { %13660 = vst [vmem:[#allocation84_spill] sm:$0xff] %v10539_v10 }
 0xbd0   :  { %8580 = vset.pattern.permute.xlu1 %v13624_v34 }
 0xbd1   :  { %8617 = vset.pattern.permute.xlu0 %v13633_v58  ;;  %2910 = vperm.xlu1 %8580, %v10371_v20   ;;  %v10518_v24 = vpop.permute.xlu1 %4828 }
 0xbd2   :  { %13652 = vst [vmem:[#allocation78_spill] sm:$0xff] %v10518_v24  ;;  %4796 = vperm.xlu0 %8617, %v10451_v4   ;;  %v13658_v24 = vmov 23   ;;  %v10547_v21 = vpop.permute.xlu0 %3597 }
 0xbd3   :  { %13662 = vst [vmem:[#allocation86_spill] sm:$0xff] %v10547_v21  ;;  %v13443_v21 = vmov 22  }
 0xbd5   :  { %8581 = vset.pattern.permute.xlu1 %v13655_v11 }
 0xbd6   :  { %8618 = vset.pattern.permute.xlu0 %v13433_v18  ;;  %4628 = vperm.xlu1 %8581, %v10290_v40   ;;  %v10528_v27 = vpop.permute.xlu1 %4708  ;;  %v13435_v18 = vmov 19  }
 0xbd7   :  { %13656 = vst [vmem:[#allocation81_spill] sm:$0xff] %v10528_v27  ;;  %2646 = vperm.xlu0 %8618, %v10523_v2  }
 0xbda   :  { %8583 = vset.pattern.permute.xlu1 %v13633_v58 }
 0xbdb   :  { %8621 = vset.pattern.permute.xlu0 %v13658_v24  ;;  %4776 = vperm.xlu1 %8583, %v10290_v40   ;;  %v10536_v46 = vpop.permute.xlu1 %4856  ;;  %v13664_v40 = vmov 16  }
 0xbdc   :  { %13659 = vst [vmem:[#allocation83_spill] sm:$0xff] %v10536_v46  ;;  %3933 = vperm.xlu0 %8621, %v10523_v2  }
 0xbdf   :  { %4824 = vperm.xlu1 %8583, %v10363_v25   ;;  %v10558_v25 = vpop.permute.xlu0 %3745 }
 0xbe0   :  { %8623 = vset.pattern.permute.xlu0 %v13435_v18  ;;  %v10543_v27 = vpop.permute.xlu1 %2672  ;;  %13663 = vst [vmem:[#allocation87_spill] sm:$0xff] %v10558_v25 }
 0xbe1   :  { %13661 = vst [vmem:[#allocation85_spill] sm:$0xff] %v10543_v27  ;;  %3102 = vperm.xlu0 %8623, %v10523_v2  }
 0xbe3   :  { %8586 = vset.pattern.permute.xlu1 %v13655_v11  ;;  %v10567_v27 = vpop.permute.xlu0 %5120 }
 0xbe4   :  { %4704 = vperm.xlu1 %8586, %v10371_v20   ;;  %13666 = vst [vmem:[#allocation89_spill] sm:$0xff] %v10567_v27 }
 0xbe5   :  { %8631 = vset.pattern.permute.xlu0 %v13624_v34  ;;  %v10551_v46 = vpop.permute.xlu1 %2834 }
 0xbe6   :  { %2894 = vperm.xlu0 %8631, %v10323_v8  }
 0xbe7   :  { %v10575_v25 = vpop.permute.xlu0 %5148 }
 0xbe8   :  { %8587 = vset.pattern.permute.xlu1 %v13633_v58  ;;  %13668 = vst [vmem:[#allocation91_spill] sm:$0xff] %v10575_v25 }
 0xbe9   :  { %4852 = vperm.xlu1 %8587, %v10371_v20   ;;  %v10556_v18 = vpop.permute.xlu1 %2858 }
 0xbea   :  { %8634 = vset.pattern.permute.xlu0 %v13629_v39 }
 0xbeb   :  { %3901 = vperm.xlu0 %8634, %v10327_v62   ;;  %v10583_v27 = vpop.permute.xlu0 %2914 }
 0xbec   :  { %13670 = vst [vmem:[#allocation93_spill] sm:$0xff] %v10583_v27  ;;  %v13445_v27 = vmov 18  }
 0xbed   :  { %8588 = vset.pattern.permute.xlu1 %v13664_v40  ;;  %v10563_v10 = vpop.permute.xlu1 %2882 }
 0xbee   :  { %13665 = vst [vmem:[#allocation88_spill] sm:$0xff] %v10563_v10  ;;  %2649 = vperm.xlu1 %8588, %v10432_v56  }
 0xbef   :  { %8635 = vset.pattern.permute.xlu0 %v13623_v30  ;;  %v10595_v48 = vpop.permute.xlu0 %2700 }
 0xbf0   :  { %3577 = vperm.xlu0 %8635, %v10323_v8   ;;  %13673 = vst [vmem:[#allocation96_spill] sm:$0xff] %v10595_v48 }
 0xbf2   :  { %8589 = vset.pattern.permute.xlu1 %v13605_v28  ;;  %v10571_v20 = vpop.permute.xlu1 %3837 }
 0xbf3   :  { %13667 = vst [vmem:[#allocation90_spill] sm:$0xff] %v10571_v20  ;;  %2667 = vperm.xlu1 %8589, %v10263_v7   ;;  %v10615_v48 = vpop.permute.xlu0 %2727 }
 0xbf4   :  { %3605 = vperm.xlu0 %8635, %v10327_v62   ;;  %13677 = vst [vmem:[#allocation99_spill] sm:$0xff] %v10615_v48 }
 0xbf7   :  { %2695 = vperm.xlu1 %8589, %v10451_v4   ;;  %v10578_v10 = vpop.permute.xlu1 %3981 }
 0xbf8   :  { %13669 = vst [vmem:[#allocation92_spill] sm:$0xff] %v10578_v10  ;;  %8638 = vset.pattern.permute.xlu0 %v13631_v35  ;;  %v2529_v10 = vmul.f32 %v9849_v15, %v10162_v5 }
 0xbf9   :  { %3186 = vperm.xlu0 %8638, %v10323_v8  }
 0xbfb   :  { %8592 = vset.pattern.permute.xlu1 %v13443_v21  ;;  %v13674_v21 = vsub.f32 1.0, %v10064_v41 }
 0xbfc   :  { %3792 = vperm.xlu1 %8592, %v10432_v56   ;;  %v10586_v20 = vpop.permute.xlu1 %3861 }
 0xbfd   :  { %13671 = vst [vmem:[#allocation94_spill] sm:$0xff] %v10586_v20  ;;  %3214 = vperm.xlu0 %8638, %v10327_v62   ;;  %v2501_v20 = vmul.f32 %v10265_v51, %v13674_v21  ;;  %v10617_v21 = vsel %vm2509_vm11, %v2513_v60, 0.0  ;;  %v13682_v51 = vmov 19  }
 0xbfe   :  { %13678 = vst [vmem:[#allocation100_spill] sm:$0xff] %v10617_v21 }
 0xc00   :  { %8594 = vset.pattern.permute.xlu1 %v13629_v39  ;;  %v10591_v25 = vpop.permute.xlu1 %3889 }
 0xc01   :  { %13672 = vst [vmem:[#allocation95_spill] sm:$0xff] %v10591_v25  ;;  %8641 = vset.pattern.permute.xlu0 %v13624_v34  ;;  %3809 = vperm.xlu1 %8594, %v10263_v7   ;;  %v10606_v25 = vsel %vm2481_vm9, %v2501_v20, 0.0 }
 0xc02   :  { %2922 = vperm.xlu0 %8641, %v10327_v62   ;;  %13676 = vst [vmem:[#allocation98_spill] sm:$0xff] %v10606_v25 }
 0xc05   :  { %8596 = vset.pattern.permute.xlu1 %v13630_v50  ;;  %v10604_v42 = vpop.permute.xlu1 %2982 }
 0xc06   :  { %13675 = vst [vmem:[#allocation97_spill] sm:$0xff] %v10604_v42  ;;  %8649 = vset.pattern.permute.xlu0 %v13605_v28  ;;  %3953 = vperm.xlu1 %8596, %v10263_v7   ;;  %v10623_v42 = vpop.permute.xlu0 %2759 }
 0xc07   :  { %2737 = vperm.xlu0 %8649, %v10606_v25   ;;  %13680 = vst [vmem:[#allocation102_spill] sm:$0xff] %v10623_v42 }
 0xc0a   :  { %3977 = vperm.xlu1 %8596, %v10451_v4   ;;  %v10620_v20 = vpop.permute.xlu1 %3126 }
 0xc0b   :  { %13679 = vst [vmem:[#allocation101_spill] sm:$0xff] %v10620_v20  ;;  %2769 = vperm.xlu0 %8649, %v10617_v21   ;;  %v10634_v20 = vpop.permute.xlu0 %3813 }
 0xc0c   :  { %13684 = vst [vmem:[#allocation105_spill] sm:$0xff] %v10634_v20 }
 0xc0e   :  { %8597 = vset.pattern.permute.xlu1 %v13445_v27  ;;  %v10626_v44 = vpop.permute.xlu1 %3150  ;;  %v13447_v27 = vmov 21  }
 0xc0f   :  { %13681 = vst [vmem:[#allocation103_spill] sm:$0xff] %v10626_v44  ;;  %2961 = vperm.xlu1 %8597, %v10432_v56   ;;  %8650 = vset.pattern.permute.xlu0 %v13624_v34  ;;  %v10644_v44 = vpop.permute.xlu0 %3957 }
 0xc10   :  { %2842 = vperm.xlu0 %8650, %v10336_v29   ;;  %13686 = vst [vmem:[#allocation107_spill] sm:$0xff] %v10644_v44 }
 0xc13   :  { %8598 = vset.pattern.permute.xlu1 %v13682_v51  ;;  %v10632_v60 = vpop.permute.xlu1 %3517  ;;  %v10652_v20 = vpop.permute.xlu0 %4005 }
 0xc14   :  { %13683 = vst [vmem:[#allocation104_spill] sm:$0xff] %v10632_v60  ;;  %3105 = vperm.xlu1 %8598, %v10432_v56   ;;  %2890 = vperm.xlu0 %8650, %v10606_v25   ;;  %13688 = vst [vmem:[#allocation109_spill] sm:$0xff] %v10652_v20 }
 0xc17   :  { %v10638_v42 = vpop.permute.xlu1 %3541 }
 0xc18   :  { %13685 = vst [vmem:[#allocation106_spill] sm:$0xff] %v10638_v42  ;;  %8600 = vset.pattern.permute.xlu1 %v13447_v27  ;;  %8652 = vset.pattern.permute.xlu0 %v13629_v39 }
 0xc19   :  { %3644 = vperm.xlu1 %8600, %v10432_v56   ;;  %3821 = vperm.xlu0 %8652, %v10336_v29  }
 0xc1c   :  { %v10646_v48 = vpop.permute.xlu1 %3665 }
 0xc1d   :  { %13687 = vst [vmem:[#allocation108_spill] sm:$0xff] %v10646_v48  ;;  %8602 = vset.pattern.permute.xlu1 %v13640_v45  ;;  %8655 = vset.pattern.permute.xlu0 %v13630_v50  ;;  %v10661_v48 = vpop.permute.xlu0 %4033 }
 0xc1e   :  { %3002 = vperm.xlu1 %8602, %v10451_v4   ;;  %3989 = vperm.xlu0 %8655, %v10338_v23   ;;  %13691 = vst [vmem:[#allocation112_spill] sm:$0xff] %v10661_v48  ;;  %v13449_v48 = vmov 26  }
 0xc20   :  { %v10654_v27 = vpop.permute.xlu1 %3689 }
 0xc21   :  { %13689 = vst [vmem:[#allocation110_spill] sm:$0xff] %v10654_v27  ;;  %v10670_v27 = vpop.permute.xlu0 %3006 }
 0xc22   :  { %8603 = vset.pattern.permute.xlu1 %v13631_v35  ;;  %4013 = vperm.xlu0 %8655, %v10606_v25   ;;  %13693 = vst [vmem:[#allocation114_spill] sm:$0xff] %v10670_v27 }
 0xc23   :  { %3122 = vperm.xlu1 %8603, %v10263_v7  }
 0xc25   :  { %v10659_v9 = vpop.permute.xlu1 %3030 }
 0xc26   :  { %13690 = vst [vmem:[#allocation111_spill] sm:$0xff] %v10659_v9  ;;  %4041 = vperm.xlu0 %8655, %v10617_v21   ;;  %v10678_v9 = vpop.permute.xlu0 %3174 }
 0xc27   :  { %8605 = vset.pattern.permute.xlu1 %v13623_v30  ;;  %13695 = vst [vmem:[#allocation116_spill] sm:$0xff] %v10678_v9 }
 0xc28   :  { %3513 = vperm.xlu1 %8605, %v10263_v7  }
 0xc2a   :  { %v10666_v42 = vpop.permute.xlu1 %3565  ;;  %8659 = vset.pattern.permute.xlu0 %v13623_v30 }
 0xc2b   :  { %13692 = vst [vmem:[#allocation113_spill] sm:$0xff] %v10666_v42  ;;  %3573 = vperm.xlu0 %8659, %v10606_v25  }
 0xc2c   :  { %3537 = vperm.xlu1 %8605, %v10451_v4  }
 0xc2f   :  { %v10673_v20 = vpop.permute.xlu1 %3713  ;;  %3601 = vperm.xlu0 %8659, %v10617_v21  }
 0xc30   :  { %13694 = vst [vmem:[#allocation115_spill] sm:$0xff] %v10673_v20  ;;  %8607 = vset.pattern.permute.xlu1 %v13636_v22  ;;  %v10686_v20 = vpop.permute.xlu0 %3202 }
 0xc31   :  { %3685 = vperm.xlu1 %8607, %v10451_v4   ;;  %13697 = vst [vmem:[#allocation118_spill] sm:$0xff] %v10686_v20 }
 0xc33   :  { %8661 = vset.pattern.permute.xlu0 %v13631_v35 }
 0xc34   :  { %v10681_v42 = vpop.permute.xlu1 %3058  ;;  %3134 = vperm.xlu0 %8661, %v10336_v29  }
 0xc35   :  { %13696 = vst [vmem:[#allocation117_spill] sm:$0xff] %v10681_v42  ;;  %8608 = vset.pattern.permute.xlu1 %v13449_v48  ;;  %v10694_v42 = vpop.permute.xlu0 %3593 }
 0xc36   :  { %4903 = vperm.xlu1 %8608, %v10432_v56   ;;  %13699 = vst [vmem:[#allocation120_spill] sm:$0xff] %v10694_v42  ;;  %v13451_v42 = vmov 24  }
 0xc38   :  { %3182 = vperm.xlu0 %8661, %v10606_v25  }
 0xc39   :  { %v10689_v27 = vpop.permute.xlu1 %4924 }
 0xc3a   :  { %13698 = vst [vmem:[#allocation119_spill] sm:$0xff] %v10689_v27  ;;  %8610 = vset.pattern.permute.xlu1 %v13645_v19  ;;  %v10704_v27 = vpop.permute.xlu0 %3741 }
 0xc3b   :  { %4920 = vperm.xlu1 %8610, %v10263_v7   ;;  %13702 = vst [vmem:[#allocation123_spill] sm:$0xff] %v10704_v27 }
 0xc3c   :  { %3210 = vperm.xlu0 %8661, %v10617_v21  }
 0xc3e   :  { %v10696_v9 = vpop.permute.xlu1 %5068 }
 0xc3f   :  { %13700 = vst [vmem:[#allocation121_spill] sm:$0xff] %v10696_v9  ;;  %8612 = vset.pattern.permute.xlu1 %v13632_v55  ;;  %v10713_v9 = vpop.permute.xlu0 %4948 }
 0xc40   :  { %5064 = vperm.xlu1 %8612, %v10263_v7   ;;  %8664 = vset.pattern.permute.xlu0 %v13645_v19  ;;  %13704 = vst [vmem:[#allocation125_spill] sm:$0xff] %v10713_v9 }
 0xc41   :  { %4932 = vperm.xlu0 %8664, %v10336_v29  }
 0xc42   :  { %v10702_v48 = vpop.permute.xlu1 %5092 }
 0xc43   :  { %13701 = vst [vmem:[#allocation122_spill] sm:$0xff] %v10702_v48 }
 0xc44   :  { %5088 = vperm.xlu1 %8612, %v10451_v4  }
 0xc45   :  { %8667 = vset.pattern.permute.xlu0 %v13632_v55 }
 0xc46   :  { %v10708_v20 = vpop.permute.xlu1 %5116  ;;  %5100 = vperm.xlu0 %8667, %v10338_v23  }
 0xc47   :  { %13703 = vst [vmem:[#allocation124_spill] sm:$0xff] %v10708_v20  ;;  %v10722_v20 = vpop.permute.xlu0 %4972 }
 0xc48   :  { %8613 = vset.pattern.permute.xlu1 %v13451_v42  ;;  %13706 = vst [vmem:[#allocation127_spill] sm:$0xff] %v10722_v20 }
 0xc49   :  { %4607 = vperm.xlu1 %8613, %v10432_v56  }
 0xc4a   :  { %8670 = vset.pattern.permute.xlu0 %v13624_v34 }
 0xc4b   :  { %v10716_v48 = vpop.permute.xlu1 %5000  ;;  %2918 = vperm.xlu0 %8670, %v10617_v21  }
 0xc4c   :  { %13705 = vst [vmem:[#allocation126_spill] sm:$0xff] %v10716_v48  ;;  %v10732_v48 = vpop.permute.xlu0 %5144 }
 0xc4d   :  { %8615 = vset.pattern.permute.xlu1 %v13655_v11  ;;  %13709 = vst [vmem:[#allocation130_spill] sm:$0xff] %v10732_v48 }
 0xc4e   :  { %4624 = vperm.xlu1 %8615, %v10263_v7  }
 0xc4f   :  { %8674 = vset.pattern.permute.xlu0 %v13655_v11 }
 0xc50   :  { %v10724_v27 = vpop.permute.xlu1 %2910  ;;  %4660 = vperm.xlu0 %8674, %v10338_v23   ;;  %v10741_v9 = vpop.permute.xlu0 %4652 }
 0xc51   :  { %13707 = vst [vmem:[#allocation128_spill] sm:$0xff] %v10724_v27  ;;  %v13711_v27 = vmov 17   ;;  %13712 = vst [vmem:[#allocation132_spill] sm:$0xff] %v10741_v9  ;;  %v2530_v9 = vmul.f32 %v9849_v15, %v10182_v37 }
 0xc52   :  { %4648 = vperm.xlu1 %8615, %v10451_v4   ;;  %v13714_v4 = vmov 22  }
 0xc53   :  { %v2550_v6 = vadd.f32 %v10250_v59, %v2530_v9 }
 0xc54   :  { %8676 = vset.pattern.permute.xlu0 %v13633_v58 }
 0xc55   :  { %v10729_v42 = vpop.permute.xlu1 %4628  ;;  %4808 = vperm.xlu0 %8676, %v10338_v23   ;;  %v2578_v49 = vadd.f32 %v9857_v57, %v2550_v6  ;;  %v13723_v57 = vmov 21  }
 0xc56   :  { %13708 = vst [vmem:[#allocation129_spill] sm:$0xff] %v10729_v42  ;;  %8616 = vset.pattern.permute.xlu1 %v13633_v58  ;;  %v2457_v42 = vmul.f32 %v10295_v61, %v10064_v41  ;;  %v13718_v41 = vmov 18  }
 0xc57   :  { %4772 = vperm.xlu1 %8616, %v10263_v7   ;;  %v10759_v7 = vpop.permute.xlu0 %4800 }
 0xc58   :  { %13716 = vst [vmem:[#allocation135_spill] sm:$0xff] %v10759_v7  ;;  %v13721_v7 = vmov 20  }
 0xc59   :  { %8677 = vset.pattern.permute.xlu0 %v13655_v11 }
 0xc5a   :  { %v10737_v20 = vpop.permute.xlu1 %4776  ;;  %4684 = vperm.xlu0 %8677, %v10606_v25  }
 0xc5b   :  { %13710 = vst [vmem:[#allocation131_spill] sm:$0xff] %v10737_v20  ;;  %8619 = vset.pattern.permute.xlu1 %v13711_v27  ;;  %v10757_v20 = vsel %vm2453_vm7, %v2457_v42, 0.0  ;;  %v10770_v37 = vpop.permute.xlu0 %4676 }
 0xc5c   :  { %2810 = vperm.xlu1 %8619, %v10523_v2   ;;  %13715 = vst [vmem:[#allocation134_spill] sm:$0xff] %v10757_v20  ;;  %13719 = vst [vmem:[#allocation137_spill] sm:$0xff] %v10770_v37 }
 0xc5e   :  { %v10746_v48 = vpop.permute.xlu1 %4824  ;;  %4712 = vperm.xlu0 %8677, %v10617_v21  }
 0xc5f   :  { %13713 = vst [vmem:[#allocation133_spill] sm:$0xff] %v10746_v48  ;;  %v10781_v9 = vpop.permute.xlu0 %2813  ;;  %v13727_v48 = vmov 26  }
 0xc60   :  { %8620 = vset.pattern.permute.xlu1 %v13714_v4 }
 0xc61   :  { %3789 = vperm.xlu1 %8620, %v10523_v2  }
 0xc62   :  { %8682 = vset.pattern.permute.xlu0 %v13624_v34 }
 0xc63   :  { %v10762_v61 = vpop.permute.xlu1 %4704  ;;  %2862 = vperm.xlu0 %8682, %v10757_v20  }
 0xc64   :  { %13717 = vst [vmem:[#allocation136_spill] sm:$0xff] %v10762_v61  ;;  %v8280_v61 = vtrunc.f32 %v2578_v49  ;;  %v10791_v49 = vpop.permute.xlu0 %2830 }
 0xc65   :  { %8622 = vset.pattern.permute.xlu1 %v13718_v41  ;;  %13726 = vst [vmem:[#allocation142_spill] sm:$0xff] %v10791_v49  ;;  %v13732_v49 = vmov 24  }
 0xc66   :  { %2958 = vperm.xlu1 %8622, %v10523_v2   ;;  %v10784_v6 = vcvt.f32.s32 %v8280_v61  ;;  %v13729_v61 = vmov 27  }
 0xc67   :  { %8685 = vset.pattern.permute.xlu0 %v13629_v39 }
 0xc68   :  { %v10772_v42 = vpop.permute.xlu1 %4852  ;;  %3817 = vperm.xlu0 %8685, %v10307_v33   ;;  %13724 = vst [vmem:[#allocation140_spill] sm:$0xff] %v10784_v6  ;;  %v10800_v56 = vpop.permute.xlu0 %2854 }
 0xc69   :  { %13720 = vst [vmem:[#allocation138_spill] sm:$0xff] %v10772_v42  ;;  %13730 = vst [vmem:[#allocation144_spill] sm:$0xff] %v10800_v56  ;;  %v13734_v56 = vmov 25  }
 0xc6a   :  { %8624 = vset.pattern.permute.xlu1 %v13721_v7 }
 0xc6b   :  { %3493 = vperm.xlu1 %8624, %v10523_v2  }
 0xc6c   :  { %8688 = vset.pattern.permute.xlu0 %v13630_v50 }
 0xc6d   :  { %v10778_v59 = vpop.permute.xlu1 %2649  ;;  %3985 = vperm.xlu0 %8688, %v10757_v20  }
 0xc6e   :  { %13722 = vst [vmem:[#allocation139_spill] sm:$0xff] %v10778_v59 }
 0xc6f   :  { %8625 = vset.pattern.permute.xlu1 %v13723_v57 }
 0xc70   :  { %3641 = vperm.xlu1 %8625, %v10523_v2  }
 0xc71   :  { %8690 = vset.pattern.permute.xlu0 %v13723_v57 }
 0xc72   :  { %v10788_v42 = vpop.permute.xlu1 %2667  ;;  %3650 = vperm.xlu0 %8690, %v10784_v6  }
 0xc73   :  { %13725 = vst [vmem:[#allocation141_spill] sm:$0xff] %v10788_v42 }
 0xc74   :  { %8626 = vset.pattern.permute.xlu1 %v13727_v48 }
 0xc75   :  { %4900 = vperm.xlu1 %8626, %v10523_v2  }
 0xc76   :  { %v10795_v37 = vpop.permute.xlu1 %2695  ;;  %8693 = vset.pattern.permute.xlu0 %v13718_v41 }
 0xc77   :  { %13728 = vst [vmem:[#allocation143_spill] sm:$0xff] %v10795_v37  ;;  %2967 = vperm.xlu0 %8693, %v10784_v6   ;;  %v10809_v37 = vpop.permute.xlu0 %3936 }
 0xc79   :  { %8627 = vset.pattern.permute.xlu1 %v13729_v61 }
 0xc7a   :  { %5044 = vperm.xlu1 %8627, %v10523_v2  }
 0xc7b   :  { %v10803_v42 = vpop.permute.xlu1 %3792  ;;  %8695 = vset.pattern.permute.xlu0 %v13640_v45  ;;  %v10820_v60 = vpop.permute.xlu0 %3833 }
 0xc7c   :  { %13731 = vst [vmem:[#allocation145_spill] sm:$0xff] %v10803_v42  ;;  %2986 = vperm.xlu0 %8695, %v10307_v33   ;;  %13736 = vst [vmem:[#allocation148_spill] sm:$0xff] %v10820_v60 }
 0xc7e   :  { %8628 = vset.pattern.permute.xlu1 %v13732_v49 }
 0xc7f   :  { %4604 = vperm.xlu1 %8628, %v10523_v2  }
 0xc80   :  { %v10811_v59 = vpop.permute.xlu1 %3809  ;;  %8698 = vset.pattern.permute.xlu0 %v13631_v35 }
 0xc81   :  { %13733 = vst [vmem:[#allocation146_spill] sm:$0xff] %v10811_v59  ;;  %3154 = vperm.xlu0 %8698, %v10757_v20  }
 0xc83   :  { %8629 = vset.pattern.permute.xlu1 %v13734_v56 }
 0xc84   :  { %4752 = vperm.xlu1 %8629, %v10523_v2   ;;  %v10832_v2 = vpop.permute.xlu0 %3496 }
 0xc85   :  { %v10817_v42 = vpop.permute.xlu1 %3953  ;;  %8700 = vset.pattern.permute.xlu0 %v13729_v61 }
 0xc86   :  { %13735 = vst [vmem:[#allocation147_spill] sm:$0xff] %v10817_v42  ;;  %5053 = vperm.xlu0 %8700, %v10784_v6   ;;  %v2549_v42 = vadd.f32 %v10298_v12, %v2529_v10 }
 0xc88   :  { %8630 = vset.pattern.permute.xlu1 %v13605_v28  ;;  %v2577_v44 = vadd.f32 %v9859_v63, %v2549_v42  ;;  %v10841_v15 = vpop.permute.xlu0 %2978 }
 0xc89   :  { %2742 = vperm.xlu1 %8630, %v10323_v8   ;;  %v10825_v59 = vpop.permute.xlu1 %3977  ;;  %13738 = vst [vmem:[#allocation150_spill] sm:$0xff] %v10841_v15 }
 0xc8a   :  { %13737 = vst [vmem:[#allocation149_spill] sm:$0xff] %v10825_v59  ;;  %8702 = vset.pattern.permute.xlu0 %v13645_v19  ;;  %v8278_v12 = vtrunc.f32 %v2577_v44 }
 0xc8b   :  { %4952 = vperm.xlu0 %8702, %v10757_v20  }
 0xc8c   :  { %v10850_v63 = vcvt.f32.s32 %v8278_v12  ;;  %v10852_v10 = vpop.permute.xlu0 %3146  ;;  %v2596_v12 = vsub.f32 %v9993_v53, %v10220_v0 }
 0xc8d   :  { %2774 = vperm.xlu1 %8630, %v10327_v62   ;;  %13741 = vst [vmem:[#allocation153_spill] sm:$0xff] %v10852_v10 }
 0xc8e   :  { %v10835_v60 = vpop.permute.xlu1 %2961  ;;  %13740 = vst [vmem:[#allocation152_spill] sm:$0xff] %v10850_v63  ;;  %v2600_v10 = vmul.f32 1.442695, %v2596_v12 }
 0xc8f   :  { %8706 = vset.pattern.permute.xlu0 %v13655_v11 }
 0xc90   :  { %4632 = vperm.xlu0 %8706, %v10307_v33   ;;  %v10861_v15 = vpop.permute.xlu0 %3661  ;;  %8962 = vpow2.f32 %v2600_v10 }
 0xc91   :  { %8632 = vset.pattern.permute.xlu1 %v13629_v39  ;;  %13744 = vst [vmem:[#allocation156_spill] sm:$0xff] %v10861_v15 }
 0xc92   :  { %3873 = vperm.xlu1 %8632, %v10323_v8  }
 0xc93   :  { %v10844_v5 = vpop.permute.xlu1 %3105 }
 0xc94   :  { %13739 = vst [vmem:[#allocation151_spill] sm:$0xff] %v10844_v5  ;;  %8708 = vset.pattern.permute.xlu0 %v13633_v58  ;;  %v5550_v5 = vsub.f32 %v9993_v53, %v10218_v43  ;;  %v10874_v15 = vpop.permute.xlu0 %5047 }
 0xc95   :  { %4780 = vperm.xlu0 %8708, %v10307_v33  }
 0xc96   :  { %8633 = vset.pattern.permute.xlu1 %v13630_v50  ;;  %v5554_v0 = vmul.f32 1.442695, %v5550_v5  ;;  %v4557_v5 = vsub.f32 %v10020_v13, %v10244_v36 }
 0xc97   :  { %4017 = vperm.xlu1 %8633, %v10323_v8  }
 0xc98   :  { %v10854_v42 = vpop.permute.xlu1 %3644  ;;  %v10886_v43 = vpop.permute.xlu0 %4944  ;;  %8964 = vpow2.f32 %v5554_v0 }
 0xc99   :  { %13742 = vst [vmem:[#allocation154_spill] sm:$0xff] %v10854_v42  ;;  %8713 = vset.pattern.permute.xlu0 %v13658_v24  ;;  %13746 = vst [vmem:[#allocation158_spill] sm:$0xff] %v10886_v43 }
 0xc9a   :  { %3939 = vperm.xlu0 %8713, %v10850_v63  }
 0xc9b   :  { %4045 = vperm.xlu1 %8633, %v10327_v62  }
 0xc9c   :  { %v10897_v12 = vpop.permute.xlu0 %4755 }
 0xc9d   :  { %v10859_v44 = vpop.permute.xlu1 %3002 }
 0xc9e   :  { %13743 = vst [vmem:[#allocation155_spill] sm:$0xff] %v10859_v44  ;;  %8714 = vset.pattern.permute.xlu0 %v13721_v7  ;;  %v2599_v44 = vsub.f32 %v10012_v17, %v10228_v14  ;;  %v5552_v14 = vsub.f32 %v10020_v13, %v10230_v54 }
 0xc9f   :  { %8636 = vset.pattern.permute.xlu1 %v13636_v22  ;;  %3499 = vperm.xlu0 %8714, %v10850_v63  }
 0xca0   :  { %3725 = vperm.xlu1 %8636, %v10323_v8   ;;  %v5558_v36 = vmul.f32 1.442695, %v5552_v14  ;;  %v10911_v54 = vpop.permute.xlu0 %4796 }
 0xca1   :  { %13750 = vst [vmem:[#allocation162_spill] sm:$0xff] %v10911_v54 }
 0xca2   :  { %v10869_v42 = vpop.permute.xlu1 %3122 }
 0xca3   :  { %8715 = vset.pattern.permute.xlu0 %v13723_v57  ;;  %v2606_v57 = vmul.f32 1.442695, %v2599_v44  ;;  %v10901_v44 = vpop.eup %8962 }
 0xca4   :  { %3753 = vperm.xlu1 %8636, %v10327_v62   ;;  %3647 = vperm.xlu0 %8715, %v10850_v63   ;;  %v10924_v14 = vpop.permute.xlu0 %2646 }
 0xca5   :  { %8966 = vpow2.f32 %v2606_v57 }
 0xca7   :  { %v10880_v59 = vpop.permute.xlu1 %3513 }
 0xca8   :  { %13745 = vst [vmem:[#allocation157_spill] sm:$0xff] %v10880_v59  ;;  %8637 = vset.pattern.permute.xlu1 %v13640_v45  ;;  %8716 = vset.pattern.permute.xlu0 %v13718_v41  ;;  %v4563_v41 = vmul.f32 1.442695, %v4557_v5 }
 0xca9   :  { %3042 = vperm.xlu1 %8637, %v10323_v8   ;;  %2964 = vperm.xlu0 %8716, %v10850_v63  }
 0xcaa   :  { %8968 = vpow2.f32 %v4563_v41 }
 0xcab   :  { %v10890_v10 = vpop.permute.xlu1 %3537  ;;  %8970 = vpow2.f32 %v5558_v36 }
 0xcac   :  { %13747 = vst [vmem:[#allocation159_spill] sm:$0xff] %v10890_v10 }
 0xcad   :  { %3070 = vperm.xlu1 %8637, %v10327_v62   ;;  %8719 = vset.pattern.permute.xlu0 %v13729_v61  ;;  %v10907_v61 = vpop.eup %8964 }
 0xcae   :  { %5050 = vperm.xlu0 %8719, %v10850_v63   ;;  %13749 = vst [vmem:[#allocation161_spill] sm:$0xff] %v10907_v61 }
 0xcaf   :  { %v10917_v5 = vpop.eup %8966 }
 0xcb0   :  { %v10899_v0 = vpop.permute.xlu1 %3685 }
 0xcb1   :  { %13748 = vst [vmem:[#allocation160_spill] sm:$0xff] %v10899_v0  ;;  %8639 = vset.pattern.permute.xlu1 %v13645_v19 }
 0xcb2   :  { %4984 = vperm.xlu1 %8639, %v10323_v8   ;;  %2612 = vrot.lane.b32.xlu0 %v10901_v44, %s9082_s14 }
 0xcb4   :  { %v10927_v41 = vpop.eup %8968 }
 0xcb5   :  { %v10909_v57 = vpop.permute.xlu1 %4903  ;;  %v10934_v54 = vpop.eup %8970 }
 0xcb6   :  { %8640 = vset.pattern.permute.xlu1 %v13632_v55  ;;  %5566 = vrot.lane.b32.xlu0 %v10907_v61, %s9117_s2  ;;  %13753 = vst [vmem:[#allocation165_spill] sm:$0xff] %v10934_v54 }
 0xcb7   :  { %5128 = vperm.xlu1 %8640, %v10323_v8  }
 0xcba   :  { %v10919_v43 = vpop.permute.xlu1 %4920  ;;  %2618 = vrot.lane.b32.xlu0 %v10917_v5, %s9082_s14 }
 0xcbb   :  { %13751 = vst [vmem:[#allocation163_spill] sm:$0xff] %v10919_v43  ;;  %8642 = vset.pattern.permute.xlu1 %v13645_v19  ;;  %v10937_v43 = vpop.permute.xlu0 %3933 }
 0xcbc   :  { %5012 = vperm.xlu1 %8642, %v10327_v62  }
 0xcbe   :  { %4575 = vrot.lane.b32.xlu0 %v10927_v41, %s9085_s16 }
 0xcbf   :  { %v10931_v36 = vpop.permute.xlu1 %5064 }
 0xcc0   :  { %13752 = vst [vmem:[#allocation164_spill] sm:$0xff] %v10931_v36  ;;  %8643 = vset.pattern.permute.xlu1 %v13632_v55 }
 0xcc1   :  { %5156 = vperm.xlu1 %8643, %v10327_v62  }
 0xcc2   :  { %5570 = vrot.lane.b32.xlu0 %v10934_v54, %s9117_s2 }
 0xcc3   :  { %v10941_v61 = vpop.permute.xlu1 %5088 }
 0xcc4   :  { %13754 = vst [vmem:[#allocation166_spill] sm:$0xff] %v10941_v61 }
 0xcc5   :  { %8644 = vset.pattern.permute.xlu1 %v13655_v11 }
 0xcc6   :  { %4688 = vperm.xlu1 %8644, %v10323_v8  }
 0xcc8   :  { %v10945_v0 = vpop.permute.xlu1 %4607 }
 0xcc9   :  { %13755 = vst [vmem:[#allocation167_spill] sm:$0xff] %v10945_v0 }
 0xcca   :  { %8645 = vset.pattern.permute.xlu1 %v13633_v58 }
 0xccb   :  { %4836 = vperm.xlu1 %8645, %v10323_v8  }
 0xccd   :  { %v10949_v36 = vpop.permute.xlu1 %4624 }
 0xcce   :  { %13756 = vst [vmem:[#allocation168_spill] sm:$0xff] %v10949_v36 }
 0xccf   :  { %8646 = vset.pattern.permute.xlu1 %v13655_v11 }
 0xcd0   :  { %4716 = vperm.xlu1 %8646, %v10327_v62  }
 0xcd1   :  { %v10953_v10 = vpop.permute.xlu1 %4648 }
 0xcd2   :  { %13757 = vst [vmem:[#allocation169_spill] sm:$0xff] %v10953_v10 }
 0xcd4   :  { %8647 = vset.pattern.permute.xlu1 %v13633_v58 }
 0xcd5   :  { %4864 = vperm.xlu1 %8647, %v10327_v62  }
 0xcd6   :  { %v10957_v54 = vpop.permute.xlu1 %4772 }
 0xcd7   :  { %13758 = vst [vmem:[#allocation170_spill] sm:$0xff] %v10957_v54 }
 0xcd9   :  { %8648 = vset.pattern.permute.xlu1 %v13605_v28 }
 0xcda   :  { %2682 = vperm.xlu1 %8648, %v10336_v29  }
 0xcdb   :  { %v10961_v61 = vpop.permute.xlu1 %2810 }
 0xcde   :  { %2710 = vperm.xlu1 %8648, %v10338_v23  }
 0xce0   :  { %v10964_v8 = vpop.permute.xlu1 %3789 }
 0xce2   :  { %8651 = vset.pattern.permute.xlu1 %v13624_v34 }
 0xce3   :  { %2866 = vperm.xlu1 %8651, %v10338_v23  }
 0xce5   :  { %v10968_v10 = vpop.permute.xlu1 %2958 }
 0xce7   :  { %8653 = vset.pattern.permute.xlu1 %v13629_v39 }
 0xce8   :  { %3845 = vperm.xlu1 %8653, %v10338_v23  }
 0xcea   :  { %v10972_v62 = vpop.permute.xlu1 %3493 }
 0xceb   :  { %13759 = vst [vmem:[#allocation171_spill] sm:$0xff] %v10972_v62 }
 0xcec   :  { %8654 = vset.pattern.permute.xlu1 %v13630_v50 }
 0xced   :  { %3965 = vperm.xlu1 %8654, %v10336_v29  }
 0xcef   :  { %v10976_v54 = vpop.permute.xlu1 %3641 }
 0xcf0   :  { %13760 = vst [vmem:[#allocation172_spill] sm:$0xff] %v10976_v54 }
 0xcf1   :  { %8656 = vset.pattern.permute.xlu1 %v13629_v39 }
 0xcf2   :  { %3869 = vperm.xlu1 %8656, %v10606_v25  }
 0xcf4   :  { %v10980_v36 = vpop.permute.xlu1 %4900 }
 0xcf5   :  { %13761 = vst [vmem:[#allocation173_spill] sm:$0xff] %v10980_v36 }
 0xcf6   :  { %3897 = vperm.xlu1 %8656, %v10617_v21  }
 0xcf9   :  { %v10983_v59 = vpop.permute.xlu1 %5044 }
 0xcfa   :  { %13762 = vst [vmem:[#allocation174_spill] sm:$0xff] %v10983_v59  ;;  %8657 = vset.pattern.permute.xlu1 %v13623_v30 }
 0xcfb   :  { %3525 = vperm.xlu1 %8657, %v10336_v29  }
 0xcfe   :  { %v10987_v0 = vpop.permute.xlu1 %4604 }
 0xcff   :  { %13763 = vst [vmem:[#allocation175_spill] sm:$0xff] %v10987_v0  ;;  %3549 = vperm.xlu1 %8657, %v10338_v23  }
 0xd03   :  { %v10990_v62 = vpop.permute.xlu1 %4752  ;;  %8658 = vset.pattern.permute.xlu1 %v13636_v22 }
 0xd04   :  { %13764 = vst [vmem:[#allocation176_spill] sm:$0xff] %v10990_v62  ;;  %3673 = vperm.xlu1 %8658, %v10336_v29  }
 0xd08   :  { %v10994_v54 = vpop.permute.xlu1 %2742  ;;  %3697 = vperm.xlu1 %8658, %v10338_v23  }
 0xd09   :  { %13765 = vst [vmem:[#allocation177_spill] sm:$0xff] %v10994_v54 }
 0xd0c   :  { %v10997_v36 = vpop.permute.xlu1 %2774  ;;  %3721 = vperm.xlu1 %8658, %v10606_v25  }
 0xd0d   :  { %13766 = vst [vmem:[#allocation178_spill] sm:$0xff] %v10997_v36 }
 0xd10   :  { %3749 = vperm.xlu1 %8658, %v10617_v21  }
 0xd11   :  { %v11001_v59 = vpop.permute.xlu1 %3873 }
 0xd12   :  { %13767 = vst [vmem:[#allocation179_spill] sm:$0xff] %v11001_v59 }
 0xd14   :  { %8660 = vset.pattern.permute.xlu1 %v13640_v45 }
 0xd15   :  { %2990 = vperm.xlu1 %8660, %v10336_v29  }
 0xd16   :  { %v11005_v62 = vpop.permute.xlu1 %4017 }
 0xd17   :  { %13768 = vst [vmem:[#allocation180_spill] sm:$0xff] %v11005_v62 }
 0xd19   :  { %3014 = vperm.xlu1 %8660, %v10338_v23  }
 0xd1a   :  { %v11008_v0 = vpop.permute.xlu1 %4045 }
 0xd1b   :  { %13769 = vst [vmem:[#allocation181_spill] sm:$0xff] %v11008_v0 }
 0xd1d   :  { %8662 = vset.pattern.permute.xlu1 %v13631_v35 }
 0xd1e   :  { %3158 = vperm.xlu1 %8662, %v10338_v23  }
 0xd1f   :  { %v11012_v36 = vpop.permute.xlu1 %3725 }
 0xd20   :  { %13770 = vst [vmem:[#allocation182_spill] sm:$0xff] %v11012_v36 }
 0xd22   :  { %8663 = vset.pattern.permute.xlu1 %v13640_v45 }
 0xd23   :  { %v11015_v54 = vpop.permute.xlu1 %3753  ;;  %3038 = vperm.xlu1 %8663, %v10606_v25  }
 0xd24   :  { %13771 = vst [vmem:[#allocation183_spill] sm:$0xff] %v11015_v54 }
 0xd27   :  { %3066 = vperm.xlu1 %8663, %v10617_v21  }
 0xd28   :  { %v11019_v59 = vpop.permute.xlu1 %3042 }
 0xd29   :  { %13772 = vst [vmem:[#allocation184_spill] sm:$0xff] %v11019_v59 }
 0xd2b   :  { %8665 = vset.pattern.permute.xlu1 %v13645_v19 }
 0xd2c   :  { %v11022_v62 = vpop.permute.xlu1 %3070  ;;  %4956 = vperm.xlu1 %8665, %v10338_v23  }
 0xd2d   :  { %13773 = vst [vmem:[#allocation185_spill] sm:$0xff] %v11022_v62 }
 0xd30   :  { %8666 = vset.pattern.permute.xlu1 %v13632_v55 }
 0xd31   :  { %v11026_v0 = vpop.permute.xlu1 %4984  ;;  %5076 = vperm.xlu1 %8666, %v10336_v29  }
 0xd32   :  { %13774 = vst [vmem:[#allocation186_spill] sm:$0xff] %v11026_v0 }
 0xd35   :  { %8668 = vset.pattern.permute.xlu1 %v13645_v19 }
 0xd36   :  { %v11030_v54 = vpop.permute.xlu1 %5128  ;;  %4980 = vperm.xlu1 %8668, %v10606_v25  }
 0xd37   :  { %13775 = vst [vmem:[#allocation187_spill] sm:$0xff] %v11030_v54 }
 0xd3a   :  { %8669 = vset.pattern.permute.xlu1 %v13632_v55 }
 0xd3b   :  { %v11034_v59 = vpop.permute.xlu1 %5012  ;;  %5124 = vperm.xlu1 %8669, %v10606_v25  }
 0xd3c   :  { %13776 = vst [vmem:[#allocation188_spill] sm:$0xff] %v11034_v59 }
 0xd3f   :  { %8671 = vset.pattern.permute.xlu1 %v13645_v19 }
 0xd40   :  { %v11038_v23 = vpop.permute.xlu1 %5156  ;;  %5008 = vperm.xlu1 %8671, %v10617_v21  }
 0xd41   :  { %13777 = vst [vmem:[#allocation189_spill] sm:$0xff] %v11038_v23 }
 0xd44   :  { %8672 = vset.pattern.permute.xlu1 %v13632_v55 }
 0xd45   :  { %v11042_v0 = vpop.permute.xlu1 %4688  ;;  %5152 = vperm.xlu1 %8672, %v10617_v21  }
 0xd46   :  { %13778 = vst [vmem:[#allocation190_spill] sm:$0xff] %v11042_v0 }
 0xd49   :  { %8673 = vset.pattern.permute.xlu1 %v13655_v11 }
 0xd4a   :  { %v11046_v62 = vpop.permute.xlu1 %4836  ;;  %4636 = vperm.xlu1 %8673, %v10336_v29  }
 0xd4b   :  { %13779 = vst [vmem:[#allocation191_spill] sm:$0xff] %v11046_v62 }
 0xd4e   :  { %8675 = vset.pattern.permute.xlu1 %v13633_v58 }
 0xd4f   :  { %v11050_v59 = vpop.permute.xlu1 %4716  ;;  %4784 = vperm.xlu1 %8675, %v10336_v29   ;;  %v11082_v29 = vpop.permute.xlu0 %3102 }
 0xd50   :  { %13780 = vst [vmem:[#allocation192_spill] sm:$0xff] %v11050_v59 }
 0xd53   :  { %4832 = vperm.xlu1 %8675, %v10606_v25  }
 0xd54   :  { %v11054_v23 = vpop.permute.xlu1 %4864 }
 0xd55   :  { %13781 = vst [vmem:[#allocation193_spill] sm:$0xff] %v11054_v23 }
 0xd57   :  { %4860 = vperm.xlu1 %8675, %v10617_v21  }
 0xd59   :  { %v11057_v0 = vpop.permute.xlu1 %2682 }
 0xd5a   :  { %13782 = vst [vmem:[#allocation194_spill] sm:$0xff] %v11057_v0 }
 0xd5b   :  { %8678 = vset.pattern.permute.xlu1 %v13664_v40 }
 0xd5c   :  { %2655 = vperm.xlu1 %8678, %v10784_v6  }
 0xd5d   :  { %v11061_v62 = vpop.permute.xlu1 %2710 }
 0xd5e   :  { %13783 = vst [vmem:[#allocation195_spill] sm:$0xff] %v11061_v62 }
 0xd60   :  { %8679 = vset.pattern.permute.xlu1 %v13605_v28 }
 0xd61   :  { %2677 = vperm.xlu1 %8679, %v10307_v33  }
 0xd62   :  { %v11065_v59 = vpop.permute.xlu1 %2866 }
 0xd63   :  { %13784 = vst [vmem:[#allocation196_spill] sm:$0xff] %v11065_v59 }
 0xd65   :  { %2705 = vperm.xlu1 %8679, %v10757_v20  }
 0xd67   :  { %v11068_v25 = vpop.permute.xlu1 %3845 }
 0xd68   :  { %13785 = vst [vmem:[#allocation197_spill] sm:$0xff] %v11068_v25 }
 0xd69   :  { %8680 = vset.pattern.permute.xlu1 %v13711_v27 }
 0xd6a   :  { %2819 = vperm.xlu1 %8680, %v10784_v6  }
 0xd6c   :  { %v11072_v23 = vpop.permute.xlu1 %3965 }
 0xd6d   :  { %13786 = vst [vmem:[#allocation198_spill] sm:$0xff] %v11072_v23 }
 0xd6e   :  { %8681 = vset.pattern.permute.xlu1 %v13624_v34  ;;  %v11089_v34 = vpop.permute.xlu0 %2894 }
 0xd6f   :  { %2838 = vperm.xlu1 %8681, %v10307_v33   ;;  %13790 = vst [vmem:[#allocation202_spill] sm:$0xff] %v11089_v34 }
 0xd71   :  { %v11076_v21 = vpop.permute.xlu1 %3869 }
 0xd72   :  { %13787 = vst [vmem:[#allocation199_spill] sm:$0xff] %v11076_v21 }
 0xd73   :  { %8683 = vset.pattern.permute.xlu1 %v13714_v4 }
 0xd74   :  { %3798 = vperm.xlu1 %8683, %v10784_v6  }
 0xd75   :  { %v11080_v28 = vpop.permute.xlu1 %3897 }
 0xd76   :  { %13788 = vst [vmem:[#allocation200_spill] sm:$0xff] %v11080_v28  ;;  %v11098_v28 = vpop.permute.xlu0 %3901 }
 0xd77   :  { %13793 = vst [vmem:[#allocation205_spill] sm:$0xff] %v11098_v28 }
 0xd78   :  { %8684 = vset.pattern.permute.xlu1 %v13658_v24 }
 0xd79   :  { %3942 = vperm.xlu1 %8684, %v10784_v6  }
 0xd7a   :  { %v11086_v25 = vpop.permute.xlu1 %3525 }
 0xd7b   :  { %13789 = vst [vmem:[#allocation201_spill] sm:$0xff] %v11086_v25 }
 0xd7d   :  { %8686 = vset.pattern.permute.xlu1 %v13629_v39  ;;  %v11104_v39 = vpop.permute.xlu0 %3577 }
 0xd7e   :  { %v11091_v23 = vpop.permute.xlu1 %3549  ;;  %3841 = vperm.xlu1 %8686, %v10757_v20   ;;  %13795 = vst [vmem:[#allocation207_spill] sm:$0xff] %v11104_v39 }
 0xd7f   :  { %13791 = vst [vmem:[#allocation203_spill] sm:$0xff] %v11091_v23 }
 0xd81   :  { %v11112_v23 = vpop.permute.xlu0 %3605 }
 0xd82   :  { %8687 = vset.pattern.permute.xlu1 %v13630_v50  ;;  %13798 = vst [vmem:[#allocation210_spill] sm:$0xff] %v11112_v23 }
 0xd83   :  { %v11095_v21 = vpop.permute.xlu1 %3673  ;;  %3961 = vperm.xlu1 %8687, %v10307_v33  }
 0xd84   :  { %13792 = vst [vmem:[#allocation204_spill] sm:$0xff] %v11095_v21 }
 0xd87   :  { %v11100_v24 = vpop.permute.xlu1 %3697  ;;  %8689 = vset.pattern.permute.xlu1 %v13721_v7  ;;  %v11118_v7 = vpop.permute.xlu0 %3186 }
 0xd88   :  { %13794 = vst [vmem:[#allocation206_spill] sm:$0xff] %v11100_v24  ;;  %3502 = vperm.xlu1 %8689, %v10784_v6   ;;  %13800 = vst [vmem:[#allocation212_spill] sm:$0xff] %v11118_v7  ;;  %v13912_v24 = vld [vmem:[#allocation104_spill] sm:$0xff] }
 0xd8b   :  { %v11106_v25 = vpop.permute.xlu1 %3721 }
 0xd8c   :  { %13796 = vst [vmem:[#allocation208_spill] sm:$0xff] %v11106_v25  ;;  %8691 = vset.pattern.permute.xlu1 %v13623_v30  ;;  %v11124_v30 = vpop.permute.xlu0 %3214 }
 0xd8d   :  { %3521 = vperm.xlu1 %8691, %v10307_v33   ;;  %13802 = vst [vmem:[#allocation214_spill] sm:$0xff] %v11124_v30 }
 0xd8f   :  { %v11110_v50 = vpop.permute.xlu1 %3749 }
 0xd90   :  { %13797 = vst [vmem:[#allocation209_spill] sm:$0xff] %v11110_v50  ;;  %v11130_v23 = vpop.permute.xlu0 %2922 }
 0xd91   :  { %3545 = vperm.xlu1 %8691, %v10757_v20   ;;  %13804 = vst [vmem:[#allocation216_spill] sm:$0xff] %v11130_v23 }
 0xd94   :  { %v11115_v28 = vpop.permute.xlu1 %2990  ;;  %v11138_v7 = vpop.permute.xlu0 %2737 }
 0xd95   :  { %13799 = vst [vmem:[#allocation211_spill] sm:$0xff] %v11115_v28  ;;  %8692 = vset.pattern.permute.xlu1 %v13636_v22  ;;  %13807 = vst [vmem:[#allocation219_spill] sm:$0xff] %v11138_v7  ;;  %v13895_v28 = vld [vmem:[#allocation29_spill] sm:$0xff] }
 0xd96   :  { %3669 = vperm.xlu1 %8692, %v10307_v33  }
 0xd98   :  { %v11121_v39 = vpop.permute.xlu1 %3014 }
 0xd99   :  { %13801 = vst [vmem:[#allocation213_spill] sm:$0xff] %v11121_v39 }
 0xd9a   :  { %3693 = vperm.xlu1 %8692, %v10757_v20  }
 0xd9d   :  { %v11126_v34 = vpop.permute.xlu1 %3158 }
 0xd9e   :  { %13803 = vst [vmem:[#allocation215_spill] sm:$0xff] %v11126_v34  ;;  %8694 = vset.pattern.permute.xlu1 %v13682_v51  ;;  %v11145_v34 = vpop.permute.xlu0 %2769 }
 0xd9f   :  { %3111 = vperm.xlu1 %8694, %v10784_v6   ;;  %13809 = vst [vmem:[#allocation221_spill] sm:$0xff] %v11145_v34 }
 0xda2   :  { %v11132_v50 = vpop.permute.xlu1 %3038 }
 0xda3   :  { %13805 = vst [vmem:[#allocation217_spill] sm:$0xff] %v11132_v50  ;;  %8696 = vset.pattern.permute.xlu1 %v13640_v45  ;;  %v11152_v45 = vpop.permute.xlu0 %2842 }
 0xda4   :  { %3010 = vperm.xlu1 %8696, %v10757_v20   ;;  %13811 = vst [vmem:[#allocation223_spill] sm:$0xff] %v11152_v45 }
 0xda6   :  { %v11136_v22 = vpop.permute.xlu1 %3066 }
 0xda7   :  { %13806 = vst [vmem:[#allocation218_spill] sm:$0xff] %v11136_v22 }
 0xda8   :  { %8697 = vset.pattern.permute.xlu1 %v13631_v35  ;;  %v11158_v35 = vpop.permute.xlu0 %2890 }
 0xda9   :  { %3130 = vperm.xlu1 %8697, %v10307_v33   ;;  %13813 = vst [vmem:[#allocation225_spill] sm:$0xff] %v11158_v35 }
 0xdab   :  { %v11142_v30 = vpop.permute.xlu1 %4956 }
 0xdac   :  { %13808 = vst [vmem:[#allocation220_spill] sm:$0xff] %v11142_v30  ;;  %v11165_v22 = vpop.permute.xlu0 %3821 }
 0xdad   :  { %8699 = vset.pattern.permute.xlu1 %v13727_v48  ;;  %13816 = vst [vmem:[#allocation228_spill] sm:$0xff] %v11165_v22 }
 0xdae   :  { %4909 = vperm.xlu1 %8699, %v10784_v6  }
 0xdb0   :  { %v11148_v23 = vpop.permute.xlu1 %5076 }
 0xdb1   :  { %13810 = vst [vmem:[#allocation222_spill] sm:$0xff] %v11148_v23  ;;  %v13499_v23 = vmov 42  }
 0xdb2   :  { %8701 = vset.pattern.permute.xlu1 %v13645_v19 }
 0xdb3   :  { %4928 = vperm.xlu1 %8701, %v10307_v33  }
 0xdb5   :  { %v11154_v7 = vpop.permute.xlu1 %4980 }
 0xdb6   :  { %13812 = vst [vmem:[#allocation224_spill] sm:$0xff] %v11154_v7 }
 0xdb7   :  { %8703 = vset.pattern.permute.xlu1 %v13632_v55  ;;  %v11172_v55 = vpop.permute.xlu0 %3989 }
 0xdb8   :  { %5072 = vperm.xlu1 %8703, %v10307_v33   ;;  %13818 = vst [vmem:[#allocation230_spill] sm:$0xff] %v11172_v55 }
 0xdba   :  { %v11160_v30 = vpop.permute.xlu1 %5124 }
 0xdbb   :  { %13814 = vst [vmem:[#allocation226_spill] sm:$0xff] %v11160_v30 }
 0xdbc   :  { %5096 = vperm.xlu1 %8703, %v10757_v20  }
 0xdbf   :  { %v11163_v34 = vpop.permute.xlu1 %5008 }
 0xdc0   :  { %13815 = vst [vmem:[#allocation227_spill] sm:$0xff] %v11163_v34  ;;  %8704 = vset.pattern.permute.xlu1 %v13732_v49  ;;  %v11179_v34 = vpop.permute.xlu0 %4013 }
 0xdc1   :  { %4613 = vperm.xlu1 %8704, %v10784_v6   ;;  %13820 = vst [vmem:[#allocation232_spill] sm:$0xff] %v11179_v34 }
 0xdc4   :  { %v11169_v19 = vpop.permute.xlu1 %5152  ;;  %v11185_v33 = vpop.permute.xlu0 %4041 }
 0xdc5   :  { %13817 = vst [vmem:[#allocation229_spill] sm:$0xff] %v11169_v19  ;;  %8705 = vset.pattern.permute.xlu1 %v13734_v56  ;;  %13822 = vst [vmem:[#allocation234_spill] sm:$0xff] %v11185_v33 }
 0xdc6   :  { %4761 = vperm.xlu1 %8705, %v10784_v6  }
 0xdc9   :  { %v11175_v7 = vpop.permute.xlu1 %4636 }
 0xdca   :  { %13819 = vst [vmem:[#allocation231_spill] sm:$0xff] %v11175_v7  ;;  %8707 = vset.pattern.permute.xlu1 %v13655_v11  ;;  %v11193_v11 = vpop.permute.xlu0 %3573 }
 0xdcb   :  { %4656 = vperm.xlu1 %8707, %v10757_v20   ;;  %13825 = vst [vmem:[#allocation237_spill] sm:$0xff] %v11193_v11 }
 0xdce   :  { %v11181_v35 = vpop.permute.xlu1 %4784 }
 0xdcf   :  { %13821 = vst [vmem:[#allocation233_spill] sm:$0xff] %v11181_v35  ;;  %8709 = vset.pattern.permute.xlu1 %v13633_v58  ;;  %v11199_v58 = vpop.permute.xlu0 %3601 }
 0xdd0   :  { %4804 = vperm.xlu1 %8709, %v10757_v20   ;;  %13827 = vst [vmem:[#allocation239_spill] sm:$0xff] %v11199_v58  ;;  %v3445_v20 = vsub.f32 %v9990_v47, %v10208_v3  ;;  %v8471_v58 = vunpack.i.h.bf16 %v13895_v28 }
 0xdd2   :  { %v11187_v19 = vpop.permute.xlu1 %4832 }
 0xdd3   :  { %13823 = vst [vmem:[#allocation235_spill] sm:$0xff] %v11187_v19 }
 0xdd4   :  { %8710 = vset.pattern.permute.xlu1 %v13664_v40  ;;  %v2597_v40 = vsub.f32 %v9990_v47, %v10210_v38  ;;  %v4556_v38 = vsub.f32 %v9990_v47, %v10212_v52  ;;  %v3444_v52 = vsub.f32 %v9993_v53, %v10214_v26 }
 0xdd5   :  { %2652 = vperm.xlu1 %8710, %v10850_v63  }
 0xdd6   :  { %v11191_v7 = vpop.permute.xlu1 %4860  ;;  %v2602_v55 = vmul.f32 1.442695, %v2597_v40  ;;  %v4561_v3 = vmul.f32 1.442695, %v4556_v38 }
 0xdd7   :  { %13824 = vst [vmem:[#allocation236_spill] sm:$0xff] %v11191_v7  ;;  %v11208_v7 = vpop.permute.xlu0 %3134 }
 0xdd8   :  { %13829 = vst [vmem:[#allocation241_spill] sm:$0xff] %v11208_v7  ;;  %8972 = vpow2.f32 %v2602_v55 }
 0xdd9   :  { %8711 = vset.pattern.permute.xlu1 %v13711_v27 }
 0xdda   :  { %2816 = vperm.xlu1 %8711, %v10850_v63  }
 0xddb   :  { %v11197_v35 = vpop.permute.xlu1 %2655 }
 0xddc   :  { %13826 = vst [vmem:[#allocation238_spill] sm:$0xff] %v11197_v35 }
 0xdde   :  { %8712 = vset.pattern.permute.xlu1 %v13714_v4 }
 0xddf   :  { %3795 = vperm.xlu1 %8712, %v10850_v63  }
 0xde0   :  { %v11203_v19 = vpop.permute.xlu1 %2677 }
 0xde1   :  { %13828 = vst [vmem:[#allocation240_spill] sm:$0xff] %v11203_v19  ;;  %v3450_v19 = vmul.f32 1.442695, %v3445_v20 }
 0xde2   :  { %v11237_v55 = vpop.eup %8972 }
 0xde3   :  { %8717 = vset.pattern.permute.xlu1 %v13682_v51  ;;  %v11219_v51 = vpop.permute.xlu0 %3182  ;;  %8974 = vpow2.f32 %v3450_v19 }
 0xde4   :  { %3108 = vperm.xlu1 %8717, %v10850_v63   ;;  %v11211_v27 = vpop.permute.xlu1 %2705  ;;  %13832 = vst [vmem:[#allocation244_spill] sm:$0xff] %v11219_v51  ;;  %8976 = vpow2.f32 %v4561_v3  ;;  %v3447_v3 = vsub.f32 %v10012_v17, %v10232_v32  ;;  %v13841_v51 = vld [vmem:[#allocation49_spill] sm:$0xff] }
 0xde5   :  { %13830 = vst [vmem:[#allocation242_spill] sm:$0xff] %v11211_v27 }
 0xde7   :  { %v11229_v40 = vpop.permute.xlu0 %3210 }
 0xde8   :  { %8718 = vset.pattern.permute.xlu1 %v13727_v48  ;;  %v5551_v48 = vsub.f32 %v9990_v47, %v10216_v16  ;;  %13834 = vst [vmem:[#allocation246_spill] sm:$0xff] %v11229_v40  ;;  %v3448_v47 = vmul.f32 1.442695, %v3444_v52  ;;  %v4555_v16 = vsub.f32 %v9993_v53, %v10224_v1  ;;  %v4558_v53 = vsub.f32 %v10012_v17, %v10222_v31 }
 0xde9   :  { %4906 = vperm.xlu1 %8718, %v10850_v63   ;;  %v11217_v4 = vpop.permute.xlu1 %2819  ;;  %v3454_v1 = vmul.f32 1.442695, %v3447_v3 }
 0xdea   :  { %13831 = vst [vmem:[#allocation243_spill] sm:$0xff] %v11217_v4  ;;  %v4559_v26 = vmul.f32 1.442695, %v4555_v16  ;;  %v4565_v32 = vmul.f32 1.442695, %v4558_v53  ;;  %v13897_v4 = vld [vmem:[#allocation30_spill] sm:$0xff] }
 0xdeb   :  { %v11239_v19 = vpop.permute.xlu0 %4932  ;;  %v8481_v21 = vunpack.i.h.bf16 %v13897_v4 }
 0xdec   :  { %13836 = vst [vmem:[#allocation248_spill] sm:$0xff] %v11239_v19 }
 0xded   :  { %8720 = vset.pattern.permute.xlu1 %v13732_v49  ;;  %v5556_v49 = vmul.f32 1.442695, %v5551_v48  ;;  %v11247_v38 = vpop.eup %8974 }
 0xdee   :  { %4610 = vperm.xlu1 %8720, %v10850_v63   ;;  %v11225_v27 = vpop.permute.xlu1 %2838 }
 0xdef   :  { %13833 = vst [vmem:[#allocation245_spill] sm:$0xff] %v11225_v27  ;;  %8978 = vpow2.f32 %v5556_v49  ;;  %v11253_v48 = vpop.permute.xlu0 %5100  ;;  %v11257_v49 = vpop.eup %8976  ;;  %v5553_v27 = vsub.f32 %v10012_v17, %v13841_v51  ;;  %v13845_v51 = vld [vmem:[#allocation50_spill] sm:$0xff] }
 0xdf0   :  { %8980 = vpow2.f32 %v3448_v47  ;;  %v3446_v53 = vsub.f32 %v10020_v13, %v13845_v51 }
 0xdf1   :  { %8982 = vpow2.f32 %v4559_v26  ;;  %v13843_v26 = vld [vmem:[#allocation48_spill] sm:$0xff] }
 0xdf2   :  { %8721 = vset.pattern.permute.xlu1 %v13734_v56  ;;  %8984 = vpow2.f32 %v3454_v1  ;;  %v2598_v3 = vsub.f32 %v10020_v13, %v13843_v26 }
 0xdf3   :  { %4758 = vperm.xlu1 %8721, %v10850_v63   ;;  %v11233_v20 = vpop.permute.xlu1 %3798  ;;  %v11265_v47 = vpop.permute.xlu0 %2918  ;;  %8986 = vpow2.f32 %v4565_v32  ;;  %v13898_v63 = vmov 42  }
 0xdf4   :  { %13835 = vst [vmem:[#allocation247_spill] sm:$0xff] %v11233_v20  ;;  %13839 = vst [vmem:[#allocation251_spill] sm:$0xff] %v11265_v47  ;;  %v5560_v47 = vmul.f32 1.442695, %v5553_v27  ;;  %v2604_v17 = vmul.f32 1.442695, %v2598_v3 }
 0xdf5   :  { %v3452_v27 = vmul.f32 1.442695, %v3446_v53 }
 0xdf6   :  { %8988 = vpow2.f32 %v5560_v47 }
 0xdf7   :  { %2614 = vrot.lane.b32.xlu1 %v11237_v55, %s9082_s14  ;;  %v11281_v7 = vpop.permute.xlu0 %4660  ;;  %8990 = vpow2.f32 %v2604_v17 }
 0xdf8   :  { %v11245_v56 = vpop.permute.xlu1 %3942  ;;  %13844 = vst [vmem:[#allocation48_spill] sm:$0xff] %v11281_v7  ;;  %8992 = vpow2.f32 %v3452_v27 }
 0xdf9   :  { %13837 = vst [vmem:[#allocation249_spill] sm:$0xff] %v11245_v56  ;;  %v11263_v40 = vpop.eup %8978 }
 0xdfa   :  { %v11273_v19 = vpop.eup %8980 }
 0xdfb   :  { %3462 = vrot.lane.b32.xlu1 %v11247_v38, %s9118_s6  ;;  %v11293_v32 = vpop.permute.xlu0 %4808 }
 0xdfc   :  { %13847 = vst [vmem:[#allocation253_spill] sm:$0xff] %v11293_v32 }
 0xdfd   :  { %v11255_v52 = vpop.permute.xlu1 %3841 }
 0xdfe   :  { %13838 = vst [vmem:[#allocation250_spill] sm:$0xff] %v11255_v52  ;;  %v11283_v52 = vpop.eup %8982 }
 0xdff   :  { %4573 = vrot.lane.b32.xlu1 %v11257_v49, %s9085_s16  ;;  %v11303_v13 = vpop.permute.xlu0 %4684 }
 0xe00   :  { %13849 = vst [vmem:[#allocation255_spill] sm:$0xff] %v11303_v13 }
 0xe02   :  { %v11267_v16 = vpop.permute.xlu1 %3961 }
 0xe03   :  { %13840 = vst [vmem:[#allocation252_spill] sm:$0xff] %v11267_v16  ;;  %5568 = vrot.lane.b32.xlu1 %v11263_v40, %s9117_s2  ;;  %v11291_v16 = vpop.eup %8984  ;;  %v11315_v53 = vpop.permute.xlu0 %4712 }
 0xe04   :  { %v11299_v7 = vpop.eup %8986  ;;  %13853 = vst [vmem:[#allocation259_spill] sm:$0xff] %v11315_v53 }
 0xe05   :  { %v11307_v3 = vpop.eup %8988 }
 0xe06   :  { %13851 = vst [vmem:[#allocation257_spill] sm:$0xff] %v11307_v3  ;;  %v11313_v17 = vpop.eup %8990 }
 0xe07   :  { %3460 = vrot.lane.b32.xlu1 %v11273_v19, %s9118_s6  ;;  %v11277_v31 = vpop.permute.xlu1 %3502  ;;  %v11319_v32 = vpop.eup %8992 }
 0xe08   :  { %13842 = vst [vmem:[#allocation49_spill] sm:$0xff] %v11277_v31  ;;  %v11325_v13 = vpop.permute.xlu0 %2862 }
 0xe09   :  { %13855 = vst [vmem:[#allocation261_spill] sm:$0xff] %v11325_v13 }
 0xe0b   :  { %4571 = vrot.lane.b32.xlu1 %v11283_v52, %s9085_s16 }
 0xe0c   :  { %v11289_v1 = vpop.permute.xlu1 %3521 }
 0xe0d   :  { %13846 = vst [vmem:[#allocation50_spill] sm:$0xff] %v11289_v1 }
 0xe0f   :  { %3466 = vrot.lane.b32.xlu1 %v11291_v16, %s9118_s6 }
 0xe10   :  { %v11297_v26 = vpop.permute.xlu1 %3545 }
 0xe11   :  { %13848 = vst [vmem:[#allocation254_spill] sm:$0xff] %v11297_v26 }
 0xe13   :  { %4577 = vrot.lane.b32.xlu1 %v11299_v7, %s9085_s16 }
 0xe15   :  { %v11305_v47 = vpop.permute.xlu1 %3669 }
 0xe16   :  { %13850 = vst [vmem:[#allocation256_spill] sm:$0xff] %v11305_v47 }
 0xe17   :  { %5572 = vrot.lane.b32.xlu1 %v11307_v3, %s9117_s2  ;;  %v11329_v3 = vpop.permute.xlu0 %3817 }
 0xe18   :  { %13857 = vst [vmem:[#allocation263_spill] sm:$0xff] %v11329_v3 }
 0xe19   :  { %v11311_v51 = vpop.permute.xlu1 %3693 }
 0xe1a   :  { %13852 = vst [vmem:[#allocation258_spill] sm:$0xff] %v11311_v51 }
 0xe1b   :  { %2616 = vrot.lane.b32.xlu1 %v11313_v17, %s9082_s14  ;;  %v11333_v51 = vpop.permute.xlu0 %3985 }
 0xe1c   :  { %13859 = vst [vmem:[#allocation265_spill] sm:$0xff] %v11333_v51  ;;  %v13505_v51 = vmov 31  }
 0xe1e   :  { %v11321_v27 = vpop.permute.xlu1 %3111 }
 0xe1f   :  { %13854 = vst [vmem:[#allocation260_spill] sm:$0xff] %v11321_v27  ;;  %3464 = vrot.lane.b32.xlu1 %v11319_v32, %s9118_s6  ;;  %v11337_v26 = vpop.permute.xlu0 %3650 }
 0xe23   :  { %v11327_v47 = vpop.permute.xlu1 %3010  ;;  %v11343_v22 = vpop.permute.xlu0 %2967 }
 0xe24   :  { %13856 = vst [vmem:[#allocation262_spill] sm:$0xff] %v11327_v47 }
 0xe27   :  { %v11347_v13 = vpop.permute.xlu0 %2986 }
 0xe28   :  { %v11331_v1 = vpop.permute.xlu1 %3130  ;;  %13864 = vst [vmem:[#allocation270_spill] sm:$0xff] %v11347_v13 }
 0xe29   :  { %13858 = vst [vmem:[#allocation264_spill] sm:$0xff] %v11331_v1 }
 0xe2b   :  { %v11351_v3 = vpop.permute.xlu0 %3154 }
 0xe2c   :  { %13866 = vst [vmem:[#allocation272_spill] sm:$0xff] %v11351_v3 }
 0xe2d   :  { %v11335_v53 = vpop.permute.xlu1 %4909 }
 0xe2e   :  { %13860 = vst [vmem:[#allocation266_spill] sm:$0xff] %v11335_v53 }
 0xe2f   :  { %v11355_v50 = vpop.permute.xlu0 %5053 }
 0xe32   :  { %v11339_v30 = vpop.permute.xlu1 %4928 }
 0xe33   :  { %13861 = vst [vmem:[#allocation267_spill] sm:$0xff] %v11339_v30  ;;  %v11361_v30 = vpop.permute.xlu0 %4952 }
 0xe34   :  { %13870 = vst [vmem:[#allocation276_spill] sm:$0xff] %v11361_v30 }
 0xe37   :  { %v11341_v27 = vpop.permute.xlu1 %5072  ;;  %v11365_v25 = vpop.permute.xlu0 %4632 }
 0xe38   :  { %13862 = vst [vmem:[#allocation268_spill] sm:$0xff] %v11341_v27  ;;  %13872 = vst [vmem:[#allocation278_spill] sm:$0xff] %v11365_v25 }
 0xe3b   :  { %v11345_v31 = vpop.permute.xlu1 %5096  ;;  %v11369_v59 = vpop.permute.xlu0 %4780 }
 0xe3c   :  { %13863 = vst [vmem:[#allocation269_spill] sm:$0xff] %v11345_v31  ;;  %13874 = vst [vmem:[#allocation280_spill] sm:$0xff] %v11369_v59 }
 0xe3f   :  { %v11373_v3 = vpop.permute.xlu0 %3939 }
 0xe40   :  { %v11349_v47 = vpop.permute.xlu1 %4613 }
 0xe41   :  { %13865 = vst [vmem:[#allocation271_spill] sm:$0xff] %v11349_v47 }
 0xe43   :  { %v11377_v45 = vpop.permute.xlu0 %3499 }
 0xe45   :  { %v11353_v1 = vpop.permute.xlu1 %4761 }
 0xe46   :  { %13867 = vst [vmem:[#allocation273_spill] sm:$0xff] %v11353_v1 }
 0xe47   :  { %v11383_v30 = vpop.permute.xlu0 %3647 }
 0xe48   :  { %13879 = vst [vmem:[#allocation285_spill] sm:$0xff] %v11383_v30  ;;  %v13913_v30 = vld [vmem:[#allocation106_spill] sm:$0xff] }
 0xe4a   :  { %v11357_v53 = vpop.permute.xlu1 %4656 }
 0xe4b   :  { %13868 = vst [vmem:[#allocation274_spill] sm:$0xff] %v11357_v53  ;;  %v11387_v25 = vpop.permute.xlu0 %2964 }
 0xe4c   :  { %13881 = vst [vmem:[#allocation287_spill] sm:$0xff] %v11387_v25 }
 0xe4f   :  { %v11359_v56 = vpop.permute.xlu1 %4804 }
 0xe50   :  { %13869 = vst [vmem:[#allocation275_spill] sm:$0xff] %v11359_v56 }
 0xe54   :  { %v11363_v27 = vpop.permute.xlu1 %2652 }
 0xe55   :  { %13871 = vst [vmem:[#allocation277_spill] sm:$0xff] %v11363_v27 }
 0xe59   :  { %v11367_v31 = vpop.permute.xlu1 %2816 }
 0xe5a   :  { %13873 = vst [vmem:[#allocation279_spill] sm:$0xff] %v11367_v31 }
 0xe5e   :  { %v11371_v47 = vpop.permute.xlu1 %3795 }
 0xe5f   :  { %13875 = vst [vmem:[#allocation281_spill] sm:$0xff] %v11371_v47  ;;  %v11390_v47 = vpop.permute.xlu0 %5050 }
 0xe60   :  { %13882 = vst [vmem:[#allocation288_spill] sm:$0xff] %v11390_v47 }
 0xe63   :  { %v11375_v1 = vpop.permute.xlu1 %3108  ;;  %v2613_v62 = vpop.permute.xlu0 %2612 }
 0xe64   :  { %13876 = vst [vmem:[#allocation282_spill] sm:$0xff] %v11375_v1 }
 0xe67   :  { %v5567_v54 = vpop.permute.xlu0 %5566 }
 0xe68   :  { %v11379_v53 = vpop.permute.xlu1 %4906  ;;  %v5578_v47 = vsel %vm2624_vm5, %v5567_v54, 0.0 }
 0xe69   :  { %13877 = vst [vmem:[#allocation283_spill] sm:$0xff] %v11379_v53 }
 0xe6d   :  { %v11381_v56 = vpop.permute.xlu1 %4610 }
 0xe6e   :  { %13878 = vst [vmem:[#allocation284_spill] sm:$0xff] %v11381_v56 }
 0xe72   :  { %v11385_v27 = vpop.permute.xlu1 %4758 }
 0xe73   :  { %13880 = vst [vmem:[#allocation286_spill] sm:$0xff] %v11385_v27 }
 0xe76   :  { %v2615_v31 = vpop.permute.xlu1 %2614 }
 0xe77   :  { %v2628_v59 = vsel %vm2624_vm5, %v2615_v31, 0.0  ;;  %v2625_v31 = vsel %vm2624_vm5, %v2613_v62, 0.0 }
 0xe78   :  { %2629 = vadd.xlane.f32.xlu0 %v2628_v59 }
 0xe7a   :  { %v3463_v1 = vpop.permute.xlu1 %3462 }
 0xe7b   :  { %v3475_v20 = vsel %vm2624_vm5, %v3463_v1, 0.0 }
 0xe7c   :  { %3476 = vadd.xlane.f32.xlu0 %v3475_v20  ;;  %v2619_v20 = vpop.permute.xlu0 %2618 }
 0xe7e   :  { %v4574_v53 = vpop.permute.xlu1 %4573 }
 0xe7f   :  { %v4586_v56 = vsel %vm2624_vm5, %v4574_v53, 0.0 }
 0xe80   :  { %4587 = vadd.xlane.f32.xlu1 %v4586_v56  ;;  %v2634_v56 = vsel %vm2624_vm5, %v2619_v20, 0.0  ;;  %v4576_v20 = vpop.permute.xlu0 %4575 }
 0xe82   :  { %v5569_v0 = vpop.permute.xlu1 %5568 }
 0xe83   :  { %v5581_v27 = vsel %vm2624_vm5, %v5569_v0, 0.0 }
 0xe84   :  { %5582 = vadd.xlane.f32.xlu1 %v5581_v27 }
 0xe86   :  { %v3461_v13 = vpop.permute.xlu1 %3460 }
 0xe87   :  { %v3472_v6 = vsel %vm2624_vm5, %v3461_v13, 0.0 }
 0xe88   :  { %2626 = vadd.xlane.f32.xlu1 %v2625_v31  ;;  %v13484_v31 = vmov 32  }
 0xe89   :  { %8722 = vset.pattern.permute.xlu1 %v13484_v31 }
 0xe8a   :  { %v4572_v59 = vpop.permute.xlu1 %4571 }
 0xe8b   :  { %v4583_v1 = vsel %vm2624_vm5, %v4572_v59, 0.0 }
 0xe8c   :  { %3473 = vadd.xlane.f32.xlu1 %v3472_v6  ;;  %4584 = vadd.xlane.f32.xlu0 %v4583_v1  ;;  %v13482_v6 = vmov 37  }
 0xe8d   :  { %8728 = vset.pattern.permute.xlu0 %v13482_v6 }
 0xe8e   :  { %v3467_v53 = vpop.permute.xlu1 %3466 }
 0xe8f   :  { %v3481_v27 = vsel %vm2624_vm5, %v3467_v53, 0.0  ;;  %v4589_v53 = vsel %vm2624_vm5, %v4576_v20, 0.0  ;;  %v13486_v20 = vmov 38  }
 0xe90   :  { %2635 = vadd.xlane.f32.xlu1 %v2634_v56  ;;  %5579 = vadd.xlane.f32.xlu0 %v5578_v47  ;;  %v11409_v56 = vpop.permute.xlu0 %5570 }
 0xe92   :  { %v4578_v0 = vpop.permute.xlu1 %4577 }
 0xe93   :  { %v4592_v62 = vsel %vm2624_vm5, %v4578_v0, 0.0 }
 0xe94   :  { %3482 = vadd.xlane.f32.xlu0 %v3481_v27  ;;  %4593 = vadd.xlane.f32.xlu1 %v4592_v62 }
 0xe96   :  { %v11403_v13 = vpop.permute.xlu1 %5572 }
 0xe9a   :  { %v2617_v59 = vpop.permute.xlu1 %2616 }
 0xe9b   :  { %v2631_v54 = vsel %vm2624_vm5, %v2617_v59, 0.0 }
 0xe9c   :  { %2632 = vadd.xlane.f32.xlu0 %v2631_v54 }
 0xe9e   :  { %v3465_v47 = vpop.permute.xlu1 %3464 }
 0xe9f   :  { %v3478_v1 = vsel %vm2624_vm5, %v3465_v47, 0.0 }
 0xea0   :  { %3479 = vadd.xlane.f32.xlu1 %v3478_v1 }
 0xea4   :  { %4590 = vadd.xlane.f32.xlu1 %v4589_v53 }
 0xf05   :  { %v2630_v0 = vpop.xlane.xlu0 %2629 }
 0xf06   :  { %8994 = vrcp.f32 %v2630_v0 }
 0xf09   :  { %v3477_v27 = vpop.xlane.xlu0 %3476 }
 0xf0a   :  { %8996 = vrcp.f32 %v3477_v27 }
 0xf0d   :  { %v4588_v62 = vpop.xlane.xlu1 %4587 }
 0xf0e   :  { %8998 = vrcp.f32 %v4588_v62  ;;  %v13488_v62 = vmov 41  }
 0xf10   :  { %v8995_v6 = vpop.eup %8994 }
 0xf11   :  { %v11411_v31 = vpop.xlane.xlu1 %5582  ;;  %v11414_v59 = vmul.f32 %v8995_v6, %v11237_v55  ;;  %v13492_v55 = vmov 39  }
 0xf13   :  { %2792 = vperm.xlu1 %8722, %v11414_v59  }
 0xf14   :  { %v8997_v54 = vpop.eup %8996 }
 0xf15   :  { %v2627_v47 = vpop.xlane.xlu1 %2626  ;;  %v3489_v1 = vmul.f32 %v8997_v54, %v11247_v38  ;;  %v13883_v54 = vmov 32  }
 0xf16   :  { %9000 = vrcp.f32 %v2627_v47  ;;  %v13490_v47 = vmov 34  }
 0xf17   :  { %3769 = vperm.xlu0 %8728, %v3489_v1   ;;  %8723 = vset.pattern.permute.xlu1 %v13486_v20 }
 0xf18   :  { %v8999_v53 = vpop.eup %8998  ;;  %3917 = vperm.xlu1 %8723, %v3489_v1  }
 0xf19   :  { %v3474_v0 = vpop.xlane.xlu1 %3473  ;;  %v4600_v27 = vmul.f32 %v8999_v53, %v11257_v49  ;;  %v4585_v6 = vpop.xlane.xlu0 %4584  ;;  %v9125_v53 = vmov 35  }
 0xf1a   :  { %9002 = vrcp.f32 %v3474_v0 }
 0xf1b   :  { %8733 = vset.pattern.permute.xlu0 %v13488_v62  ;;  %9004 = vrcp.f32 %v4585_v6 }
 0xf1c   :  { %8724 = vset.pattern.permute.xlu1 %v13492_v55  ;;  %4880 = vperm.xlu0 %8733, %v4600_v27  }
 0xf1d   :  { %4061 = vperm.xlu1 %8724, %v3489_v1   ;;  %v2636_v62 = vpop.xlane.xlu1 %2635 }
 0xf1e   :  { %9006 = vrcp.f32 %v2636_v62 }
 0xf20   :  { %v9001_v38 = vpop.eup %9000  ;;  %8734 = vset.pattern.permute.xlu0 %v13883_v54 }
 0xf21   :  { %8725 = vset.pattern.permute.xlu1 %v13490_v47  ;;  %v11425_v20 = vmul.f32 %v9001_v38, %v10901_v44  ;;  %v13494_v47 = vmov 36   ;;  %v13884_v44 = vmov 37   ;;  %v4594_v6 = vpop.xlane.xlu1 %4593 }
 0xf22   :  { %3086 = vperm.xlu1 %8725, %v11414_v59   ;;  %9008 = vrcp.f32 %v4594_v6 }
 0xf23   :  { %2787 = vperm.xlu0 %8734, %v11425_v20  }
 0xf24   :  { %v9003_v49 = vpop.eup %9002 }
 0xf25   :  { %v3488_v0 = vmul.f32 %v9003_v49, %v11273_v19  ;;  %v9005_v38 = vpop.eup %9004  ;;  %v13496_v49 = vmov 43  }
 0xf26   :  { %8726 = vset.pattern.permute.xlu1 %v9125_v53  ;;  %v4599_v19 = vmul.f32 %v9005_v38, %v11283_v52 }
 0xf27   :  { %3230 = vperm.xlu1 %8726, %v11414_v59   ;;  %8736 = vset.pattern.permute.xlu0 %v13492_v55 }
 0xf28   :  { %4057 = vperm.xlu0 %8736, %v3488_v0   ;;  %v9007_v62 = vpop.eup %9006 }
 0xf29   :  { %v11441_v52 = vmul.f32 %v9007_v62, %v10917_v5  ;;  %v13886_v5 = vmov 41   ;;  %v13887_v62 = vmov 34  }
 0xf2b   :  { %8727 = vset.pattern.permute.xlu1 %v13494_v47  ;;  %v9130_v47 = vmov 33  }
 0xf2c   :  { %3623 = vperm.xlu1 %8727, %v3489_v1   ;;  %8740 = vset.pattern.permute.xlu0 %v13884_v44  ;;  %v13498_v1 = vmov 40   ;;  %v9009_v38 = vpop.eup %9008 }
 0xf2d   :  { %3765 = vperm.xlu0 %8740, %v3488_v0   ;;  %v3480_v55 = vpop.xlane.xlu1 %3479  ;;  %v4602_v6 = vmul.f32 %v9009_v38, %v11299_v7  ;;  %v13888_v7 = vmov 36  }
 0xf2e   :  { %9010 = vrcp.f32 %v3480_v55 }
 0xf30   :  { %8729 = vset.pattern.permute.xlu1 %v13499_v23 }
 0xf31   :  { %5028 = vperm.xlu1 %8729, %v4600_v27   ;;  %8742 = vset.pattern.permute.xlu0 %v13496_v49 }
 0xf32   :  { %5168 = vperm.xlu0 %8742, %v4599_v19  }
 0xf35   :  { %8730 = vset.pattern.permute.xlu1 %v13496_v49  ;;  %v13885_v49 = vmov 38  }
 0xf36   :  { %5172 = vperm.xlu1 %8730, %v4600_v27   ;;  %8744 = vset.pattern.permute.xlu0 %v13498_v1 }
 0xf37   :  { %4729 = vperm.xlu0 %8744, %v4599_v19  }
 0xf3a   :  { %8731 = vset.pattern.permute.xlu1 %v9130_v47 }
 0xf3b   :  { %2938 = vperm.xlu1 %8731, %v11414_v59   ;;  %8746 = vset.pattern.permute.xlu0 %v13883_v54  ;;  %v9011_v59 = vpop.eup %9010 }
 0xf3c   :  { %2802 = vperm.xlu0 %8746, %v11441_v52   ;;  %v11453_v55 = vmul.f32 %v9011_v59, %v11319_v32 }
 0xf3f   :  { %8732 = vset.pattern.permute.xlu1 %v13498_v1 }
 0xf40   :  { %4734 = vperm.xlu1 %8732, %v4600_v27   ;;  %8751 = vset.pattern.permute.xlu0 %v13499_v23  ;;  %v11460_v27 = vpop.xlane.xlu0 %5579 }
 0xf41   :  { %5036 = vperm.xlu0 %8751, %v4602_v6  }
 0xf44   :  { %8735 = vset.pattern.permute.xlu1 %v13885_v49  ;;  %v3483_v32 = vpop.xlane.xlu0 %3482 }
 0xf45   :  { %3913 = vperm.xlu1 %8735, %v3488_v0   ;;  %8754 = vset.pattern.permute.xlu0 %v13886_v5  ;;  %9012 = vrcp.f32 %v3483_v32 }
 0xf46   :  { %4888 = vperm.xlu0 %8754, %v4602_v6  }
 0xf49   :  { %8737 = vset.pattern.permute.xlu1 %v13887_v62 }
 0xf4a   :  { %3082 = vperm.xlu1 %8737, %v11425_v20   ;;  %8756 = vset.pattern.permute.xlu0 %v13885_v49 }
 0xf4b   :  { %3921 = vperm.xlu0 %8756, %v11453_v55  }
 0xf4e   :  { %8738 = vset.pattern.permute.xlu1 %v9125_v53 }
 0xf4f   :  { %3226 = vperm.xlu1 %8738, %v11425_v20   ;;  %8759 = vset.pattern.permute.xlu0 %v13888_v7  ;;  %v9013_v38 = vpop.eup %9012 }
 0xf50   :  { %3628 = vperm.xlu0 %8759, %v11453_v55   ;;  %v3491_v59 = vmul.f32 %v9013_v38, %v11291_v16  ;;  %v13890_v16 = vmov 43   ;;  %v13892_v38 = vld [vmem:[#allocation31_spill] sm:$0xff] }
 0xf53   :  { %8739 = vset.pattern.permute.xlu1 %v13888_v7 }
 0xf54   :  { %3618 = vperm.xlu1 %8739, %v3488_v0   ;;  %8761 = vset.pattern.permute.xlu0 %v9125_v53  ;;  %v13889_v0 = vmov 39   ;;  %v5584_v53 = vsel %vm2624_vm5, %v11409_v56, 0.0 }
 0xf58   :  { %8741 = vset.pattern.permute.xlu1 %v13499_v23 }
 0xf59   :  { %5024 = vperm.xlu1 %8741, %v4599_v19  }
 0xf5d   :  { %8743 = vset.pattern.permute.xlu1 %v9130_v47 }
 0xf5e   :  { %2934 = vperm.xlu1 %8743, %v11425_v20   ;;  %v2633_v20 = vpop.xlane.xlu0 %2632 }
 0xf5f   :  { %9014 = vrcp.f32 %v2633_v20  ;;  %v13893_v20 = vld [vmem:[#allocation28_spill] sm:$0xff] }
 0xf62   :  { %8745 = vset.pattern.permute.xlu1 %v13886_v5 }
 0xf63   :  { %4876 = vperm.xlu1 %8745, %v4599_v19  }
 0xf67   :  { %8747 = vset.pattern.permute.xlu1 %v13885_v49  ;;  %v4591_v49 = vpop.xlane.xlu1 %4590 }
 0xf68   :  { %3925 = vperm.xlu1 %8747, %v3491_v59   ;;  %9016 = vrcp.f32 %v4591_v49  ;;  %v8465_v49 = vunpack.i.l.bf16 %v13893_v20 }
 0xf69   :  { %v9015_v19 = vpop.eup %9014  ;;  %9018 = vrcp.f32 %v11460_v27 }
 0xf6a   :  { %v11479_v56 = vmul.f32 %v9015_v19, %v11313_v17  ;;  %v8466_v19 = vunpack.i.h.bf16 %v13893_v20  ;;  %v8480_v20 = vunpack.i.l.bf16 %v13897_v4  ;;  %9020 = vrcp.f32 %v11411_v31  ;;  %v14008_v31 = vld [vmem:[#allocation88_spill] sm:$0xff] }
 0xf6c   :  { %8748 = vset.pattern.permute.xlu1 %v13889_v0  ;;  %v11519_v39 = vpack.c.bf16 %v8466_v19, %v8465_v49 }
 0xf6d   :  { %4069 = vperm.xlu1 %8748, %v3491_v59  }
 0xf6f   :  { %5585 = vadd.xlane.f32.xlu0 %v5584_v53  ;;  %v8461_v53 = vunpack.i.h.bf16 %v13892_v38 }
 0xf71   :  { %8749 = vset.pattern.permute.xlu1 %v13888_v7  ;;  %v13891_v7 = vld [vmem:[#allocation27_spill] sm:$0xff] }
 0xf72   :  { %3633 = vperm.xlu1 %8749, %v3491_v59   ;;  %v8456_v32 = vunpack.i.h.bf16 %v13891_v7  ;;  %v9017_v17 = vpop.eup %9016 }
 0xf73   :  { %v11505_v33 = vmul.f32 %v9017_v17, %v10927_v41  ;;  %v13901_v41 = vld [vmem:[#allocation37_spill] sm:$0xff]  ;;  %v13903_v17 = vld [vmem:[#allocation32_spill] sm:$0xff] }
 0xf76   :  { %8750 = vset.pattern.permute.xlu1 %v9130_v47 }
 0xf77   :  { %2946 = vperm.xlu1 %8750, %v11441_v52  }
 0xf7b   :  { %8752 = vset.pattern.permute.xlu1 %v13890_v16 }
 0xf7c   :  { %5180 = vperm.xlu1 %8752, %v4602_v6  }
 0xf80   :  { %8753 = vset.pattern.permute.xlu1 %v13498_v1 }
 0xf81   :  { %4744 = vperm.xlu1 %8753, %v4602_v6   ;;  %v8455_v6 = vunpack.i.l.bf16 %v13891_v7  ;;  %v8470_v7 = vunpack.i.l.bf16 %v13895_v28  ;;  %v13900_v28 = vld [vmem:[#allocation6_spill] sm:$0xff] }
 0xf83   :  { %v11510_v35 = vpack.c.bf16 %v8456_v32, %v8455_v6  ;;  %v11521_v4 = vpack.c.bf16 %v8471_v58, %v8470_v7  ;;  %v11527_v32 = vpack.c.bf16 %v8481_v21, %v8480_v20  ;;  %v11539_v58 = vsub.s32 %v13900_v28, %v10832_v2  ;;  %v13906_v2 = vld [vmem:[#allocation41_spill] sm:$0xff]  ;;  %v13907_v20 = vld [vmem:[#allocation36_spill] sm:$0xff] }
 0xf84   :  { %v8521_v7 = vunpack.i.h.bf16 %v13906_v2 }
 0xf85   :  { %8755 = vset.pattern.permute.xlu1 %v13883_v54  ;;  %3238 = vperm.xlu0 %8761, %v11441_v52   ;;  %v8460_v54 = vunpack.i.l.bf16 %v13892_v38  ;;  %vm3509_vm8 = vcmp.eq.s32.totalorder %v11539_v58, 0  ;;  %vm3533_vm12 = vcmp.eq.s32.totalorder %v11539_v58, 1  ;;  %vm3561_vm15 = vcmp.eq.s32.totalorder %v11539_v58, 8 }
 0xf86   :  { %2797 = vperm.xlu1 %8755, %v11479_v56   ;;  %v3529_v25 = vsel %vm3509_vm8, %v13912_v24, 0.0  ;;  %vm3589_vm7 = vcmp.eq.s32.totalorder %v11539_v58, 9 }
 0xf89   :  { %3234 = vperm.xlu0 %8761, %v11479_v56  }
 0xf8a   :  { %8757 = vset.pattern.permute.xlu1 %v13889_v0  ;;  %v13894_v0 = vld [vmem:[#allocation33_spill] sm:$0xff] }
 0xf8b   :  { %4065 = vperm.xlu1 %8757, %v11453_v55   ;;  %v8476_v1 = vunpack.i.h.bf16 %v13894_v0  ;;  %v8475_v23 = vunpack.i.l.bf16 %v13894_v0 }
 0xf8d   :  { %8762 = vset.pattern.permute.xlu0 %v9130_v47  ;;  %v13896_v47 = vld [vmem:[#allocation35_spill] sm:$0xff] }
 0xf8e   :  { %2942 = vperm.xlu0 %8762, %v11479_v56   ;;  %v8486_v11 = vunpack.i.h.bf16 %v13896_v47  ;;  %v8485_v38 = vunpack.i.l.bf16 %v13896_v47  ;;  %v11517_v47 = vpack.c.bf16 %v8461_v53, %v8460_v54  ;;  %v11535_v53 = vsub.s32 %v13900_v28, %v10809_v37  ;;  %v13905_v54 = vld [vmem:[#allocation34_spill] sm:$0xff] }
 0xf8f   :  { %8758 = vset.pattern.permute.xlu1 %v13884_v44  ;;  %v11514_v44 = vsub.s32 %v13900_v28, %v10781_v9  ;;  %v8490_v9 = vunpack.i.l.bf16 %v13901_v41  ;;  %v8501_v19 = vunpack.i.h.bf16 %v13905_v54  ;;  %v8500_v49 = vunpack.i.l.bf16 %v13905_v54  ;;  %v13910_v54 = vld [vmem:[#allocation107_spill] sm:$0xff] }
 0xf90   :  { %3777 = vperm.xlu1 %8758, %v3491_v59   ;;  %v8491_v59 = vunpack.i.h.bf16 %v13901_v41  ;;  %v11529_v6 = vpack.c.bf16 %v8486_v11, %v8485_v38  ;;  %v11546_v11 = vsub.s32 %v13900_v28, %v10874_v15  ;;  %v8520_v38 = vunpack.i.l.bf16 %v13906_v2 }
 0xf91   :  { %vm2826_vm14 = vcmp.eq.s32.totalorder %v11514_v44, 0  ;;  %vm2850_vm3 = vcmp.eq.s32.totalorder %v11514_v44, 1  ;;  %v8511_v41 = vunpack.i.h.bf16 %v13907_v20  ;;  %v8510_v15 = vunpack.i.l.bf16 %v13907_v20  ;;  %v13911_v20 = vld [vmem:[#allocation92_spill] sm:$0xff] }
 0xf92   :  { %8763 = vset.pattern.permute.xlu0 %v13898_v63  ;;  %v11508_v0 = vpop.permute.xlu1 %2792  ;;  %v11525_v63 = vpack.c.bf16 %v8476_v1, %v8475_v23  ;;  %13902 = vst [vmem:[#allocation31_spill] sm:$0xff] %v11529_v6  ;;  %v13904_v23 = vld [vmem:[#allocation39_spill] sm:$0xff]  ;;  %vm3949_vm1 = vcmp.eq.s32.totalorder %v11535_v53, 0  ;;  %vm3973_vm0 = vcmp.eq.s32.totalorder %v11535_v53, 1  ;;  %vm5060_vm4 = vcmp.eq.s32.totalorder %v11546_v11, 0 }
 0xf93   :  { %13899 = vst [vmem:[#allocation27_spill] sm:$0xff] %v11508_v0  ;;  %5032 = vperm.xlu0 %8763, %v11505_v33   ;;  %v8496_v0 = vunpack.i.h.bf16 %v13903_v17  ;;  %v8506_v1 = vunpack.i.h.bf16 %v13904_v23  ;;  %v8505_v21 = vunpack.i.l.bf16 %v13904_v23  ;;  %vm5084_vm6 = vcmp.eq.s32.totalorder %v11546_v11, 1 }
 0xf94   :  { %3773 = vperm.xlu1 %8758, %v11453_v55   ;;  %v8495_v55 = vunpack.i.l.bf16 %v13903_v17  ;;  %v11570_v17 = vpack.c.bf16 %v8491_v59, %v8490_v9  ;;  %v3969_v2 = vsel %vm3949_vm1, %v13910_v54, 0.0  ;;  %v3993_v36 = vsel %vm3973_vm0, %v13911_v20, 0.0  ;;  %v13915_v59 = vld [vmem:[#allocation122_spill] sm:$0xff] }
 0xf95   :  { %v3553_v6 = vsel %vm3533_vm12, %v13913_v30, 0.0  ;;  %vm2878_vm10 = vcmp.eq.s32.totalorder %v11514_v44, 8  ;;  %v11590_v54 = vpack.c.bf16 %v8511_v41, %v8510_v15  ;;  %v11592_v24 = vpack.c.bf16 %v8521_v7, %v8520_v38  ;;  %v13923_v38 = vld [vmem:[#allocation76_spill] sm:$0xff]  ;;  %v13924_v15 = vld [vmem:[#allocation71_spill] sm:$0xff] }
 0xf96   :  { %v11572_v23 = vpack.c.bf16 %v8496_v0, %v8495_v55  ;;  %v5104_v0 = vsel %vm5084_vm6, %v13915_v59, 0.0  ;;  %v13916_v55 = vld [vmem:[#allocation38_spill] sm:$0xff]  ;;  %v3997_v30 = vadd.f32 %v3993_v36, %v3969_v2  ;;  %vm4001_vm13 = vcmp.eq.s32.totalorder %v11535_v53, 4  ;;  %v13921_v59 = vld [vmem:[#allocation40_spill] sm:$0xff] }
 0xf97   :  { %8766 = vset.pattern.permute.xlu0 %v13886_v5  ;;  %v11551_v37 = vpop.permute.xlu1 %3917  ;;  %v2846_v5 = vsel %vm2826_vm14, %v10551_v46, 0.0  ;;  %13918 = vst [vmem:[#allocation35_spill] sm:$0xff] %v11590_v54  ;;  %13919 = vst [vmem:[#allocation30_spill] sm:$0xff] %v11592_v24  ;;  %v3557_v20 = vadd.f32 %v3553_v6, %v3529_v25  ;;  %vm5112_vm2 = vcmp.eq.s32.totalorder %v11546_v11, 4  ;;  %vm2906_vm9 = vcmp.eq.s32.totalorder %v11514_v44, 9  ;;  %v13922_v25 = vld [vmem:[#allocation139_spill] sm:$0xff] }
 0xf98   :  { %8760 = vset.pattern.permute.xlu1 %v13887_v62  ;;  %4884 = vperm.xlu0 %8766, %v11505_v33   ;;  %v2870_v62 = vsel %vm2850_vm3, %v10556_v18, 0.0  ;;  %13908 = vst [vmem:[#allocation28_spill] sm:$0xff] %v11572_v23  ;;  %v13914_v18 = vld [vmem:[#allocation121_spill] sm:$0xff]  ;;  %v11607_v6 = vsub.s32 %v13900_v28, %v13922_v25  ;;  %v4021_v41 = vsel %vm4001_vm13, %v13923_v38, 0.0  ;;  %vm4029_vm11 = vcmp.eq.s32.totalorder %v11535_v53, 5  ;;  %v14137_v23 = vld [vmem:[#allocation256_spill] sm:$0xff] }
 0xf99   :  { %3094 = vperm.xlu1 %8760, %v11441_v52   ;;  %v11574_v52 = vpack.c.bf16 %v8501_v19, %v8500_v49  ;;  %v5080_v46 = vsel %vm5060_vm4, %v13914_v18, 0.0  ;;  %v2874_v9 = vadd.f32 %v2870_v62, %v2846_v5  ;;  %v8516_v19 = vunpack.i.h.bf16 %v13916_v55  ;;  %v13920_v5 = vld [vmem:[#allocation67_spill] sm:$0xff] }
 0xf9a   :  { %v11588_v49 = vpack.c.bf16 %v8506_v1, %v8505_v21  ;;  %v8515_v18 = vunpack.i.l.bf16 %v13916_v55  ;;  %v2898_v62 = vsel %vm2878_vm10, %v13920_v5, 0.0  ;;  %v8526_v1 = vunpack.i.h.bf16 %v13921_v59  ;;  %v13926_v5 = vld [vmem:[#allocation93_spill] sm:$0xff] }
 0xf9b   :  { %13909 = vst [vmem:[#allocation33_spill] sm:$0xff] %v11574_v52  ;;  %v8525_v21 = vunpack.i.l.bf16 %v13921_v59  ;;  %v2902_v36 = vadd.f32 %v2898_v62, %v2874_v9  ;;  %v3581_v2 = vsel %vm3561_vm15, %v13924_v15, 0.0  ;;  %v2657_v44 = vsub.s32 %v13900_v28, %v10924_v14  ;;  %v13927_v59 = vld [vmem:[#allocation79_spill] sm:$0xff] }
 0xf9c   :  { %v11578_v34 = vpop.permute.xlu1 %4061  ;;  %8770 = vset.pattern.permute.xlu0 %v13505_v51  ;;  %13917 = vst [vmem:[#allocation29_spill] sm:$0xff] %v11588_v49  ;;  %v3585_v55 = vadd.f32 %v3581_v2, %v3557_v20  ;;  %vm5140_vm14 = vcmp.eq.s32.totalorder %v11546_v11, 5  ;;  %v2926_v62 = vsel %vm2906_vm9, %v13926_v5, 0.0  ;;  %v4049_v53 = vsel %vm4029_vm11, %v13927_v59, 0.0  ;;  %v13932_v20 = vld [vmem:[#allocation86_spill] sm:$0xff]  ;;  %v13939_v11 = vld [vmem:[#allocation99_spill] sm:$0xff] }
 0xf9d   :  { %3090 = vperm.xlu1 %8760, %v11479_v56   ;;  %v5108_v56 = vadd.f32 %v5104_v0, %v5080_v46  ;;  %v13925_v46 = vld [vmem:[#allocation89_spill] sm:$0xff]  ;;  %v11620_v25 = vadd.f32 %v2926_v62, %v2902_v36  ;;  %v11622_v38 = vpack.c.bf16 %v8516_v19, %v8515_v18  ;;  %v11624_v15 = vpack.c.bf16 %v8526_v1, %v8525_v21 }
 0xf9e   :  { %v5132_v0 = vsel %vm5112_vm2, %v13925_v46, 0.0  ;;  %vm2662_vm3 = vcmp.eq.s32.totalorder %v11607_v6, 0  ;;  %vm2690_vm1 = vcmp.eq.s32.totalorder %v11607_v6, 1  ;;  %v13931_v14 = vmov 40  }
 0xf9f   :  { %v5136_v9 = vadd.f32 %v5132_v0, %v5108_v56  ;;  %13928 = vst [vmem:[#allocation6_spill] sm:$0xff] %v11620_v25  ;;  %13929 = vst [vmem:[#allocation37_spill] sm:$0xff] %v11622_v38  ;;  %v3609_v56 = vsel %vm3589_vm7, %v13932_v20, 0.0  ;;  %vm2721_vm0 = vcmp.eq.s32.totalorder %v2657_v44, 8  ;;  %vm2753_vm8 = vcmp.eq.s32.totalorder %v2657_v44, 9  ;;  %v13937_v0 = vld [vmem:[#allocation85_spill] sm:$0xff] }
 0xfa0   :  { %13930 = vst [vmem:[#allocation32_spill] sm:$0xff] %v11624_v15  ;;  %v11641_v18 = vadd.f32 %v3609_v56, %v3585_v55  ;;  %v11650_v2 = vsub.s32 %v13900_v28, %v10897_v12  ;;  %v11654_v46 = vsub.s32 %v13900_v28, %v11082_v29  ;;  %vm2661_vm12 = vcmp.eq.s32.totalorder %v2657_v44, 0  ;;  %v13940_v12 = vld [vmem:[#allocation102_spill] sm:$0xff]  ;;  %v13943_v56 = vld [vmem:[#allocation109_spill] sm:$0xff] }
 0xfa1   :  { %8764 = vset.pattern.permute.xlu1 %v13890_v16  ;;  %v11602_v7 = vpop.permute.xlu1 %3086  ;;  %v4025_v16 = vadd.f32 %v4021_v41, %v3997_v30  ;;  %v3944_v30 = vsub.s32 %v13900_v28, %v10937_v43  ;;  %v13933_v41 = vld [vmem:[#allocation145_spill] sm:$0xff]  ;;  %v13934_v43 = vld [vmem:[#allocation91_spill] sm:$0xff]  ;;  %vm2689_vm4 = vcmp.eq.s32.totalorder %v2657_v44, 1  ;;  %v2745_v5 = vsel %vm2721_vm0, %v13939_v11, 0.0 }
 0xfa2   :  { %5176 = vperm.xlu1 %8764, %v11505_v33   ;;  %v11636_v36 = vsub.s32 %v13900_v28, %v13933_v41  ;;  %v5160_v1 = vsel %vm5140_vm14, %v13934_v43, 0.0  ;;  %13936 = vst [vmem:[#allocation34_spill] sm:$0xff] %v11650_v2  ;;  %v13503_v62 = vmov 30   ;;  %vm2722_vm11 = vcmp.eq.s32.totalorder %v11607_v6, 8  ;;  %v13944_v43 = vld [vmem:[#allocation112_spill] sm:$0xff]  ;;  %v13950_v15 = vld [vmem:[#allocation153_spill] sm:$0xff] }
 0xfa3   :  { %v11638_v19 = vadd.f32 %v4049_v53, %v4025_v16  ;;  %v11646_v21 = vadd.f32 %v5160_v1, %v5136_v9  ;;  %v13938_v16 = vld [vmem:[#allocation96_spill] sm:$0xff]  ;;  %vm4000_vm6 = vcmp.eq.s32.totalorder %v3944_v30, 4  ;;  %vm4028_vm10 = vcmp.eq.s32.totalorder %v3944_v30, 5 }
 0xfa4   :  { %v2714_v55 = vsel %vm2690_vm1, %v13938_v16, 0.0  ;;  %vm3805_vm13 = vcmp.eq.s32.totalorder %v11636_v36, 0  ;;  %vm3829_vm15 = vcmp.eq.s32.totalorder %v11636_v36, 1  ;;  %v11662_v9 = vsel %vm2753_vm8, %v13940_v12, 0.0  ;;  %v13941_v53 = vld [vmem:[#allocation80_spill] sm:$0xff]  ;;  %v13947_v12 = vld [vmem:[#allocation141_spill] sm:$0xff] }
 0xfa5   :  { %13935 = vst [vmem:[#allocation39_spill] sm:$0xff] %v11646_v21  ;;  %vm3948_vm2 = vcmp.eq.s32.totalorder %v3944_v30, 0  ;;  %vm3972_vm9 = vcmp.eq.s32.totalorder %v3944_v30, 1  ;;  %v4020_v41 = vsel %vm4000_vm6, %v13943_v56, 0.0  ;;  %vm3141_vm7 = vcmp.eq.s32.totalorder %v11654_v46, 1  ;;  %v13948_v56 = vld [vmem:[#allocation149_spill] sm:$0xff] }
 0xfa6   :  { %8765 = vset.pattern.permute.xlu1 %v13931_v14  ;;  %v11631_v58 = vpop.permute.xlu1 %3230  ;;  %v13942_v14 = vld [vmem:[#allocation143_spill] sm:$0xff]  ;;  %v11674_v1 = vsel %vm4028_vm10, %v13944_v43, 0.0  ;;  %vm3169_vm14 = vcmp.eq.s32.totalorder %v11654_v46, 4  ;;  %v3992_v43 = vsel %vm3972_vm9, %v13948_v56, 0.0  ;;  %v11693_v24 = vsel %vm3141_vm7, %v13950_v15, 0.0  ;;  %v13955_v30 = vld [vmem:[#allocation154_spill] sm:$0xff] }
 0xfa7   :  { %4739 = vperm.xlu1 %8765, %v11505_v33   ;;  %v2686_v33 = vsel %vm2662_vm3, %v13937_v0, 0.0  ;;  %v2713_v20 = vsel %vm2689_vm4, %v13942_v14, 0.0  ;;  %v11678_v0 = vsub.s32 %v13900_v28, %v10835_v60  ;;  %v2685_v14 = vsel %vm2661_vm12, %v13947_v12, 0.0  ;;  %v13958_v56 = vld [vmem:[#allocation118_spill] sm:$0xff] }
 0xfa8   :  { %v2718_v59 = vadd.f32 %v2714_v55, %v2686_v33  ;;  %v13945_v33 = vld [vmem:[#allocation105_spill] sm:$0xff]  ;;  %v13946_v55 = vld [vmem:[#allocation90_spill] sm:$0xff]  ;;  %vm3197_vm3 = vcmp.eq.s32.totalorder %v11654_v46, 5  ;;  %v2717_v60 = vadd.f32 %v2713_v20, %v2685_v14  ;;  %vm2754_vm1 = vcmp.eq.s32.totalorder %v11607_v6, 9  ;;  %v13956_v20 = vld [vmem:[#allocation116_spill] sm:$0xff] }
 0xfa9   :  { %v3825_v16 = vsel %vm3805_vm13, %v13945_v33, 0.0  ;;  %v3849_v11 = vsel %vm3829_vm15, %v13946_v55, 0.0  ;;  %v13951_v33 = vmov 31   ;;  %v13953_v55 = vld [vmem:[#allocation147_spill] sm:$0xff]  ;;  %v11703_v12 = vsub.s32 %v13900_v28, %v10964_v8 }
 0xfaa   :  { %v3968_v44 = vsel %vm3948_vm2, %v13953_v55, 0.0  ;;  %vm3857_vm0 = vcmp.eq.s32.totalorder %v11636_v36, 4  ;;  %vm2974_vm8 = vcmp.eq.s32.totalorder %v11678_v0, 0  ;;  %vm2998_vm12 = vcmp.eq.s32.totalorder %v11678_v0, 1 }
 0xfab   :  { %8767 = vset.pattern.permute.xlu1 %v13503_v62  ;;  %v11665_v29 = vpop.permute.xlu1 %3623  ;;  %v13949_v62 = vld [vmem:[#allocation64_spill] sm:$0xff]  ;;  %v3996_v15 = vadd.f32 %v3992_v43, %v3968_v44  ;;  %v11717_v8 = vsub.s32 %v13900_v28, %v13955_v30  ;;  %v11728_v43 = vsel %vm3197_vm3, %v13958_v56, 0.0  ;;  %v2749_v55 = vadd.f32 %v2745_v5, %v2717_v60  ;;  %v13961_v30 = vld [vmem:[#allocation97_spill] sm:$0xff]  ;;  %v13965_v60 = vld [vmem:[#allocation63_spill] sm:$0xff] }
 0xfac   :  { %5895 = vperm.xlu1 %8767, %v13941_v53   ;;  %v2746_v51 = vsel %vm2722_vm11, %v13949_v62, 0.0  ;;  %v3853_v62 = vadd.f32 %v3849_v11, %v3825_v16  ;;  %v11722_v16 = vsel %vm3169_vm14, %v13956_v20, 0.0  ;;  %v13957_v11 = vld [vmem:[#allocation65_spill] sm:$0xff]  ;;  %vm3885_vm4 = vcmp.eq.s32.totalorder %v11636_v36, 5  ;;  %v13962_v20 = vld [vmem:[#allocation114_spill] sm:$0xff] }
 0xfad   :  { %v2750_v38 = vadd.f32 %v2746_v51, %v2718_v59  ;;  %v13954_v51 = vld [vmem:[#allocation151_spill] sm:$0xff]  ;;  %v11711_v59 = vpop.permute.xlu0 %3769  ;;  %v2778_v14 = vsel %vm2754_vm1, %v13957_v11, 0.0  ;;  %vm3117_vm6 = vcmp.eq.s32.totalorder %v11654_v46, 0  ;;  %v2994_v49 = vsel %vm2974_vm8, %v13961_v30, 0.0  ;;  %v13969_v30 = vld [vmem:[#allocation69_spill] sm:$0xff]  ;;  %v13983_v46 = vld [vmem:[#allocation82_spill] sm:$0xff] }
 0xfae   :  { %v11709_v6 = vsub.s32 %v13900_v28, %v13954_v51  ;;  %v13960_v51 = vld [vmem:[#allocation68_spill] sm:$0xff]  ;;  %v3018_v25 = vsel %vm2998_vm12, %v13962_v20, 0.0  ;;  %vm3804_vm10 = vcmp.eq.s32.totalorder %v11703_v12, 0  ;;  %vm3828_vm13 = vcmp.eq.s32.totalorder %v11703_v12, 1 }
 0xfaf   :  { %v11730_v44 = vadd.f32 %v2778_v14, %v2750_v38  ;;  %v3877_v54 = vsel %vm3857_vm0, %v13960_v51, 0.0  ;;  %v4024_v38 = vadd.f32 %v4020_v41, %v3996_v15  ;;  %v5587_v14 = vsel %vm2624_vm5, %v11403_v13, 0.0 }
 0xfb0   :  { %8768 = vset.pattern.permute.xlu1 %v13951_v33  ;;  %v11697_v2 = vpop.permute.xlu1 %5028  ;;  %v3881_v5 = vadd.f32 %v3877_v54, %v3853_v62  ;;  %vm3118_vm15 = vcmp.eq.s32.totalorder %v11709_v6, 0  ;;  %vm3657_vm2 = vcmp.eq.s32.totalorder %v11717_v8, 0  ;;  %vm3681_vm9 = vcmp.eq.s32.totalorder %v11717_v8, 1  ;;  %v13967_v54 = vld [vmem:[#allocation146_spill] sm:$0xff]  ;;  %v13968_v62 = vld [vmem:[#allocation148_spill] sm:$0xff] }
 0xfb1   :  { %13952 = vst [vmem:[#allocation41_spill] sm:$0xff] %v11697_v2  ;;  %6039 = vperm.xlu1 %8768, %v13941_v53   ;;  %13959 = vst [vmem:[#allocation36_spill] sm:$0xff] %v11730_v44  ;;  %v13963_v53 = vmov 30   ;;  %vm3142_vm11 = vcmp.eq.s32.totalorder %v11709_v6, 1  ;;  %v11749_v56 = vpop.permute.xlu0 %4880  ;;  %v3022_v51 = vadd.f32 %v3018_v25, %v2994_v49  ;;  %vm3026_vm7 = vcmp.eq.s32.totalorder %v11678_v0, 4  ;;  %v13971_v44 = vld [vmem:[#allocation101_spill] sm:$0xff] }
 0xfb2   :  { %13966 = vst [vmem:[#allocation92_spill] sm:$0xff] %v11749_v56  ;;  %v3824_v41 = vsel %vm3804_vm10, %v13967_v54, 0.0  ;;  %v3848_v15 = vsel %vm3828_vm13, %v13968_v62, 0.0  ;;  %v3905_v13 = vsel %vm3885_vm4, %v13969_v30, 0.0  ;;  %vm3054_vm5 = vcmp.eq.s32.totalorder %v11678_v0, 5  ;;  %v13972_v25 = vld [vmem:[#allocation108_spill] sm:$0xff] }
 0xfb3   :  { %v11759_v20 = vadd.f32 %v11662_v9, %v2749_v55  ;;  %v11764_v49 = vsub.s32 %v13900_v28, %v10909_v57  ;;  %v3677_v56 = vsel %vm3657_vm2, %v13972_v25, 0.0  ;;  %v13973_v54 = vld [vmem:[#allocation110_spill] sm:$0xff]  ;;  %v13974_v62 = vld [vmem:[#allocation103_spill] sm:$0xff]  ;;  %v11774_v9 = vsub.s32 %v13900_v28, %v10968_v10 }
 0xfb4   :  { %v3701_v52 = vsel %vm3681_vm9, %v13973_v54, 0.0  ;;  %v3162_v2 = vsel %vm3142_vm11, %v13974_v62, 0.0  ;;  %v13976_v55 = vld [vmem:[#allocation70_spill] sm:$0xff]  ;;  %v13977_v30 = vld [vmem:[#allocation51_spill] sm:$0xff]  ;;  %v3852_v57 = vadd.f32 %v3848_v15, %v3824_v41  ;;  %vm3856_vm14 = vcmp.eq.s32.totalorder %v11703_v12, 4 }
 0xfb5   :  { %8769 = vset.pattern.permute.xlu1 %v13963_v53  ;;  %v11738_v11 = vpop.permute.xlu1 %5172  ;;  %13970 = vst [vmem:[#allocation104_spill] sm:$0xff] %v11759_v20  ;;  %v3909_v25 = vadd.f32 %v3905_v13, %v3881_v5  ;;  %v13978_v20 = vld [vmem:[#allocation73_spill] sm:$0xff]  ;;  %v3705_v21 = vadd.f32 %v3701_v52, %v3677_v56  ;;  %vm3709_vm3 = vcmp.eq.s32.totalorder %v11717_v8, 8  ;;  %vm3170_vm1 = vcmp.eq.s32.totalorder %v11709_v6, 4  ;;  %v13980_v0 = vld [vmem:[#allocation94_spill] sm:$0xff]  ;;  %v13984_v56 = vld [vmem:[#allocation72_spill] sm:$0xff] }
 0xfb6   :  { %13964 = vst [vmem:[#allocation107_spill] sm:$0xff] %v11738_v11  ;;  %5898 = vperm.xlu1 %8769, %v13965_v60   ;;  %v13515_v11 = vmov 14   ;;  %v3074_v62 = vsel %vm3054_vm5, %v13978_v20, 0.0  ;;  %v3137_v41 = vsel %vm3117_vm6, %v10869_v42, 0.0  ;;  %vm3198_vm0 = vcmp.eq.s32.totalorder %v11709_v6, 5  ;;  %v13985_v20 = vld [vmem:[#allocation119_spill] sm:$0xff] }
 0xfb7   :  { %5588 = vadd.xlane.f32.xlu0 %v5587_v14  ;;  %v3138_v14 = vsel %vm3118_vm15, %v13971_v44, 0.0  ;;  %v3046_v44 = vsel %vm3026_vm7, %v13976_v55, 0.0  ;;  %vm4916_vm8 = vcmp.eq.s32.totalorder %v11764_v49, 0  ;;  %vm4940_vm12 = vcmp.eq.s32.totalorder %v11764_v49, 1 }
 0xfb8   :  { %v3050_v54 = vadd.f32 %v3046_v44, %v3022_v51  ;;  %v3166_v10 = vadd.f32 %v3162_v2, %v3138_v14  ;;  %v3876_v5 = vsel %vm3856_vm14, %v13980_v0, 0.0  ;;  %v13981_v51 = vld [vmem:[#allocation66_spill] sm:$0xff]  ;;  %vm3884_vm4 = vcmp.eq.s32.totalorder %v11703_v12, 5  ;;  %v13986_v12 = vld [vmem:[#allocation125_spill] sm:$0xff]  ;;  %v13987_v0 = vld [vmem:[#allocation95_spill] sm:$0xff] }
 0xfb9   :  { %vm2973_vm10 = vcmp.eq.s32.totalorder %v11774_v9, 0  ;;  %vm2997_vm13 = vcmp.eq.s32.totalorder %v11774_v9, 1  ;;  %v11802_v42 = vsub.s32 %v13900_v28, %v10961_v61  ;;  %v3729_v15 = vsel %vm3709_vm3, %v13984_v56, 0.0  ;;  %v13988_v61 = vld [vmem:[#allocation150_spill] sm:$0xff] }
 0xfba   :  { %8771 = vset.pattern.permute.xlu1 %v13515_v11  ;;  %v11770_v36 = vpop.permute.xlu1 %2938  ;;  %v11782_v11 = vpop.permute.xlu0 %2787  ;;  %v11804_v2 = vadd.f32 %v3074_v62, %v3050_v54  ;;  %v4936_v14 = vsel %vm4916_vm8, %v13985_v20, 0.0  ;;  %v4960_v55 = vsel %vm4940_vm12, %v13986_v12, 0.0  ;;  %v3165_v44 = vadd.f32 %v11693_v24, %v3137_v41  ;;  %v13989_v54 = vld [vmem:[#allocation155_spill] sm:$0xff]  ;;  %v13990_v12 = vld [vmem:[#allocation74_spill] sm:$0xff] }
 0xfbb   :  { %13975 = vst [vmem:[#allocation106_spill] sm:$0xff] %v11770_v36  ;;  %5915 = vperm.xlu1 %8771, %v13977_v30   ;;  %13979 = vst [vmem:[#allocation121_spill] sm:$0xff] %v11782_v11  ;;  %v4052_v36 = vadd.f32 %v11674_v1, %v4024_v38  ;;  %v3880_v1 = vadd.f32 %v3876_v5, %v3852_v57  ;;  %v3190_v38 = vsel %vm3170_vm1, %v13983_v46, 0.0  ;;  %v3904_v5 = vsel %vm3884_vm4, %v13987_v0, 0.0 }
 0xfbc   :  { %v3194_v13 = vadd.f32 %v3190_v38, %v3166_v10  ;;  %v3017_v62 = vsel %vm2997_vm13, %v13989_v54, 0.0  ;;  %v3733_v11 = vadd.f32 %v3729_v15, %v3705_v21  ;;  %vm3737_vm6 = vcmp.eq.s32.totalorder %v11717_v8, 9  ;;  %v14000_v8 = vld [vmem:[#allocation172_spill] sm:$0xff] }
 0xfbd   :  { %vm4968_vm15 = vcmp.eq.s32.totalorder %v11764_v49, 4  ;;  %v13519_v46 = vmov 15   ;;  %v3908_v10 = vadd.f32 %v3904_v5, %v3880_v1  ;;  %v4073_v38 = vmul.f32 %v11578_v34, %v11638_v19  ;;  %v13991_v19 = vld [vmem:[#allocation171_spill] sm:$0xff] }
 0xfbe   :  { %v4058_v57 = vpop.permute.xlu0 %4057  ;;  %v4964_v24 = vadd.f32 %v4960_v55, %v4936_v14  ;;  %vm2825_vm2 = vcmp.eq.s32.totalorder %v11802_v42, 0  ;;  %vm2849_vm9 = vcmp.eq.s32.totalorder %v11802_v42, 1  ;;  %vm3025_vm11 = vcmp.eq.s32.totalorder %v11774_v9, 4 }
 0xfbf   :  { %5939 = vperm.xlu1 %8771, %v13981_v51   ;;  %v11795_v52 = vpop.permute.xlu1 %4734  ;;  %v4072_v21 = vmul.f32 %v4058_v57, %v4052_v36  ;;  %v3193_v20 = vadd.f32 %v11722_v16, %v3165_v44  ;;  %v3929_v1 = vmul.f32 %v11551_v37, %v3909_v25  ;;  %v4988_v34 = vsel %vm4968_vm15, %v13990_v12, 0.0  ;;  %v13992_v36 = vld [vmem:[#allocation142_spill] sm:$0xff]  ;;  %v13994_v25 = vld [vmem:[#allocation111_spill] sm:$0xff] }
 0xfc0   :  { %13982 = vst [vmem:[#allocation122_spill] sm:$0xff] %v11795_v52  ;;  %v2993_v52 = vsel %vm2973_vm10, %v13988_v61, 0.0  ;;  %vm4996_vm7 = vcmp.eq.s32.totalorder %v11764_v49, 5  ;;  %v11833_v14 = vsub.s32 %v13900_v28, %v13991_v19  ;;  %v2845_v57 = vsel %vm2825_vm2, %v13992_v36, 0.0  ;;  %v9053_v37 = vld [vmem:[%s13330_s4 + $0x8] sm:$0xff]  ;;  %v13995_v61 = vld [vmem:[#allocation87_spill] sm:$0xff] }
 0xfc1   :  { %v3021_v15 = vadd.f32 %v3017_v62, %v2993_v52  ;;  %v13993_v52 = vld [vmem:[#allocation144_spill] sm:$0xff]  ;;  %v4077_v16 = vadd.f32 %v4073_v38, %v3929_v1  ;;  %v4992_v44 = vadd.f32 %v4988_v34, %v4964_v24  ;;  %v3045_v5 = vsel %vm3025_vm11, %v13994_v25, 0.0  ;;  %v14001_v1 = vld [vmem:[#allocation75_spill] sm:$0xff] }
 0xfc2   :  { %v2869_v0 = vsel %vm2849_vm9, %v13993_v52, 0.0  ;;  %v3757_v54 = vsel %vm3737_vm6, %v13995_v61, 0.0  ;;  %v13996_v62 = vld [vmem:[#allocation84_spill] sm:$0xff]  ;;  %vm13997_vm5 = vcmask 261120   ;;  %vm3053_vm14 = vcmp.eq.s32.totalorder %v11774_v9, 5  ;;  %v14002_v9 = vld [vmem:[#allocation26_spill] sm:$0xff] }
 0xfc3   :  { %8772 = vset.pattern.permute.xlu1 %v13519_v46  ;;  %v3049_v27 = vadd.f32 %v3045_v5, %v3021_v15  ;;  %v13998_v24 = vmov 14   ;;  %vm13999_vm3 = vmmov %vm13997_vm5  ;;  %vm2877_vm1 = vcmp.eq.s32.totalorder %v11802_v42, 8  ;;  %v11858_v6 = vsub.s32 %v13900_v28, %v14000_v8  ;;  %v14005_v19 = vld [vmem:[#allocation55_spill] sm:$0xff]  ;;  %v14015_v8 = vld [vmem:[#allocation128_spill] sm:$0xff] }
 0xfc4   :  { %6083 = vperm.xlu1 %8772, %v13981_v51   ;;  %v3914_v41 = vpop.permute.xlu1 %3913  ;;  %v5016_v15 = vsel %vm4996_vm7, %v14001_v1, 0.0  ;;  %v3221_v12 = vadd.f32 %v11728_v43, %v3193_v20  ;;  %vm3532_vm8 = vcmp.eq.s32.totalorder %v11833_v14, 1  ;;  %v14006_v49 = vld [vmem:[#allocation167_spill] sm:$0xff]  ;;  %v9054_v43 = vld [vmem:[%s13330_s4 + $0x20] sm:$0xff]  ;;  %v2897_v20 = vsel %vm2877_vm1, %v14008_v31, 0.0  ;;  %v14020_v31 = vld [vmem:[#allocation160_spill] sm:$0xff] }
 0xfc5   :  { %v3928_v56 = vmul.f32 %v3914_v41, %v3908_v10  ;;  %v3218_v10 = vsel %vm3198_vm0, %v13996_v62, 0.0  ;;  %v11852_v41 = vadd.f32 %v3757_v54, %v3733_v11  ;;  %vm3508_vm0 = vcmp.eq.s32.totalorder %v11833_v14, 0  ;;  %v14010_v5 = vld [vmem:[#allocation159_spill] sm:$0xff]  ;;  %v14011_v54 = vld [vmem:[#allocation173_spill] sm:$0xff]  ;;  %vm14021_vm15 = vmmov %vm13999_vm3 }
 0xfc6   :  { %v11867_v11 = vadd.f32 %v5016_v15, %v4992_v44  ;;  %vm2905_vm12 = vcmp.eq.s32.totalorder %v11802_v42, 9  ;;  %vm3560_vm4 = vcmp.eq.s32.totalorder %v11833_v14, 8  ;;  %vm3656_vm10 = vcmp.eq.s32.totalorder %v11858_v6, 0  ;;  %vm14023_vm9 = vmmov %vm13999_vm3  ;;  %v14080_v51 = vld [vmem:[#allocation222_spill] sm:$0xff] }
 0xfc7   :  { %v4076_v55 = vadd.f32 %v4072_v21, %v3928_v56  ;;  %v3222_v21 = vadd.f32 %v3218_v10, %v3194_v13  ;;  %v2873_v56 = vadd.f32 %v2869_v0, %v2845_v57  ;;  %v14004_v13 = vld [vmem:[#allocation117_spill] sm:$0xff]  ;;  %v3552_v61 = vsel %vm3532_vm8, %v14010_v5, 0.0  ;;  %v14027_v5 = vld [vmem:[#allocation10_spill] sm:$0xff] }
 0xfc8   :  { %4442 = vrot.lane.b32.xlu1 %v9053_v37, %s9135_s10  ;;  %14003 = vst [vmem:[#allocation38_spill] sm:$0xff] %v11867_v11  ;;  %v3073_v34 = vsel %vm3053_vm14, %v14004_v13, 0.0  ;;  %v14009_v0 = vld [vmem:[#allocation157_spill] sm:$0xff]  ;;  %v11895_v62 = vsub.s32 %v13900_v28, %v14011_v54  ;;  %vm3680_vm13 = vcmp.eq.s32.totalorder %v11858_v6, 1  ;;  %vm3588_vm6 = vcmp.eq.s32.totalorder %v11833_v14, 9  ;;  %v14029_v54 = vld [vmem:[#allocation163_spill] sm:$0xff] }
 0xfc9   :  { %7722 = vmatprep.mubr.msk.f32.mxu1 %vm13997_vm5, %v4076_v55  ;;  %v3083_v38 = vpop.permute.xlu1 %3082  ;;  %8773 = vset.pattern.permute.xlu1 %v13998_v24  ;;  %v11875_v55 = vsub.s32 %v13900_v28, %v14006_v49  ;;  %v3077_v36 = vadd.f32 %v3073_v34, %v3049_v27  ;;  %v3242_v57 = vmul.f32 %v11631_v58, %v3222_v21  ;;  %v14012_v58 = vld [vmem:[#allocation174_spill] sm:$0xff]  ;;  %v14018_v34 = vld [vmem:[#allocation176_spill] sm:$0xff]  ;;  %v3700_v42 = vsel %vm3680_vm13, %v14020_v31, 0.0 }
 0xfca   :  { %7723 = vmatmul.mubr.msk.f32.vlgmr.msra.gmra.mrb[40].mxu1 %vm13999_vm3, %v4077_v16  ;;  %v3528_v16 = vsel %vm3508_vm0, %v14009_v0, 0.0  ;;  %v2901_v44 = vadd.f32 %v2897_v20, %v2873_v56  ;;  %v11899_v10 = vsub.s32 %v13900_v28, %v14012_v58  ;;  %v3098_v27 = vmul.f32 %v11602_v7, %v11804_v2  ;;  %v14014_v56 = vld [vmem:[#allocation54_spill] sm:$0xff]  ;;  %v9019_v2 = vpop.eup %9018  ;;  %v14022_v20 = vld [vmem:[#allocation120_spill] sm:$0xff] }
 0xfcb   :  { %8101 = vmatpush3.bf16.msra.mxu1 %v14002_v9  ;;  %14007 = vst [vmem:[#allocation67_spill] sm:$0xff] %v11875_v55  ;;  %v3097_v37 = vmul.f32 %v3083_v38, %v3077_v36  ;;  %v2925_v7 = vsel %vm2905_vm12, %v14015_v8, 0.0  ;;  %v3556_v15 = vadd.f32 %v3552_v61, %v3528_v16  ;;  %v14016_v9 = vld [vmem:[#allocation113_spill] sm:$0xff]  ;;  %v11923_v49 = vsub.s32 %v13900_v28, %v14018_v34  ;;  %v14019_v36 = vld [vmem:[#allocation156_spill] sm:$0xff]  ;;  %v9021_v16 = vpop.eup %9020 }
 0xfcc   :  { %8103 = vmatprep.subr.bf16.mxu1 %v11510_v35  ;;  %5943 = vperm.xlu1 %8773, %v14005_v19   ;;  %v3246_v1 = vadd.f32 %v3242_v57, %v3098_v27  ;;  %v11919_v13 = vadd.f32 %v2925_v7, %v2901_v44  ;;  %vm5059_vm2 = vcmp.eq.s32.totalorder %v11899_v10, 0  ;;  %v3608_v57 = vsel %vm3588_vm6, %v14022_v20, 0.0  ;;  %v14028_v61 = vld [vmem:[#allocation61_spill] sm:$0xff]  ;;  %v14030_v27 = vld [vmem:[#allocation158_spill] sm:$0xff] }
 0xfcd   :  { %4342 = vrot.lane.b32.xlu0 %v9054_v43, %s9135_s10  ;;  %v3676_v43 = vsel %vm3656_vm10, %v14019_v36, 0.0  ;;  %vm4915_vm11 = vcmp.eq.s32.totalorder %v11895_v62, 0  ;;  %vm4939_vm7 = vcmp.eq.s32.totalorder %v11895_v62, 1  ;;  %vm5083_vm5 = vcmp.eq.s32.totalorder %v11899_v10, 1  ;;  %v14032_v7 = vld [vmem:[#allocation166_spill] sm:$0xff]  ;;  %v14081_v55 = vld [vmem:[#allocation53_spill] sm:$0xff] }
 0xfce   :  { %v3227_v52 = vpop.permute.xlu1 %3226  ;;  %14017 = vst [vmem:[#allocation40_spill] sm:$0xff] %v11919_v13  ;;  %v3704_v44 = vadd.f32 %v3700_v42, %v3676_v43  ;;  %vm3708_vm1 = vcmp.eq.s32.totalorder %v11858_v6, 8  ;;  %vm3736_vm0 = vcmp.eq.s32.totalorder %v11858_v6, 9  ;;  %v4935_v58 = vsel %vm4915_vm11, %v14029_v54, 0.0  ;;  %v14035_v43 = vld [vmem:[#allocation115_spill] sm:$0xff] }
 0xfcf   :  { %8105 = vmatpush3.bf16.msra.mxu1 %v11510_v35  ;;  %v3241_v25 = vmul.f32 %v3227_v52, %v3221_v12  ;;  %v14013_v35 = vld [vmem:[#allocation175_spill] sm:$0xff]  ;;  %v3580_v12 = vsel %vm3560_vm4, %v14016_v9, 0.0  ;;  %v14025_v52 = vld [vmem:[#allocation161_spill] sm:$0xff]  ;;  %vm4767_vm8 = vcmp.eq.s32.totalorder %v11923_v49, 0  ;;  %vm4791_vm12 = vcmp.eq.s32.totalorder %v11923_v49, 1 }
 0xfd0   :  { %8107 = vmatprep.subr.bf16.mxu1 %v11517_v47  ;;  %8774 = vset.pattern.permute.xlu1 %v13519_v46  ;;  %v11908_v38 = vsub.s32 %v13900_v28, %v14013_v35  ;;  %v11947_v0 = vmul.f32 %v9019_v2, %v14025_v52  ;;  %v4959_v35 = vsel %vm4939_vm7, %v14030_v27, 0.0  ;;  %v5103_v2 = vsel %vm5083_vm5, %v14032_v7, 0.0  ;;  %v14034_v9 = vld [vmem:[#allocation169_spill] sm:$0xff]  ;;  %v14036_v42 = vld [vmem:[#allocation123_spill] sm:$0xff]  ;;  %v14039_v52 = vld [vmem:[#allocation170_spill] sm:$0xff] }
 0xfd1   :  { %v3245_v21 = vadd.f32 %v3241_v25, %v3097_v37  ;;  %6063 = vperm.xlu1 %8774, %v14014_v56   ;;  %6042 = vperm.xlu0 %8770, %v13965_v60   ;;  %v3584_v37 = vadd.f32 %v3580_v12, %v3556_v15  ;;  %v13517_v25 = vmov 46   ;;  %v11980_v36 = vsub.s32 %v13900_v28, %v11337_v26  ;;  %v14038_v26 = vld [vmem:[#allocation12_spill] sm:$0xff]  ;;  %v14040_v27 = vld [vmem:[#allocation162_spill] sm:$0xff] }
 0xfd2   :  { %vm4619_vm14 = vcmp.eq.s32.totalorder %v11908_v38, 0  ;;  %vm4643_vm3 = vcmp.eq.s32.totalorder %v11908_v38, 1  ;;  %14026 = vst [vmem:[#allocation139_spill] sm:$0xff] %v11947_v0  ;;  %v3728_v31 = vsel %vm3708_vm1, %v14035_v43, 0.0  ;;  %v3756_v20 = vsel %vm3736_vm0, %v14036_v42, 0.0  ;;  %v14046_v43 = vld [vmem:[#allocation24_spill] sm:$0xff] }
 0xfd3   :  { %8109 = vmatpush3.bf16.msra.mxu1 %v11517_v47  ;;  %7670 = vmatprep.mubr.msk.f32.mxu0 %vm14021_vm15, %v3245_v21  ;;  %v11933_v14 = vpop.permute.xlu1 %3618  ;;  %v14024_v47 = vld [vmem:[#allocation8_spill] sm:$0xff]  ;;  %v4663_v12 = vsel %vm4643_vm3, %v14034_v9, 0.0  ;;  %vm4967_vm4 = vcmp.eq.s32.totalorder %v11895_v62, 4  ;;  %v4787_v54 = vsel %vm4767_vm8, %v14039_v52, 0.0  ;;  %v4811_v6 = vsel %vm4791_vm12, %v14040_v27, 0.0 }
 0xfd4   :  { %8111 = vmatprep.subr.bf16.mxu1 %v11519_v39  ;;  %7671 = vmatmul.mubr.msk.f32.vlgmr.msra.gmra.mrb[32].mxu0 %vm14023_vm9, %v3246_v1  ;;  %v14031_v21 = vld [vmem:[#allocation164_spill] sm:$0xff]  ;;  %vm5111_vm10 = vcmp.eq.s32.totalorder %v11899_v10, 4  ;;  %vm4671_vm13 = vcmp.eq.s32.totalorder %v11908_v38, 8  ;;  %vm4995_vm6 = vcmp.eq.s32.totalorder %v11895_v62, 5  ;;  %vm3683_vm15 = vcmp.eq.s32.totalorder %v11980_v36, 1 }
 0xfd5   :  { %8061 = vmatpush3.bf16.msra.mxu0 %v14024_v47  ;;  %8775 = vset.pattern.permute.xlu1 %v13998_v24  ;;  %v5079_v8 = vsel %vm5059_vm2, %v14031_v21, 0.0  ;;  %v14033_v1 = vld [vmem:[#allocation168_spill] sm:$0xff]  ;;  %v4963_v47 = vadd.f32 %v4959_v35, %v4935_v58  ;;  %v12001_v21 = vpop.permute.xlu0 %3765  ;;  %v12011_v58 = vadd.f32 %v3608_v57, %v3584_v37  ;;  %v12018_v35 = vsub.s32 %v13900_v28, %v11355_v50 }
 0xfd6   :  { %8779 = vset.pattern.permute.xlu0 %v13517_v25  ;;  %8063 = vmatprep.subr.bf16.mxu0 %v14027_v5  ;;  %v4639_v15 = vsel %vm4619_vm14, %v14033_v1, 0.0  ;;  %v5107_v7 = vadd.f32 %v5103_v2, %v5079_v8  ;;  %v14041_v8 = vld [vmem:[#allocation127_spill] sm:$0xff]  ;;  %vm4819_vm2 = vcmp.eq.s32.totalorder %v11923_v49, 8  ;;  %vm3711_vm9 = vcmp.eq.s32.totalorder %v11980_v36, 8  ;;  %v14043_v50 = vld [vmem:[#allocation124_spill] sm:$0xff]  ;;  %v14044_v2 = vld [vmem:[#allocation137_spill] sm:$0xff] }
 0xfd7   :  { %5967 = vperm.xlu1 %8775, %v14028_v61   ;;  %6019 = vperm.xlu0 %8779, %v11947_v0   ;;  %v5131_v37 = vsel %vm5111_vm10, %v14043_v50, 0.0  ;;  %vm5139_vm11 = vcmp.eq.s32.totalorder %v11899_v10, 5  ;;  %v4691_v1 = vsel %vm4671_vm13, %v14044_v2, 0.0  ;;  %vm3659_vm7 = vcmp.eq.s32.totalorder %v11980_v36, 0  ;;  %v14047_v42 = vld [vmem:[#allocation52_spill] sm:$0xff]  ;;  %v14078_v25 = vld [vmem:[#allocation183_spill] sm:$0xff] }
 0xfd8   :  { %8113 = vmatpush3.bf16.msra.mxu1 %v11519_v39  ;;  %v11976_v34 = vpop.permute.xlu1 %5024  ;;  %v11991_v39 = vmul.f32 %v9021_v16, %v11263_v40  ;;  %v4667_v40 = vadd.f32 %v4663_v12, %v4639_v15  ;;  %v12009_v16 = vsub.s32 %v13900_v28, %v11343_v22  ;;  %v4987_v22 = vsel %vm4967_vm4, %v14041_v8, 0.0  ;;  %v14045_v15 = vld [vmem:[#allocation14_spill] sm:$0xff]  ;;  %v14051_v27 = vld [vmem:[#allocation136_spill] sm:$0xff] }
 0xfd9   :  { %8115 = vmatprep.subr.bf16.mxu1 %v11521_v4  ;;  %8065 = vmatpush3.bf16.msra.mxu0 %v14027_v5  ;;  %v3732_v5 = vadd.f32 %v3728_v31, %v3704_v44  ;;  %v4815_v44 = vadd.f32 %v4811_v6, %v4787_v54  ;;  %v5135_v9 = vadd.f32 %v5131_v37, %v5107_v7  ;;  %vm4699_vm5 = vcmp.eq.s32.totalorder %v11908_v38, 9  ;;  %v12061_v54 = vpop.permute.xlu0 %5168  ;;  %v14052_v7 = vld [vmem:[#allocation126_spill] sm:$0xff]  ;;  %v14057_v38 = vld [vmem:[#allocation7_spill] sm:$0xff]  ;;  %v14059_v37 = vld [vmem:[#allocation265_spill] sm:$0xff] }
 0xfda   :  { %14037 = vst [vmem:[#allocation76_spill] sm:$0xff] %v11991_v39  ;;  %8067 = vmatprep.subr.bf16.mxu0 %v14038_v26  ;;  %v4695_v12 = vadd.f32 %v4691_v1, %v4667_v40  ;;  %vm3739_vm14 = vcmp.eq.s32.totalorder %v11980_v36, 9  ;;  %vm2976_vm3 = vcmp.eq.s32.totalorder %v12009_v16, 0  ;;  %vm3000_vm1 = vcmp.eq.s32.totalorder %v12009_v16, 1  ;;  %14049 = vst [vmem:[#allocation89_spill] sm:$0xff] %v12061_v54  ;;  %v14063_v1 = vld [vmem:[#allocation285_spill] sm:$0xff] }
 0xfdb   :  { %8776 = vset.pattern.permute.xlu1 %v13519_v46  ;;  %6023 = vperm.xlu0 %8779, %v11991_v39   ;;  %v12049_v31 = vadd.f32 %v3756_v20, %v3732_v5  ;;  %vm5086_vm0 = vcmp.eq.s32.totalorder %v12018_v35, 1  ;;  %vm4847_vm8 = vcmp.eq.s32.totalorder %v11923_v49, 9  ;;  %vm3028_vm12 = vcmp.eq.s32.totalorder %v12009_v16, 4  ;;  %v14053_v5 = vld [vmem:[#allocation16_spill] sm:$0xff]  ;;  %v14062_v49 = vld [vmem:[#allocation62_spill] sm:$0xff] }
 0xfdc   :  { %8117 = vmatpush3.bf16.msra.mxu1 %v11521_v4  ;;  %6111 = vperm.xlu1 %8776, %v14028_v61   ;;  %v12031_v4 = vsub.s32 %v13900_v28, %v11373_v3  ;;  %v4991_v3 = vadd.f32 %v4987_v22, %v4963_v47  ;;  %v12058_v47 = vsub.s32 %v13900_v28, %v11377_v45  ;;  %v4719_v6 = vsel %vm4699_vm5, %v14051_v27, 0.0  ;;  %v14079_v61 = vld [vmem:[#allocation211_spill] sm:$0xff]  ;;  %v14083_v36 = vld [vmem:[#allocation288_spill] sm:$0xff] }
 0xfdd   :  { %8119 = vmatprep.subr.bf16.mxu1 %v11525_v63  ;;  %8069 = vmatpush3.bf16.msra.mxu0 %v14038_v26  ;;  %v12026_v57 = vpop.permute.xlu1 %2934  ;;  %v14048_v26 = vld [vmem:[#allocation133_spill] sm:$0xff]  ;;  %v5015_v40 = vsel %vm4995_vm6, %v14052_v7, 0.0  ;;  %v12084_v10 = vadd.f32 %v4719_v6, %v4695_v12  ;;  %vm5062_vm13 = vcmp.eq.s32.totalorder %v12018_v35, 0  ;;  %v5106_v62 = vsel %vm5086_vm0, %v11253_v48, 0.0  ;;  %v14069_v6 = vld [vmem:[#allocation238_spill] sm:$0xff] }
 0xfde   :  { %14042 = vst [vmem:[#allocation71_spill] sm:$0xff] %v12026_v57  ;;  %8071 = vmatprep.subr.bf16.mxu0 %v14045_v15  ;;  %v4839_v52 = vsel %vm4819_vm2, %v14048_v26, 0.0  ;;  %vm3974_vm4 = vcmp.eq.s32.totalorder %v12031_v4, 1  ;;  %vm4002_vm10 = vcmp.eq.s32.totalorder %v12031_v4, 4  ;;  %vm4030_vm6 = vcmp.eq.s32.totalorder %v12031_v4, 5  ;;  %v14066_v26 = vld [vmem:[#allocation232_spill] sm:$0xff] }
 0xfdf   :  { %8782 = vrot.lane.b32.xlu0 %v14046_v43, %s9090_s21  ;;  %v4843_v20 = vadd.f32 %v4839_v52, %v4815_v44  ;;  %14056 = vst [vmem:[#allocation86_spill] sm:$0xff] %v12084_v10  ;;  %v12086_v44 = vadd.f32 %v5015_v40, %v4991_v3  ;;  %vm5114_vm2 = vcmp.eq.s32.totalorder %v12018_v35, 4  ;;  %v12104_v2 = vsel %vm3974_vm4, %v14059_v37, 0.0  ;;  %v14065_v3 = vld [vmem:[#allocation206_spill] sm:$0xff]  ;;  %v12140_v40 = vpop.permute.xlu0 %4729  ;;  %v14089_v10 = vld [vmem:[#allocation187_spill] sm:$0xff] }
 0xfe0   :  { %8121 = vmatpush3.bf16.msra.mxu1 %v11525_v63  ;;  %6115 = vperm.xlu1 %8776, %v14047_v42   ;;  %v14050_v63 = vld [vmem:[#allocation130_spill] sm:$0xff]  ;;  %vm3590_vm5 = vcmp.eq.s32.totalorder %v12058_v47, 9  ;;  %v3703_v43 = vsel %vm3683_vm15, %v14065_v3, 0.0  ;;  %v12126_v52 = vsel %vm4002_vm10, %v14066_v26, 0.0  ;;  %vm3056_vm0 = vcmp.eq.s32.totalorder %v12009_v16, 5  ;;  %14070 = vst [vmem:[#allocation91_spill] sm:$0xff] %v12140_v40 }
 0xfe1   :  { %8123 = vmatprep.subr.bf16.mxu1 %v11527_v32  ;;  %8073 = vmatpush3.bf16.msra.mxu0 %v14045_v15  ;;  %v5159_v45 = vsel %vm5139_vm11, %v14050_v63, 0.0  ;;  %vm3562_vm11 = vcmp.eq.s32.totalorder %v12058_v47, 8  ;;  %v12114_v15 = vsub.s32 %v13900_v28, %v14063_v1  ;;  %v12138_v7 = vsub.s32 %v13900_v28, %v14069_v6  ;;  %v14074_v1 = vld [vmem:[#allocation204_spill] sm:$0xff]  ;;  %v14075_v3 = vld [vmem:[#allocation243_spill] sm:$0xff] }
 0xfe2   :  { %8075 = vmatprep.subr.bf16.mxu0 %v14053_v5  ;;  %v12078_v8 = vpop.permute.xlu1 %4876  ;;  %8801 = vset.pattern.permute.xlu0 %v13963_v53  ;;  %v12082_v22 = vadd.f32 %v5159_v45, %v5135_v9  ;;  %v14058_v53 = vld [vmem:[#allocation138_spill] sm:$0xff]  ;;  %v14064_v9 = vld [vmem:[#allocation287_spill] sm:$0xff]  ;;  %v14068_v45 = vld [vmem:[#allocation213_spill] sm:$0xff]  ;;  %vm5142_vm15 = vcmp.eq.s32.totalorder %v12018_v35, 5  ;;  %v12157_v26 = vsub.s32 %v13900_v28, %v14075_v3  ;;  %v2996_v3 = vsel %vm2976_vm3, %v14079_v61, 0.0 }
 0xfe3   :  { %14054 = vst [vmem:[#allocation93_spill] sm:$0xff] %v12078_v8  ;;  %8792 = vrot.lane.b32.xlu0 %v14057_v38, %s9090_s21  ;;  %v4867_v50 = vsel %vm4847_vm8, %v14058_v53, 0.0  ;;  %v12118_v12 = vsub.s32 %v13900_v28, %v14064_v9  ;;  %v3020_v27 = vsel %vm3000_vm1, %v14068_v45, 0.0  ;;  %v14071_v38 = vld [vmem:[#allocation18_spill] sm:$0xff]  ;;  %v14072_v53 = vld [vmem:[#allocation152_spill] sm:$0xff]  ;;  %v3679_v9 = vsel %vm3659_vm7, %v14074_v1, 0.0 }
 0xfe4   :  { %14055 = vst [vmem:[#allocation79_spill] sm:$0xff] %v12082_v22  ;;  %8125 = vmatpush3.bf16.msra.mxu1 %v11527_v32  ;;  %8777 = vset.pattern.permute.xlu1 %v13998_v24  ;;  %v12108_v48 = vadd.f32 %v4867_v50, %v4843_v20  ;;  %v14061_v32 = vld [vmem:[#allocation31_spill] sm:$0xff]  ;;  %v14067_v20 = vld [vmem:[#allocation182_spill] sm:$0xff]  ;;  %v3759_v1 = vsel %vm3739_vm14, %v14078_v25, 0.0  ;;  %v3707_v46 = vadd.f32 %v3703_v43, %v3679_v9  ;;  %vm3738_vm7 = vcmp.eq.s32.totalorder %v12114_v15, 9  ;;  %v14082_v25 = vld [vmem:[#allocation184_spill] sm:$0xff] }
 0xfe5   :  { %8127 = vmatprep.subr.bf16.mxu1 %v14061_v32  ;;  %5995 = vperm.xlu1 %8777, %v14062_v49   ;;  %v3731_v63 = vsel %vm3711_vm9, %v14067_v20, 0.0  ;;  %v14073_v50 = vld [vmem:[#allocation234_spill] sm:$0xff]  ;;  %v14076_v20 = vld [vmem:[#allocation237_spill] sm:$0xff]  ;;  %v14077_v6 = vld [vmem:[#allocation239_spill] sm:$0xff]  ;;  %vm3710_vm9 = vcmp.eq.s32.totalorder %v12114_v15, 8  ;;  %vm2975_vm14 = vcmp.eq.s32.totalorder %v12118_v12, 0 }
 0xfe6   :  { %14060 = vst [vmem:[#allocation145_spill] sm:$0xff] %v12108_v48  ;;  %8077 = vmatpush3.bf16.msra.mxu0 %v14053_v5  ;;  %v12149_v37 = vsel %vm4030_vm6, %v14073_v50, 0.0  ;;  %v12162_v45 = vsel %vm3562_vm11, %v14076_v20, 0.0  ;;  %v12167_v50 = vsel %vm3590_vm5, %v14077_v6, 0.0  ;;  %v5082_v20 = vsel %vm5062_vm13, %v14080_v51, 0.0  ;;  %v14084_v43 = vld [vmem:[#allocation21_spill] sm:$0xff] }
 0xfe7   :  { %8079 = vmatprep.subr.bf16.mxu0 %v14071_v38  ;;  %5901 = vperm.xlu0 %8801, %v14072_v53   ;;  %v12144_v5 = vpop.permute.xlu1 %3925  ;;  %v3048_v61 = vsel %vm3028_vm12, %v14082_v25, 0.0  ;;  %v12190_v51 = vsub.s32 %v13900_v28, %v14083_v36  ;;  %vm2664_vm3 = vcmp.eq.s32.totalorder %v12138_v7, 0  ;;  %vm2692_vm1 = vcmp.eq.s32.totalorder %v12138_v7, 1  ;;  %v14085_v9 = vld [vmem:[#allocation140_spill] sm:$0xff]  ;;  %v12205_v36 = vpop.permute.xlu0 %2802  ;;  %v14090_v8 = vld [vmem:[#allocation194_spill] sm:$0xff]  ;;  %v14093_v57 = vld [vmem:[#allocation23_spill] sm:$0xff] }
 0xfe8   :  { %8129 = vmatpush3.bf16.msra.mxu1 %v14061_v32  ;;  %v3024_v32 = vadd.f32 %v3020_v27, %v2996_v3  ;;  %v5110_v27 = vadd.f32 %v5106_v62, %v5082_v20  ;;  %vm2828_vm8 = vcmp.eq.s32.totalorder %v12157_v26, 0  ;;  %vm2852_vm4 = vcmp.eq.s32.totalorder %v12157_v26, 1  ;;  %v14086_v3 = vld [vmem:[#allocation270_spill] sm:$0xff]  ;;  %14087 = vst [vmem:[#allocation85_spill] sm:$0xff] %v12205_v36 }
 0xfe9   :  { %8131 = vmatprep.subr.bf16.mxu1 %v11570_v17  ;;  %5999 = vperm.xlu1 %8777, %v14081_v55   ;;  %vm3027_vm12 = vcmp.eq.s32.totalorder %v12118_v12, 4  ;;  %vm3055_vm10 = vcmp.eq.s32.totalorder %v12118_v12, 5  ;;  %v12203_v25 = vsel %vm2975_vm14, %v14086_v3, 0.0  ;;  %v14088_v40 = vmov 15   ;;  %v14092_v3 = vld [vmem:[#allocation247_spill] sm:$0xff]  ;;  %v14136_v22 = vld [vmem:[#allocation50_spill] sm:$0xff] }
 0xfea   :  { %8081 = vmatpush3.bf16.msra.mxu0 %v14071_v38  ;;  %v3735_v38 = vadd.f32 %v3731_v63, %v3707_v46  ;;  %v5134_v62 = vsel %vm5114_vm2, %v14089_v10, 0.0  ;;  %v3052_v20 = vadd.f32 %v3048_v61, %v3024_v32  ;;  %v2688_v46 = vsel %vm2664_vm3, %v14090_v8, 0.0  ;;  %v14091_v63 = vld [vmem:[#allocation195_spill] sm:$0xff]  ;;  %v14095_v61 = vld [vmem:[#allocation196_spill] sm:$0xff] }
 0xfeb   :  { %8083 = vmatprep.subr.bf16.mxu0 %v14084_v43  ;;  %5904 = vperm.xlu0 %8801, %v14085_v9   ;;  %v2716_v48 = vsel %vm2692_vm1, %v14091_v63, 0.0  ;;  %v12221_v36 = vsub.s32 %v13900_v28, %v14092_v3  ;;  %v13525_v10 = vmov 29   ;;  %v14094_v32 = vld [vmem:[#allocation223_spill] sm:$0xff]  ;;  %v2872_v63 = vsel %vm2852_vm4, %v14095_v61, 0.0  ;;  %v14097_v3 = vld [vmem:[#allocation189_spill] sm:$0xff] }
 0xfec   :  { %v12196_v6 = vpop.permute.xlu1 %4069  ;;  %v2848_v8 = vsel %vm2828_vm8, %v14094_v32, 0.0  ;;  %v5138_v13 = vadd.f32 %v5134_v62, %v5110_v27  ;;  %vm5113_vm13 = vcmp.eq.s32.totalorder %v12190_v51, 4  ;;  %vm5141_vm6 = vcmp.eq.s32.totalorder %v12190_v51, 5  ;;  %v14098_v32 = vld [vmem:[#allocation208_spill] sm:$0xff]  ;;  %v14099_v61 = vld [vmem:[#allocation209_spill] sm:$0xff] }
 0xfed   :  { %8778 = vset.pattern.permute.xlu1 %v14088_v40  ;;  %v12243_v11 = vsel %vm3710_vm9, %v14098_v32, 0.0  ;;  %v12248_v16 = vsel %vm3738_vm7, %v14099_v61, 0.0  ;;  %v12252_v62 = vadd.f32 %v3759_v1, %v3735_v38  ;;  %vm3950_vm2 = vcmp.eq.s32.totalorder %v12031_v4, 0  ;;  %v14100_v32 = vld [vmem:[#allocation249_spill] sm:$0xff]  ;;  %v14104_v38 = vld [vmem:[#allocation218_spill] sm:$0xff] }
 0xfee   :  { %8085 = vmatpush3.bf16.msra.mxu0 %v14084_v43  ;;  %6143 = vperm.xlu1 %8778, %v14081_v55   ;;  %v14096_v43 = vld [vmem:[#allocation185_spill] sm:$0xff]  ;;  %vm2724_vm11 = vcmp.eq.s32.totalorder %v12138_v7, 8  ;;  %v13528_v35 = vmov 47   ;;  %vm2880_vm5 = vcmp.eq.s32.totalorder %v12157_v26, 8  ;;  %v12261_v61 = vsub.s32 %v13900_v28, %v14100_v32 }
 0xfef   :  { %8087 = vmatprep.subr.bf16.mxu0 %v14093_v57  ;;  %8820 = vset.pattern.permute.xlu0 %v13525_v10  ;;  %v3076_v55 = vsel %vm3056_vm0, %v14096_v43, 0.0  ;;  %v5162_v10 = vsel %vm5142_vm15, %v14097_v3, 0.0  ;;  %v2720_v43 = vadd.f32 %v2716_v48, %v2688_v46  ;;  %v2876_v3 = vadd.f32 %v2872_v63, %v2848_v8  ;;  %v14107_v63 = vld [vmem:[#allocation177_spill] sm:$0xff] }
 0xff0   :  { %5750 = vperm.xlu0 %8820, %v13965_v60   ;;  %v12263_v60 = vpop.permute.xlu0 %5036  ;;  %vm3807_vm0 = vcmp.eq.s32.totalorder %v12221_v36, 0  ;;  %vm3831_vm15 = vcmp.eq.s32.totalorder %v12221_v36, 1  ;;  %v12268_v48 = vadd.f32 %v3076_v55, %v3052_v20  ;;  %v12278_v46 = vsel %vm3055_vm10, %v14104_v38, 0.0  ;;  %v14106_v20 = vld [vmem:[#allocation49_spill] sm:$0xff] }
 0xff1   :  { %v12250_v27 = vpop.permute.xlu1 %3633  ;;  %14101 = vst [vmem:[#allocation96_spill] sm:$0xff] %v12263_v60  ;;  %vm3534_vm9 = vcmp.eq.s32.totalorder %v12058_v47, 1  ;;  %vm3682_vm7 = vcmp.eq.s32.totalorder %v12114_v15, 1  ;;  %vm2756_vm14 = vcmp.eq.s32.totalorder %v12138_v7, 9  ;;  %v12284_v55 = vadd.f32 %v5162_v10, %v5138_v13  ;;  %v14109_v10 = vld [vmem:[#allocation228_spill] sm:$0xff]  ;;  %v14112_v60 = vld [vmem:[#allocation226_spill] sm:$0xff] }
 0xff2   :  { %8089 = vmatpush3.bf16.msra.mxu0 %v14093_v57  ;;  %8780 = vset.pattern.permute.xlu1 %v13528_v35  ;;  %14102 = vst [vmem:[#allocation99_spill] sm:$0xff] %v12268_v48  ;;  %v14103_v57 = vld [vmem:[#allocation217_spill] sm:$0xff]  ;;  %v12288_v8 = vsub.s32 %v13900_v28, %v14106_v20  ;;  %v2748_v32 = vsel %vm2724_vm11, %v14107_v63, 0.0  ;;  %vm2908_vm3 = vcmp.eq.s32.totalorder %v12157_v26, 9  ;;  %vm3510_vm1 = vcmp.eq.s32.totalorder %v12058_v47, 0 }
 0xff3   :  { %6163 = vperm.xlu1 %8780, %v11947_v0   ;;  %v12273_v1 = vsel %vm3027_vm12, %v14103_v57, 0.0  ;;  %14105 = vst [vmem:[#allocation102_spill] sm:$0xff] %v12284_v55  ;;  %v14108_v57 = vld [vmem:[#allocation202_spill] sm:$0xff]  ;;  %vm3658_vm8 = vcmp.eq.s32.totalorder %v12114_v15, 0  ;;  %v2752_v13 = vadd.f32 %v2748_v32, %v2720_v43  ;;  %v3827_v20 = vsel %vm3807_vm0, %v14109_v10, 0.0  ;;  %v14110_v35 = vld [vmem:[#allocation197_spill] sm:$0xff] }
 0xff4   :  { %8821 = vset.pattern.permute.xlu0 %v13998_v24  ;;  %v2900_v38 = vsel %vm2880_vm5, %v14108_v57, 0.0  ;;  %v3851_v63 = vsel %vm3831_vm15, %v14110_v35, 0.0  ;;  %v12311_v57 = vsel %vm5113_vm13, %v14112_v60, 0.0  ;;  %v14114_v55 = vld [vmem:[#allocation281_spill] sm:$0xff]  ;;  %vm3859_vm4 = vcmp.eq.s32.totalorder %v12221_v36, 4  ;;  %v9055_v43 = vld [vmem:[%s13330_s4 + $0x38] sm:$0xff]  ;;  %v12335_v10 = vpop.permute.xlu0 %4888 }
 0xff5   :  { %5919 = vperm.xlu0 %8821, %v14014_v56   ;;  %v2904_v0 = vadd.f32 %v2900_v38, %v2876_v3  ;;  %14113 = vst [vmem:[#allocation109_spill] sm:$0xff] %v12311_v57  ;;  %v12315_v48 = vsub.s32 %v13900_v28, %v14114_v55  ;;  %vm3951_vm12 = vcmp.eq.s32.totalorder %v12261_v61, 0  ;;  %v14115_v35 = vld [vmem:[#allocation229_spill] sm:$0xff]  ;;  %v14117_v60 = vld [vmem:[#allocation178_spill] sm:$0xff]  ;;  %vm3975_vm10 = vcmp.eq.s32.totalorder %v12261_v61, 1  ;;  %v14118_v32 = vld [vmem:[#allocation216_spill] sm:$0xff] }
 0xff6   :  { %v12306_v56 = vpop.permute.xlu1 %2946  ;;  %v12326_v3 = vsel %vm5141_vm6, %v14115_v35, 0.0  ;;  %v2780_v55 = vsel %vm2756_vm14, %v14117_v60, 0.0  ;;  %v2928_v38 = vsel %vm2908_vm3, %v14118_v32, 0.0  ;;  %14119 = vst [vmem:[#allocation105_spill] sm:$0xff] %v12335_v10  ;;  %vm3887_vm13 = vcmp.eq.s32.totalorder %v12221_v36, 5  ;;  %v14122_v35 = vld [vmem:[#allocation198_spill] sm:$0xff] }
 0xff7   :  { %14111 = vst [vmem:[#allocation143_spill] sm:$0xff] %v12306_v56  ;;  %5433 = vrot.lane.b32.xlu1 %v9055_v43, %s9135_s10  ;;  %14116 = vst [vmem:[#allocation112_spill] sm:$0xff] %v12326_v3  ;;  %v3855_v56 = vadd.f32 %v3851_v63, %v3827_v20  ;;  %vm3511_vm11 = vcmp.eq.s32.totalorder %v12288_v8, 0  ;;  %vm3535_vm6 = vcmp.eq.s32.totalorder %v12288_v8, 1  ;;  %vm2999_vm5 = vcmp.eq.s32.totalorder %v12118_v12, 1  ;;  %v14121_v43 = vld [vmem:[#allocation179_spill] sm:$0xff] }
 0xff8   :  { %v12342_v7 = vadd.f32 %v2780_v55, %v2752_v13  ;;  %v3879_v26 = vsel %vm3859_vm4, %v14121_v43, 0.0  ;;  %v3971_v20 = vsel %vm3951_vm12, %v14122_v35, 0.0  ;;  %v12350_v63 = vadd.f32 %v2928_v38, %v2904_v0  ;;  %v14124_v60 = vld [vmem:[#allocation252_spill] sm:$0xff]  ;;  %v14125_v13 = vld [vmem:[#allocation230_spill] sm:$0xff]  ;;  %v14128_v38 = vld [vmem:[#allocation205_spill] sm:$0xff] }
 0xff9   :  { %5971 = vperm.xlu0 %8821, %v14047_v42   ;;  %v3970_v32 = vsel %vm3950_vm2, %v14124_v60, 0.0  ;;  %vm3806_vm0 = vcmp.eq.s32.totalorder %v12315_v48, 0  ;;  %vm3830_vm15 = vcmp.eq.s32.totalorder %v12315_v48, 1  ;;  %v3995_v55 = vsel %vm3975_vm10, %v14125_v13, 0.0  ;;  %v14127_v42 = vld [vmem:[#allocation260_spill] sm:$0xff]  ;;  %v14129_v35 = vld [vmem:[#allocation201_spill] sm:$0xff] }
 0xffa   :  { %14120 = vst [vmem:[#allocation90_spill] sm:$0xff] %v12342_v7  ;;  %14123 = vst [vmem:[#allocation141_spill] sm:$0xff] %v12350_v63  ;;  %v12365_v0 = vsub.s32 %v13900_v28, %v14127_v42  ;;  %v3907_v4 = vsel %vm3887_vm13, %v14128_v38, 0.0  ;;  %v3531_v60 = vsel %vm3511_vm11, %v14129_v35, 0.0  ;;  %v14130_v10 = vld [vmem:[#allocation203_spill] sm:$0xff]  ;;  %v14131_v7 = vld [vmem:[#allocation254_spill] sm:$0xff]  ;;  %v3998_v38 = vadd.f32 %v12104_v2, %v3970_v32 }
 0xffb   :  { %6167 = vperm.xlu1 %8780, %v11991_v39   ;;  %v12361_v43 = vpop.permute.xlu1 %5180  ;;  %v3555_v13 = vsel %vm3535_vm6, %v14130_v10, 0.0  ;;  %v3554_v39 = vsel %vm3534_vm9, %v14131_v7, 0.0  ;;  %v14132_v63 = vld [vmem:[#allocation258_spill] sm:$0xff]  ;;  %vm4003_vm2 = vcmp.eq.s32.totalorder %v12261_v61, 4  ;;  %v14133_v36 = vld [vmem:[#allocation56_spill] sm:$0xff]  ;;  %v14134_v35 = vld [vmem:[#allocation263_spill] sm:$0xff]  ;;  %v3999_v10 = vadd.f32 %v3995_v55, %v3971_v20 }
 0xffc   :  { %14126 = vst [vmem:[#allocation149_spill] sm:$0xff] %v12361_v43  ;;  %v3702_v42 = vsel %vm3682_vm7, %v14132_v63, 0.0  ;;  %v3883_v43 = vadd.f32 %v3879_v26, %v3855_v56  ;;  %v3826_v3 = vsel %vm3806_vm0, %v14134_v35, 0.0  ;;  %v14135_v57 = vld [vmem:[#allocation250_spill] sm:$0xff]  ;;  %v3530_v7 = vsel %vm3510_vm1, %v14136_v22, 0.0  ;;  %v3922_v56 = vpop.permute.xlu0 %3921  ;;  %v14140_v15 = vld [vmem:[#allocation59_spill] sm:$0xff] }
 0xffd   :  { %5923 = vperm.xlu0 %8821, %v14133_v36   ;;  %v3850_v54 = vsel %vm3830_vm15, %v14135_v57, 0.0  ;;  %v3678_v63 = vsel %vm3658_vm8, %v14137_v23, 0.0  ;;  %v3559_v26 = vadd.f32 %v3555_v13, %v3531_v60  ;;  %vm3563_vm9 = vcmp.eq.s32.totalorder %v12288_v8, 8  ;;  %v14138_v36 = vld [vmem:[#allocation25_spill] sm:$0xff]  ;;  %v14139_v23 = vld [vmem:[#allocation180_spill] sm:$0xff]  ;;  %v14141_v20 = vld [vmem:[#allocation207_spill] sm:$0xff] }
 0xffe   :  { %v3558_v2 = vadd.f32 %v3554_v39, %v3530_v7  ;;  %v3706_v32 = vadd.f32 %v3702_v42, %v3678_v63  ;;  %vm3120_vm7 = vcmp.eq.s32.totalorder %v12365_v0, 0  ;;  %vm3144_vm14 = vcmp.eq.s32.totalorder %v12365_v0, 1  ;;  %v14142_v60 = vld [vmem:[#allocation262_spill] sm:$0xff]  ;;  %v14144_v13 = vld [vmem:[#allocation241_spill] sm:$0xff] }
 0xfff   :  { %8787 = vrot.lane.b32.xlu1 %v14138_v36, %s9090_s21  ;;  %v3854_v47 = vadd.f32 %v3850_v54, %v3826_v3  ;;  %vm3858_vm3 = vcmp.eq.s32.totalorder %v12315_v48, 4  ;;  %v4023_v22 = vsel %vm4003_vm2, %v14139_v23, 0.0  ;;  %vm4031_vm1 = vcmp.eq.s32.totalorder %v12261_v61, 5  ;;  %v14143_v3 = vld [vmem:[#allocation9_spill] sm:$0xff]  ;;  %v14145_v36 = vld [vmem:[#allocation215_spill] sm:$0xff] }
0x1000   :  { %v12396_v35 = vpop.permute.xlu1 %4744  ;;  %8802 = vset.pattern.permute.xlu1 %v13951_v33  ;;  %v4026_v39 = vadd.f32 %v12126_v52, %v3998_v38  ;;  %v4027_v57 = vadd.f32 %v4023_v22, %v3999_v10  ;;  %v3583_v55 = vsel %vm3563_vm9, %v14141_v20, 0.0  ;;  %vm3591_vm8 = vcmp.eq.s32.totalorder %v12288_v8, 9  ;;  %v14146_v38 = vld [vmem:[#allocation266_spill] sm:$0xff]  ;;  %v14147_v23 = vld [vmem:[#allocation199_spill] sm:$0xff]  ;;  %v12428_v22 = vpop.permute.xlu0 %3628 }
0x1001   :  { %5927 = vperm.xlu0 %8821, %v14140_v15   ;;  %v3019_v33 = vsel %vm2999_vm5, %v14142_v60, 0.0  ;;  %v3587_v54 = vadd.f32 %v3583_v55, %v3559_v26  ;;  %v3140_v42 = vsel %vm3120_vm7, %v14144_v13, 0.0  ;;  %v3164_v7 = vsel %vm3144_vm14, %v14145_v36, 0.0  ;;  %v14148_v55 = vld [vmem:[#allocation181_spill] sm:$0xff]  ;;  %v14150_v60 = vld [vmem:[#allocation210_spill] sm:$0xff] }
0x1002   :  { %v3586_v63 = vadd.f32 %v12162_v45, %v3558_v2  ;;  %v3734_v52 = vadd.f32 %v12243_v11, %v3706_v32  ;;  %v12421_v10 = vsub.s32 %v13900_v28, %v14146_v38  ;;  %v3878_v12 = vsel %vm3858_vm3, %v14147_v23, 0.0  ;;  %v14149_v45 = vld [vmem:[#allocation57_spill] sm:$0xff]  ;;  %v14156_v23 = vld [vmem:[#allocation248_spill] sm:$0xff] }
0x1003   :  { %8797 = vrot.lane.b32.xlu1 %v14143_v3, %s9090_s21  ;;  %vm5085_vm4 = vcmp.eq.s32.totalorder %v12190_v51, 1  ;;  %v3882_v26 = vadd.f32 %v3878_v12, %v3854_v47  ;;  %vm3886_vm12 = vcmp.eq.s32.totalorder %v12315_v48, 5  ;;  %v3911_v20 = vadd.f32 %v3907_v4, %v3883_v43 }
0x1004   :  { %v4051_v11 = vsel %vm4031_vm1, %v14148_v55, 0.0  ;;  %v3023_v32 = vadd.f32 %v3019_v33, %v12203_v25  ;;  %vm5061_vm10 = vcmp.eq.s32.totalorder %v12190_v51, 0  ;;  %v3611_v47 = vsel %vm3591_vm8, %v14150_v60, 0.0  ;;  %v14151_v25 = vld [vmem:[#allocation200_spill] sm:$0xff]  ;;  %v12460_v36 = vpop.xlane.xlu0 %5585 }
0x1005   :  { %5979 = vperm.xlu0 %8821, %v14149_v45   ;;  %v12434_v2 = vpop.permute.xlu1 %2797  ;;  %v3168_v3 = vadd.f32 %v3164_v7, %v3140_v42  ;;  %vm3172_vm13 = vcmp.eq.s32.totalorder %v12365_v0, 4  ;;  %v4055_v43 = vadd.f32 %v4051_v11, %v4027_v57  ;;  %v12442_v4 = vadd.f32 %v3611_v47, %v3587_v54  ;;  %v14152_v57 = vld [vmem:[#allocation282_spill] sm:$0xff]  ;;  %v14154_v7 = vld [vmem:[#allocation100_spill] sm:$0xff]  ;;  %v14157_v11 = vld [vmem:[#allocation11_spill] sm:$0xff] }
0x1006   :  { %vm3200_vm11 = vcmp.eq.s32.totalorder %v12365_v0, 5  ;;  %v4054_v61 = vadd.f32 %v12149_v37, %v4026_v39  ;;  %vm4918_vm6 = vcmp.eq.s32.totalorder %v12421_v10, 0  ;;  %v3906_v33 = vsel %vm3886_vm12, %v14151_v25, 0.0  ;;  %v14153_v37 = vld [vmem:[#allocation212_spill] sm:$0xff]  ;;  %v14158_v47 = vld [vmem:[#allocation277_spill] sm:$0xff] }
0x1007   :  { %6045 = vperm.xlu1 %8802, %v14072_v53   ;;  %v3614_v8 = vadd.f32 %v12167_v50, %v3586_v63  ;;  %v12453_v13 = vadd.f32 %v12248_v16, %v3734_v52  ;;  %v12457_v54 = vsub.s32 %v13900_v28, %v14152_v57  ;;  %vm4942_vm5 = vcmp.eq.s32.totalorder %v12421_v10, 1  ;;  %v14155_v16 = vld [vmem:[#allocation214_spill] sm:$0xff]  ;;  %v14160_v0 = vld [vmem:[#allocation220_spill] sm:$0xff] }
0x1008   :  { %v3910_v42 = vadd.f32 %v3906_v33, %v3882_v26  ;;  %v3192_v39 = vsel %vm3172_vm13, %v14153_v37, 0.0  ;;  %v3051_v48 = vadd.f32 %v12273_v1, %v3023_v32  ;;  %v4075_v50 = vmul.f32 %v12196_v6, %v4055_v43  ;;  %v14159_v6 = vld [vmem:[#allocation279_spill] sm:$0xff] }
0x1009   :  { %6003 = vperm.xlu0 %8821, %v14154_v7   ;;  %v3196_v63 = vadd.f32 %v3192_v39, %v3168_v3  ;;  %v3220_v52 = vsel %vm3200_vm11, %v14155_v16, 0.0  ;;  %v4938_v12 = vsel %vm4918_vm6, %v14156_v23, 0.0  ;;  %v3636_v26 = vmul.f32 %v11933_v14, %v12011_v58  ;;  %v12488_v58 = vpop.permute.xlu0 %3238  ;;  %v14162_v33 = vld [vmem:[#allocation283_spill] sm:$0xff] }
0x100a   :  { %v4066_v38 = vpop.permute.xlu1 %4065  ;;  %v3930_v55 = vmul.f32 %v3922_v56, %v3910_v42  ;;  %v12476_v1 = vsub.s32 %v13900_v28, %v14158_v47  ;;  %v12480_v32 = vsub.s32 %v13900_v28, %v14159_v6  ;;  %v4962_v3 = vsel %vm4942_vm5, %v14160_v0, 0.0  ;;  %v14170_v47 = vld [vmem:[#allocation134_spill] sm:$0xff] }
0x100b   :  { %8804 = vrot.lane.b32.xlu1 %v14157_v11, %s9090_s21  ;;  %v4074_v60 = vmul.f32 %v4066_v38, %v4054_v61  ;;  %v3931_v56 = vmul.f32 %v12144_v5, %v3911_v20  ;;  %v3780_v14 = vmul.f32 %v12001_v21, %v12049_v31  ;;  %vm3119_vm0 = vcmp.eq.s32.totalorder %v12457_v54, 0  ;;  %v14161_v61 = vld [vmem:[#allocation269_spill] sm:$0xff]  ;;  %v14163_v5 = vld [vmem:[#allocation268_spill] sm:$0xff] }
0x100c   :  { %vm3143_vm15 = vcmp.eq.s32.totalorder %v12457_v54, 1  ;;  %v5105_v25 = vsel %vm5085_vm4, %v14161_v61, 0.0  ;;  %v12498_v57 = vsub.s32 %v13900_v28, %v14162_v33  ;;  %v3637_v21 = vmul.f32 %v11665_v29, %v11641_v18  ;;  %v14165_v29 = vld [vmem:[#allocation264_spill] sm:$0xff] }
0x100d   :  { %v4078_v43 = vadd.f32 %v4074_v60, %v3930_v55  ;;  %8826 = vset.pattern.permute.xlu0 %v14088_v40  ;;  %v4079_v31 = vadd.f32 %v4075_v50, %v3931_v56  ;;  %v5081_v20 = vsel %vm5061_vm10, %v14163_v5, 0.0  ;;  %v3784_v42 = vadd.f32 %v3780_v14, %v3636_v26  ;;  %v14166_v50 = vld [vmem:[#allocation272_spill] sm:$0xff]  ;;  %v3235_v23 = vpop.permute.xlu0 %3234  ;;  %v14169_v26 = vld [vmem:[#allocation245_spill] sm:$0xff]  ;;  %v14172_v14 = vld [vmem:[#allocation267_spill] sm:$0xff] }
0x100e   :  { %6059 = vperm.xlu0 %8826, %v13977_v30   ;;  %v12506_v37 = vadd.f32 %v3220_v52, %v3196_v63  ;;  %vm14164_vm2 = vcmask 261120   ;;  %v12511_v16 = vadd.f32 %v12278_v46, %v3051_v48  ;;  %v3781_v18 = vmul.f32 %v11711_v59, %v11852_v41  ;;  %v14168_v41 = vld [vmem:[#allocation240_spill] sm:$0xff] }
0x100f   :  { %6048 = vperm.xlu1 %8802, %v14085_v9   ;;  %7725 = vmatprep.mubr.msk.f32.mxu1 %vm14164_vm2, %v4078_v43  ;;  %v3778_v39 = vpop.permute.xlu1 %3777  ;;  %vm2663_vm9 = vcmp.eq.s32.totalorder %v12476_v1, 0  ;;  %v3139_v51 = vsel %vm3119_vm0, %v14165_v29, 0.0  ;;  %v3163_v63 = vsel %vm3143_vm15, %v14166_v50, 0.0  ;;  %vm14167_vm7 = vmmov %vm14164_vm2  ;;  %v5109_v52 = vadd.f32 %v5105_v25, %v5081_v20  ;;  %v14174_v43 = vld [vmem:[#allocation242_spill] sm:$0xff]  ;;  %v14176_v33 = vld [vmem:[#allocation28_spill] sm:$0xff] }
0x1010   :  { %7726 = vmatmul.mubr.msk.f32.gmra.mrb[42].mxu1 %vm14167_vm7, %v4079_v31  ;;  %v12523_v38 = vadd.f32 %v4962_v3, %v4938_v12  ;;  %vm4970_vm14 = vcmp.eq.s32.totalorder %v12421_v10, 4  ;;  %vm2827_vm3 = vcmp.eq.s32.totalorder %v12480_v32, 0  ;;  %v3785_v59 = vadd.f32 %v3781_v18, %v3637_v21  ;;  %v14171_v3 = vld [vmem:[#allocation261_spill] sm:$0xff]  ;;  %v14177_v21 = vld [vmem:[#allocation79_spill] sm:$0xff]  ;;  %vm14190_vm15 = vmmov %vm14164_vm2 }
0x1011   :  { %7760 = vmatprep.mubr.f32.mxu1 %v3784_v42  ;;  %vm2851_vm1 = vcmp.eq.s32.totalorder %v12480_v32, 1  ;;  %vm4917_vm8 = vcmp.eq.s32.totalorder %v12498_v57, 0  ;;  %vm4941_vm4 = vcmp.eq.s32.totalorder %v12498_v57, 1  ;;  %v2687_v46 = vsel %vm2663_vm9, %v14168_v41, 0.0  ;;  %v14178_v31 = vld [vmem:[#allocation89_spill] sm:$0xff]  ;;  %v14180_v29 = vld [vmem:[#allocation39_spill] sm:$0xff] }
0x1012   :  { %6087 = vperm.xlu0 %8826, %v14005_v19   ;;  %vm2691_vm12 = vcmp.eq.s32.totalorder %v12476_v1, 1  ;;  %v3167_v48 = vadd.f32 %v3163_v63, %v3139_v51  ;;  %vm3171_vm10 = vcmp.eq.s32.totalorder %v12457_v54, 4  ;;  %v3638_v55 = vmul.f32 %v12428_v22, %v3614_v8  ;;  %v14173_v8 = vld [vmem:[#allocation276_spill] sm:$0xff]  ;;  %v14181_v51 = vld [vmem:[#allocation107_spill] sm:$0xff]  ;;  %v14182_v63 = vld [vmem:[#allocation186_spill] sm:$0xff] }
0x1013   :  { %8808 = vset.pattern.permute.xlu1 %v13998_v24  ;;  %v3774_v12 = vpop.permute.xlu1 %3773  ;;  %v2847_v11 = vsel %vm2827_vm3, %v14169_v26, 0.0  ;;  %v3783_v60 = vmul.f32 %v3778_v39, %v12252_v62  ;;  %v5039_v0 = vmul.f32 %v11976_v34, %v12086_v44  ;;  %v2871_v56 = vsel %vm2851_vm1, %v14171_v3, 0.0  ;;  %v14175_v44 = vld [vmem:[#allocation244_spill] sm:$0xff]  ;;  %v14179_v39 = vld [vmem:[#allocation109_spill] sm:$0xff]  ;;  %v14184_v26 = vld [vmem:[#allocation246_spill] sm:$0xff] }
0x1014   :  { %5947 = vperm.xlu1 %8808, %v14170_v47   ;;  %v3782_v6 = vmul.f32 %v3774_v12, %v12453_v13  ;;  %7761 = vmatmul.mubr.f32.vlgmr.msra.gmra.mrb[40].mxu1 %v3785_v59  ;;  %v4937_v22 = vsel %vm4917_vm8, %v14172_v14, 0.0  ;;  %v4961_v62 = vsel %vm4941_vm4, %v14173_v8, 0.0  ;;  %v3639_v13 = vmul.f32 %v12250_v27, %v12442_v4  ;;  %v14183_v12 = vld [vmem:[#allocation56_spill] sm:$0xff] }
0x1015   :  { %8133 = vmatpush3.bf16.msra.mxu1 %v11570_v17  ;;  %v2715_v34 = vsel %vm2691_vm12, %v14174_v43, 0.0  ;;  %v3191_v61 = vsel %vm3171_vm10, %v14175_v44, 0.0  ;;  %v5183_v5 = vmul.f32 %v14178_v31, %v14177_v21  ;;  %vm3199_vm13 = vcmp.eq.s32.totalorder %v12457_v54, 5  ;;  %v14188_v14 = vld [vmem:[#allocation224_spill] sm:$0xff]  ;;  %v14193_v31 = vld [vmem:[#allocation71_spill] sm:$0xff] }
0x1016   :  { %v3786_v25 = vadd.f32 %v3782_v6, %v3638_v55  ;;  %6139 = vperm.xlu0 %8826, %v14062_v49   ;;  %8135 = vmatprep.subr.bf16.mxu1 %v14176_v33  ;;  %v3195_v17 = vadd.f32 %v3191_v61, %v3167_v48  ;;  %vm2879_vm11 = vcmp.eq.s32.totalorder %v12480_v32, 8  ;;  %vm4998_vm6 = vcmp.eq.s32.totalorder %v12421_v10, 5  ;;  %v2943_v48 = vpop.permute.xlu0 %2942  ;;  %v14192_v21 = vld [vmem:[#allocation40_spill] sm:$0xff]  ;;  %v14218_v10 = vld [vmem:[#allocation141_spill] sm:$0xff] }
0x1017   :  { %v2875_v27 = vadd.f32 %v2871_v56, %v2847_v11  ;;  %v3787_v4 = vadd.f32 %v3783_v60, %v3639_v13  ;;  %v4965_v20 = vadd.f32 %v4961_v62, %v4937_v22  ;;  %vm4969_vm5 = vcmp.eq.s32.totalorder %v12498_v57, 4  ;;  %v14185_v11 = vld [vmem:[#allocation38_spill] sm:$0xff]  ;;  %v14186_v60 = vld [vmem:[#allocation41_spill] sm:$0xff] }
0x1018   :  { %8809 = vset.pattern.permute.xlu1 %v14088_v40  ;;  %7763 = vmatprep.mubr.f32.mxu1 %v3786_v25  ;;  %v3095_v42 = vpop.permute.xlu1 %3094  ;;  %v5137_v18 = vadd.f32 %v14179_v39, %v5109_v52  ;;  %v5184_v50 = vmul.f32 %v14181_v51, %v14180_v29  ;;  %v4990_v59 = vsel %vm4970_vm14, %v14182_v63, 0.0  ;;  %v5187_v41 = vadd.f32 %v5183_v5, %v5039_v0  ;;  %v14187_v0 = vld [vmem:[#allocation225_spill] sm:$0xff]  ;;  %vm14198_vm14 = vmmov %vm14190_vm15  ;;  %v14199_v51 = vld [vmem:[#allocation104_spill] sm:$0xff] }
0x1019   :  { %6067 = vperm.xlu1 %8809, %v14183_v12   ;;  %8137 = vmatpush3.bf16.msra.mxu1 %v14176_v33  ;;  %v2719_v55 = vadd.f32 %v2715_v34, %v2687_v46  ;;  %vm2723_vm0 = vcmp.eq.s32.totalorder %v12476_v1, 8  ;;  %v3219_v52 = vsel %vm3199_vm13, %v14184_v26, 0.0  ;;  %v5040_v6 = vmul.f32 %v14186_v60, %v14185_v11  ;;  %v14189_v22 = vld [vmem:[#allocation33_spill] sm:$0xff]  ;;  %v14191_v34 = vld [vmem:[#allocation99_spill] sm:$0xff]  ;;  %vm14206_vm3 = vmmov %vm14198_vm14 }
0x101a   :  { %6091 = vperm.xlu0 %8826, %v14170_v47   ;;  %7764 = vmatmul.mubr.f32.gmra.mrb[42].mxu1 %v3787_v4  ;;  %v3223_v3 = vadd.f32 %v3219_v52, %v3195_v17  ;;  %v2899_v56 = vsel %vm2879_vm11, %v14187_v0, 0.0  ;;  %v4989_v46 = vsel %vm4969_vm5, %v14188_v14, 0.0  ;;  %vm2907_vm2 = vcmp.eq.s32.totalorder %v12480_v32, 9  ;;  %v14194_v17 = vld [vmem:[#allocation219_spill] sm:$0xff]  ;;  %v14195_v4 = vld [vmem:[#allocation60_spill] sm:$0xff]  ;;  %v5033_v39 = vpop.permute.xlu0 %5032  ;;  %v14204_v52 = vld [vmem:[#allocation106_spill] sm:$0xff] }
0x101b   :  { %8139 = vmatprep.subr.bf16.mxu1 %v14189_v22  ;;  %7790 = vmatprep.mubr.msk.f32.mxu1 %vm14190_vm15, %v5187_v41  ;;  %v2903_v54 = vadd.f32 %v2899_v56, %v2875_v27  ;;  %v4993_v8 = vadd.f32 %v4989_v46, %v4965_v20  ;;  %vm4997_vm9 = vcmp.eq.s32.totalorder %v12498_v57, 5  ;;  %v5188_v13 = vadd.f32 %v5184_v50, %v5040_v6  ;;  %v14200_v50 = vld [vmem:[#allocation121_spill] sm:$0xff]  ;;  %v14208_v46 = vld [vmem:[#allocation58_spill] sm:$0xff]  ;;  %vm14213_vm1 = vmmov %vm14206_vm3 }
0x101c   :  { %v3091_v62 = vpop.permute.xlu1 %3090  ;;  %v3243_v43 = vmul.f32 %v3235_v23, %v3223_v3  ;;  %v3100_v44 = vmul.f32 %v3095_v42, %v14191_v34  ;;  %v9139_v61 = vmov 28   ;;  %v4994_v33 = vadd.f32 %v4990_v59, %v12523_v38  ;;  %v14196_v23 = vld [vmem:[#allocation80_spill] sm:$0xff]  ;;  %v14201_v59 = vld [vmem:[#allocation251_spill] sm:$0xff]  ;;  %v14205_v6 = vld [vmem:[#allocation29_spill] sm:$0xff] }
0x101d   :  { %8810 = vset.pattern.permute.xlu1 %v9139_v61  ;;  %v3099_v25 = vmul.f32 %v3091_v62, %v12511_v16  ;;  %v2949_v5 = vmul.f32 %v14193_v31, %v14192_v21  ;;  %v2747_v27 = vsel %vm2723_vm0, %v14194_v17, 0.0  ;;  %vm2755_vm7 = vcmp.eq.s32.totalorder %v12476_v1, 9  ;;  %v14197_v16 = vld [vmem:[#allocation227_spill] sm:$0xff]  ;;  %v14207_v56 = vld [vmem:[#allocation221_spill] sm:$0xff]  ;;  %vm14224_vm8 = vmmov %vm14213_vm1 }
0x101e   :  { %6095 = vperm.xlu0 %8826, %v14195_v4   ;;  %5599 = vperm.xlu1 %8810, %v14196_v23   ;;  %v3244_v20 = vmul.f32 %v12488_v58, %v12506_v37  ;;  %v2751_v42 = vadd.f32 %v2747_v27, %v2719_v55  ;;  %v5017_v38 = vsel %vm4997_vm9, %v14197_v16, 0.0  ;;  %v2805_v63 = vmul.f32 %v14200_v50, %v14199_v51  ;;  %v14202_v58 = vld [vmem:[#allocation112_spill] sm:$0xff]  ;;  %v14203_v55 = vld [vmem:[#allocation6_spill] sm:$0xff]  ;;  %v14211_v62 = vld [vmem:[#allocation27_spill] sm:$0xff] }
0x101f   :  { %v3247_v29 = vadd.f32 %v3243_v43, %v3099_v25  ;;  %7791 = vmatmul.mubr.msk.f32.vlgmr.msra.gmra.mrb[44].mxu1 %vm14198_vm14, %v5188_v13  ;;  %v2927_v41 = vsel %vm2907_vm2, %v14201_v59, 0.0  ;;  %v5021_v26 = vadd.f32 %v5017_v38, %v4993_v8  ;;  %v5165_v37 = vadd.f32 %v14202_v58, %v5137_v18  ;;  %v14210_v8 = vld [vmem:[#allocation36_spill] sm:$0xff]  ;;  %v14214_v25 = vld [vmem:[#allocation102_spill] sm:$0xff]  ;;  %v14215_v21 = vld [vmem:[#allocation149_spill] sm:$0xff] }
0x1020   :  { %8141 = vmatpush3.bf16.msra.mxu1 %v14189_v22  ;;  %v2950_v57 = vmul.f32 %v14204_v52, %v14203_v55  ;;  %v2931_v11 = vadd.f32 %v2927_v41, %v2903_v54  ;;  %v3248_v60 = vadd.f32 %v3244_v20, %v3100_v44  ;;  %v2953_v0 = vadd.f32 %v2949_v5, %v2805_v63  ;;  %v14212_v13 = vld [vmem:[#allocation188_spill] sm:$0xff]  ;;  %v14216_v27 = vld [vmem:[#allocation145_spill] sm:$0xff]  ;;  %v14219_v38 = vld [vmem:[#allocation143_spill] sm:$0xff] }
0x1021   :  { %8143 = vmatprep.subr.bf16.mxu1 %v14205_v6  ;;  %7673 = vmatprep.mubr.msk.f32.mxu0 %vm14206_vm3, %v3247_v29  ;;  %v5177_v3 = vpop.permute.xlu1 %5176  ;;  %v2779_v32 = vsel %vm2755_vm7, %v14207_v56, 0.0  ;;  %v5041_v14 = vmul.f32 %v5033_v39, %v5021_v26  ;;  %v14209_v22 = vmov 29   ;;  %v2806_v54 = vmul.f32 %v14211_v62, %v14210_v8  ;;  %v14217_v20 = vld [vmem:[#allocation93_spill] sm:$0xff]  ;;  %v14221_v39 = vld [vmem:[#allocation46_spill] sm:$0xff]  ;;  %v14222_v51 = vld [vmem:[#allocation284_spill] sm:$0xff] }
0x1022   :  { %6151 = vperm.xlu0 %8826, %v14208_v46   ;;  %8811 = vset.pattern.permute.xlu1 %v14209_v22  ;;  %v5185_v18 = vmul.f32 %v5177_v3, %v5165_v37  ;;  %v5018_v43 = vsel %vm4998_vm6, %v14212_v13, 0.0  ;;  %v2783_v34 = vadd.f32 %v2779_v32, %v2751_v42  ;;  %v2951_v44 = vmul.f32 %v2943_v48, %v2931_v11  ;;  %v14223_v63 = vld [vmem:[#allocation96_spill] sm:$0xff]  ;;  %v14226_v58 = vld [vmem:[#allocation47_spill] sm:$0xff]  ;;  %v14227_v37 = vld [vmem:[#allocation86_spill] sm:$0xff] }
0x1023   :  { %5747 = vperm.xlu1 %8811, %v14196_v23   ;;  %7674 = vmatmul.mubr.msk.f32.gmra.mrb[34].mxu0 %vm14213_vm1, %v3248_v60  ;;  %v5022_v1 = vadd.f32 %v5018_v43, %v4994_v33  ;;  %v5186_v31 = vmul.f32 %v14215_v21, %v14214_v25  ;;  %v2954_v17 = vadd.f32 %v2950_v57, %v2806_v54  ;;  %v14220_v23 = vld [vmem:[#allocation35_spill] sm:$0xff]  ;;  %v8531_v33 = vunpack.i.h.bf16 %v14221_v39  ;;  %v14229_v57 = vld [vmem:[#allocation90_spill] sm:$0xff]  ;;  %v14230_v11 = vld [vmem:[#allocation85_spill] sm:$0xff] }
0x1024   :  { %8145 = vmatpush3.bf16.msra.mxu1 %v14205_v6  ;;  %v5189_v5 = vadd.f32 %v5185_v18, %v5041_v14  ;;  %7708 = vmatprep.mubr.f32.mxu0 %v2953_v0  ;;  %v4891_v16 = vmul.f32 %v14217_v20, %v14216_v27  ;;  %v2952_v42 = vmul.f32 %v14219_v38, %v14218_v10  ;;  %v8530_v29 = vunpack.i.l.bf16 %v14221_v39  ;;  %v14228_v55 = vld [vmem:[#allocation91_spill] sm:$0xff]  ;;  %v14231_v3 = vld [vmem:[#allocation286_spill] sm:$0xff]  ;;  %v14235_v13 = vld [vmem:[#allocation37_spill] sm:$0xff] }
0x1025   :  { %v2807_v48 = vmul.f32 %v12434_v2, %v2783_v34  ;;  %8147 = vmatprep.subr.bf16.mxu1 %v14220_v23  ;;  %v12648_v50 = vsub.s32 %v13900_v28, %v14222_v51  ;;  %v5042_v59 = vmul.f32 %v14223_v63, %v5022_v1  ;;  %v14225_v26 = vmov 47   ;;  %v14232_v56 = vld [vmem:[#allocation67_spill] sm:$0xff]  ;;  %v14233_v14 = vld [vmem:[#allocation34_spill] sm:$0xff]  ;;  %vm14236_vm5 = vmmov %vm14213_vm1 }
0x1026   :  { %7793 = vmatprep.mubr.msk.f32.mxu1 %vm14224_vm8, %v5189_v5  ;;  %v12652_v41 = vpop.permute.xlu1 %4739  ;;  %8844 = vset.pattern.permute.xlu0 %v14225_v26  ;;  %v8536_v2 = vunpack.i.h.bf16 %v14226_v58  ;;  %v4747_v52 = vmul.f32 %v14228_v55, %v14227_v37  ;;  %v2808_v60 = vmul.f32 %v14230_v11, %v14229_v57  ;;  %v12663_v0 = vsub.s32 %v13900_v28, %v14231_v3  ;;  %v14234_v18 = vld [vmem:[#allocation271_spill] sm:$0xff]  ;;  %v14238_v1 = vld [vmem:[#allocation273_spill] sm:$0xff]  ;;  %v14240_v5 = vld [vmem:[#allocation132_spill] sm:$0xff] }
0x1027   :  { %v2955_v6 = vadd.f32 %v2951_v44, %v2807_v48  ;;  %8812 = vset.pattern.permute.xlu1 %v13998_v24  ;;  %7709 = vmatmul.mubr.f32.vlgmr.msra.gmra.mrb[32].mxu0 %v2954_v17  ;;  %vm4620_vm4 = vcmp.eq.s32.totalorder %v14232_v56, 0  ;;  %vm4644_vm12 = vcmp.eq.s32.totalorder %v14232_v56, 1  ;;  %v5190_v32 = vadd.f32 %v5186_v31, %v5042_v59  ;;  %v14237_v34 = vld [vmem:[#allocation131_spill] sm:$0xff]  ;;  %v14239_v21 = vld [vmem:[#allocation129_spill] sm:$0xff]  ;;  %v14242_v38 = vld [vmem:[#allocation278_spill] sm:$0xff] }
0x1028   :  { %8149 = vmatpush3.bf16.msra.mxu1 %v14220_v23  ;;  %5951 = vperm.xlu1 %8812, %v14195_v4   ;;  %vm4792_vm10 = vcmp.eq.s32.totalorder %v14233_v14, 1  ;;  %v12672_v8 = vsub.s32 %v13900_v28, %v14234_v18  ;;  %v4895_v62 = vadd.f32 %v4891_v16, %v4747_v52  ;;  %v2956_v54 = vadd.f32 %v2952_v42, %v2808_v60  ;;  %v14241_v20 = vld [vmem:[#allocation135_spill] sm:$0xff]  ;;  %v14243_v48 = vld [vmem:[#allocation274_spill] sm:$0xff]  ;;  %v14248_v57 = vld [vmem:[#allocation48_spill] sm:$0xff] }
0x1029   :  { %8151 = vmatprep.subr.bf16.mxu1 %v14235_v13  ;;  %7711 = vmatprep.mubr.f32.mxu0 %v2955_v6  ;;  %v8535_v43 = vunpack.i.l.bf16 %v14226_v58  ;;  %vm4768_vm13 = vcmp.eq.s32.totalorder %v14233_v14, 0  ;;  %vm4621_vm11 = vcmp.eq.s32.totalorder %v12648_v50, 0  ;;  %vm4645_vm6 = vcmp.eq.s32.totalorder %v12648_v50, 1  ;;  %v14244_v39 = vld [vmem:[#allocation30_spill] sm:$0xff]  ;;  %v14246_v59 = vld [vmem:[#allocation275_spill] sm:$0xff]  ;;  %v14250_v18 = vld [vmem:[#allocation77_spill] sm:$0xff] }
0x102a   :  { %7794 = vmatmul.mubr.msk.f32.gmra.mrb[46].mxu1 %vm14236_vm5, %v5190_v32  ;;  %v4788_v44 = vsel %vm4768_vm13, %v14237_v34, 0.0  ;;  %v12683_v25 = vsub.s32 %v13900_v28, %v14238_v1  ;;  %v4640_v31 = vsel %vm4620_vm4, %v14239_v21, 0.0  ;;  %v4664_v17 = vsel %vm4644_vm12, %v14240_v5, 0.0  ;;  %v14247_v55 = vld [vmem:[#allocation231_spill] sm:$0xff]  ;;  %v14249_v3 = vld [vmem:[#allocation78_spill] sm:$0xff]  ;;  %v14253_v34 = vld [vmem:[#allocation233_spill] sm:$0xff] }
0x102b   :  { %7828 = vmatprep.mubr.f32.mxu1 %v4895_v62  ;;  %7712 = vmatmul.mubr.f32.gmra.mrb[34].mxu0 %v2956_v54  ;;  %v12691_v27 = vpop.permute.xlu1 %5895  ;;  %v4812_v16 = vsel %vm4792_vm10, %v14241_v20, 0.0  ;;  %vm4769_vm0 = vcmp.eq.s32.totalorder %v12663_v0, 0  ;;  %vm4793_vm15 = vcmp.eq.s32.totalorder %v12663_v0, 1  ;;  %v8162_v10 = vpack.c.bf16 %v8531_v33, %v8530_v29  ;;  %v14245_v29 = vld [vmem:[#allocation280_spill] sm:$0xff]  ;;  %v14254_v1 = vld [vmem:[#allocation253_spill] sm:$0xff]  ;;  %v14255_v20 = vld [vmem:[#allocation255_spill] sm:$0xff] }
0x102c   :  { %8153 = vmatpush3.bf16.msra.mxu1 %v14235_v13  ;;  %8813 = vset.pattern.permute.xlu1 %v14088_v40  ;;  %vm4622_vm2 = vcmp.eq.s32.totalorder %v12672_v8, 0  ;;  %vm4646_vm9 = vcmp.eq.s32.totalorder %v12672_v8, 1  ;;  %v4641_v42 = vsel %vm4621_vm11, %v14242_v38, 0.0  ;;  %v4665_v23 = vsel %vm4645_vm6, %v14243_v48, 0.0  ;;  %v14251_v54 = vld [vmem:[#allocation32_spill] sm:$0xff]  ;;  %v14252_v13 = vld [vmem:[#allocation13_spill] sm:$0xff] }
0x102d   :  { %8155 = vmatprep.subr.bf16.mxu1 %v14244_v39  ;;  %6071 = vperm.xlu1 %8813, %v14140_v15   ;;  %vm4820_vm7 = vcmp.eq.s32.totalorder %v14233_v14, 8  ;;  %v4816_v51 = vadd.f32 %v4812_v16, %v4788_v44  ;;  %v4668_v33 = vadd.f32 %v4664_v17, %v4640_v31  ;;  %vm4672_vm14 = vcmp.eq.s32.totalorder %v14232_v56, 8  ;;  %v14260_v58 = vld [vmem:[#allocation190_spill] sm:$0xff] }
0x102e   :  { %vm4770_vm3 = vcmp.eq.s32.totalorder %v12683_v25, 0  ;;  %vm4794_vm1 = vcmp.eq.s32.totalorder %v12683_v25, 1  ;;  %v4789_v63 = vsel %vm4769_vm0, %v14245_v29, 0.0  ;;  %v4813_v37 = vsel %vm4793_vm15, %v14246_v59, 0.0  ;;  %v14257_v29 = vld [vmem:[#allocation235_spill] sm:$0xff] }
0x102f   :  { %v4642_v52 = vsel %vm4622_vm2, %v14247_v55, 0.0  ;;  %v4666_v11 = vsel %vm4646_vm9, %v14248_v57, 0.0  ;;  %v4669_v60 = vadd.f32 %v4665_v23, %v4641_v42  ;;  %vm4673_vm8 = vcmp.eq.s32.totalorder %v12648_v50, 8  ;;  %v14256_v23 = vld [vmem:[#allocation83_spill] sm:$0xff] }
0x1030   :  { %8157 = vmatpush3.bf16.msra.mxu1 %v14244_v39  ;;  %v12724_v6 = vpop.permute.xlu1 %6039  ;;  %v4840_v32 = vsel %vm4820_vm7, %v14249_v3, 0.0  ;;  %vm4848_vm4 = vcmp.eq.s32.totalorder %v14233_v14, 9  ;;  %v4692_v62 = vsel %vm4672_vm14, %v14250_v18, 0.0  ;;  %vm4700_vm12 = vcmp.eq.s32.totalorder %v14232_v56, 9  ;;  %v14258_v59 = vld [vmem:[#allocation63_spill] sm:$0xff]  ;;  %v14263_v56 = vld [vmem:[#allocation122_spill] sm:$0xff] }
0x1031   :  { %8159 = vmatprep.subr.bf16.mxu1 %v14251_v54  ;;  %8815 = vrot.lane.b32.xlu1 %v14252_v13, %s9090_s21  ;;  %v4790_v44 = vsel %vm4770_vm3, %v14253_v34, 0.0  ;;  %v4814_v21 = vsel %vm4794_vm1, %v14254_v1, 0.0  ;;  %v4817_v31 = vadd.f32 %v4813_v37, %v4789_v63  ;;  %vm4821_vm10 = vcmp.eq.s32.totalorder %v12663_v0, 8  ;;  %v14259_v37 = vld [vmem:[#allocation81_spill] sm:$0xff]  ;;  %v14261_v57 = vld [vmem:[#allocation259_spill] sm:$0xff]  ;;  %v14264_v13 = vld [vmem:[#allocation236_spill] sm:$0xff]  ;;  %v4885_v34 = vpop.permute.xlu0 %4884 }
0x1032   :  { %8819 = vset.pattern.permute.xlu1 %v9139_v61  ;;  %v4696_v5 = vadd.f32 %v4692_v62, %v4668_v33  ;;  %v4670_v17 = vadd.f32 %v4666_v11, %v4642_v52  ;;  %vm4674_vm13 = vcmp.eq.s32.totalorder %v12672_v8, 8  ;;  %v4693_v16 = vsel %vm4673_vm8, %v14255_v20, 0.0  ;;  %v14262_v3 = vld [vmem:[#allocation191_spill] sm:$0xff]  ;;  %v14268_v20 = vld [vmem:[#allocation193_spill] sm:$0xff] }
0x1033   :  { %v4844_v38 = vadd.f32 %v4840_v32, %v4816_v51  ;;  %v4697_v42 = vadd.f32 %v4693_v16, %v4669_v60  ;;  %vm4701_vm11 = vcmp.eq.s32.totalorder %v12648_v50, 9  ;;  %v8166_v48 = vpack.c.bf16 %v8536_v2, %v8535_v43 }
0x1034   :  { %8161 = vmatpush3.bf16.msra.mxu1 %v14251_v54  ;;  %v4868_v39 = vsel %vm4848_vm4, %v14256_v23, 0.0  ;;  %v4818_v33 = vadd.f32 %v4814_v21, %v4790_v44  ;;  %vm4822_vm6 = vcmp.eq.s32.totalorder %v12683_v25, 8  ;;  %v4841_v63 = vsel %vm4821_vm10, %v14257_v29, 0.0  ;;  %v14266_v21 = vld [vmem:[#allocation98_spill] sm:$0xff] }
0x1035   :  { %8163 = vmatprep.subr.bf16.mxu1 %v8162_v10  ;;  %5602 = vperm.xlu1 %8819, %v14258_v59   ;;  %v12755_v51 = vpop.permute.xlu1 %5898  ;;  %v4720_v55 = vsel %vm4700_vm12, %v14259_v37, 0.0  ;;  %v4694_v2 = vsel %vm4674_vm13, %v14260_v58, 0.0  ;;  %v4845_v43 = vadd.f32 %v4841_v63, %v4817_v31  ;;  %vm4849_vm5 = vcmp.eq.s32.totalorder %v12663_v0, 9 }
0x1036   :  { %v4724_v14 = vadd.f32 %v4720_v55, %v4696_v5  ;;  %v4698_v52 = vadd.f32 %v4694_v2, %v4670_v17  ;;  %vm4702_vm0 = vcmp.eq.s32.totalorder %v12672_v8, 9  ;;  %v4721_v11 = vsel %vm4701_vm11, %v14261_v57, 0.0  ;;  %v14265_v8 = vld [vmem:[#allocation192_spill] sm:$0xff]  ;;  %v14270_v57 = vld [vmem:[#allocation257_spill] sm:$0xff] }
0x1037   :  { %v4872_v60 = vadd.f32 %v4868_v39, %v4844_v38  ;;  %v4842_v32 = vsel %vm4822_vm6, %v14262_v3, 0.0  ;;  %v4725_v18 = vadd.f32 %v4721_v11, %v4697_v42  ;;  %vm4850_vm15 = vcmp.eq.s32.totalorder %v12683_v25, 9 }
0x1038   :  { %8165 = vmatpush3.bf16.msra.mxu1 %v8162_v10  ;;  %v4748_v62 = vmul.f32 %v14263_v56, %v4724_v14  ;;  %v4846_v54 = vadd.f32 %v4842_v32, %v4818_v33  ;;  %v4869_v0 = vsel %vm4849_vm5, %v14264_v13, 0.0  ;;  %v4722_v44 = vsel %vm4702_vm0, %v14265_v8, 0.0  ;;  %v14267_v10 = vld [vmem:[#allocation92_spill] sm:$0xff] }
0x1039   :  { %8167 = vmatprep.subr.bf16.mxu1 %v8166_v48  ;;  %8822 = vset.pattern.permute.xlu1 %v13998_v24  ;;  %v4873_v50 = vadd.f32 %v4869_v0, %v4845_v43  ;;  %v4749_v1 = vmul.f32 %v12652_v41, %v4725_v18  ;;  %v4892_v5 = vmul.f32 %v14267_v10, %v4872_v60  ;;  %v4870_v25 = vsel %vm4850_vm15, %v14268_v20, 0.0  ;;  %v14269_v41 = vld [vmem:[#allocation105_spill] sm:$0xff]  ;;  %v14271_v60 = vld [vmem:[#allocation66_spill] sm:$0xff] }
0x103a   :  { %5975 = vperm.xlu1 %8822, %v14266_v21   ;;  %v12774_v31 = vpop.permute.xlu1 %5915  ;;  %v4726_v17 = vadd.f32 %v4722_v44, %v4698_v52  ;;  %v4874_v42 = vadd.f32 %v4870_v25, %v4846_v54  ;;  %v9141_v2 = vmov 13   ;;  %v14273_v54 = vld [vmem:[#allocation53_spill] sm:$0xff]  ;;  %v13537_v8 = vmov 44  }
0x103b   :  { %v4893_v16 = vmul.f32 %v4885_v34, %v4873_v50  ;;  %v4896_v38 = vadd.f32 %v4892_v5, %v4748_v62  ;;  %v14274_v50 = vld [vmem:[#allocation139_spill] sm:$0xff]  ;;  %v12848_v5 = vsub.s32 %v13900_v28, %v12755_v51  ;;  %v14276_v25 = vld [vmem:[#allocation61_spill] sm:$0xff] }
0x103c   :  { %8169 = vmatpush3.bf16.msra.mxu1 %v8166_v48  ;;  %v4750_v23 = vmul.f32 %v12396_v35, %v4726_v17  ;;  %v4894_v29 = vmul.f32 %v14269_v41, %v4874_v42  ;;  %v13539_v35 = vmov 12   ;;  %v14277_v41 = vld [vmem:[#allocation52_spill] sm:$0xff] }
0x103d   :  { %v4897_v39 = vadd.f32 %v4893_v16, %v4749_v1  ;;  %vm5911_vm2 = vcmp.eq.s32.totalorder %v12848_v5, 0  ;;  %vm5935_vm9 = vcmp.eq.s32.totalorder %v12848_v5, 1  ;;  %vm5963_vm7 = vcmp.eq.s32.totalorder %v12848_v5, 4 }
0x103e   :  { %8823 = vset.pattern.permute.xlu1 %v14088_v40  ;;  %v12780_v33 = vpop.permute.xlu1 %5939  ;;  %v4898_v63 = vadd.f32 %v4894_v29, %v4750_v23 }
0x103f   :  { %7829 = vmatmul.mubr.f32.vlgmr.msra.gmra.mrb[44].mxu1 %v4896_v38  ;;  %6119 = vperm.xlu1 %8823, %v14266_v21  }
0x1040   :  { %7831 = vmatprep.mubr.f32.mxu1 %v4897_v39 }
0x1043   :  { %7832 = vmatmul.mubr.f32.gmra.mrb[46].mxu1 %v4898_v63  ;;  %6123 = vperm.xlu1 %8823, %v14149_v45   ;;  %v12785_v48 = vpop.permute.xlu1 %6083 }
0x1044   :  { %v5589_v59 = vpop.xlane.xlu0 %5588 }
0x1045   :  { %9022 = vrcp.f32 %v5589_v59 }
0x1046   :  { %9024 = vrcp.f32 %v12460_v36 }
0x1047   :  { %8824 = vset.pattern.permute.xlu1 %v13539_v35  ;;  %v12788_v37 = vpop.permute.xlu1 %4442 }
0x1048   :  { %5619 = vperm.xlu1 %8824, %v13977_v30   ;;  %v4343_v55 = vpop.permute.xlu0 %4342 }
0x1049   :  { %7766 = vmatprep.subr.mxu0 %v4343_v55 }
0x104a   :  { %7767 = vmatpush3.msra.mxu0 %v4343_v55 }
0x104b   :  { %7774 = vmatprep.subr.mxu0 %v12788_v37  ;;  %v5944_v58 = vpop.permute.xlu1 %5943 }
0x104c   :  { %8825 = vset.pattern.permute.xlu1 %v9141_v2  ;;  %v5955_v51 = vsel %vm5935_vm9, %v5944_v58, 0.0 }
0x104d   :  { %5767 = vperm.xlu1 %8825, %v13977_v30   ;;  %v14272_v30 = vld [vmem:[#allocation54_spill] sm:$0xff] }
0x104f   :  { %v9023_v43 = vpop.eup %9022 }
0x1050   :  { %v12794_v14 = vpop.permute.xlu0 %6042  ;;  %v12796_v52 = vpop.permute.xlu1 %6063  ;;  %v12799_v11 = vmul.f32 %v9023_v43, %v14270_v57 }
0x1051   :  { %5791 = vperm.xlu1 %8825, %v14271_v60  }
0x1052   :  { %6175 = vperm.xlu0 %8844, %v12799_v11  }
0x1055   :  { %8827 = vset.pattern.permute.xlu1 %v14088_v40 }
0x1056   :  { %v12804_v3 = vpop.permute.xlu0 %6019  ;;  %6147 = vperm.xlu1 %8827, %v14154_v7   ;;  %v12807_v32 = vpop.permute.xlu1 %5967  ;;  %8845 = vset.pattern.permute.xlu0 %v9141_v2 }
0x1057   :  { %5771 = vperm.xlu0 %8845, %v14272_v30  }
0x105a   :  { %v12811_v18 = vpop.permute.xlu0 %6023  ;;  %8828 = vset.pattern.permute.xlu1 %v9139_v61 }
0x105b   :  { %5605 = vperm.xlu1 %8828, %v14072_v53   ;;  %v12815_v56 = vpop.permute.xlu1 %6111  ;;  %5799 = vperm.xlu0 %8845, %v14170_v47  }
0x105e   :  { %v12818_v40 = vpop.permute.xlu0 %8782 }
0x105f   :  { %8829 = vset.pattern.permute.xlu1 %v13539_v35  ;;  %v12821_v62 = vpop.permute.xlu1 %6115  ;;  %5851 = vperm.xlu0 %8845, %v14273_v54  }
0x1060   :  { %5647 = vperm.xlu1 %8829, %v14005_v19  }
0x1062   :  { %v12825_v13 = vpop.permute.xlu0 %8792 }
0x1063   :  { %5827 = vperm.xlu0 %8845, %v14266_v21  }
0x1064   :  { %8830 = vset.pattern.permute.xlu1 %v14209_v22  ;;  %v12829_v0 = vpop.permute.xlu1 %5995 }
0x1065   :  { %5753 = vperm.xlu1 %8830, %v14072_v53  }
0x1066   :  { %v5902_v34 = vpop.permute.xlu0 %5901 }
0x1067   :  { %8854 = vset.pattern.permute.xlu0 %v13537_v8  ;;  %v12863_v38 = vsub.s32 %v13900_v28, %v5902_v34 }
0x1068   :  { %v12833_v44 = vpop.permute.xlu1 %5999  ;;  %5724 = vperm.xlu0 %8854, %v14274_v50  }
0x1069   :  { %8831 = vset.pattern.permute.xlu1 %v9141_v2  ;;  %vm5912_vm14 = vcmp.eq.s32.totalorder %v12863_v38, 0  ;;  %vm5992_vm8 = vcmp.eq.s32.totalorder %v12863_v38, 5  ;;  %vm5936_vm4 = vcmp.eq.s32.totalorder %v12863_v38, 1  ;;  %vm5964_vm10 = vcmp.eq.s32.totalorder %v12863_v38, 4 }
0x106a   :  { %v5905_v1 = vpop.permute.xlu0 %5904  ;;  %5795 = vperm.xlu1 %8831, %v14005_v19   ;;  %v14275_v19 = vld [vmem:[#allocation15_spill] sm:$0xff] }
0x106b   :  { %v12873_v63 = vsub.s32 %v13900_v28, %v5905_v1  ;;  %v14278_v1 = vld [vmem:[#allocation76_spill] sm:$0xff] }
0x106c   :  { %8855 = vset.pattern.permute.xlu0 %v13539_v35 }
0x106d   :  { %v12839_v10 = vpop.permute.xlu1 %6143  ;;  %5643 = vperm.xlu0 %8855, %v14271_v60   ;;  %vm5913_vm3 = vcmp.eq.s32.totalorder %v12873_v63, 0  ;;  %vm5965_vm1 = vcmp.eq.s32.totalorder %v12873_v63, 4  ;;  %vm5937_vm12 = vcmp.eq.s32.totalorder %v12873_v63, 1 }
0x106e   :  { %8832 = vset.pattern.permute.xlu1 %v13998_v24 }
0x106f   :  { %v12843_v53 = vpop.permute.xlu0 %5750  ;;  %6007 = vperm.xlu1 %8832, %v14208_v46  }
0x1071   :  { %5623 = vperm.xlu0 %8855, %v14272_v30  }
0x1072   :  { %v12851_v17 = vpop.permute.xlu1 %6163 }
0x1073   :  { %8834 = vrot.lane.b32.xlu1 %v14275_v19, %s9090_s21  ;;  %v9025_v19 = vpop.eup %9024 }
0x1074   :  { %v5920_v20 = vpop.permute.xlu0 %5919  ;;  %8838 = vset.pattern.permute.xlu1 %v9139_v61 }
0x1075   :  { %v5931_v24 = vsel %vm5911_vm2, %v5920_v20, 0.0  ;;  %5671 = vperm.xlu0 %8855, %v14276_v25  }
0x1076   :  { %v12859_v16 = vpop.permute.xlu1 %5433  ;;  %v5959_v42 = vadd.f32 %v5955_v51, %v5931_v24  ;;  %v14279_v24 = vld [vmem:[#allocation20_spill] sm:$0xff]  ;;  %v14281_v51 = vld [vmem:[#allocation165_spill] sm:$0xff] }
0x1077   :  { %5608 = vperm.xlu1 %8838, %v14085_v9  }
0x1078   :  { %v5972_v23 = vpop.permute.xlu0 %5971 }
0x1079   :  { %v5983_v39 = vsel %vm5963_vm7, %v5972_v23, 0.0  ;;  %5675 = vperm.xlu0 %8855, %v14277_v41  }
0x107a   :  { %v12867_v61 = vadd.f32 %v5983_v39, %v5959_v42  ;;  %v12869_v29 = vpop.permute.xlu1 %6167  ;;  %v12904_v42 = vmul.f32 %v9025_v19, %v14281_v51 }
0x107b   :  { %8839 = vset.pattern.permute.xlu1 %v14209_v22 }
0x107c   :  { %v5924_v59 = vpop.permute.xlu0 %5923  ;;  %5756 = vperm.xlu1 %8839, %v14085_v9  }
0x107d   :  { %v5932_v55 = vsel %vm5912_vm14, %v5924_v59, 0.0  ;;  %5651 = vperm.xlu0 %8855, %v14170_v47  }
0x107e   :  { %v12878_v58 = vpop.permute.xlu1 %8787 }
0x1080   :  { %v5928_v43 = vpop.permute.xlu0 %5927  ;;  %8840 = vset.pattern.permute.xlu1 %v9141_v2 }
0x1081   :  { %v5933_v57 = vsel %vm5913_vm3, %v5928_v43, 0.0  ;;  %5819 = vperm.xlu1 %8840, %v14276_v25   ;;  %5703 = vperm.xlu0 %8855, %v14273_v54   ;;  %v13540_v54 = vmov 45   ;;  %v14280_v25 = vmov 46  }
0x1082   :  { %v12884_v22 = vpop.permute.xlu1 %8797 }
0x1084   :  { %v5980_v9 = vpop.permute.xlu0 %5979 }
0x1085   :  { %v5985_v47 = vsel %vm5965_vm1, %v5980_v9, 0.0  ;;  %5823 = vperm.xlu1 %8840, %v14277_v41   ;;  %5707 = vperm.xlu0 %8855, %v14154_v7  }
0x1086   :  { %v12890_v60 = vpop.permute.xlu1 %6045 }
0x1088   :  { %v6004_v30 = vpop.permute.xlu0 %6003 }
0x1089   :  { %v6012_v34 = vsel %vm5992_vm8, %v6004_v30, 0.0  ;;  %8841 = vset.pattern.permute.xlu1 %v13539_v35  ;;  %8860 = vset.pattern.permute.xlu0 %v13540_v54 }
0x108a   :  { %5627 = vperm.xlu1 %8841, %v14183_v12   ;;  %v12896_v36 = vpop.permute.xlu1 %8804  ;;  %5875 = vperm.xlu0 %8860, %v14278_v1  }
0x108d   :  { %v12927_v43 = vpop.permute.xlu0 %6059 }
0x108e   :  { %5699 = vperm.xlu1 %8841, %v14062_v49   ;;  %v6049_v20 = vpop.permute.xlu1 %6048  ;;  %8864 = vrot.lane.b32.xlu0 %v14279_v24, %s9090_s21 }
0x108f   :  { %8868 = vset.pattern.permute.xlu0 %v14280_v25 }
0x1091   :  { %v12932_v24 = vpop.permute.xlu0 %6087 }
0x1092   :  { %8842 = vset.pattern.permute.xlu1 %v9141_v2  ;;  %6027 = vperm.xlu0 %8868, %v12904_v42  }
0x1093   :  { %5775 = vperm.xlu1 %8842, %v14183_v12   ;;  %v5948_v23 = vpop.permute.xlu1 %5947 }
0x1094   :  { %v5956_v39 = vsel %vm5936_vm4, %v5948_v23, 0.0 }
0x1095   :  { %v5960_v41 = vadd.f32 %v5956_v39, %v5932_v55  ;;  %v9056_v55 = vld [vmem:[%s13330_s4 + $0x50] sm:$0xff]  ;;  %v12938_v23 = vpop.permute.xlu0 %6139 }
0x1096   :  { %8871 = vset.pattern.permute.xlu0 %v13540_v54 }
0x1097   :  { %5847 = vperm.xlu1 %8842, %v14062_v49   ;;  %5879 = vperm.xlu0 %8871, %v12904_v42  }
0x1098   :  { %v12913_v59 = vpop.permute.xlu1 %6067 }
0x109b   :  { %8843 = vset.pattern.permute.xlu1 %v14280_v25  ;;  %5883 = vperm.xlu0 %8871, %v12799_v11  }
0x109c   :  { %6031 = vperm.xlu1 %8843, %v12799_v11  }
0x109d   :  { %v12918_v12 = vpop.permute.xlu1 %5599 }
0x109f   :  { %6428 = vrot.lane.b32.xlu0 %v9056_v55, %s9135_s10  ;;  %v14283_v55 = vld [vmem:[#allocation17_spill] sm:$0xff] }
0x10a0   :  { %8846 = vset.pattern.permute.xlu1 %v13539_v35  ;;  %8897 = vset.pattern.permute.xlu0 %v14225_v26 }
0x10a1   :  { %5631 = vperm.xlu1 %8846, %v14140_v15  }
0x10a2   :  { %v5748_v49 = vpop.permute.xlu1 %5747 }
0x10a5   :  { %5655 = vperm.xlu1 %8846, %v14195_v4  }
0x10a7   :  { %v5952_v9 = vpop.permute.xlu1 %5951 }
0x10a8   :  { %v5957_v30 = vsel %vm5937_vm12, %v5952_v9, 0.0  ;;  %v6092_v9 = vpop.permute.xlu0 %6091 }
0x10a9   :  { %v5961_v19 = vadd.f32 %v5957_v30, %v5933_v57  ;;  %8847 = vset.pattern.permute.xlu1 %v9141_v2 }
0x10aa   :  { %5779 = vperm.xlu1 %8847, %v14140_v15  }
0x10ab   :  { %v12935_v25 = vadd.f32 %v5985_v47, %v5961_v19  ;;  %v6053_v47 = vsub.s32 %v13900_v28, %v6049_v20 }
0x10ac   :  { %v6072_v51 = vpop.permute.xlu1 %6071  ;;  %v6096_v19 = vpop.permute.xlu0 %6095 }
0x10ad   :  { %vm6057_vm13 = vcmp.eq.s32.totalorder %v6053_v47, 0  ;;  %vm6081_vm11 = vcmp.eq.s32.totalorder %v6053_v47, 1  ;;  %vm6109_vm6 = vcmp.eq.s32.totalorder %v6053_v47, 4  ;;  %vm6137_vm5 = vcmp.eq.s32.totalorder %v6053_v47, 5 }
0x10ae   :  { %5803 = vperm.xlu1 %8847, %v14195_v4   ;;  %v12973_v47 = vsub.s32 %v13900_v28, %v12843_v53 }
0x10b0   :  { %v12940_v39 = vpop.permute.xlu1 %8815  ;;  %v6152_v38 = vpop.permute.xlu0 %6151  ;;  %vm5763_vm3 = vcmp.eq.s32.totalorder %v12973_v47, 0  ;;  %vm5843_vm1 = vcmp.eq.s32.totalorder %v12973_v47, 9  ;;  %vm5787_vm12 = vcmp.eq.s32.totalorder %v12973_v47, 1 }
0x10b1   :  { %14282 = vst [vmem:[#allocation64_spill] sm:$0xff] %v12940_v39  ;;  %v14284_v39 = vmov 45  }
0x10b2   :  { %8849 = vrot.lane.b32.xlu1 %v14283_v55, %s9090_s21 }
0x10b3   :  { %8853 = vset.pattern.permute.xlu1 %v13539_v35  ;;  %v6077_v35 = vsel %vm6057_vm13, %v6072_v51, 0.0  ;;  %v14285_v51 = vmov 44  }
0x10b4   :  { %v12945_v57 = vpop.permute.xlu1 %5602 }
0x10b6   :  { %5679 = vperm.xlu1 %8853, %v14266_v21   ;;  %v6101_v21 = vsel %vm6081_vm11, %v6096_v19, 0.0  ;;  %vm5993_vm11 = vcmp.eq.s32.totalorder %v12873_v63, 5 }
0x10b7   :  { %v6105_v54 = vadd.f32 %v6101_v21, %v6077_v35  ;;  %v12964_v35 = vsub.s32 %v13900_v28, %v5748_v49 }
0x10b9   :  { %v5976_v15 = vpop.permute.xlu1 %5975  ;;  %vm5762_vm2 = vcmp.eq.s32.totalorder %v12964_v35, 0  ;;  %vm5786_vm9 = vcmp.eq.s32.totalorder %v12964_v35, 1 }
0x10ba   :  { %v5984_v4 = vsel %vm5964_vm10, %v5976_v15, 0.0  ;;  %5683 = vperm.xlu1 %8853, %v14149_v45   ;;  %vm14287_vm10 = vcmask 64512  }
0x10bb   :  { %v5988_v30 = vadd.f32 %v5984_v4, %v5960_v41  ;;  %vm14289_vm13 = vmmov %vm14287_vm10 }
0x10bd   :  { %v12951_v8 = vadd.f32 %v6012_v34, %v5988_v30  ;;  %v6157_v34 = vsel %vm6137_vm5, %v6152_v38, 0.0 }
0x10be   :  { %8856 = vset.pattern.permute.xlu1 %v9141_v2  ;;  %v6120_v55 = vpop.permute.xlu1 %6119 }
0x10bf   :  { %5831 = vperm.xlu1 %8856, %v14149_v45   ;;  %v6052_v45 = vsub.s32 %v13900_v28, %v12890_v60 }
0x10c1   :  { %vm6056_vm0 = vcmp.eq.s32.totalorder %v6052_v45, 0  ;;  %vm6080_vm15 = vcmp.eq.s32.totalorder %v6052_v45, 1  ;;  %vm6108_vm7 = vcmp.eq.s32.totalorder %v6052_v45, 4  ;;  %vm6136_vm14 = vcmp.eq.s32.totalorder %v6052_v45, 5 }
0x10c2   :  { %v6124_v20 = vpop.permute.xlu1 %6123  ;;  %v6128_v21 = vsel %vm6108_vm7, %v6120_v55, 0.0 }
0x10c3   :  { %v6129_v15 = vsel %vm6109_vm6, %v6124_v20, 0.0  ;;  %8857 = vset.pattern.permute.xlu1 %v14284_v39  ;;  %vm14290_vm6 = vmmov %vm14287_vm10 }
0x10c4   :  { %v6133_v41 = vadd.f32 %v6129_v15, %v6105_v54  ;;  %5871 = vperm.xlu1 %8857, %v14274_v50   ;;  %v6076_v50 = vsel %vm6056_vm0, %v12913_v59, 0.0  ;;  %v6100_v54 = vsel %vm6080_vm15, %v6092_v9, 0.0  ;;  %v14286_v59 = vmov 12   ;;  %vm14291_vm0 = vmmov %vm14290_vm6 }
0x10c5   :  { %v6104_v9 = vadd.f32 %v6100_v54, %v6076_v50 }
0x10c6   :  { %v6161_v4 = vadd.f32 %v6157_v34, %v6133_v41 }
0x10c7   :  { %v12957_v30 = vpop.permute.xlu1 %5619  ;;  %v6132_v20 = vadd.f32 %v6128_v21, %v6104_v9  ;;  %v5611_v9 = vsub.s32 %v13900_v28, %v12945_v57 }
0x10c8   :  { %8858 = vset.pattern.permute.xlu1 %v14285_v51 }
0x10c9   :  { %5729 = vperm.xlu1 %8858, %v14278_v1   ;;  %vm5639_vm5 = vcmp.eq.s32.totalorder %v5611_v9, 1  ;;  %vm5615_vm15 = vcmp.eq.s32.totalorder %v5611_v9, 0 }
0x10cc   :  { %v5768_v19 = vpop.permute.xlu1 %5767 }
0x10cd   :  { %8859 = vset.pattern.permute.xlu1 %v9141_v2  ;;  %v5782_v60 = vsel %vm5762_vm2, %v5768_v19, 0.0  ;;  %vm5667_vm2 = vcmp.eq.s32.totalorder %v5611_v9, 8 }
0x10ce   :  { %5855 = vperm.xlu1 %8859, %v14154_v7  }
0x10d0   :  { %v5792_v1 = vpop.permute.xlu1 %5791 }
0x10d1   :  { %v5806_v39 = vsel %vm5786_vm9, %v5792_v1, 0.0  ;;  %v6176_v49 = vpop.permute.xlu0 %6175  ;;  %vm14292_vm9 = vmmov %vm14291_vm0 }
0x10d2   :  { %v12975_v7 = vadd.f32 %v5806_v39, %v5782_v60  ;;  %v12977_v38 = vmul.f32 %v6176_v49, %v6161_v4  ;;  %8861 = vset.pattern.permute.xlu1 %v14286_v59 }
0x10d3   :  { %5711 = vperm.xlu1 %8861, %v14208_v46  }
0x10d5   :  { %v6148_v15 = vpop.permute.xlu1 %6147 }
0x10d6   :  { %v6156_v41 = vsel %vm6136_vm14, %v6148_v15, 0.0  ;;  %v5772_v34 = vpop.permute.xlu0 %5771  ;;  %vm14293_vm14 = vmmov %vm14291_vm0 }
0x10d7   :  { %v12982_v19 = vadd.f32 %v6156_v41, %v6132_v20  ;;  %v5783_v53 = vsel %vm5763_vm3, %v5772_v34, 0.0  ;;  %8862 = vset.pattern.permute.xlu1 %v9141_v2  ;;  %vm14294_vm3 = vmmov %vm14291_vm0 }
0x10d8   :  { %5859 = vperm.xlu1 %8862, %v14208_v46  }
0x10da   :  { %v5606_v55 = vpop.permute.xlu1 %5605  ;;  %v5800_v4 = vpop.permute.xlu0 %5799 }
0x10dc   :  { %8869 = vset.pattern.permute.xlu1 %v14225_v26 }
0x10dd   :  { %6171 = vperm.xlu1 %8869, %v12904_v42  }
0x10de   :  { %v5852_v45 = vpop.permute.xlu0 %5851 }
0x10df   :  { %v12989_v50 = vsel %vm5843_vm1, %v5852_v45, 0.0  ;;  %v5648_v54 = vpop.permute.xlu1 %5647  ;;  %vm5814_vm1 = vcmp.eq.s32.totalorder %v12964_v35, 8 }
0x10e0   :  { %v5659_v45 = vsel %vm5639_vm5, %v5648_v54, 0.0 }
0x10e1   :  { %8870 = vset.pattern.permute.xlu1 %v14285_v51 }
0x10e2   :  { %5739 = vperm.xlu1 %8870, %v12799_v11   ;;  %v5828_v1 = vpop.permute.xlu0 %5827 }
0x10e4   :  { %v5754_v2 = vpop.permute.xlu1 %5753 }
0x10e5   :  { %v12994_v46 = vsub.s32 %v13900_v28, %v5754_v2 }
0x10e6   :  { %5734 = vperm.xlu1 %8870, %v12904_v42   ;;  %v14288_v42 = vld [vmem:[#allocation22_spill] sm:$0xff] }
0x10e7   :  { %v12997_v26 = vpop.permute.xlu0 %5724  ;;  %v7762_v60 = vpop.f32.mrb[40].mxu1  ;;  %vm5788_vm8 = vcmp.eq.s32.totalorder %v12994_v46, 1  ;;  %vm5816_vm4 = vcmp.eq.s32.totalorder %v12994_v46, 8 }
0x10e8   :  { %v4323_v39 = vpop.f32.mrb[41].mxu1  ;;  %v13001_v49 = vsel %vm5788_vm8, %v5800_v4, 0.0  ;;  %v13003_v51 = vsel %vm5816_vm4, %v5828_v1, 0.0  ;;  %v9057_v4 = vld [vmem:[%s13333_s7 + $0x1] ss:$0 sm:$0xff]  ;;  %vm5695_vm8 = vcmp.eq.s32.totalorder %v5611_v9, 9  ;;  %vm14295_vm4 = vmmov %vm14291_vm0 }
0x10e9   :  { %v5796_v11 = vpop.permute.xlu1 %5795  ;;  %7768 = vmatprep.mubr.msk.f32.mxu0 %vm14287_vm10, %v4323_v39  ;;  %vm5815_vm10 = vcmp.eq.s32.totalorder %v12973_v47, 8 }
0x10ea   :  { %v5807_v21 = vsel %vm5787_vm12, %v5796_v11, 0.0  ;;  %8873 = vrot.lane.b32.xlu1 %v14288_v42, %s9090_s21  ;;  %7769 = vmatmul.mubr.msk.f32.vlgmr.msra.gmra.mrb[36].mxu0 %vm14289_vm13, %v7762_v60  ;;  %v13035_v11 = vsub.s32 %v13900_v28, %v5606_v55  ;;  %v8784_v42 = vunpack.i.l.bf16 %v12818_v40 }
0x10eb   :  { %v13010_v59 = vadd.f32 %v5807_v21, %v5783_v53  ;;  %7775 = vmatpush3.msra.mxu0 %v12788_v37 }
0x10ec   :  { %7834 = vmatprep.subr.mxu0 %v12859_v16  ;;  %v13016_v20 = vpop.permute.xlu0 %5643  ;;  %vm5640_vm7 = vcmp.eq.s32.totalorder %v13035_v11, 1  ;;  %vm5696_vm13 = vcmp.eq.s32.totalorder %v13035_v11, 9 }
0x10ed   :  { %v7765_v15 = vpop.f32.mrb[42].mxu1 }
0x10ee   :  { %v4333_v41 = vpop.f32.mrb[43].mxu1  ;;  %v6008_v34 = vpop.permute.xlu1 %6007  ;;  %6532 = vrot.lane.b32.xlu1 %v9057_v4, %s9135_s10 }
0x10ef   :  { %v6013_v53 = vsel %vm5993_vm11, %v6008_v34, 0.0  ;;  %7771 = vmatprep.mubr.msk.f32.mxu0 %vm14290_vm6, %v4333_v41 }
0x10f0   :  { %v13025_v37 = vadd.f32 %v6013_v53, %v12935_v25  ;;  %7772 = vmatmul.mubr.msk.f32.gmra.mrb[38].mxu0 %vm14291_vm0, %v7765_v15  ;;  %v5624_v57 = vpop.permute.xlu0 %5623  ;;  %v8785_v25 = vunpack.i.h.bf16 %v12818_v40 }
0x10f1   :  { %v5635_v63 = vsel %vm5615_vm15, %v5624_v57, 0.0 }
0x10f2   :  { %v5663_v1 = vadd.f32 %v5659_v45, %v5635_v63  ;;  %v13028_v2 = vpop.permute.xlu1 %8834  ;;  %v13044_v55 = vpack.c.bf16 %v8785_v25, %v8784_v42  ;;  %v13050_v63 = vsub.s32 %v13900_v28, %v12691_v27  ;;  %v13059_v42 = vsub.s32 %v13900_v28, %v12794_v14 }
0x10f4   :  { %v13030_v60 = vpop.permute.xlu0 %5671  ;;  %vm5910_vm12 = vcmp.eq.s32.totalorder %v13050_v63, 0  ;;  %vm5934_vm11 = vcmp.eq.s32.totalorder %v13050_v63, 1  ;;  %vm5962_vm6 = vcmp.eq.s32.totalorder %v13050_v63, 4  ;;  %vm6055_vm0 = vcmp.eq.s32.totalorder %v13059_v42, 0 }
0x10f5   :  { %vm5990_vm15 = vcmp.eq.s32.totalorder %v13050_v63, 5 }
0x10f6   :  { %v13032_v39 = vpop.permute.xlu1 %5608 }
0x10f8   :  { %v5676_v21 = vpop.permute.xlu0 %5675 }
0x10f9   :  { %v5687_v15 = vsel %vm5667_vm2, %v5676_v21, 0.0 }
0x10fa   :  { %v5691_v41 = vadd.f32 %v5687_v15, %v5663_v1  ;;  %v7710_v54 = vpop.f32.mrb[32].mxu0 }
0x10fb   :  { %v3412_v34 = vpop.f32.mrb[33].mxu0  ;;  %v13039_v4 = vpop.permute.xlu1 %5756 }
0x10fc   :  { %7776 = vmatprep.mubr.msk.f32.mxu0 %vm14292_vm9, %v3412_v34  ;;  %v5652_v53 = vpop.permute.xlu0 %5651  ;;  %v5610_v34 = vsub.s32 %v13900_v28, %v12918_v12 }
0x10fd   :  { %v5660_v57 = vsel %vm5640_vm7, %v5652_v53, 0.0  ;;  %7777 = vmatmul.mubr.msk.f32.vlgmr.msra.gmra.mrb[36].mxu0 %vm14293_vm14, %v7710_v54  ;;  %vm6079_vm7 = vcmp.eq.s32.totalorder %v13059_v42, 1 }
0x10fe   :  { %7835 = vmatpush3.msra.mxu0 %v12859_v16  ;;  %v7713_v45 = vpop.f32.mrb[34].mxu0  ;;  %v6050_v16 = vsub.s32 %v13900_v28, %v12724_v6  ;;  %vm5638_vm14 = vcmp.eq.s32.totalorder %v5610_v34, 1 }
0x10ff   :  { %8171 = vmatprep.subr.bf16.mxu0 %v13044_v55  ;;  %v3422_v40 = vpop.f32.mrb[35].mxu0 }
0x1100   :  { %7779 = vmatprep.mubr.msk.f32.mxu0 %vm14294_vm3, %v3422_v40  ;;  %v5820_v1 = vpop.permute.xlu1 %5819  ;;  %v5704_v21 = vpop.permute.xlu0 %5703  ;;  %vm6078_vm5 = vcmp.eq.s32.totalorder %v6050_v16, 1  ;;  %vm6054_vm2 = vcmp.eq.s32.totalorder %v6050_v16, 0  ;;  %vm6106_vm9 = vcmp.eq.s32.totalorder %v6050_v16, 4  ;;  %vm5614_vm3 = vcmp.eq.s32.totalorder %v5610_v34, 0 }
0x1101   :  { %v5834_v15 = vsel %vm5814_vm1, %v5820_v1, 0.0  ;;  %v5715_v25 = vsel %vm5695_vm8, %v5704_v21, 0.0  ;;  %7780 = vmatmul.mubr.msk.f32.gmra.mrb[38].mxu0 %vm14295_vm4, %v7713_v45  ;;  %v6074_v47 = vsel %vm6054_vm2, %v12927_v43, 0.0  ;;  %v5658_v45 = vsel %vm5638_vm14, %v13016_v20, 0.0 }
0x1102   :  { %v13062_v27 = vadd.f32 %v5834_v15, %v12975_v7  ;;  %v13064_v54 = vadd.f32 %v5715_v25, %v5691_v41  ;;  %v6098_v7 = vsel %vm6078_vm5, %v12785_v48, 0.0  ;;  %v6099_v41 = vsel %vm6079_vm7, %v12932_v24, 0.0 }
0x1103   :  { %v6075_v1 = vsel %vm6055_vm0, %v12796_v52, 0.0  ;;  %vm5666_vm1 = vcmp.eq.s32.totalorder %v5610_v34, 8  ;;  %vm5616_vm8 = vcmp.eq.s32.totalorder %v13035_v11, 0  ;;  %v6102_v43 = vadd.f32 %v6098_v7, %v6074_v47 }
0x1104   :  { %v5824_v9 = vpop.permute.xlu1 %5823  ;;  %v5708_v53 = vpop.permute.xlu0 %5707  ;;  %v5634_v21 = vsel %vm5614_vm3, %v12957_v30, 0.0  ;;  %v5686_v15 = vsel %vm5666_vm1, %v13030_v60, 0.0  ;;  %v5954_v24 = vsel %vm5934_vm11, %v12780_v33, 0.0  ;;  %v6103_v20 = vadd.f32 %v6099_v41, %v6075_v1 }
0x1105   :  { %v5835_v6 = vsel %vm5815_vm10, %v5824_v9, 0.0  ;;  %v13073_v14 = vsel %vm5696_vm13, %v5708_v53, 0.0  ;;  %v5930_v52 = vsel %vm5910_vm12, %v12774_v31, 0.0  ;;  %v5982_v9 = vsel %vm5962_vm6, %v12807_v32, 0.0 }
0x1106   :  { %v5839_v12 = vadd.f32 %v5835_v6, %v13010_v59  ;;  %vm6107_vm4 = vcmp.eq.s32.totalorder %v13059_v42, 4  ;;  %vm6134_vm10 = vcmp.eq.s32.totalorder %v6050_v16, 5  ;;  %v6126_v30 = vsel %vm6106_vm9, %v12815_v56, 0.0 }
0x1107   :  { %v6154_v33 = vsel %vm6134_vm10, %v12938_v23, 0.0  ;;  %vm5694_vm13 = vcmp.eq.s32.totalorder %v5610_v34, 9  ;;  %v5958_v53 = vadd.f32 %v5954_v24, %v5930_v52  ;;  %v6127_v6 = vsel %vm6107_vm4, %v12821_v62, 0.0 }
0x1108   :  { %v13084_v40 = vadd.f32 %v12989_v50, %v5839_v12  ;;  %v5662_v50 = vadd.f32 %v5658_v45, %v5634_v21  ;;  %v6130_v12 = vadd.f32 %v6126_v30, %v6102_v43  ;;  %v6010_v32 = vsel %vm5990_vm15, %v12829_v0, 0.0 }
0x1109   :  { %v5628_v59 = vpop.permute.xlu1 %5627  ;;  %v6131_v47 = vadd.f32 %v6127_v6, %v6103_v20  ;;  %v5986_v41 = vadd.f32 %v5982_v9, %v5958_v53  ;;  %vm6135_vm12 = vcmp.eq.s32.totalorder %v13059_v42, 5  ;;  %v8790_v56 = vunpack.i.h.bf16 %v12878_v58 }
0x110a   :  { %v5636_v48 = vsel %vm5616_vm8, %v5628_v59, 0.0  ;;  %v5690_v60 = vadd.f32 %v5686_v15, %v5662_v50  ;;  %v6158_v45 = vadd.f32 %v6154_v33, %v6130_v12  ;;  %v8789_v23 = vunpack.i.l.bf16 %v12878_v58 }
0x110b   :  { %v13093_v25 = vadd.f32 %v5660_v57, %v5636_v48  ;;  %v6014_v62 = vadd.f32 %v6010_v32, %v5986_v41  ;;  %v6155_v34 = vsel %vm6135_vm12, %v12839_v10, 0.0  ;;  %vm5764_vm11 = vcmp.eq.s32.totalorder %v12994_v46, 0 }
0x110c   :  { %vm5991_vm6 = vcmp.eq.s32.totalorder %v12848_v5, 5  ;;  %v6159_v63 = vadd.f32 %v6155_v34, %v6131_v47  ;;  %v6178_v21 = vmul.f32 %v12851_v17, %v6158_v45  ;;  %vm14296_vm5 = vcmask 64512   ;;  %v5876_v45 = vpop.permute.xlu0 %5875 }
0x110d   :  { %v5700_v57 = vpop.permute.xlu1 %5699  ;;  %v6011_v42 = vsel %vm5991_vm6, %v12833_v44, 0.0  ;;  %v8794_v10 = vunpack.i.l.bf16 %v12825_v13  ;;  %vm14297_vm0 = vmmov %vm14296_vm5  ;;  %v8174_v5 = vpack.c.bf16 %v8790_v56, %v8789_v23  ;;  %v6034_v48 = vmul.f32 %v12804_v3, %v6014_v62 }
0x110e   :  { %v5714_v31 = vsel %vm5694_vm13, %v5700_v57, 0.0  ;;  %v6015_v15 = vadd.f32 %v6011_v42, %v12867_v61  ;;  %vm5842_vm15 = vcmp.eq.s32.totalorder %v12964_v35, 9  ;;  %vm14298_vm2 = vmmov %vm14297_vm0  ;;  %v8799_v35 = vunpack.i.l.bf16 %v12884_v22 }
0x110f   :  { %v5718_v7 = vadd.f32 %v5714_v31, %v5690_v60  ;;  %v6182_v61 = vadd.f32 %v6178_v21, %v6034_v48  ;;  %vm14299_vm9 = vmmov %vm14297_vm0  ;;  %vm14300_vm7 = vcmask 261120   ;;  %v13144_v9 = vsub.s32 %v13900_v28, %v13032_v39  ;;  %v14302_v60 = vld [vmem:[#allocation64_spill] sm:$0xff] }
0x1110   :  { %v6035_v3 = vmul.f32 %v12811_v18, %v6015_v15  ;;  %v8807_v18 = vunpack.i.h.bf16 %v12896_v36  ;;  %v8806_v30 = vunpack.i.l.bf16 %v12896_v36  ;;  %vm14301_vm14 = vmmov %vm14300_vm7  ;;  %v8818_v57 = vunpack.i.h.bf16 %v14302_v60 }
0x1111   :  { %v13113_v16 = vmul.f32 %v12997_v26, %v5718_v7  ;;  %v8795_v26 = vunpack.i.h.bf16 %v12825_v13  ;;  %v8817_v53 = vunpack.i.l.bf16 %v14302_v60  ;;  %vm5617_vm3 = vcmp.eq.s32.totalorder %v13144_v9, 0 }
0x1112   :  { %v7830_v1 = vpop.f32.mrb[44].mxu1  ;;  %v5776_v0 = vpop.permute.xlu1 %5775  ;;  %v8186_v6 = vpack.c.bf16 %v8807_v18, %v8806_v30  ;;  %vm5641_vm1 = vcmp.eq.s32.totalorder %v13144_v9, 1  ;;  %v8836_v31 = vunpack.i.l.bf16 %v13028_v2  ;;  %v5761_v32 = vsub.s32 %v13900_v28, %v13039_v4 }
0x1113   :  { %v5414_v59 = vpop.f32.mrb[45].mxu1  ;;  %v5784_v43 = vsel %vm5764_vm11, %v5776_v0, 0.0  ;;  %v8190_v12 = vpack.c.bf16 %v8818_v57, %v8817_v53  ;;  %vm5668_vm10 = vcmp.eq.s32.totalorder %v13035_v11, 8  ;;  %vm5669_vm13 = vcmp.eq.s32.totalorder %v13144_v9, 8 }
0x1114   :  { %7836 = vmatprep.mubr.msk.f32.mxu0 %vm14296_vm5, %v5414_v59  ;;  %v5812_v58 = vadd.f32 %v13001_v49, %v5784_v43  ;;  %v6179_v49 = vmul.f32 %v12869_v29, %v6159_v63  ;;  %vm5765_vm8 = vcmp.eq.s32.totalorder %v5761_v32, 0  ;;  %vm5789_vm4 = vcmp.eq.s32.totalorder %v5761_v32, 1 }
0x1115   :  { %7837 = vmatmul.mubr.msk.f32.vlgmr.msra.gmra.mrb[36].mxu0 %vm14297_vm0, %v7830_v1  ;;  %v8865_v1 = vpop.permute.xlu0 %8864  ;;  %vm5817_vm12 = vcmp.eq.s32.totalorder %v5761_v32, 8  ;;  %vm5844_vm11 = vcmp.eq.s32.totalorder %v12994_v46, 9  ;;  %vm5697_vm6 = vcmp.eq.s32.totalorder %v13144_v9, 9  ;;  %vm5845_vm5 = vcmp.eq.s32.totalorder %v5761_v32, 9  ;;  %vm14303_vm0 = vmmov %vm14300_vm7 }
0x1116   :  { %8173 = vmatpush3.bf16.msra.mxu0 %v13044_v55  ;;  %v7833_v44 = vpop.f32.mrb[46].mxu1  ;;  %v5848_v17 = vpop.permute.xlu1 %5847  ;;  %v13130_v24 = vadd.f32 %v13003_v51, %v5812_v58  ;;  %v8800_v55 = vunpack.i.h.bf16 %v12884_v22  ;;  %v8178_v51 = vpack.c.bf16 %v8795_v26, %v8794_v10  ;;  %v6183_v29 = vadd.f32 %v6179_v49, %v6035_v3 }
0x1117   :  { %8175 = vmatprep.subr.bf16.mxu0 %v8174_v5  ;;  %v5424_v13 = vpop.f32.mrb[47].mxu1  ;;  %v5862_v20 = vsel %vm5842_vm15, %v5848_v17, 0.0  ;;  %v8867_v63 = vunpack.i.h.bf16 %v8865_v1  ;;  %v8866_v28 = vunpack.i.l.bf16 %v8865_v1  ;;  %vm14304_vm15 = vmmov %vm14303_vm0  ;;  %v14308_v1 = vld [vmem:[#allocation42_spill] sm:$0xff] }
0x1118   :  { %7839 = vmatprep.mubr.msk.f32.mxu0 %vm14298_vm2, %v5424_v13  ;;  %v13135_v50 = vadd.f32 %v5862_v20, %v13062_v27  ;;  %v8182_v22 = vpack.c.bf16 %v8800_v55, %v8799_v35 }
0x1119   :  { %7840 = vmatmul.mubr.msk.f32.gmra.mrb[38].mxu0 %vm14299_vm9, %v7833_v44  ;;  %v8202_v21 = vpack.c.bf16 %v8867_v63, %v8866_v28  ;;  %vm14305_vm9 = vmmov %vm14298_vm2 }
0x111a   :  { %8177 = vmatpush3.bf16.msra.mxu0 %v8174_v5  ;;  %7850 = vmatprep.mubr.msk.f32.mxu0 %vm14300_vm7, %v6182_v61  ;;  %v5887_v61 = vmul.f32 %v5876_v45, %v13084_v40  ;;  %vm14306_vm7 = vmmov %vm14298_vm2 }
0x111b   :  { %8179 = vmatprep.subr.bf16.mxu0 %v8178_v51  ;;  %v6032_v52 = vpop.permute.xlu1 %6031 }
0x111c   :  { %v6037_v27 = vmul.f32 %v6032_v52, %v13025_v37 }
0x111d   :  { %7851 = vmatmul.mubr.msk.f32.vlgmr.msra.gmra.mrb[40].mxu0 %vm14301_vm14, %v6183_v29  ;;  %vm14307_vm14 = vmmov %vm14298_vm2 }
0x111e   :  { %v13151_v33 = vadd.f32 %v12977_v38, %v6037_v27  ;;  %8181 = vmatpush3.bf16.msra.mxu0 %v8178_v51  ;;  %v8837_v38 = vunpack.i.h.bf16 %v13028_v2 }
0x111f   :  { %8183 = vmatprep.subr.bf16.mxu0 %v8182_v22 }
0x1120   :  { %v5632_v39 = vpop.permute.xlu1 %5631  ;;  %v8194_v41 = vpack.c.bf16 %v8837_v38, %v8836_v31 }
0x1121   :  { %v5637_v37 = vsel %vm5617_vm3, %v5632_v39, 0.0  ;;  %vm14310_vm3 = vmmov %vm14303_vm0 }
0x1122   :  { %8185 = vmatpush3.bf16.msra.mxu0 %v8182_v22 }
0x1123   :  { %8187 = vmatprep.subr.bf16.mxu0 %v8186_v6 }
0x1124   :  { %v5656_v36 = vpop.permute.xlu1 %5655 }
0x1125   :  { %v5661_v47 = vsel %vm5641_vm1, %v5656_v36, 0.0  ;;  %vm14311_vm1 = vmmov %vm14303_vm0 }
0x1126   :  { %8189 = vmatpush3.bf16.msra.mxu0 %v8186_v6  ;;  %v5665_v7 = vadd.f32 %v5661_v47, %v5637_v37 }
0x1127   :  { %8191 = vmatprep.subr.bf16.mxu0 %v8190_v12 }
0x1129   :  { %v5780_v56 = vpop.permute.xlu1 %5779 }
0x112a   :  { %8193 = vmatpush3.bf16.msra.mxu0 %v8190_v12  ;;  %v5785_v23 = vsel %vm5765_vm8, %v5780_v56, 0.0  ;;  %vm14314_vm8 = vmmov %vm14303_vm0 }
0x112b   :  { %8195 = vmatprep.subr.bf16.mxu0 %v8194_v41 }
0x112d   :  { %v5804_v62 = vpop.permute.xlu1 %5803 }
0x112e   :  { %8197 = vmatpush3.bf16.msra.mxu0 %v8194_v41  ;;  %v5809_v34 = vsel %vm5789_vm4, %v5804_v62, 0.0  ;;  %vm14315_vm4 = vmmov %vm14303_vm0 }
0x112f   :  { %v5813_v2 = vadd.f32 %v5809_v34, %v5785_v23 }
0x1131   :  { %v8850_v0 = vpop.permute.xlu1 %8849 }
0x1132   :  { %v8852_v4 = vunpack.i.h.bf16 %v8850_v0  ;;  %v8851_v59 = vunpack.i.l.bf16 %v8850_v0  ;;  %v14309_v0 = vld [vmem:[#allocation43_spill] sm:$0xff] }
0x1134   :  { %v8198_v43 = vpack.c.bf16 %v8852_v4, %v8851_v59 }
0x1135   :  { %v5680_v42 = vpop.permute.xlu1 %5679 }
0x1136   :  { %v5688_v58 = vsel %vm5668_vm10, %v5680_v42, 0.0  ;;  %8199 = vmatprep.subr.bf16.mxu0 %v8198_v43  ;;  %vm14317_vm10 = vmmov %vm14303_vm0 }
0x1137   :  { %v5692_v26 = vadd.f32 %v5688_v58, %v13093_v25  ;;  %8201 = vmatpush3.bf16.msra.mxu0 %v8198_v43  ;;  %v14312_v58 = vld [vmem:[#allocation45_spill] sm:$0xff] }
0x1138   :  { %8203 = vmatprep.subr.bf16.mxu0 %v8202_v21 }
0x1139   :  { %v5684_v10 = vpop.permute.xlu1 %5683  ;;  %v5720_v15 = vadd.f32 %v13073_v14, %v5692_v26 }
0x113a   :  { %v5689_v5 = vsel %vm5669_vm13, %v5684_v10, 0.0  ;;  %v14313_v10 = vld [vmem:[#allocation44_spill] sm:$0xff]  ;;  %vm14318_vm13 = vmmov %vm14303_vm0 }
0x113b   :  { %v5693_v48 = vadd.f32 %v5689_v5, %v5665_v7  ;;  %8205 = vmatpush3.bf16.msra.mxu0 %v8202_v21 }
0x113e   :  { %v5832_v44 = vpop.permute.xlu1 %5831 }
0x113f   :  { %v5837_v17 = vsel %vm5817_vm12, %v5832_v44, 0.0  ;;  %v6632_v44 = vld [vmem:[%s13330_s4 + $0x20] sm:$0xff]  ;;  %vm6611_vm12 = vcmask 130048  }
0x1140   :  { %v5841_v11 = vadd.f32 %v5837_v17, %v5813_v2  ;;  %v6633_v17 = vld [vmem:[%s13330_s4 + $0x28] sm:$0xff] }
0x1143   :  { %v5872_v49 = vpop.permute.xlu1 %5871 }
0x1144   :  { %v5886_v13 = vmul.f32 %v5872_v49, %v13135_v50  ;;  %v6028_v50 = vpop.permute.xlu0 %6027  ;;  %v6634_v49 = vld [vmem:[%s13330_s4 + $0x38] sm:$0xff] }
0x1146   :  { %v5890_v20 = vadd.f32 %v5886_v13, %v13113_v16  ;;  %v6635_v13 = vld [vmem:[%s13330_s4 + $0x40] sm:$0xff] }
0x1148   :  { %v5730_v25 = vpop.permute.xlu1 %5729  ;;  %v5880_v40 = vpop.permute.xlu0 %5879 }
0x1149   :  { %v5743_v3 = vmul.f32 %v5730_v25, %v13064_v54  ;;  %v6036_v54 = vmul.f32 %v6028_v50, %v12951_v8  ;;  %v6636_v25 = vld [vmem:[%s13330_s4 + $0x50] sm:$0xff] }
0x114b   :  { %v5891_v55 = vadd.f32 %v5887_v61, %v5743_v3  ;;  %v6637_v61 = vld [vmem:[%s13330_s4 + $0x58] sm:$0xff] }
0x114c   :  { %v5884_v57 = vpop.permute.xlu0 %5883  ;;  %v8892_v3 = vpack.i.bf16 %v6637_v61, %v6636_v25 }
0x114d   :  { %v5856_v14 = vpop.permute.xlu1 %5855 }
0x114e   :  { %v5864_v35 = vsel %vm5844_vm11, %v5856_v14, 0.0  ;;  %v6631_v14 = vld [vmem:[%s13330_s4 + $0x10] sm:$0xff]  ;;  %vm14319_vm11 = vmmov %vm14303_vm0 }
0x114f   :  { %v5868_v51 = vadd.f32 %v5864_v35, %v13130_v24 }
0x1150   :  { %v6429_v32 = vpop.permute.xlu0 %6428 }
0x1151   :  { %v5888_v6 = vmul.f32 %v5880_v40, %v5868_v51  ;;  %v6543_v51 = vld [vmem:[%s13333_s7 + $0x1] sm:$0x3] }
0x1152   :  { %v5712_v29 = vpop.permute.xlu1 %5711 }
0x1153   :  { %v5717_v52 = vsel %vm5697_vm6, %v5712_v29, 0.0  ;;  %v14316_v29 = vld [vmem:[#allocation19_spill] sm:$0xff]  ;;  %vm14320_vm6 = vmmov %vm14303_vm0 }
0x1154   :  { %v5721_v27 = vadd.f32 %v5717_v52, %v5693_v48  ;;  %v6602_v52 = vrot.slane %v6543_v51, %v14316_v29 }
0x1157   :  { %v5860_v16 = vpop.permute.xlu1 %5859 }
0x1158   :  { %v5865_v18 = vsel %vm5845_vm5, %v5860_v16, 0.0  ;;  %vm14322_vm5 = vmmov %vm14303_vm0 }
0x1159   :  { %v5869_v30 = vadd.f32 %v5865_v18, %v5841_v11  ;;  %v8882_v11 = vpack.i.bf16 %v6633_v17, %v6632_v44 }
0x115b   :  { %v5889_v24 = vmul.f32 %v5884_v57, %v5869_v30 }
0x115c   :  { %v6172_v22 = vpop.permute.xlu1 %6171 }
0x115d   :  { %v6180_v46 = vmul.f32 %v6172_v22, %v12982_v19 }
0x115f   :  { %v6184_v60 = vadd.f32 %v6180_v46, %v6036_v54 }
0x1161   :  { %v5740_v53 = vpop.permute.xlu1 %5739  ;;  %7853 = vmatprep.mubr.msk.f32.mxu0 %vm14303_vm0, %v6184_v60 }
0x1162   :  { %v5745_v9 = vmul.f32 %v5740_v53, %v5721_v27  ;;  %7854 = vmatmul.mubr.msk.f32.gmra.mrb[42].mxu0 %vm14304_vm15, %v13151_v33  ;;  %vm14323_vm15 = vmmov %vm14303_vm0 }
0x1163   :  { %7888 = vmatprep.mubr.f32.mxu0 %v5890_v20  ;;  %v8887_v20 = vpack.i.bf16 %v6635_v13, %v6634_v49 }
0x1164   :  { %v5893_v39 = vadd.f32 %v5889_v24, %v5745_v9 }
0x1165   :  { %v5735_v37 = vpop.permute.xlu1 %5734 }
0x1166   :  { %v5744_v36 = vmul.f32 %v5735_v37, %v5720_v15 }
0x1168   :  { %v5892_v12 = vadd.f32 %v5888_v6, %v5744_v36 }
0x1169   :  { %v8874_v38 = vpop.permute.xlu1 %8873 }
0x116a   :  { %v8876_v8 = vunpack.i.h.bf16 %v8874_v38  ;;  %v8875_v31 = vunpack.i.l.bf16 %v8874_v38 }
0x116c   :  { %v8206_v19 = vpack.c.bf16 %v8876_v8, %v8875_v31 }
0x116d   :  { %v6533_v45 = vpop.permute.xlu1 %6532 }
0x116e   :  { %8207 = vmatprep.subr.bf16.mxu0 %v8206_v19 }
0x116f   :  { %8209 = vmatpush3.bf16.msra.mxu0 %v8206_v19 }
0x1170   :  { %7894 = vmatprep.subr.mxu0 %v6429_v32 }
0x1172   :  { %7889 = vmatmul.mubr.f32.vlgmr.msra.gmra.mrb[40].mxu0 %v5891_v55  ;;  %v6630_v55 = vld [vmem:[%s13330_s4 + $0x8] sm:$0xff] }
0x1173   :  { %7891 = vmatprep.mubr.f32.mxu0 %v5892_v12  ;;  %7895 = vmatpush3.msra.mxu0 %v6429_v32  ;;  %v8877_v35 = vpack.i.bf16 %v6631_v14, %v6630_v55 }
0x1176   :  { %7892 = vmatmul.mubr.f32.gmra.mrb[42].mxu0 %v5893_v39 }
0x1245   :  { %v7890_v47 = vpop.f32.mrb[40].mxu0 }
0x1246   :  { %v6409_v33 = vpop.f32.mrb[41].mxu0 }
0x1247   :  { %7896 = vmatprep.mubr.msk.f32.mxu0 %vm14298_vm2, %v6409_v33  ;;  %vm14324_vm2 = vmmov %vm14303_vm0 }
0x1248   :  { %7897 = vmatmul.mubr.msk.f32.vlgmr.msra.gmra.mrb[36].mxu0 %vm14305_vm9, %v7890_v47  ;;  %vm6798_vm9 = vcmask 523264  }
0x1249   :  { %v7893_v7 = vpop.f32.mrb[42].mxu0 }
0x124a   :  { %v6419_v41 = vpop.f32.mrb[43].mxu0 }
0x124b   :  { %7899 = vmatprep.mubr.msk.f32.mxu0 %vm14306_vm7, %v6419_v41  ;;  %vm14325_vm7 = vmmov %vm14303_vm0 }
0x124c   :  { %7900 = vmatmul.mubr.msk.f32.gmra.mrb[38].mxu0 %vm14307_vm14, %v7893_v7  ;;  %vm14326_vm14 = vmmov %vm14303_vm0 }
0x131b   :  { %v7898_v56 = vpop.f32.mrb[36].mxu0 }
0x131c   :  { %v6536_v23 = vadd.f32 %v7898_v56, %v6533_v45  ;;  %v6509_v62 = vpop.f32.mrb[37].mxu0 }
0x131d   :  { %v6535_v34 = vadd.f32 %v6533_v45, %v6509_v62 }
0x131e   :  { %v6540_v2 = vadd.f32 %v6536_v23, %v14308_v1 }
0x131f   :  { %v6539_v63 = vadd.f32 %v6535_v34, %v14309_v0  ;;  %v7901_v28 = vpop.f32.mrb[38].mxu0 }
0x1320   :  { %v6519_v4 = vpop.f32.mrb[39].mxu0  ;;  %v6548_v59 = vsel %vm14310_vm3, %v6540_v2, 0.0  ;;  %v6538_v43 = vadd.f32 %v7901_v28, %v6533_v45  ;;  %vm14327_vm3 = vmmov %vm14303_vm0 }
0x1321   :  { %v6537_v42 = vadd.f32 %v6533_v45, %v6519_v4  ;;  %6549 = vadd.xlane.f32.xlu1 %v6548_v59  ;;  %v6545_v21 = vsel %vm14311_vm1, %v6539_v63, 0.0  ;;  %v14321_v4 = vld [vmem:[#allocation5_spill] sm:$0xff]  ;;  %vm14328_vm1 = vmmov %vm14303_vm0 }
0x1322   :  { %6546 = vadd.xlane.f32.xlu0 %v6545_v21  ;;  %v6542_v15 = vadd.f32 %v6538_v43, %v14313_v10  ;;  %v6605_v59 = vsub.s32 1, %v14321_v4  ;;  %v6774_v21 = vld [vmem:[%s13331_s5] sm:$0xff] }
0x1323   :  { %v6541_v26 = vadd.f32 %v6537_v42, %v14312_v58  ;;  %v7131_v42 = vld [vmem:[%s13333_s7 + $0x2] ss:$0 sm:$0xff]  ;;  %v6775_v58 = vld [vmem:[%s13331_s5 + $0x8] sm:$0xff] }
0x1324   :  { %v6554_v48 = vsel %vm14315_vm4, %v6542_v15, 0.0  ;;  %v6606_v43 = vrot.slane %v6543_v51, %v6605_v59  ;;  %vm14330_vm4 = vmmov %vm14303_vm0 }
0x1325   :  { %v6551_v5 = vsel %vm14314_vm8, %v6541_v26, 0.0  ;;  %vm14329_vm8 = vmmov %vm14303_vm0 }
0x1326   :  { %6552 = vadd.xlane.f32.xlu0 %v6551_v5 }
0x132a   :  { %6555 = vadd.xlane.f32.xlu0 %v6554_v48 }
0x1332   :  { %8883 = vrot.lane.b32.xlu1 %v8882_v11, %s9092_s24 }
0x1336   :  { %8888 = vrot.lane.b32.xlu1 %v8887_v20, %s9092_s24 }
0x133a   :  { %8893 = vrot.lane.b32.xlu1 %v8892_v3, %s9092_s24 }
0x1340   :  { %8878 = vrot.lane.b32.xlu0 %v8877_v35, %s9092_s24 }
0x1344   :  { %6607 = vrot.lane.b32.xlu0 %v6602_v52, %s9092_s24 }
0x13ae   :  { %v6550_v27 = vpop.xlane.xlu1 %6549 }
0x13af   :  { %v6559_v50 = vmul.f32 0.03125, %v6550_v27  ;;  %v6547_v16 = vpop.xlane.xlu0 %6546 }
0x13b0   :  { %v6558_v18 = vmul.f32 0.03125, %v6547_v16 }
0x13b1   :  { %v13222_v30 = vsub.f32 %v6540_v2, %v6559_v50 }
0x13b2   :  { %v13224_v40 = vsub.f32 %v6539_v63, %v6558_v18  ;;  %v8884_v22 = vpop.permute.xlu1 %8883 }
0x13b3   :  { %v6553_v54 = vpop.xlane.xlu0 %6552  ;;  %v6567_v46 = vmul.f32 %v13222_v30, %v13222_v30  ;;  %v8886_v6 = vunpack.i.h.bf16 %v8884_v22  ;;  %v8885_v36 = vunpack.i.l.bf16 %v8884_v22  ;;  %v6776_v22 = vld [vmem:[%s13331_s5 + $0x10] sm:$0xff] }
0x13b4   :  { %v6560_v60 = vmul.f32 0.03125, %v6553_v54  ;;  %v6566_v57 = vmul.f32 %v13224_v40, %v13224_v40  ;;  %v6777_v54 = vld [vmem:[%s13331_s5 + $0x18] sm:$0xff] }
0x13b5   :  { %v6573_v53 = vsel %vm14317_vm10, %v6567_v46, 0.0  ;;  %v6663_v45 = vsel %vm6611_vm12, %v8885_v36, %v8886_v6  ;;  %vm14331_vm10 = vmmov %vm14303_vm0 }
0x13b6   :  { %v13231_v24 = vsub.f32 %v6541_v26, %v6560_v60  ;;  %6574 = vadd.xlane.f32.xlu1 %v6573_v53  ;;  %v6570_v9 = vsel %vm14318_vm13, %v6566_v57, 0.0  ;;  %v8889_v39 = vpop.permute.xlu1 %8888  ;;  %v8218_v26 = vpack.c.bf16 %v6775_v58, %v6774_v21  ;;  %v8222_v53 = vpack.c.bf16 %v6777_v54, %v6776_v22  ;;  %vm14332_vm13 = vmmov %vm14303_vm0 }
0x13b7   :  { %6571 = vadd.xlane.f32.xlu0 %v6570_v9  ;;  %v6556_v37 = vpop.xlane.xlu0 %6555  ;;  %v8891_v8 = vunpack.i.h.bf16 %v8889_v39  ;;  %v8890_v31 = vunpack.i.l.bf16 %v8889_v39  ;;  %v6778_v9 = vld [vmem:[%s13331_s5 + $0x20] sm:$0xff]  ;;  %v6779_v39 = vld [vmem:[%s13331_s5 + $0x28] sm:$0xff] }
0x13b8   :  { %v6561_v12 = vmul.f32 0.03125, %v6556_v37  ;;  %v6568_v38 = vmul.f32 %v13231_v24, %v13231_v24  ;;  %v8226_v36 = vpack.c.bf16 %v6779_v39, %v6778_v9 }
0x13b9   :  { %v6664_v34 = vsel %vm6611_vm12, %v8890_v31, %v8891_v8  ;;  %v6780_v8 = vld [vmem:[%s13331_s5 + $0x30] sm:$0xff]  ;;  %v6781_v31 = vld [vmem:[%s13331_s5 + $0x38] sm:$0xff] }
0x13ba   :  { %v13236_v19 = vsub.f32 %v6542_v15, %v6561_v12  ;;  %v6576_v32 = vsel %vm14319_vm11, %v6568_v38, 0.0  ;;  %v8894_v47 = vpop.permute.xlu1 %8893  ;;  %vm14334_vm11 = vmmov %vm14303_vm0 }
0x13bb   :  { %6577 = vadd.xlane.f32.xlu0 %v6576_v32  ;;  %v8879_v33 = vpop.permute.xlu0 %8878  ;;  %v8896_v7 = vunpack.i.h.bf16 %v8894_v47  ;;  %v8895_v41 = vunpack.i.l.bf16 %v8894_v47  ;;  %v6782_v32 = vld [vmem:[%s13333_s7 + $0x2] sm:$0x3] }
0x13bc   :  { %v6569_v56 = vmul.f32 %v13236_v19, %v13236_v19  ;;  %v8881_v23 = vunpack.i.h.bf16 %v8879_v33  ;;  %v8880_v62 = vunpack.i.l.bf16 %v8879_v33  ;;  %v6787_v47 = vrot.slane %v6782_v32, %v14316_v29 }
0x13bd   :  { %v6665_v1 = vsel %vm6611_vm12, %v8895_v41, %v8896_v7  ;;  %v6791_v33 = vrot.slane %v6782_v32, %v6605_v59 }
0x13be   :  { %v6579_v2 = vsel %vm14320_vm6, %v6569_v56, 0.0  ;;  %v6662_v0 = vsel %vm6611_vm12, %v8880_v62, %v8881_v23  ;;  %v8214_v28 = vpack.c.bf16 %v6665_v1, %v6664_v34  ;;  %vm14335_vm6 = vmmov %vm14303_vm0 }
0x13bf   :  { %6580 = vadd.xlane.f32.xlu1 %v6579_v2  ;;  %v8210_v63 = vpack.c.bf16 %v6663_v45, %v6662_v0  ;;  %v6608_v10 = vpop.permute.xlu0 %6607 }
0x13c1   :  { %8211 = vmatprep.subr.bf16.mxu1 %v8210_v63 }
0x13c2   :  { %8213 = vmatpush3.bf16.msra.mxu1 %v8210_v63 }
0x13c3   :  { %8215 = vmatprep.subr.bf16.mxu1 %v8214_v28 }
0x13c6   :  { %8217 = vmatpush3.bf16.msra.mxu1 %v8214_v28 }
0x13c7   :  { %8219 = vmatprep.subr.bf16.mxu1 %v8218_v26 }
0x13d0   :  { %6609 = vrot.lane.b32.xlu1 %v6606_v43, %s9092_s24 }
0x13d1   :  { %6623 = vrot.lane.b32.xlu0 %v7131_v42, %s9088_s19 }
0x13d4   :  { %6670 = vrot.lane.b32.xlu1 %v7131_v42, %s9087_s18 }
0x13d5   :  { %6792 = vrot.lane.b32.xlu0 %v6787_v47, %s9092_s24 }
0x13d8   :  { %6794 = vrot.lane.b32.xlu1 %v6791_v33, %s9092_s24 }
0x1443   :  { %v6575_v15 = vpop.xlane.xlu1 %6574 }
0x1444   :  { %v6583_v5 = vmul.f32 0.03125, %v6575_v15  ;;  %v6572_v48 = vpop.xlane.xlu0 %6571 }
0x1445   :  { %v6582_v44 = vmul.f32 0.03125, %v6572_v48 }
0x1446   :  { %v6587_v17 = vadd.f32 1e-05, %v6583_v5 }
0x1447   :  { %v6586_v11 = vadd.f32 1e-05, %v6582_v44 }
0x1448   :  { %9026 = vrsqrt.f32 %v6587_v17  ;;  %v6578_v49 = vpop.xlane.xlu0 %6577 }
0x1449   :  { %9028 = vrsqrt.f32 %v6586_v11  ;;  %v6584_v13 = vmul.f32 0.03125, %v6578_v49 }
0x144b   :  { %v6588_v20 = vadd.f32 1e-05, %v6584_v13 }
0x144c   :  { %v6581_v25 = vpop.xlane.xlu1 %6580  ;;  %v6624_v16 = vpop.permute.xlu0 %6623 }
0x144d   :  { %9030 = vrsqrt.f32 %v6588_v20  ;;  %v6585_v61 = vmul.f32 0.03125, %v6581_v25 }
0x144f   :  { %v6589_v3 = vadd.f32 1e-05, %v6585_v61 }
0x1450   :  { %v6610_v55 = vpop.permute.xlu1 %6609  ;;  %v6793_v59 = vpop.permute.xlu0 %6792 }
0x1451   :  { %9032 = vrsqrt.f32 %v6589_v3  ;;  %v6612_v27 = vsel %vm6611_vm12, %v6608_v10, %v6610_v55 }
0x1452   :  { %v9027_v14 = vpop.eup %9026 }
0x1453   :  { %v9029_v35 = vpop.eup %9028  ;;  %v6595_v51 = vmul.f32 %v9027_v14, %v13222_v30 }
0x1454   :  { %v6594_v52 = vmul.f32 %v9029_v35, %v13224_v40  ;;  %v6671_v7 = vpop.permute.xlu1 %6670 }
0x1455   :  { %v6615_v50 = vmul.f32 %v6612_v27, %v6595_v51 }
0x1456   :  { %v6614_v18 = vmul.f32 %v6612_v27, %v6594_v52 }
0x1457   :  { %v9031_v46 = vpop.eup %9030  ;;  %v6627_v30 = vadd.f32 %v6624_v16, %v6615_v50 }
0x1458   :  { %v6596_v60 = vmul.f32 %v9031_v46, %v13231_v24  ;;  %v6626_v57 = vadd.f32 %v6624_v16, %v6614_v18  ;;  %v6795_v4 = vpop.permute.xlu1 %6794 }
0x1459   :  { %v6796_v43 = vsel %vm6611_vm12, %v6793_v59, %v6795_v4  ;;  %vm14333_vm12 = vmmov %vm14303_vm0 }
0x145a   :  { %v6616_v40 = vmul.f32 %v6612_v27, %v6596_v60  ;;  %7910 = vmatprep.mubr.msk.f32.mxu1 %vm14322_vm5, %v6626_v57  ;;  %vm14336_vm5 = vmmov %vm14303_vm0 }
0x145b   :  { %v9033_v37 = vpop.eup %9032  ;;  %7911 = vmatmul.mubr.msk.f32.vlgmr.msra.gmra.mrb[48].mxu1 %vm14303_vm0, %v6627_v30 }
0x145c   :  { %v6597_v6 = vmul.f32 %v9033_v37, %v13236_v19  ;;  %v6628_v24 = vadd.f32 %v6624_v16, %v6616_v40  ;;  %8221 = vmatpush3.bf16.msra.mxu1 %v8218_v26  ;;  %v8230_v19 = vpack.c.bf16 %v6781_v31, %v6780_v8  ;;  %v7140_v37 = vld [vmem:[%s13333_s7 + $0x3] ss:$0 sm:$0xff]  ;;  %s9144_s7 = smov [#allocation2]  }
0x145d   :  { %8223 = vmatprep.subr.bf16.mxu1 %v8222_v53 }
0x145e   :  { %v6617_v12 = vmul.f32 %v6612_v27, %v6597_v6  ;;  %7913 = vmatprep.mubr.msk.f32.mxu1 %vm14323_vm15, %v6628_v24 }
0x1460   :  { %v6629_v38 = vadd.f32 %v6624_v16, %v6617_v12  ;;  %8225 = vmatpush3.bf16.msra.mxu1 %v8222_v53 }
0x1461   :  { %8227 = vmatprep.subr.bf16.mxu1 %v8226_v36 }
0x1462   :  { %7914 = vmatmul.mubr.msk.f32.gmra.mrb[50].mxu1 %vm14324_vm2, %v6629_v38 }
0x1464   :  { %8229 = vmatpush3.bf16.msra.mxu1 %v8226_v36 }
0x1465   :  { %8231 = vmatprep.subr.bf16.mxu1 %v8230_v19 }
0x1468   :  { %8233 = vmatpush3.bf16.msra.mxu1 %v8230_v19 }
0x152e   :  { %v7912_v41 = vpop.f32.mrb[48].mxu1 }
0x152f   :  { %v6757_v45 = vadd.f32 %v7912_v41, %v6671_v7  ;;  %v6751_v56 = vpop.f32.mrb[49].mxu1 }
0x1530   :  { %v6752_v23 = vadd.f32 %v6751_v56, %v6671_v7 }
0x1531   :  { %v6771_v34 = vmax.f32 %v6757_v45, 0.0 }
0x1532   :  { %v6770_v62 = vmax.f32 %v6752_v23, 0.0 }
0x1534   :  { %7932 = vmatprep.mubr.msk.f32.mxu1 %vm6798_vm9, %v6770_v62 }
0x1535   :  { %v7915_v1 = vpop.f32.mrb[50].mxu1  ;;  %7933 = vmatmul.mubr.msk.f32.vlgmr.msra.gmra.mrb[52].mxu1 %vm6798_vm9, %v6771_v34 }
0x1536   :  { %v6767_v2 = vadd.f32 %v7915_v1, %v6671_v7  ;;  %v6761_v29 = vpop.f32.mrb[51].mxu1 }
0x1537   :  { %v6762_v0 = vadd.f32 %v6761_v29, %v6671_v7 }
0x1538   :  { %v6773_v28 = vmax.f32 %v6767_v2, 0.0 }
0x1539   :  { %v6772_v63 = vmax.f32 %v6762_v0, 0.0 }
0x153b   :  { %7935 = vmatprep.mubr.msk.f32.mxu1 %vm6798_vm9, %v6772_v63 }
0x153c   :  { %7936 = vmatmul.mubr.msk.f32.gmra.mrb[54].mxu1 %vm6798_vm9, %v6773_v28 }
0x1608   :  { %v7934_v42 = vpop.f32.mrb[52].mxu1 }
0x1609   :  { %v6883_v21 = vadd.f32 %v7934_v42, %v6796_v43  ;;  %v6877_v58 = vpop.f32.mrb[53].mxu1 }
0x160a   :  { %v6878_v26 = vadd.f32 %v6877_v58, %v6796_v43 }
0x160b   :  { %v6897_v10 = vadd.f32 %v6883_v21, %v6627_v30 }
0x160c   :  { %v6896_v15 = vadd.f32 %v6878_v26, %v6626_v57 }
0x160d   :  { %v6904_v5 = vsel %vm14325_vm7, %v6897_v10, 0.0 }
0x160e   :  { %6905 = vadd.xlane.f32.xlu1 %v6904_v5  ;;  %v6901_v48 = vsel %vm14326_vm14, %v6896_v15, 0.0 }
0x160f   :  { %v7937_v44 = vpop.f32.mrb[54].mxu1  ;;  %6902 = vadd.xlane.f32.xlu0 %v6901_v48 }
0x1610   :  { %v6887_v17 = vpop.f32.mrb[55].mxu1  ;;  %v6893_v11 = vadd.f32 %v7937_v44, %v6796_v43 }
0x1611   :  { %v6888_v49 = vadd.f32 %v6887_v17, %v6796_v43 }
0x1612   :  { %v6899_v20 = vadd.f32 %v6893_v11, %v6629_v38 }
0x1613   :  { %v6898_v13 = vadd.f32 %v6888_v49, %v6628_v24 }
0x1614   :  { %v6910_v61 = vsel %vm14328_vm1, %v6899_v20, 0.0 }
0x1615   :  { %v6907_v25 = vsel %vm14327_vm3, %v6898_v13, 0.0 }
0x1616   :  { %6908 = vadd.xlane.f32.xlu0 %v6907_v25 }
0x161a   :  { %6911 = vadd.xlane.f32.xlu0 %v6910_v61 }
0x169b   :  { %v6906_v3 = vpop.xlane.xlu1 %6905 }
0x169c   :  { %v6914_v55 = vmul.f32 0.03125, %v6906_v3  ;;  %v6903_v14 = vpop.xlane.xlu0 %6902 }
0x169d   :  { %v6913_v35 = vmul.f32 0.03125, %v6903_v14 }
0x169e   :  { %v6918_v51 = vsub.f32 %v6897_v10, %v6914_v55 }
0x169f   :  { %v6917_v52 = vsub.f32 %v6896_v15, %v6913_v35 }
0x16a0   :  { %v6922_v27 = vmul.f32 %v6918_v51, %v6918_v51 }
0x16a1   :  { %v6921_v50 = vmul.f32 %v6917_v52, %v6917_v52 }
0x16a2   :  { %v6928_v16 = vsel %vm14329_vm8, %v6922_v27, 0.0 }
0x16a3   :  { %6929 = vadd.xlane.f32.xlu1 %v6928_v16  ;;  %v6909_v18 = vpop.xlane.xlu0 %6908  ;;  %v6925_v22 = vsel %vm14330_vm4, %v6921_v50, 0.0 }
0x16a4   :  { %v6915_v54 = vmul.f32 0.03125, %v6909_v18  ;;  %6926 = vadd.xlane.f32.xlu0 %v6925_v22 }
0x16a6   :  { %v6919_v46 = vsub.f32 %v6898_v13, %v6915_v54 }
0x16a7   :  { %v6912_v60 = vpop.xlane.xlu0 %6911 }
0x16a8   :  { %v6916_v57 = vmul.f32 0.03125, %v6912_v60  ;;  %v6923_v30 = vmul.f32 %v6919_v46, %v6919_v46 }
0x16aa   :  { %v6920_v53 = vsub.f32 %v6899_v20, %v6916_v57  ;;  %v6931_v40 = vsel %vm14331_vm10, %v6923_v30, 0.0 }
0x16ab   :  { %6932 = vadd.xlane.f32.xlu0 %v6931_v40 }
0x16ac   :  { %v6924_v9 = vmul.f32 %v6920_v53, %v6920_v53 }
0x16ae   :  { %v6934_v39 = vsel %vm14332_vm13, %v6924_v9, 0.0 }
0x16af   :  { %6935 = vadd.xlane.f32.xlu1 %v6934_v39 }
0x16c0   :  { %6965 = vrot.lane.b32.xlu1 %v7140_v37, %s9087_s18  ;;  %s6981_s18 = sshll.u32 %s9144_s7, 4  ;;  %s6982_s18 = int_to_ptr.vmem [resolvable:$true] %s6981_s18 }
0x16c1   :  { %6958 = vrot.lane.b32.xlu0 %v7140_v37, %s9088_s19  ;;  %s9058_s19 = scalar_lea.vmem %s6982_s18, 512  ;;  %p9063_p1 = scmp.lt.s32.totalorder %s6982_s18, %s6982_s18 }
0x16c2   :  { %p9059_p0 = scmp.ne.s32.totalorder %s6982_s18, %s9058_s19  ;;  %p9064_p2 = scmp.lt.s32.totalorder %s9058_s19, %s9058_s19 }
0x16c4   :  { %p9065_p3 = por %p9064_p2, %p9063_p1 }
0x16c6   :  { %p9066_p4 = pnand %p9065_p3, %p9059_p0 }
0x1730   :  { %v6930_v6 = vpop.xlane.xlu1 %6929 }
0x1731   :  { %v6938_v24 = vmul.f32 0.03125, %v6930_v6  ;;  %v6927_v36 = vpop.xlane.xlu0 %6926 }
0x1732   :  { %v6937_v12 = vmul.f32 0.03125, %v6927_v36 }
0x1733   :  { %v6942_v38 = vadd.f32 1e-05, %v6938_v24 }
0x1734   :  { %v6941_v8 = vadd.f32 1e-05, %v6937_v12 }
0x1735   :  { %9034 = vrsqrt.f32 %v6942_v38 }
0x1736   :  { %9036 = vrsqrt.f32 %v6941_v8 }
0x1738   :  { %v6933_v31 = vpop.xlane.xlu0 %6932 }
0x1739   :  { %v6939_v19 = vmul.f32 0.03125, %v6933_v31 }
0x173b   :  { %v6943_v32 = vadd.f32 1e-05, %v6939_v19 }
0x173c   :  { %v6936_v47 = vpop.xlane.xlu1 %6935  ;;  %v6959_v45 = vpop.permute.xlu0 %6958 }
0x173d   :  { %9038 = vrsqrt.f32 %v6943_v32  ;;  %v6940_v33 = vmul.f32 0.03125, %v6936_v47 }
0x173f   :  { %v9035_v7 = vpop.eup %9034  ;;  %v6944_v41 = vadd.f32 1e-05, %v6940_v33 }
0x1740   :  { %v9037_v56 = vpop.eup %9036  ;;  %v6950_v23 = vmul.f32 %v9035_v7, %v6918_v51  ;;  %v6966_v34 = vpop.permute.xlu1 %6965 }
0x1741   :  { %9040 = vrsqrt.f32 %v6944_v41  ;;  %v6949_v62 = vmul.f32 %v9037_v56, %v6917_v52 }
0x1742   :  { %v6962_v1 = vmul.f32 %v6959_v45, %v6950_v23 }
0x1743   :  { %v6961_v2 = vmul.f32 %v6959_v45, %v6949_v62 }
0x1744   :  { %v6969_v29 = vadd.f32 %v6966_v34, %v6962_v1 }
0x1745   :  { %v6968_v0 = vadd.f32 %v6966_v34, %v6961_v2 }
0x1746   :  { %6973 = vst.msk [vmem:[#allocation2 + $0x8] sm:$0xff] %vm14333_vm12, %v6969_v29 }
0x1747   :  { %v9039_v63 = vpop.eup %9038  ;;  %6972 = vst.msk [vmem:[#allocation2] sm:$0xff] %vm14334_vm11, %v6968_v0 }
0x1748   :  { %v6951_v28 = vmul.f32 %v9039_v63, %v6919_v46 }
0x174a   :  { %v6963_v4 = vmul.f32 %v6959_v45, %v6951_v28 }
0x174b   :  { %v9041_v59 = vpop.eup %9040 }
0x174c   :  { %v6952_v43 = vmul.f32 %v9041_v59, %v6920_v53  ;;  %v6970_v42 = vadd.f32 %v6966_v34, %v6963_v4 }
0x174e   :  { %v6964_v21 = vmul.f32 %v6959_v45, %v6952_v43  ;;  %6974 = vst.msk [vmem:[#allocation2 + $0x10] sm:$0xff] %vm14335_vm6, %v6970_v42 }
0x1750   :  { %v6971_v58 = vadd.f32 %v6966_v34, %v6964_v21 }
0x1752   :  { %6975 = vst.msk [vmem:[#allocation2 + $0x18] sm:$0xff] %vm14336_vm5, %v6971_v58 }
0x1753   :  { %9069 = shalt.err (!%p9066_p4)
}
0x1754   :  { %s9070_s10 = scalar_lea.hbm %s13335_s9, 512 }
0x1755   :  { %p9071_p5 = scmp.ne.s32.totalorder %s13335_s9, %s9070_s10  ;;  %p9074_p6 = scmp.lt.u32.totalorder %s9070_s10, %s13335_s9 }
0x1757   :  { %p9076_p7 = pnand %p9074_p6, %p9071_p5 }
0x1759   :  { %9079 = shalt.err (!%p9076_p7)
}
0x175a   :  { %s9145_s15 = smov 128   ;;  %s9146_s20 = smov 8  }
0x175b   :  { %6987 = dma.vmem_to_hbm [thread:$0]  %s6982_s18, 512, %s13335_s9, [#allocation3], %s9145_s15, %s9145_s15, %s9146_s20  }
0x175c   :  { %9080 = dma.done.wait [#allocation3], 512  }
0x175d   :  { %9081 = vsyncadd [#allocation3], 4294966784 }
0x175e   :  { %6991 = vsyncpa [#allocation3], 1 }

</bundles_post_ra>
